<compile_context>
chip_gen: v5e
topology: v5e:2x2
jax: 0.10.0
libtpu: 0.0.40
codegen_flags: <defaults>
</compile_context>

<pallas_src>
import jax
import jax.numpy as jnp
from jax.experimental import pallas as pl
from jax.experimental.pallas import tpu as pltpu


def _pixel_shuffle_1d_kernel(x_ref, o_ref):
    # x_ref : (1, r, tc, tm)    -- r channel groups of a lane-dense spatial tile
    # o_ref : (1, tc, tm * r)   -- lane-dense interleaved output tile
    x = x_ref[...]
    _, r, tc, tm = x.shape
    # Interleave the r groups along the flattened spatial axis:
    #   o[0, c, m*r + k] = x[0, k, c, m]
    y = jnp.transpose(x, (0, 2, 3, 1))        # (1, tc, tm, r)
    o_ref[...] = y.reshape(1, tc, tm * r)     # dense, unmasked store


def _pick_tile(extent, quantum, cap):
    """Largest multiple of `quantum` that divides `extent` and is <= cap.

    Falls back to the full extent (always legal for a BlockSpec: a block dim equal
    to the array dim satisfies the (8,128) tiling rule) when no such divisor exists
    or when the extent is already small.
    """
    if extent <= cap:
        return extent
    best = None
    t = quantum
    while t <= cap:
        if extent % t == 0:
            best = t
        t += quantum
    return best if best is not None else extent


def pixel_shuffle_1d(x, upscale_factor):
    """Pallas TPU implementation of PixelShuffle1D.forward (NCHW layout)."""
    b, c_short, h, w = x.shape
    r = upscale_factor
    assert c_short % r == 0, "channels must be divisible by upscale_factor"
    c_long = c_short // r
    m = h * w                      # flattened spatial extent
    itemsize = jnp.dtype(x.dtype).itemsize

    # Free, contiguous view: channel axis split into (r, C_long) groups,
    # spatial dims flattened so the minor axis is as lane-dense as possible.
    x_g = x.reshape(b, r, c_long, m)

    # Tile sizes:
    #   tc: <= 8 output channels per block (bounds the in-kernel relayout scratch,
    #       adds a parallel grid axis when C_long is large).
    #   tm: target 512 input lanes (measured sweet spot for memory-bound tiles),
    #       further capped so the double-buffered in+out blocks stay ~<= 2 MiB.
    tc = _pick_tile(c_long, 8, 8)
    lane_cap = max(128, (2 * 1024 * 1024) // max(1, 4 * r * tc * itemsize))
    tm = _pick_tile(m, 128, min(512, lane_cap))

    grid = (b, c_long // tc, m // tm)

    out_flat = pl.pallas_call(
        _pixel_shuffle_1d_kernel,
        out_shape=jax.ShapeDtypeStruct((b, c_long, m * r), x.dtype),
        grid_spec=pltpu.PrefetchScalarGridSpec(
            num_scalar_prefetch=0,
            grid=grid,
            in_specs=[
                # Grab all r channel groups for this (channel-tile, spatial-tile).
                pl.BlockSpec((1, r, tc, tm), lambda bi, ci, mi: (bi, 0, ci, mi)),
            ],
            # Output block is lane-dense: last dim tm*r (large multiple of 128
            # whenever tm is), one distinct block per grid step (no revisits).
            out_specs=pl.BlockSpec((1, tc, tm * r), lambda bi, ci, mi: (bi, ci, mi)),
        ),
        compiler_params=pltpu.CompilerParams(
            # Every grid step is independent -> fully parallel (megacore-friendly).
            dimension_semantics=("parallel", "parallel", "parallel"),
            # Small blocks + headroom for the relayout scratch; safe on v5e/v6e/v7x.
            vmem_limit_bytes=32 * 1024 * 1024,
        ),
    )(x_g)

    # Free, contiguous reshape back to NCHW with the upscaled width.
    return out_flat.reshape(b, c_long, h, w * r)


def pixel_shuffle_1d_ref(x, upscale_factor):
    """Pure-JAX reference mirroring the torch view->permute->view exactly."""
    b, c_short, h, w = x.shape
    c_long = c_short // upscale_factor
    y = x.reshape(b, upscale_factor, c_long, h, w)
    y = jnp.transpose(y, (0, 2, 3, 4, 1))
    return y.reshape(b, c_long, h, w * upscale_factor)


if __name__ == "__main__":
    key = jax.random.PRNGKey(0)
    B, C, H, W = 2, 4, 16, 16
    r = 2  # upscale_factor

    x = jax.random.normal(key, (B, C, H, W), dtype=jnp.float32)

    out = pixel_shuffle_1d(x, r)
    out = jax.block_until_ready(out)

    ref = pixel_shuffle_1d_ref(x, r)
    assert out.shape == (B, C // r, H, W * r), out.shape
    assert out.dtype == x.dtype
    assert jnp.array_equal(out, ref), "Pallas output mismatch vs reference"

    print("KERNEL_OK")
</pallas_src>

<mosaic_0001>
module attributes {stable_mosaic.version = 11 : i64} {
  func.func @_pixel_shuffle_1d_kernel(%arg0: i32, %arg1: i32, %arg2: i32, %arg3: memref<1x2x2x256xf32, #tpu.memory_space<vmem>>, %arg4: memref<1x2x512xf32, #tpu.memory_space<vmem>>) attributes {dimension_semantics = [#tpu.dimension_semantics<parallel>, #tpu.dimension_semantics<parallel>, #tpu.dimension_semantics<parallel>], iteration_bounds = array<i64: 2, 1, 1>, scalar_prefetch = 0 : i64, scratch_operands = 0 : i64, tpu.core_type = #tpu.core_type<tc>, window_params = [{transform_indices = @transform_0, window_bounds = array<i64: 1, 2, 2, 256>}, {transform_indices = @transform_1, window_bounds = array<i64: 1, 2, 512>}]} {
    %c0 = arith.constant 0 : index
    %c0_0 = arith.constant 0 : index
    %c0_1 = arith.constant 0 : index
    %c0_2 = arith.constant 0 : index
    %0 = vector.load %arg3[%c0, %c0_0, %c0_1, %c0_2] : memref<1x2x2x256xf32, #tpu.memory_space<vmem>>, vector<1x2x2x256xf32>
    %1 = tpu.transpose %0, [0, 2, 3, 1] : vector<1x2x2x256xf32> -> vector<1x2x256x2xf32>
    %2 = vector.shape_cast %1 : vector<1x2x256x2xf32> to vector<1x2x512xf32>
    %c0_3 = arith.constant 0 : index
    %c0_4 = arith.constant 0 : index
    %c0_5 = arith.constant 0 : index
    %3 = vector.load %arg4[%c0_3, %c0_4, %c0_5] : memref<1x2x512xf32, #tpu.memory_space<vmem>>, vector<1x2x512xf32>
    tpu.vector_store %arg4[%c0_3, %c0_4, %c0_5], %2 {strides = array<i32>} : memref<1x2x512xf32, #tpu.memory_space<vmem>>, vector<1x2x512xf32>,
    return
  }
  func.func @transform_0(%arg0: i32, %arg1: i32, %arg2: i32) -> (i32, i32, i32, i32) {
    %c0_i32 = arith.constant 0 : i32
    %c0_i32_0 = arith.constant 0 : i32
    return %arg0, %c0_i32, %arg1, %arg2 : i32, i32, i32, i32
  }
  func.func @transform_1(%arg0: i32, %arg1: i32, %arg2: i32) -> (i32, i32, i32) {
    %c0_i32 = arith.constant 0 : i32
    return %arg0, %arg1, %arg2 : i32, i32, i32
  }
}

</mosaic_0001>

<bundles_post_ra>
// kernel: tpu_custom_call.1
= control target key start
LH: loop header
LB: loop body
LE: loop exit
PB: predicated region body
PF: predicated region fallthrough
CT: control target
= control target key end

     0   :  { %s19289_s0 = inlined_call_operand.hbm [shape: f32[2,2,2,256], index: 0, kind: input, shape index: {}]   ;;  %s19290_s1 = inlined_call_operand.hbm [shape: f32[2,2,512], index: 1, kind: output, shape index: {}]  }
   0x1   :  { %19537 = sst [smem:[#allocation184_spill]] %s19289_s0 }
   0x2   :  { %19538 = sst [smem:[#allocation185_spill]] %s19290_s1 }
   0x3   :  { %6 = vsyncpa [#allocation3], 0 }
   0x4   :  { %8 = vsyncpa [#allocation3 + $0x1], 0 }
   0x5   :  { %9 = vsyncpa [#allocation4], 0 }
   0x6   :  { %11 = vsyncpa [#allocation4 + $0x1], 0  ;;  %s14902_s6 = smov 0   ;;  %s14904_s7 = smov 0  }
   0x7   :  { %s14906_s8 = smov 0   ;;  %s14908_s9 = smov 0  }
   0x8   :  { %s14910_s10 = smov 0   ;;  %s14912_s11 = smov 0  }
   0x9 LB: > { %19539 = sst [smem:[#allocation8_spill]] %s14803_s6  ;;  %s14564_s12 = sadd.s32 4294967295, %s14823_s11   ;;  %s14823_s11 = sphi %s14912_s11, %s17_s11   ;;  %s14819_s10 = sphi %s14910_s10, %s20450_s10   ;;  %s14815_s9 = sphi %s14908_s9, %s20449_s9   ;;  %s14811_s8 = sphi %s14906_s8, %s20448_s8   ;;  %s14807_s7 = sphi %s14904_s7, %s20447_s7   ;;  %s14803_s6 = sphi %s14902_s6, %s20446_s6  }
   0xa   : > { %19540 = sst [smem:[#allocation9_spill]] %s14807_s7  ;;  %s14565_s13 = sadd.s32 4294967294, %s14823_s11  }
   0xb   : > { %19541 = sst [smem:[#allocation10_spill]] %s14811_s8  ;;  %s36_s14 = sadd.s32 1, %s14819_s10 }
   0xc   : > { %19542 = sst [smem:[#allocation11_spill]] %s14815_s9  ;;  %s47_s15 = sadd.s32 1, %s14811_s8 }
   0xd   : > { %19543 = sst [smem:[#allocation12_spill]] %s14819_s10  ;;  %p38_p0 = scmp.ge.s32.totalorder %s36_s14, 2 }
   0xe   : > { %19544 = sst [smem:[#allocation13_spill]] %s14823_s11  ;;  %p54_p1 = scmp.ne.s32.totalorder %s14811_s8, %s14807_s7 }
   0xf   : > { %p55_p2 = scmp.eq.s32.totalorder %s14823_s11, 0  ;;  %p60_p3 = scmp.ne.s32.totalorder %s14807_s7, %s14803_s6 }
  0x10   : > { %s20452_s14 = smov (%p38_p0, %s36_s14), 0  ;;  %p61_p5 = scmp.eq.s32.totalorder %s14564_s12, 0 }
  0x11   : > { %19545 = sst [smem:[#allocation14_spill]] %s20452_s14  ;;  %p14943_p4 = por %p55_p2, %p54_p1 }
  0x12   : > { %s40_s17 = ssub.s32 %s14819_s10, %s20452_s14  ;;  %p88_p6 = scmp.eq.s32.totalorder %s14564_s12, 1 }
  0x13   : > { %p45_p7 = scmp.eq.s32.totalorder %s40_s17, 0  ;;  %p14949_p8 = por %p61_p5, %p60_p3 }
  0x14   : > { %p14953_p9 = por %p88_p6, %p54_p1  ;;  %p94_p10 = scmp.eq.s32.totalorder %s14565_s13, 1 }
  0x15   : > { %s14958_s20 = scalar_select %p45_p7, %s14811_s8, %s47_s15  }
  0x16   : > { %s19548_s19 = scalar_select %p14953_p9, 1, 0 }
  0x17   : > { %19550 = sst [smem:[#allocation16_spill]] %s14958_s20  ;;  %p14960_p11 = por %p94_p10, %p60_p3 }
  0x18   : > { %19549 = sst [smem:[#allocation15_spill]] %s19548_s19  ;;  %p14567_p12 = scmp.ge.s32.totalorder %s14823_s11, 2 }
  0x19   : > { %s19551_s21 = scalar_select %p14960_p11, 1, 0 }
  0x1a   : > { %p14593_p13 = scmp.lt.s32.totalorder %s14823_s11, 2  ;;  %s114_s22 = sand.u32 1, %s14811_s8  }
  0x1b   : > { %19552 = sst [smem:[#allocation17_spill]] %s19551_s21  ;;  %s14568_s23 = sshll.u32 %s114_s22, 3 }
  0x1c   : > { %s14579_s24 = sshll.u32 %s14819_s10, 3  ;;  %s19553_s0 = sld [smem:[#allocation184_spill]] }
  0x1d   : > { %s118_s28 = scalar_lea.vmem [#allocation2], %s14568_s23  ;;  %p14586_p0 = pnand %p14593_p13, %p14943_p4 }
  0x1e   : > { %s130_s29 = sshll.u32 %s118_s28, 4  ;;  %p14571_p1 = scmp.ge.s32.totalorder %s14823_s11, 1  ;;  %s131_s29 = int_to_ptr.vmem [resolvable:$true] %s130_s29 }
  0x1f   : > { %s115_s2 = scalar_lea.sflag [#allocation3], %s114_s22  ;;  %s14825_s3 = smov 64  }
  0x20   : > { %s14826_s4 = smov 4   ;;  %p138_p2 = scmp.lt.s32.totalorder %s14823_s11, 3 }
  0x22   : > { %s127_s27 = scalar_lea.hbm %s19553_s0, %s14579_s24  ;;  %p139_p3 = pnand %p14571_p1, %p138_p2 }
  0x23   : > { %s128_s30 = sshll.u32 %s127_s27, 4  ;;  %s129_s30 = int_to_ptr.hbm [resolvable:$true] %s128_s30 }
  0x24   : > { %14588 = dma.hbm_to_vmem [thread:$0]  (!%p14586_p0), %s129_s30, 128, %s131_s29, %s115_s2, %s14825_s3, %s14825_s3, %s14826_s4  }
  0x25   : > { %142 = sbr.rel (%p139_p3) target bundleno = 1938 (0x792), region = 24 }
  0x2a   : > { %s14976_s5 = sand.u32 1, %s14807_s7  }
  0x2b   : > { %19554 = sst [smem:[#allocation18_spill]] %s14976_s5  ;;  %s19316_s12 = sshll.u32 %s14976_s5, 3 }
  0x2c   : > { %s145_s13 = scalar_lea.sflag [#allocation3], %s14976_s5  ;;  %s148_s15 = scalar_lea.vmem [#allocation2], %s19316_s12 }
  0x2d   : > { %14794 = dma.done.wait (%p14949_p8), %s145_s13, 128  }
  0x2e   : > { %14796 = vsyncadd (%p14949_p8), %s145_s13, 4294967168  ;;  %v170_v0 = vld [vmem:[%s148_s15] sm:$0xf]  ;;  %v171_v1 = vld [vmem:[%s148_s15 + $0x4] sm:$0xf]  ;;  %vm314_vm0 = vcmask 1047556  }
  0x2f   : > { %174 = vst [vmem:[#allocation1] ss:$4 sm:$0xff] %v170_v0  ;;  %v14827_v6 = vmov 1983009808   ;;  %v14828_v9 = vmov 1934713408  }
  0x30   : > { %178 = vst [vmem:[#allocation1 + $0x20] ss:$4 sm:$0xff] %v171_v1  ;;  %v317_v7 = vunpack.c.l.s4 %v14827_v6  ;;  %v339_v10 = vunpack.c.l.s4 %v14828_v9  ;;  %s19372_s16 = smov 6   ;;  %s19317_s17 = smov 8   ;;  %vm14122_vm1 = vcmask 15360   ;;  %vm14124_vm2 = vcmask 31744  }
  0x31   : > { %s19374_s18 = smov 12   ;;  %s19435_s22 = smov 4   ;;  %vm14126_vm3 = vcmask 48128   ;;  %vm14128_vm4 = vcmask 64512   ;;  %vm14130_vm5 = vcmask 80896   ;;  %vm14132_vm6 = vcmask 97280  }
  0x32   : > { %v14986_v8 = vunpack.c.0.s8 %v317_v7  ;;  %v14989_v14 = vunpack.c.0.s8 %v339_v10  ;;  %s19425_s23 = smov 16   ;;  %s19377_s24 = smov 18   ;;  %vm19536_vm7 = vcmask 113664   ;;  %vm19535_vm8 = vcmask 130048  }
  0x33   : > { %s19419_s25 = smov 22   ;;  %s19379_s26 = smov 24   ;;  %vm19534_vm9 = vcmask 146432   ;;  %vm19532_vm10 = vcmask 162816   ;;  %vm19531_vm11 = vcmask 179200   ;;  %vm19533_vm12 = vcmask 195584  }
  0x34   : > { %s19413_s27 = smov 28   ;;  %s19381_s28 = smov 30   ;;  %vm19485_vm13 = vcmask 211968   ;;  %vm19481_vm14 = vcmask 228352   ;;  %vm19482_vm15 = vcmask 244736  }
  0x35   : > { %s19407_s29 = smov 34   ;;  %s19383_s30 = smov 36  }
  0x36   : > { %v175_v2 = vld.sshfl [vmem:[#allocation1] sm:$0xff pattern:$0x73625140]  ;;  %v176_v4 = vld.sshfl [vmem:[#allocation1 + $0x8] sm:$0xff pattern:$0x73625140] }
  0x37   : > { %v179_v3 = vld.sshfl [vmem:[#allocation1 + $0x20] sm:$0xff pattern:$0x73625140]  ;;  %185 = vxpose.xlu0.b32.start.end [1/1] (short) %v175_v2, 128  ;;  %v180_v5 = vld.sshfl [vmem:[#allocation1 + $0x28] sm:$0xff pattern:$0x73625140] }
  0x38   : > { %249 = vxpose.xlu1.b32.start.end [1/1] (short) %v179_v3, 128  ;;  %s19401_s2 = smov 40   ;;  %s19395_s3 = smov 42  }
  0x39   : > { %s19385_s4 = smov 46   ;;  %s19387_s13 = smov 48  }
  0x3a   : > { %s19389_s15 = smov 52   ;;  %s19319_s12 = smov 54  }
  0x3b   : > { %s19977_s0 = smov 106   ;;  %s19978_s14 = smov 108  }
  0x3c   : > { %s19445_s10 = smov 110   ;;  %s19985_s20 = smov 114  }
  0x3d   : > { %s19449_s8 = smov 116   ;;  %s19989_s7 = smov 120  }
  0x3e   : > { %s19454_s11 = smov 122   ;;  %s19996_s21 = smov 126  }
  0x3f   : > { %s20003_s6 = smov 2   ;;  %s20004_s19 = smov 6  }
  0x40   : > { %s20006_s1 = smov 10   ;;  %s20007_s5 = smov 8  }
  0x41   : > { %s20008_s9 = smov 12  }
  0xb7   : > { %217 = vxpose.xlu0.b32.start.end [1/1] (short) %v176_v4, 128 }
  0xb8   : > { %281 = vxpose.xlu1.b32.start.end [1/1] (short) %v180_v5, 128 }
  0xdb   : > { %v201_v12 = vpop.trf.xlu0 }
  0xdc   : > { %v265_v11 = vpop.trf.xlu1  ;;  %v319_v16 = vperm.slane %v201_v12, %v14986_v8  ;;  %v313_v30 = vrot.slane %v201_v12, 4 }
  0xdd   : > { %v329_v13 = vperm.slane %v265_v11, %v14986_v8  ;;  %v324_v25 = vrot.slane %v265_v11, 4 }
  0xde   : > { %v336_v19 = vrot.slane %v319_v16, 4  ;;  %v315_v33 = vsel %vm314_vm0, 0.0, %v313_v30 }
  0xdf   : > { %v334_v15 = vrot.slane %v329_v13, 4  ;;  %v325_v27 = vsel %vm314_vm0, 0.0, %v324_v25  ;;  %v323_v38 = vperm.slane %v315_v33, %v14986_v8 }
  0xe0   : > { %v337_v21 = vsel %vm314_vm0, %v329_v13, %v336_v19  ;;  %v333_v31 = vperm.slane %v325_v27, %v14986_v8 }
  0xe1   : > { %v335_v17 = vsel %vm314_vm0, %v334_v15, %v319_v16  ;;  %v345_v22 = vperm.slane %v337_v21, %v14989_v14  ;;  %v348_v41 = vrot.slane %v323_v38, 4 }
  0xe2   : > { %v341_v18 = vperm.slane %v335_v17, %v14989_v14  ;;  %v346_v35 = vrot.slane %v333_v31, 4 }
  0xe3   : > { %v15004_v29 = vpop.trf.xlu0  ;;  %v360_v32 = vrot.slane %v345_v22, 4  ;;  %v349_v44 = vsel %vm314_vm0, %v333_v31, %v348_v41 }
  0xe4   : > { %1978 = vxpose.xlu2.b32.start.end [1/1] (short) (narrow) %v341_v18, 8  ;;  %v14994_v20 = vpop.trf.xlu1  ;;  %v358_v24 = vrot.slane %v341_v18, 4  ;;  %v347_v39 = vsel %vm314_vm0, %v346_v35, %v323_v38  ;;  %v357_v45 = vperm.slane %v349_v44, %v14989_v14  ;;  %v371_v55 = vperm.slane %v15004_v29, %v14986_v8 }
  0xe5   : > { %v361_v34 = vsel %vm314_vm0, 0.0, %v360_v32  ;;  %v353_v40 = vperm.slane %v347_v39, %v14989_v14  ;;  %v381_v51 = vperm.slane %v14994_v20, %v14986_v8  ;;  %v376_v17 = vrot.slane %v14994_v20, 4 }
  0xe6   : > { %v359_v26 = vsel %vm314_vm0, 0.0, %v358_v24  ;;  %v364_v52 = vrot.slane %v357_v45, 4  ;;  %v388_v6 = vrot.slane %v371_v55, 4 }
  0xe7   : > { %v362_v48 = vrot.slane %v353_v40, 4  ;;  %v386_v54 = vrot.slane %v381_v51, 4  ;;  %v377_v30 = vsel %vm314_vm0, 0.0, %v376_v17 }
  0xe8   : > { %v365_v56 = vsel %vm314_vm0, 0.0, %v364_v52  ;;  %v389_v18 = vsel %vm314_vm0, %v381_v51, %v388_v6  ;;  %v385_v39 = vperm.slane %v377_v30, %v14986_v8 }
  0xe9   : > { %v363_v49 = vsel %vm314_vm0, 0.0, %v362_v48  ;;  %v387_v58 = vsel %vm314_vm0, %v386_v54, %v371_v55  ;;  %v397_v27 = vperm.slane %v389_v18, %v14989_v14 }
  0xea   : > { %v393_v59 = vperm.slane %v387_v58, %v14989_v14  ;;  %v398_v52 = vrot.slane %v385_v39, 4 }
  0xeb   : > { %v15009_v37 = vpop.trf.xlu0 }
  0xec   : > { %2042 = vxpose.xlu2.b32.start.end [1/1] (short) (narrow) %v345_v22, 8  ;;  %v14998_v23 = vpop.trf.xlu1  ;;  %v423_v0 = vperm.slane %v15009_v37, %v14986_v8  ;;  %v410_v1 = vrot.slane %v393_v59, 4 }
  0xed   : > { %v433_v61 = vperm.slane %v14998_v23, %v14986_v8 }
  0xee   : > { %v411_v7 = vsel %vm314_vm0, 0.0, %v410_v1  ;;  %v440_v12 = vrot.slane %v423_v0, 4 }
  0xef   : > { %v438_v63 = vrot.slane %v433_v61, 4 }
  0xf0   : > { %v441_v25 = vsel %vm314_vm0, %v433_v61, %v440_v12 }
  0xf1   : > { %v439_v4 = vsel %vm314_vm0, %v438_v63, %v423_v0  ;;  %v15075_v31 = vperm.slane %v441_v25, %v14989_v14 }
  0xf2   : > { %v15052_v9 = vperm.slane %v439_v4, %v14989_v14 }
  0xf3   : > { %v15016_v43 = vpop.trf.xlu0 }
  0xf4   : > { %2010 = vxpose.xlu2.b32.start.end [1/1] (short) (narrow) %v359_v26, 8  ;;  %v15002_v28 = vpop.trf.xlu1  ;;  %v462_v19 = vrot.slane %v15052_v9, 4 }
  0xf6   : > { %v463_v32 = vsel %vm314_vm0, 0.0, %v462_v19 }
  0xfb   : > { %v205_v47 = vpop.trf.xlu0 }
  0xfc   : > { %2074 = vxpose.xlu2.b32.start.end [1/1] (short) (narrow) %v361_v34, 8  ;;  %v269_v36 = vpop.trf.xlu1  ;;  %v15047_v3 = vperm.slane %v205_v47, %v14986_v8  ;;  %v522_v13 = vrot.slane %v205_v47, 4 }
  0xfd   : > { %v532_v5 = vrot.slane %v269_v36, 4  ;;  %v15057_v11 = vperm.slane %v269_v36, %v14986_v8  ;;  %v366_v36 = vrot.slane %v15004_v29, 4 }
  0xfe   : > { %v544_v15 = vrot.slane %v15047_v3, 4  ;;  %v523_v24 = vsel %vm314_vm0, 0.0, %v522_v13 }
  0xff   : > { %v533_v16 = vsel %vm314_vm0, 0.0, %v532_v5  ;;  %v531_v20 = vperm.slane %v523_v24, %v14986_v8  ;;  %v367_v48 = vsel %vm314_vm0, 0.0, %v366_v36 }
 0x100   : > { %v541_v22 = vperm.slane %v533_v16, %v14986_v8  ;;  %v545_v26 = vsel %vm314_vm0, %v15057_v11, %v544_v15  ;;  %v375_v58 = vperm.slane %v367_v48, %v14986_v8 }
 0x101   : > { %v15079_v33 = vperm.slane %v545_v26, %v14989_v14  ;;  %v556_v38 = vrot.slane %v531_v20, 4 }
 0x102   : > { %v554_v35 = vrot.slane %v541_v22, 4  ;;  %v399_v1 = vsel %vm314_vm0, %v398_v52, %v375_v58 }
 0x103   : > { %v15027_v53 = vpop.trf.xlu0  ;;  %v568_v41 = vrot.slane %v15079_v33, 4  ;;  %v557_v29 = vsel %vm314_vm0, %v541_v22, %v556_v38  ;;  %v405_v12 = vperm.slane %v399_v1, %v14989_v14 }
 0x104   : > { %2106 = vxpose.xlu2.b32.start.end [1/1] (short) (narrow) %v353_v40, 8  ;;  %v15014_v42 = vpop.trf.xlu1  ;;  %v412_v40 = vrot.slane %v397_v27, 4  ;;  %v555_v47 = vsel %vm314_vm0, %v554_v35, %v531_v20  ;;  %v579_v61 = vperm.slane %v15027_v53, %v14986_v8  ;;  %v565_v63 = vperm.slane %v557_v29, %v14989_v14 }
 0x105   : > { %v569_v54 = vsel %vm314_vm0, 0.0, %v568_v41  ;;  %v15098_v55 = vperm.slane %v555_v47, %v14989_v14  ;;  %v574_v0 = vrot.slane %v15027_v53, 4  ;;  %v414_v22 = vrot.slane %v405_v12, 4 }
 0x106   : > { %v413_v51 = vsel %vm314_vm0, 0.0, %v412_v40  ;;  %v572_v5 = vrot.slane %v565_v63, 4  ;;  %v596_v16 = vrot.slane %v579_v61, 4  ;;  %v400_v20 = vrot.slane %v375_v58, 4 }
 0x107   : > { %v575_v13 = vsel %vm314_vm0, 0.0, %v574_v0  ;;  %v415_v30 = vsel %vm314_vm0, 0.0, %v414_v22 }
 0x108   : > { %v573_v17 = vsel %vm314_vm0, 0.0, %v572_v5  ;;  %v583_v18 = vperm.slane %v575_v13, %v14986_v8  ;;  %v401_v41 = vsel %vm314_vm0, %v385_v39, %v400_v20 }
 0x10a   : > { %v608_v38 = vrot.slane %v583_v18, 4 }
 0x10b   : > { %v15036_v60 = vpop.trf.xlu0 }
 0x10c   : > { %2170 = vxpose.xlu2.b32.start.end [1/1] (short) (narrow) %v357_v45, 8  ;;  %v15020_v46 = vpop.trf.xlu1  ;;  %v589_v45 = vperm.slane %v15014_v42, %v14986_v8  ;;  %v631_v52 = vperm.slane %v15036_v60, %v14986_v8 }
 0x10d   : > { %v641_v47 = vperm.slane %v15020_v46, %v14986_v8 }
 0x10e   : > { %v597_v26 = vsel %vm314_vm0, %v589_v45, %v596_v16 }
 0x10f   : > { %v646_v58 = vrot.slane %v641_v47, 4 }
 0x113   : > { %v15044_v2 = vpop.trf.xlu0 }
 0x114   : > { %2138 = vxpose.xlu2.b32.start.end [1/1] (short) (narrow) %v363_v49, 8  ;;  %v15023_v50 = vpop.trf.xlu1  ;;  %v584_v49 = vrot.slane %v15014_v42, 4 }
 0x115   : > { %v693_v20 = vperm.slane %v15023_v50, %v14986_v8 }
 0x116   : > { %v585_v42 = vsel %vm314_vm0, 0.0, %v584_v49  ;;  %v636_v49 = vrot.slane %v15020_v46, 4 }
 0x11b   : > { %v15064_v21 = vpop.trf.xlu0 }
 0x11c   : > { %2202 = vxpose.xlu2.b32.start.end [1/1] (short) (narrow) %v365_v56, 8  ;;  %v15032_v57 = vpop.trf.xlu1 }
 0x123   : > { %v15087_v44 = vpop.trf.xlu0 }
 0x124   : > { %2234 = vxpose.xlu2.b32.start.end [1/1] (short) (narrow) %v393_v59, 8  ;;  %v15040_v62 = vpop.trf.xlu1  ;;  %v594_v59 = vrot.slane %v589_v45, 4 }
 0x126   : > { %v595_v6 = vsel %vm314_vm0, %v594_v59, %v579_v61  ;;  %v637_v61 = vsel %vm314_vm0, 0.0, %v636_v49 }
 0x127   : > { %v15117_v15 = vperm.slane %v595_v6, %v14989_v14  ;;  %v645_v5 = vperm.slane %v637_v61, %v14986_v8  ;;  %v647_v6 = vsel %vm314_vm0, %v646_v58, %v631_v52 }
 0x128   : > { %v15165_v16 = vperm.slane %v647_v6, %v14989_v14 }
 0x129   : > { %v618_v24 = vrot.slane %v15117_v15, 4 }
 0x12b   : > { %v15110_v4 = vpop.trf.xlu0  ;;  %v619_v35 = vsel %vm314_vm0, 0.0, %v618_v24  ;;  %v428_v24 = vrot.slane %v14998_v23, 4 }
 0x12c   : > { %2266 = vxpose.xlu2.b32.start.end [1/1] (short) (narrow) %v411_v7, 8  ;;  %v15054_v10 = vpop.trf.xlu1  ;;  %v593_v7 = vperm.slane %v585_v42, %v14986_v8  ;;  %v648_v42 = vrot.slane %v631_v52, 4 }
 0x12e   : > { %v606_v19 = vrot.slane %v593_v7, 4  ;;  %v609_v29 = vsel %vm314_vm0, %v593_v7, %v608_v38 }
 0x12f   : > { %v15148_v39 = vperm.slane %v609_v29, %v14989_v14  ;;  %v683_v29 = vperm.slane %v15044_v2, %v14986_v8 }
 0x131   : > { %v624_v0 = vrot.slane %v15148_v39, 4 }
 0x133   : > { %v15124_v25 = vpop.trf.xlu0 }
 0x134   : > { %2298 = vxpose.xlu2.b32.start.end [1/1] (short) (narrow) %v397_v27, 8  ;;  %v15081_v34 = vpop.trf.xlu1  ;;  %v607_v27 = vsel %vm314_vm0, %v606_v19, %v583_v18  ;;  %v658_v18 = vrot.slane %v645_v5, 4 }
 0x135   : > { %v613_v40 = vperm.slane %v607_v27, %v14989_v14 }
 0x137   : > { %2522 = vxpose.xlu0.b32.start.end [1/1] (short) (narrow) %v463_v32, 8  ;;  %v15130_v32 = vperm.slane %v597_v26, %v14989_v14  ;;  %v622_v48 = vrot.slane %v613_v40, 4 }
 0x138   : > { %2554 = vxpose.xlu1.b32.start.end [1/1] (short) (narrow) %v15075_v31, 8 }
 0x139   : > { %v623_v59 = vsel %vm314_vm0, 0.0, %v622_v48  ;;  %v698_v48 = vrot.slane %v693_v20, 4 }
 0x13b   : > { %v15138_v45 = vpop.trf.xlu0  ;;  %v699_v61 = vsel %vm314_vm0, %v698_v48, %v683_v29 }
 0x13c   : > { %2330 = vxpose.xlu2.b32.start.end [1/1] (short) (narrow) %v413_v51, 8  ;;  %v15100_v56 = vpop.trf.xlu1  ;;  %v409_v51 = vperm.slane %v401_v41, %v14989_v14 }
 0x13e   : > { %v416_v46 = vrot.slane %v409_v51, 4 }
 0x13f   : > { %3098 = vxpose.xlu0.b32.start.end [1/1] (short) (narrow) %v569_v54, 8 }
 0x140   : > { %3130 = vxpose.xlu1.b32.start.end [1/1] (short) (narrow) %v15098_v55, 8  ;;  %v417_v13 = vsel %vm314_vm0, 0.0, %v416_v46 }
 0x143   : > { %v15156_v1 = vpop.trf.xlu0 }
 0x144   : > { %2362 = vxpose.xlu2.b32.start.end [1/1] (short) (narrow) %v405_v12, 8  ;;  %v15119_v53 = vpop.trf.xlu1  ;;  %v649_v12 = vsel %vm314_vm0, %v641_v47, %v648_v42  ;;  %v418_v47 = vrot.slane %v15009_v37, 4  ;;  %v688_v37 = vrot.slane %v15023_v50, 4  ;;  %v705_v50 = vperm.slane %v699_v61, %v14989_v14 }
 0x145   : > { %v657_v22 = vperm.slane %v649_v12, %v14989_v14 }
 0x146   : > { %v689_v12 = vsel %vm314_vm0, 0.0, %v688_v37 }
 0x147   : > { %3194 = vxpose.xlu0.b32.start.end [1/1] (short) (narrow) %v565_v63, 8  ;;  %v626_v63 = vrot.slane %v15036_v60, 4  ;;  %v625_v60 = vsel %vm314_vm0, 0.0, %v624_v0  ;;  %v672_v27 = vrot.slane %v657_v22, 4 }
 0x148   : > { %3226 = vxpose.xlu1.b32.start.end [1/1] (short) (narrow) %v573_v17, 8 }
 0x149   : > { %v627_v7 = vsel %vm314_vm0, 0.0, %v626_v63  ;;  %v673_v23 = vsel %vm314_vm0, 0.0, %v672_v27 }
 0x14a   : > { %v635_v19 = vperm.slane %v627_v7, %v14986_v8  ;;  %v700_v7 = vrot.slane %v683_v29, 4 }
 0x14b   : > { %v15173_v26 = vpop.trf.xlu0 }
 0x14c   : > { %2394 = vxpose.xlu2.b32.start.end [1/1] (short) (narrow) %v415_v30, 8  ;;  %v15133_v36 = vpop.trf.xlu1  ;;  %v659_v30 = vsel %vm314_vm0, %v658_v18, %v635_v19  ;;  %v660_v41 = vrot.slane %v635_v19, 4  ;;  %v697_v18 = vperm.slane %v689_v12, %v14986_v8 }
 0x14d   : > { %v15181_v38 = vperm.slane %v659_v30, %v14989_v14 }
 0x14e   : > { %v661_v58 = vsel %vm314_vm0, %v645_v5, %v660_v41  ;;  %v678_v5 = vrot.slane %v15044_v2, 4  ;;  %v710_v41 = vrot.slane %v697_v18, 4 }
 0x14f   : > { %3290 = vxpose.xlu0.b32.start.end [1/1] (short) (narrow) %v619_v35, 8  ;;  %v429_v35 = vsel %vm314_vm0, 0.0, %v428_v24  ;;  %v15200_v46 = vperm.slane %v661_v58, %v14989_v14  ;;  %v701_v24 = vsel %vm314_vm0, %v693_v20, %v700_v7  ;;  %v735_v7 = vperm.slane %v15064_v21, %v14986_v8 }
 0x150   : > { %3322 = vxpose.xlu1.b32.start.end [1/1] (short) (narrow) %v15130_v32, 8  ;;  %v437_v49 = vperm.slane %v429_v35, %v14986_v8  ;;  %v679_v19 = vsel %vm314_vm0, 0.0, %v678_v5  ;;  %v15219_v30 = vperm.slane %v701_v24, %v14989_v14 }
 0x151   : > { %v687_v27 = vperm.slane %v679_v19, %v14986_v8 }
 0x152   : > { %v450_v42 = vrot.slane %v437_v49, 4  ;;  %v724_v29 = vrot.slane %v15219_v30, 4 }
 0x153   : > { %v15192_v52 = vpop.trf.xlu0 }
 0x154   : > { %2426 = vxpose.xlu2.b32.start.end [1/1] (short) (narrow) %v409_v51, 8  ;;  %v15150_v54 = vpop.trf.xlu1  ;;  %v464_v51 = vrot.slane %v15075_v31, 4 }
 0x156   : > { %v465_v63 = vsel %vm314_vm0, 0.0, %v464_v51  ;;  %v745_v51 = vperm.slane %v15032_v57, %v14986_v8 }
 0x157   : > { %3386 = vxpose.xlu0.b32.start.end [1/1] (short) (narrow) %v613_v40, 8 }
 0x158   : > { %3418 = vxpose.xlu1.b32.start.end [1/1] (short) (narrow) %v623_v59, 8  ;;  %v419_v59 = vsel %vm314_vm0, 0.0, %v418_v47  ;;  %v712_v47 = vrot.slane %v687_v27, 4  ;;  %v750_v5 = vrot.slane %v745_v51, 4 }
 0x159   : > { %v427_v6 = vperm.slane %v419_v59, %v14986_v8  ;;  %v740_v59 = vrot.slane %v15032_v57, 4 }
 0x15a   : > { %v713_v58 = vsel %vm314_vm0, %v697_v18, %v712_v47 }
 0x15b   : > { %v452_v61 = vrot.slane %v427_v6, 4  ;;  %v721_v12 = vperm.slane %v713_v58, %v14989_v14  ;;  %v741_v57 = vsel %vm314_vm0, 0.0, %v740_v59 }
 0x15c   : > { %2458 = vxpose.xlu2.b32.start.end [1/1] (short) (narrow) %v417_v13, 8  ;;  %v15167_v17 = vpop.trf.xlu1  ;;  %v451_v13 = vsel %vm314_vm0, %v450_v42, %v427_v6  ;;  %v730_v6 = vrot.slane %v15064_v21, 4  ;;  %v749_v24 = vperm.slane %v741_v57, %v14986_v8 }
 0x15d   : > { %v457_v2 = vperm.slane %v451_v13, %v14989_v14  ;;  %v453_v13 = vsel %vm314_vm0, %v437_v49, %v452_v61  ;;  %v728_v19 = vrot.slane %v721_v12, 4  ;;  %v15261_v49 = vperm.slane %v15002_v28, %v14986_v8 }
 0x15f   : > { %3482 = vxpose.xlu0.b32.start.end [1/1] (short) (narrow) %v625_v60, 8  ;;  %v15211_v60 = vpop.trf.xlu0  ;;  %v466_v48 = vrot.slane %v457_v2, 4  ;;  %v490_v61 = vrot.slane %v15261_v49, 4 }
 0x160   : > { %3514 = vxpose.xlu1.b32.start.end [1/1] (short) (narrow) %v15165_v16, 8 }
 0x161   : > { %v467_v37 = vsel %vm314_vm0, 0.0, %v466_v48  ;;  %v729_v48 = vsel %vm314_vm0, 0.0, %v728_v19 }
 0x164   : > { %2490 = vxpose.xlu2.b32.start.end [1/1] (short) (narrow) %v15052_v9, 8  ;;  %v15183_v40 = vpop.trf.xlu1  ;;  %v674_v9 = vrot.slane %v15181_v38, 4 }
 0x166   : > { %v675_v31 = vsel %vm314_vm0, 0.0, %v674_v9  ;;  %v711_v9 = vsel %vm314_vm0, %v710_v41, %v687_v27  ;;  %v731_v27 = vsel %vm314_vm0, 0.0, %v730_v6  ;;  %v752_v41 = vrot.slane %v735_v7, 4 }
 0x167   : > { %3578 = vxpose.xlu0.b32.start.end [1/1] (short) (narrow) %v657_v22, 8  ;;  %v722_v22 = vrot.slane %v705_v50, 4  ;;  %v15225_v20 = vpop.trf.xlu0  ;;  %v15235_v42 = vperm.slane %v711_v9, %v14989_v14  ;;  %v762_v9 = vrot.slane %v749_v24, 4 }
 0x168   : > { %3610 = vxpose.xlu1.b32.start.end [1/1] (short) (narrow) %v673_v23, 8 }
 0x169   : > { %v723_v23 = vsel %vm314_vm0, 0.0, %v722_v22  ;;  %v751_v22 = vsel %vm314_vm0, %v750_v5, %v735_v7  ;;  %v475_v7 = vperm.slane %v15016_v43, %v14986_v8 }
 0x16c   : > { %2586 = vxpose.xlu2.b32.start.end [1/1] (short) (narrow) %v465_v63, 8  ;;  %v15203_v0 = vpop.trf.xlu1  ;;  %v725_v63 = vsel %vm314_vm0, 0.0, %v724_v29  ;;  %v739_v29 = vperm.slane %v731_v27, %v14986_v8 }
 0x16e   : > { %v763_v5 = vsel %vm314_vm0, %v762_v9, %v739_v29  ;;  %v764_v19 = vrot.slane %v739_v29, 4  ;;  %v792_v29 = vrot.slane %v15040_v62, 4 }
 0x16f   : > { %3674 = vxpose.xlu0.b32.start.end [1/1] (short) (narrow) %v675_v31, 8  ;;  %v15248_v18 = vpop.trf.xlu0 }
 0x170   : > { %3706 = vxpose.xlu1.b32.start.end [1/1] (short) (narrow) %v15200_v46, 8 }
 0x174   : > { %2618 = vxpose.xlu2.b32.start.end [1/1] (short) (narrow) %v457_v2, 8  ;;  %v15221_v35 = vpop.trf.xlu1  ;;  %v461_v2 = vperm.slane %v453_v13, %v14989_v14 }
 0x175   : > { %19555 = vst [vmem:[#allocation19_spill] sm:$0xff] %v15221_v35 }
 0x176   : > { %v468_v58 = vrot.slane %v461_v2, 4 }
 0x177   : > { %3770 = vxpose.xlu0.b32.start.end [1/1] (short) (narrow) %v705_v50, 8 }
 0x178   : > { %3802 = vxpose.xlu1.b32.start.end [1/1] (short) (narrow) %v723_v23, 8  ;;  %v15255_v23 = vperm.slane %v751_v22, %v14989_v14  ;;  %v469_v57 = vsel %vm314_vm0, 0.0, %v468_v58  ;;  %v765_v58 = vsel %vm314_vm0, %v749_v24, %v764_v19  ;;  %v782_v24 = vrot.slane %v15087_v44, 4 }
 0x17a   : > { %v774_v59 = vrot.slane %v15255_v23, 4 }
 0x17c   : > { %2650 = vxpose.xlu2.b32.start.end [1/1] (short) (narrow) %v467_v37, 8  ;;  %v15237_v31 = vpop.trf.xlu1  ;;  %v15268_v37 = vpop.trf.xlu0  ;;  %v775_v6 = vsel %vm314_vm0, 0.0, %v774_v59  ;;  %v787_v59 = vperm.slane %v15087_v44, %v14986_v8 }
 0x17d   : > { %19556 = vst [vmem:[#allocation20_spill] sm:$0xff] %v15237_v31  ;;  %v15241_v50 = vpop.trf.xlu2  ;;  %v492_v31 = vrot.slane %v475_v7, 4 }
 0x17e   : > { %19558 = vst [vmem:[#allocation22_spill] sm:$0xff] %v15268_v37  ;;  %v804_v19 = vrot.slane %v787_v59, 4 }
 0x17f   : > { %3866 = vxpose.xlu0.b32.start.end [1/1] (short) (narrow) %v725_v63, 8  ;;  %v753_v63 = vsel %vm314_vm0, %v745_v51, %v752_v41  ;;  %v491_v51 = vsel %vm314_vm0, %v490_v61, %v475_v7  ;;  %v15297_v61 = vperm.slane %v765_v58, %v14989_v14  ;;  %v493_v7 = vsel %vm314_vm0, %v15261_v49, %v492_v31 }
 0x180   : > { %3898 = vxpose.xlu1.b32.start.end [1/1] (short) (narrow) %v15235_v42, 8  ;;  %v497_v27 = vperm.slane %v491_v51, %v14989_v14  ;;  %v793_v51 = vsel %vm314_vm0, 0.0, %v792_v29 }
 0x181   : > { %v801_v58 = vperm.slane %v793_v51, %v14986_v8 }
 0x184   : > { %2682 = vxpose.xlu2.b32.start.end [1/1] (short) (narrow) %v461_v2, 8  ;;  %v15257_v21 = vpop.trf.xlu1  ;;  %v769_v2 = vperm.slane %v763_v5, %v14989_v14  ;;  %v15288_v41 = vpop.trf.xlu0 }
 0x185   : > { %19557 = vst [vmem:[#allocation21_spill] sm:$0xff] %v15257_v21  ;;  %v15263_v47 = vpop.trf.xlu2 }
 0x186   : > { %19560 = vst [vmem:[#allocation24_spill] sm:$0xff] %v15288_v41  ;;  %v778_v9 = vrot.slane %v769_v2, 4  ;;  %v783_v41 = vsel %vm314_vm0, 0.0, %v782_v24  ;;  %v501_v24 = vperm.slane %v493_v7, %v14989_v14 }
 0x187   : > { %3962 = vxpose.xlu0.b32.start.end [1/1] (short) (narrow) %v721_v12, 8  ;;  %v15277_v12 = vperm.slane %v753_v63, %v14989_v14  ;;  %v791_v51 = vperm.slane %v783_v41, %v14986_v8  ;;  %v849_v41 = vperm.slane %v15054_v10, %v14986_v8 }
 0x188   : > { %3994 = vxpose.xlu1.b32.start.end [1/1] (short) (narrow) %v729_v48, 8  ;;  %v797_v48 = vperm.slane %v15040_v62, %v14986_v8  ;;  %v514_v62 = vrot.slane %v497_v27, 4 }
 0x18a   : > { %v802_v5 = vrot.slane %v797_v48, 4  ;;  %v515_v29 = vsel %vm314_vm0, 0.0, %v514_v62 }
 0x18c   : > { %2714 = vxpose.xlu2.b32.start.end [1/1] (short) (narrow) %v469_v57, 8  ;;  %v15280_v13 = vpop.trf.xlu1  ;;  %v15307_v21 = vpop.trf.xlu0 }
 0x18d   : > { %19559 = vst [vmem:[#allocation23_spill] sm:$0xff] %v15280_v13  ;;  %v15282_v22 = vpop.trf.xlu2  ;;  %v780_v13 = vrot.slane %v15297_v61, 4 }
 0x18e   : > { %19562 = vst [vmem:[#allocation26_spill] sm:$0xff] %v15307_v21 }
 0x18f   : > { %4058 = vxpose.xlu0.b32.start.end [1/1] (short) (narrow) %v775_v6, 8  ;;  %v779_v6 = vsel %vm314_vm0, 0.0, %v778_v9  ;;  %v805_v9 = vsel %vm314_vm0, %v797_v48, %v804_v19  ;;  %v781_v44 = vsel %vm314_vm0, 0.0, %v780_v13  ;;  %v480_v48 = vrot.slane %v15002_v28, 4 }
 0x190   : > { %4090 = vxpose.xlu1.b32.start.end [1/1] (short) (narrow) %v15277_v12, 8 }
 0x191   : > { %v481_v19 = vsel %vm314_vm0, 0.0, %v480_v48  ;;  %v516_v48 = vrot.slane %v501_v24, 4 }
 0x192   : > { %v15347_v7 = vperm.slane %v481_v19, %v14986_v8 }
 0x194   : > { %2746 = vxpose.xlu2.b32.start.end [1/1] (short) (narrow) %v497_v27, 8  ;;  %v15299_v63 = vpop.trf.xlu1  ;;  %v15328_v13 = vpop.trf.xlu0  ;;  %v502_v19 = vrot.slane %v15347_v7, 4 }
 0x195   : > { %19561 = vst [vmem:[#allocation25_spill] sm:$0xff] %v15299_v63  ;;  %v15301_v57 = vpop.trf.xlu2  ;;  %v803_v63 = vsel %vm314_vm0, %v802_v5, %v787_v59  ;;  %v813_v59 = vperm.slane %v805_v9, %v14989_v14  ;;  %v816_v9 = vrot.slane %v791_v51, 4 }
 0x196   : > { %19564 = vst [vmem:[#allocation28_spill] sm:$0xff] %v15328_v13  ;;  %v517_v13 = vsel %vm314_vm0, 0.0, %v516_v48 }
 0x197   : > { %4154 = vxpose.xlu0.b32.start.end [1/1] (short) (narrow) %v769_v2, 8  ;;  %v15316_v2 = vperm.slane %v803_v63, %v14989_v14  ;;  %v828_v63 = vrot.slane %v813_v59, 4 }
 0x198   : > { %4186 = vxpose.xlu1.b32.start.end [1/1] (short) (narrow) %v779_v6, 8  ;;  %v814_v6 = vrot.slane %v801_v58, 4 }
 0x199   : > { %v829_v49 = vsel %vm314_vm0, 0.0, %v828_v63 }
 0x19a   : > { %v815_v5 = vsel %vm314_vm0, %v814_v6, %v791_v51  ;;  %v839_v6 = vperm.slane %v15110_v4, %v14986_v8 }
 0x19b   : > { %v15336_v62 = vperm.slane %v815_v5, %v14989_v14 }
 0x19c   : > { %2778 = vxpose.xlu2.b32.start.end [1/1] (short) (narrow) %v515_v29, 8  ;;  %v15318_v27 = vpop.trf.xlu1  ;;  %v470_v29 = vrot.slane %v15016_v43, 4  ;;  %v844_v43 = vrot.slane %v15054_v10, 4 }
 0x19d   : > { %19563 = vst [vmem:[#allocation27_spill] sm:$0xff] %v15318_v27  ;;  %v15321_v21 = vpop.trf.xlu2  ;;  %v830_v5 = vrot.slane %v15336_v62, 4  ;;  %v817_v27 = vsel %vm314_vm0, %v801_v58, %v816_v9  ;;  %v834_v9 = vrot.slane %v15110_v4, 4 }
 0x19e   : > { %v471_v51 = vsel %vm314_vm0, 0.0, %v470_v29  ;;  %v856_v29 = vrot.slane %v839_v6, 4  ;;  %v845_v48 = vsel %vm314_vm0, 0.0, %v844_v43 }
 0x19f   : > { %4250 = vxpose.xlu0.b32.start.end [1/1] (short) (narrow) %v781_v44, 8  ;;  %v854_v44 = vrot.slane %v849_v41, 4  ;;  %v479_v58 = vperm.slane %v471_v51, %v14986_v8 }
 0x1a0   : > { %4282 = vxpose.xlu1.b32.start.end [1/1] (short) (narrow) %v15316_v2, 8  ;;  %v857_v4 = vsel %vm314_vm0, %v849_v41, %v856_v29  ;;  %v901_v41 = vperm.slane %v15081_v34, %v14986_v8 }
 0x1a1   : > { %v855_v63 = vsel %vm314_vm0, %v854_v44, %v839_v6  ;;  %v15378_v43 = vperm.slane %v857_v4, %v14989_v14 }
 0x1a2   : > { %v861_v44 = vperm.slane %v855_v63, %v14989_v14 }
 0x1a3   : > { %19569 = vst [vmem:[#allocation33_spill] sm:$0xff] %v15378_v43 }
 0x1a4   : > { %2810 = vxpose.xlu2.b32.start.end [1/1] (short) (narrow) %v501_v24, 8  ;;  %v15338_v31 = vpop.trf.xlu1  ;;  %v831_v24 = vsel %vm314_vm0, 0.0, %v830_v5  ;;  %v853_v5 = vperm.slane %v845_v48, %v14986_v8  ;;  %v878_v51 = vrot.slane %v861_v44, 4 }
 0x1a5   : > { %19565 = vst [vmem:[#allocation29_spill] sm:$0xff] %v15338_v31  ;;  %v15340_v28 = vpop.trf.xlu2  ;;  %v15350_v31 = vpop.trf.xlu0 }
 0x1a6   : > { %19566 = vst [vmem:[#allocation30_spill] sm:$0xff] %v15350_v31  ;;  %v879_v48 = vsel %vm314_vm0, 0.0, %v878_v51 }
 0x1a7   : > { %4346 = vxpose.xlu0.b32.start.end [1/1] (short) (narrow) %v813_v59, 8  ;;  %v15359_v59 = vperm.slane %v817_v27, %v14989_v14 }
 0x1a8   : > { %4378 = vxpose.xlu1.b32.start.end [1/1] (short) (narrow) %v829_v49, 8 }
 0x1ac   : > { %2842 = vxpose.xlu2.b32.start.end [1/1] (short) (narrow) %v517_v13, 8  ;;  %v15362_v49 = vpop.trf.xlu1  ;;  %v503_v13 = vsel %vm314_vm0, %v502_v19, %v479_v58 }
 0x1ad   : > { %19567 = vst [vmem:[#allocation31_spill] sm:$0xff] %v15362_v49  ;;  %v2154_v10 = vpop.trf.xlu2  ;;  %v15370_v27 = vpop.trf.xlu0  ;;  %v835_v49 = vsel %vm314_vm0, 0.0, %v834_v9  ;;  %v509_v6 = vperm.slane %v503_v13, %v14989_v14  ;;  %v880_v13 = vrot.slane %v15378_v43, 4 }
 0x1ae   : > { %19568 = vst [vmem:[#allocation32_spill] sm:$0xff] %v15370_v27  ;;  %v843_v63 = vperm.slane %v835_v49, %v14986_v8  ;;  %v10176_v27 = vrot.slane %v15301_v57, 4  ;;  %v10170_v49 = vrot.slane %v15263_v47, 4 }
 0x1af   : > { %4442 = vxpose.xlu0.b32.start.end [1/1] (short) (narrow) %v831_v24, 8  ;;  %v866_v24 = vrot.slane %v853_v5, 4  ;;  %v518_v29 = vrot.slane %v509_v6, 4 }
 0x1b0   : > { %4474 = vxpose.xlu1.b32.start.end [1/1] (short) (narrow) %v15359_v59, 8  ;;  %v868_v9 = vrot.slane %v843_v63, 4  ;;  %v10177_v57 = vsel %vm314_vm0, %v10176_v27, %v15282_v22  ;;  %v881_v22 = vsel %vm314_vm0, 0.0, %v880_v13 }
 0x1b1   : > { %v519_v47 = vsel %vm314_vm0, 0.0, %v518_v29  ;;  %v10181_v43 = vperm.slane %v10177_v57, %v14986_v8 }
 0x1b2   : > { %v869_v35 = vsel %vm314_vm0, %v853_v5, %v868_v9 }
 0x1b3   : > { %v877_v5 = vperm.slane %v869_v35, %v14989_v14  ;;  %v10194_v13 = vrot.slane %v10181_v43, 4 }
 0x1b4   : > { %2874 = vxpose.xlu2.b32.start.end [1/1] (short) (narrow) %v509_v6, 8  ;;  %v15380_v19 = vpop.trf.xlu1  ;;  %v906_v6 = vrot.slane %v901_v41, 4 }
 0x1b5   : > { %19570 = vst [vmem:[#allocation34_spill] sm:$0xff] %v15380_v19  ;;  %v2218_v31 = vpop.trf.xlu2  ;;  %v15388_v4 = vpop.trf.xlu0  ;;  %v10182_v19 = vrot.slane %v15340_v28, 4 }
 0x1b6   : > { %v10188_v37 = vrot.slane %v2218_v31, 4  ;;  %19571 = vst [vmem:[#allocation35_spill] sm:$0xff] %v15388_v4  ;;  %v867_v31 = vsel %vm314_vm0, %v866_v24, %v843_v63  ;;  %v886_v24 = vrot.slane %v15124_v25, 4 }
 0x1b7   : > { %4538 = vxpose.xlu0.b32.start.end [1/1] (short) (narrow) %v861_v44, 8  ;;  %v896_v44 = vrot.slane %v15081_v34, 4  ;;  %v15402_v28 = vperm.slane %v867_v31, %v14989_v14  ;;  %v10171_v34 = vsel %vm314_vm0, %v10170_v49, %v15241_v50 }
 0x1b8   : > { %4570 = vxpose.xlu1.b32.start.end [1/1] (short) (narrow) %v879_v48, 8  ;;  %v10189_v51 = vsel %vm314_vm0, %v10188_v37, %v2154_v10  ;;  %v504_v48 = vrot.slane %v479_v58, 4  ;;  %v891_v10 = vperm.slane %v15124_v25, %v14986_v8  ;;  %v10183_v58 = vsel %vm314_vm0, %v10182_v19, %v15321_v21 }
 0x1b9   : > { %v10193_v4 = vperm.slane %v10189_v51, %v14986_v8  ;;  %v897_v63 = vsel %vm314_vm0, 0.0, %v896_v44  ;;  %v10175_v29 = vperm.slane %v10171_v34, %v14986_v8  ;;  %v10187_v50 = vperm.slane %v10183_v58, %v14986_v8 }
 0x1ba   : > { %v505_v9 = vsel %vm314_vm0, %v15347_v7, %v504_v48  ;;  %v884_v19 = vrot.slane %v877_v5, 4  ;;  %v907_v35 = vsel %vm314_vm0, %v906_v6, %v891_v10  ;;  %v905_v57 = vperm.slane %v897_v63, %v14986_v8 }
 0x1bb   : > { %v10200_v49 = vrot.slane %v10193_v4, 4  ;;  %v513_v25 = vperm.slane %v505_v9, %v14989_v14  ;;  %v887_v51 = vsel %vm314_vm0, 0.0, %v886_v24  ;;  %v10195_v7 = vsel %vm314_vm0, %v10194_v13, %v10175_v29 }
 0x1bc   : > { %2906 = vxpose.xlu2.b32.start.end [1/1] (short) (narrow) %v519_v47, 8  ;;  %v15404_v37 = vpop.trf.xlu1  ;;  %v15431_v4 = vperm.slane %v907_v35, %v14989_v14  ;;  %v908_v44 = vrot.slane %v891_v10, 4  ;;  %v885_v6 = vsel %vm314_vm0, 0.0, %v884_v19  ;;  %v918_v48 = vrot.slane %v905_v57, 4 }
 0x1bd   : > { %v15412_v27 = vpop.trf.xlu2  ;;  %v15422_v21 = vpop.trf.xlu0  ;;  %v10201_v43 = vsel %vm314_vm0, %v10200_v49, %v10187_v50  ;;  %v10199_v34 = vperm.slane %v10195_v7, %v14989_v14  ;;  %v520_v63 = vrot.slane %v513_v25, 4  ;;  %v542_v13 = vrot.slane %v15057_v11, 4 }
 0x1be   : > { %19572 = vst [vmem:[#allocation36_spill] sm:$0xff] %v15412_v27  ;;  %v10205_v58 = vperm.slane %v10201_v43, %v14989_v14  ;;  %v930_v24 = vrot.slane %v15431_v4, 4  ;;  %v909_v10 = vsel %vm314_vm0, %v901_v41, %v908_v44 }
 0x1bf   : > { %4634 = vxpose.xlu0.b32.start.end [1/1] (short) (narrow) %v881_v22, 8  ;;  %v895_v22 = vperm.slane %v887_v51, %v14986_v8  ;;  %v10208_v50 = vrot.slane %v10199_v34, 4  ;;  %v521_v19 = vsel %vm314_vm0, 0.0, %v520_v63  ;;  %v15449_v35 = vperm.slane %v909_v10, %v14989_v14 }
 0x1c0   : > { %4666 = vxpose.xlu1.b32.start.end [1/1] (short) (narrow) %v15402_v28, 8  ;;  %v10206_v49 = vrot.slane %v10205_v58, 4  ;;  %v543_v11 = vsel %vm314_vm0, %v542_v13, %v15047_v3  ;;  %v943_v10 = vperm.slane %v15138_v45, %v14986_v8 }
 0x1c1   : > { %v919_v29 = vsel %vm314_vm0, %v918_v48, %v895_v22  ;;  %v920_v51 = vrot.slane %v895_v22, 4  ;;  %v15458_v43 = vsel %vm314_vm0, %v10205_v58, %v10208_v50  ;;  %v953_v22 = vperm.slane %v15100_v56, %v14986_v8 }
 0x1c2   : > { %v925_v41 = vperm.slane %v919_v29, %v14989_v14  ;;  %19573 = vst [vmem:[#allocation37_spill] sm:$0xff] %v15458_v43  ;;  %v15463_v44 = vsel %vm314_vm0, %v10206_v49, %v10199_v34  ;;  %v15470_v48 = vperm.slane %v15458_v43, %v14986_v8  ;;  %v549_v3 = vperm.slane %v543_v11, %v14989_v14 }
 0x1c3   : > { %19574 = vst [vmem:[#allocation38_spill] sm:$0xff] %v15463_v44  ;;  %v921_v63 = vsel %vm314_vm0, %v905_v57, %v920_v51  ;;  %v15479_v34 = vperm.slane %v15463_v44, %v14986_v8  ;;  %v958_v57 = vrot.slane %v953_v22, 4  ;;  %v960_v51 = vrot.slane %v943_v10, 4 }
 0x1c4   : > { %2938 = vxpose.xlu2.b32.start.end [1/1] (short) (narrow) %v513_v25, 8  ;;  %v15433_v31 = vpop.trf.xlu1  ;;  %19575 = vst [vmem:[#allocation39_spill] sm:$0xff] %v15470_v48  ;;  %v934_v58 = vrot.slane %v925_v41, 4  ;;  %v15484_v29 = vperm.slane %v921_v63, %v14989_v14  ;;  %v11470_v50 = vrot.slane %v15470_v48, 4  ;;  %v566_v63 = vrot.slane %v549_v3, 4 }
 0x1c5   : > { %v15435_v47 = vpop.trf.xlu2  ;;  %v15442_v9 = vpop.trf.xlu0  ;;  %19576 = vst [vmem:[#allocation40_spill] sm:$0xff] %v15479_v34 }
 0x1c6   : > { %v15496_v11 = vsel %vm314_vm0, %v11470_v50, %v15479_v34  ;;  %v936_v44 = vrot.slane %v15484_v29, 4  ;;  %v567_v27 = vsel %vm314_vm0, 0.0, %v566_v63 }
 0x1c7   : > { %4730 = vxpose.xlu0.b32.start.end [1/1] (short) (narrow) %v877_v5, 8  ;;  %v931_v5 = vsel %vm314_vm0, 0.0, %v930_v24  ;;  %v948_v24 = vrot.slane %v15100_v56, 4  ;;  %v935_v56 = vsel %vm314_vm0, 0.0, %v934_v58  ;;  %19577 = vst [vmem:[#allocation41_spill] sm:$0xff] %v15496_v11  ;;  %v959_v58 = vsel %vm314_vm0, %v958_v57, %v943_v10 }
 0x1c8   : > { %4762 = vxpose.xlu1.b32.start.end [1/1] (short) (narrow) %v885_v6, 8  ;;  %v937_v50 = vsel %vm314_vm0, 0.0, %v936_v44  ;;  %v1005_v57 = vperm.slane %v15119_v53, %v14986_v8 }
 0x1cc   : > { %2970 = vxpose.xlu2.b32.start.end [1/1] (short) (narrow) %v521_v19, 8  ;;  %v15452_v25 = vpop.trf.xlu1  ;;  %v949_v19 = vsel %vm314_vm0, 0.0, %v948_v24 }
 0x1cd   : > { %v15454_v7 = vpop.trf.xlu2  ;;  %v15466_v6 = vpop.trf.xlu0  ;;  %v957_v43 = vperm.slane %v949_v19, %v14986_v8 }
 0x1cf   : > { %4826 = vxpose.xlu0.b32.start.end [1/1] (short) (narrow) %v931_v5, 8  ;;  %v938_v5 = vrot.slane %v15138_v45, 4  ;;  %v961_v45 = vsel %vm314_vm0, %v953_v22, %v960_v51 }
 0x1d0   : > { %4858 = vxpose.xlu1.b32.start.end [1/1] (short) (narrow) %v15449_v35, 8  ;;  %v969_v10 = vperm.slane %v961_v45, %v14989_v14  ;;  %v1010_v45 = vrot.slane %v1005_v57, 4 }
 0x1d1   : > { %v939_v24 = vsel %vm314_vm0, 0.0, %v938_v5 }
 0x1d2   : > { %v947_v11 = vperm.slane %v939_v24, %v14986_v8 }
 0x1d4   : > { %3002 = vxpose.xlu2.b32.start.end [1/1] (short) (narrow) %v549_v3, 8  ;;  %v15486_v13 = vpop.trf.xlu1  ;;  %v972_v63 = vrot.slane %v947_v11, 4 }
 0x1d5   : > { %v15489_v49 = vpop.trf.xlu2  ;;  %v15499_v48 = vpop.trf.xlu0 }
 0x1d7   : > { %4922 = vxpose.xlu0.b32.start.end [1/1] (short) (narrow) %v925_v41, 8  ;;  %v15508_v41 = vperm.slane %v959_v58, %v14989_v14 }
 0x1d8   : > { %4954 = vxpose.xlu1.b32.start.end [1/1] (short) (narrow) %v935_v56, 8  ;;  %v970_v56 = vrot.slane %v957_v43, 4 }
 0x1da   : > { %v971_v44 = vsel %vm314_vm0, %v970_v56, %v947_v11  ;;  %v570_v56 = vrot.slane %v15098_v55, 4  ;;  %v1000_v11 = vrot.slane %v15119_v53, 4 }
 0x1db   : > { %v15524_v5 = vperm.slane %v971_v44, %v14989_v14  ;;  %v973_v44 = vsel %vm314_vm0, %v957_v43, %v972_v63 }
 0x1dc   : > { %3034 = vxpose.xlu2.b32.start.end [1/1] (short) (narrow) %v567_v27, 8  ;;  %v15510_v3 = vpop.trf.xlu1  ;;  %v984_v27 = vrot.slane %v969_v10, 4  ;;  %v1001_v53 = vsel %vm314_vm0, 0.0, %v1000_v11 }
 0x1dd   : > { %19578 = vst [vmem:[#allocation42_spill] sm:$0xff] %v15510_v3  ;;  %v15513_v19 = vpop.trf.xlu2  ;;  %v15517_v22 = vpop.trf.xlu0 }
 0x1de   : > { %19579 = vst [vmem:[#allocation43_spill] sm:$0xff] %v15513_v19  ;;  %v985_v24 = vsel %vm314_vm0, 0.0, %v984_v27  ;;  %v571_v27 = vsel %vm314_vm0, 0.0, %v570_v56  ;;  %v15542_v19 = vperm.slane %v973_v44, %v14989_v14 }
 0x1df   : > { %5018 = vxpose.xlu0.b32.start.end [1/1] (short) (narrow) %v937_v50, 8  ;;  %v995_v50 = vperm.slane %v15156_v1, %v14986_v8 }
 0x1e0   : > { %5050 = vxpose.xlu1.b32.start.end [1/1] (short) (narrow) %v15508_v41, 8 }
 0x1e4   : > { %3066 = vxpose.xlu2.b32.start.end [1/1] (short) (narrow) %v15079_v33, 8  ;;  %v15526_v51 = vpop.trf.xlu1  ;;  %v986_v33 = vrot.slane %v15524_v5, 4 }
 0x1e5   : > { %19580 = vst [vmem:[#allocation44_spill] sm:$0xff] %v15526_v51  ;;  %v15528_v58 = vpop.trf.xlu2  ;;  %v15535_v3 = vpop.trf.xlu0  ;;  %v1011_v51 = vsel %vm314_vm0, %v1010_v45, %v995_v50  ;;  %v1009_v45 = vperm.slane %v1001_v53, %v14986_v8 }
 0x1e6   : > { %19581 = vst [vmem:[#allocation45_spill] sm:$0xff] %v15528_v58  ;;  %v1012_v58 = vrot.slane %v995_v50, 4  ;;  %v1017_v43 = vperm.slane %v1011_v51, %v14989_v14 }
 0x1e7   : > { %5114 = vxpose.xlu0.b32.start.end [1/1] (short) (narrow) %v969_v10, 8  ;;  %v987_v10 = vsel %vm314_vm0, 0.0, %v986_v33  ;;  %v1022_v11 = vrot.slane %v1009_v45, 4 }
 0x1e8   : > { %5146 = vxpose.xlu1.b32.start.end [1/1] (short) (narrow) %v985_v24, 8  ;;  %v990_v24 = vrot.slane %v15156_v1, 4  ;;  %v1034_v33 = vrot.slane %v1017_v43, 4  ;;  %v1013_v44 = vsel %vm314_vm0, %v1005_v57, %v1012_v58 }
 0x1e9   : > { %v15561_v51 = vperm.slane %v1013_v44, %v14989_v14 }
 0x1ea   : > { %v991_v56 = vsel %vm314_vm0, 0.0, %v990_v24  ;;  %v620_v24 = vrot.slane %v15130_v32, 4 }
 0x1eb   : > { %v999_v1 = vperm.slane %v991_v56, %v14986_v8  ;;  %v1036_v57 = vrot.slane %v15561_v51, 4  ;;  %v1057_v56 = vperm.slane %v15133_v36, %v14986_v8 }
 0x1ec   : > { %3162 = vxpose.xlu2.b32.start.end [1/1] (short) (narrow) %v571_v27, 8  ;;  %v15545_v55 = vpop.trf.xlu1  ;;  %v621_v44 = vsel %vm314_vm0, 0.0, %v620_v24 }
 0x1ed   : > { %19582 = vst [vmem:[#allocation46_spill] sm:$0xff] %v15545_v55  ;;  %v15548_v34 = vpop.trf.xlu2  ;;  %v15553_v63 = vpop.trf.xlu0  ;;  %v1024_v53 = vrot.slane %v999_v1, 4 }
 0x1ee   : > { %19583 = vst [vmem:[#allocation47_spill] sm:$0xff] %v15553_v63 }
 0x1ef   : > { %5210 = vxpose.xlu0.b32.start.end [1/1] (short) (narrow) %v987_v10, 8  ;;  %v1035_v10 = vsel %vm314_vm0, 0.0, %v1034_v33  ;;  %v1025_v32 = vsel %vm314_vm0, %v1009_v45, %v1024_v53  ;;  %v1042_v45 = vrot.slane %v15173_v26, 4 }
 0x1f0   : > { %5242 = vxpose.xlu1.b32.start.end [1/1] (short) (narrow) %v15542_v19, 8 }
 0x1f4   : > { %3258 = vxpose.xlu2.b32.start.end [1/1] (short) (narrow) %v15117_v15, 8  ;;  %v15563_v50 = vpop.trf.xlu1  ;;  %v1023_v15 = vsel %vm314_vm0, %v1022_v11, %v999_v1  ;;  %v1062_v1 = vrot.slane %v1057_v56, 4  ;;  %v1033_v11 = vperm.slane %v1025_v32, %v14989_v14 }
 0x1f5   : > { %19584 = vst [vmem:[#allocation48_spill] sm:$0xff] %v15563_v50  ;;  %v15565_v27 = vpop.trf.xlu2  ;;  %v15570_v58 = vpop.trf.xlu0  ;;  %v1037_v50 = vsel %vm314_vm0, 0.0, %v1036_v57 }
 0x1f6   : > { %19585 = vst [vmem:[#allocation49_spill] sm:$0xff] %v15570_v58  ;;  %v1040_v53 = vrot.slane %v1033_v11, 4  ;;  %v670_v58 = vrot.slane %v15165_v16, 4 }
 0x1f7   : > { %5306 = vxpose.xlu0.b32.start.end [1/1] (short) (narrow) %v1017_v43, 8  ;;  %v15578_v43 = vperm.slane %v1023_v15, %v14989_v14  ;;  %v1047_v15 = vperm.slane %v15173_v26, %v14986_v8 }
 0x1f8   : > { %5338 = vxpose.xlu1.b32.start.end [1/1] (short) (narrow) %v1035_v10, 8  ;;  %v1052_v10 = vrot.slane %v15133_v36, 4  ;;  %v1041_v26 = vsel %vm314_vm0, 0.0, %v1040_v53 }
 0x1f9   : > { %v1063_v36 = vsel %vm314_vm0, %v1062_v1, %v1047_v15 }
 0x1fa   : > { %v1053_v57 = vsel %vm314_vm0, 0.0, %v1052_v10  ;;  %v1043_v10 = vsel %vm314_vm0, 0.0, %v1042_v45 }
 0x1fc   : > { %3354 = vxpose.xlu2.b32.start.end [1/1] (short) (narrow) %v621_v44, 8  ;;  %v15581_v33 = vpop.trf.xlu1  ;;  %v1061_v44 = vperm.slane %v1053_v57, %v14986_v8 }
 0x1fd   : > { %19586 = vst [vmem:[#allocation50_spill] sm:$0xff] %v15581_v33  ;;  %v15584_v55 = vpop.trf.xlu2  ;;  %v15588_v24 = vpop.trf.xlu0  ;;  %v15602_v33 = vperm.slane %v1063_v36, %v14989_v14 }
 0x1fe   : > { %19587 = vst [vmem:[#allocation51_spill] sm:$0xff] %v15584_v55  ;;  %v1074_v1 = vrot.slane %v1061_v44, 4  ;;  %v671_v55 = vsel %vm314_vm0, 0.0, %v670_v58 }
 0x1ff   : > { %5402 = vxpose.xlu0.b32.start.end [1/1] (short) (narrow) %v1037_v50, 8  ;;  %19588 = vst [vmem:[#allocation52_spill] sm:$0xff] %v15588_v24  ;;  %v1064_v24 = vrot.slane %v1047_v15, 4 }
 0x200   : > { %5434 = vxpose.xlu1.b32.start.end [1/1] (short) (narrow) %v15578_v43, 8 }
 0x201   : > { %v1065_v36 = vsel %vm314_vm0, %v1057_v56, %v1064_v24 }
 0x202   : > { %v15619_v16 = vperm.slane %v1065_v36, %v14989_v14  ;;  %v1099_v36 = vperm.slane %v15192_v52, %v14986_v8 }
 0x204   : > { %3450 = vxpose.xlu2.b32.start.end [1/1] (short) (narrow) %v15148_v39, 8  ;;  %v15597_v50 = vpop.trf.xlu1  ;;  %v1051_v39 = vperm.slane %v1043_v10, %v14986_v8 }
 0x205   : > { %19589 = vst [vmem:[#allocation53_spill] sm:$0xff] %v15597_v50  ;;  %v15599_v32 = vpop.trf.xlu2  ;;  %v15607_v57 = vpop.trf.xlu0  ;;  %v1086_v50 = vrot.slane %v15602_v33, 4 }
 0x206   : > { %19590 = vst [vmem:[#allocation54_spill] sm:$0xff] %v15607_v57  ;;  %v1075_v15 = vsel %vm314_vm0, %v1074_v1, %v1051_v39  ;;  %v1104_v1 = vrot.slane %v15150_v54, 4 }
 0x207   : > { %5498 = vxpose.xlu0.b32.start.end [1/1] (short) (narrow) %v1033_v11, 8  ;;  %v1087_v53 = vsel %vm314_vm0, 0.0, %v1086_v50  ;;  %v1081_v10 = vperm.slane %v1075_v15, %v14989_v14 }
 0x208   : > { %5530 = vxpose.xlu1.b32.start.end [1/1] (short) (narrow) %v1041_v26, 8  ;;  %v1076_v26 = vrot.slane %v1051_v39, 4 }
 0x209   : > { %v1090_v56 = vrot.slane %v1081_v10, 4 }
 0x20a   : > { %v1077_v24 = vsel %vm314_vm0, %v1061_v44, %v1076_v26  ;;  %v676_v44 = vrot.slane %v15200_v46, 4  ;;  %v1116_v26 = vrot.slane %v1099_v36, 4 }
 0x20b   : > { %v15638_v15 = vperm.slane %v1077_v24, %v14989_v14 }
 0x20c   : > { %3546 = vxpose.xlu2.b32.start.end [1/1] (short) (narrow) %v671_v55, 8  ;;  %v15614_v11 = vpop.trf.xlu1  ;;  %v1109_v55 = vperm.slane %v15150_v54, %v14986_v8  ;;  %v1105_v54 = vsel %vm314_vm0, 0.0, %v1104_v1  ;;  %v677_v24 = vsel %vm314_vm0, 0.0, %v676_v44 }
 0x20d   : > { %19591 = vst [vmem:[#allocation55_spill] sm:$0xff] %v15614_v11  ;;  %v15616_v45 = vpop.trf.xlu2  ;;  %v15624_v58 = vpop.trf.xlu0  ;;  %v1091_v11 = vsel %vm314_vm0, 0.0, %v1090_v56  ;;  %v1113_v57 = vperm.slane %v1105_v54, %v14986_v8 }
 0x20e   : > { %19592 = vst [vmem:[#allocation56_spill] sm:$0xff] %v15616_v45  ;;  %v1117_v56 = vsel %vm314_vm0, %v1109_v55, %v1116_v26  ;;  %v1161_v26 = vperm.slane %v15167_v17, %v14986_v8 }
 0x20f   : > { %5594 = vxpose.xlu0.b32.start.end [1/1] (short) (narrow) %v1087_v53, 8  ;;  %19593 = vst [vmem:[#allocation57_spill] sm:$0xff] %v15624_v58  ;;  %v1114_v53 = vrot.slane %v1109_v55, 4  ;;  %v1126_v45 = vrot.slane %v1113_v57, 4  ;;  %v1125_v44 = vperm.slane %v1117_v56, %v14989_v14  ;;  %v726_v56 = vrot.slane %v15235_v42, 4 }
 0x210   : > { %5626 = vxpose.xlu1.b32.start.end [1/1] (short) (narrow) %v15619_v16, 8  ;;  %v1146_v42 = vrot.slane %v15211_v60, 4 }
 0x214   : > { %3642 = vxpose.xlu2.b32.start.end [1/1] (short) (narrow) %v15181_v38, 8  ;;  %v15633_v50 = vpop.trf.xlu1  ;;  %v1094_v38 = vrot.slane %v15192_v52, 4 }
 0x215   : > { %19594 = vst [vmem:[#allocation58_spill] sm:$0xff] %v15633_v50  ;;  %v15635_v39 = vpop.trf.xlu2  ;;  %v15643_v58 = vpop.trf.xlu0  ;;  %v1092_v50 = vrot.slane %v15638_v15, 4 }
 0x216   : > { %19595 = vst [vmem:[#allocation59_spill] sm:$0xff] %v15635_v39 }
 0x217   : > { %5690 = vxpose.xlu0.b32.start.end [1/1] (short) (narrow) %v1081_v10, 8  ;;  %19596 = vst [vmem:[#allocation60_spill] sm:$0xff] %v15643_v58  ;;  %v1115_v10 = vsel %vm314_vm0, %v1114_v53, %v1099_v36  ;;  %v1093_v58 = vsel %vm314_vm0, 0.0, %v1092_v50  ;;  %v1140_v53 = vrot.slane %v1125_v44, 4 }
 0x218   : > { %5722 = vxpose.xlu1.b32.start.end [1/1] (short) (narrow) %v1091_v11, 8  ;;  %v1095_v11 = vsel %vm314_vm0, 0.0, %v1094_v38  ;;  %v15658_v52 = vperm.slane %v1115_v10, %v14989_v14 }
 0x219   : > { %v1103_v55 = vperm.slane %v1095_v11, %v14986_v8  ;;  %v1141_v10 = vsel %vm314_vm0, 0.0, %v1140_v53  ;;  %v1166_v11 = vrot.slane %v1161_v26, 4 }
 0x21b   : > { %v1127_v54 = vsel %vm314_vm0, %v1126_v45, %v1103_v55 }
 0x21c   : > { %3738 = vxpose.xlu2.b32.start.end [1/1] (short) (narrow) %v677_v24, 8  ;;  %v15651_v46 = vpop.trf.xlu1  ;;  %v1128_v24 = vrot.slane %v1103_v55, 4  ;;  %v1156_v55 = vrot.slane %v15167_v17, 4 }
 0x21d   : > { %19597 = vst [vmem:[#allocation61_spill] sm:$0xff] %v15651_v46  ;;  %v15653_v1 = vpop.trf.xlu2  ;;  %v15662_v36 = vpop.trf.xlu0  ;;  %v727_v46 = vsel %vm314_vm0, 0.0, %v726_v56 }
 0x21e   : > { %19598 = vst [vmem:[#allocation62_spill] sm:$0xff] %v15653_v1  ;;  %v1157_v17 = vsel %vm314_vm0, 0.0, %v1156_v55 }
 0x21f   : > { %5786 = vxpose.xlu0.b32.start.end [1/1] (short) (narrow) %v1093_v58, 8  ;;  %19599 = vst [vmem:[#allocation63_spill] sm:$0xff] %v15662_v36  ;;  %v15674_v58 = vperm.slane %v1127_v54, %v14989_v14  ;;  %v1129_v54 = vsel %vm314_vm0, %v1113_v57, %v1128_v24  ;;  %v1147_v24 = vsel %vm314_vm0, 0.0, %v1146_v42  ;;  %v776_v42 = vrot.slane %v15277_v12, 4 }
 0x220   : > { %5818 = vxpose.xlu1.b32.start.end [1/1] (short) (narrow) %v15658_v52, 8  ;;  %v1208_v12 = vrot.slane %v15183_v40, 4 }
 0x224   : > { %3834 = vxpose.xlu2.b32.start.end [1/1] (short) (narrow) %v15219_v30, 8  ;;  %v15669_v50 = vpop.trf.xlu1  ;;  %v1151_v30 = vperm.slane %v15211_v60, %v14986_v8  ;;  %v1165_v60 = vperm.slane %v1157_v17, %v14986_v8 }
 0x225   : > { %19600 = vst [vmem:[#allocation64_spill] sm:$0xff] %v15669_v50  ;;  %v15671_v38 = vpop.trf.xlu2  ;;  %v15678_v45 = vpop.trf.xlu0  ;;  %v1142_v50 = vrot.slane %v15674_v58, 4 }
 0x226   : > { %19601 = vst [vmem:[#allocation65_spill] sm:$0xff] %v15678_v45  ;;  %v15693_v45 = vperm.slane %v1129_v54, %v14989_v14  ;;  %v1168_v39 = vrot.slane %v1151_v30, 4  ;;  %v1155_v54 = vperm.slane %v1147_v24, %v14986_v8  ;;  %v1178_v55 = vrot.slane %v1165_v60, 4 }
 0x227   : > { %5882 = vxpose.xlu0.b32.start.end [1/1] (short) (narrow) %v1125_v44, 8  ;;  %v1167_v44 = vsel %vm314_vm0, %v1166_v11, %v1151_v30  ;;  %v1143_v36 = vsel %vm314_vm0, 0.0, %v1142_v50  ;;  %v777_v24 = vsel %vm314_vm0, 0.0, %v776_v42 }
 0x228   : > { %5914 = vxpose.xlu1.b32.start.end [1/1] (short) (narrow) %v1141_v10, 8  ;;  %v1173_v57 = vperm.slane %v1167_v44, %v14989_v14  ;;  %v1169_v11 = vsel %vm314_vm0, %v1161_v26, %v1168_v39  ;;  %v1180_v17 = vrot.slane %v1155_v54, 4 }
 0x229   : > { %v15711_v30 = vperm.slane %v1169_v11, %v14989_v14  ;;  %v1179_v11 = vsel %vm314_vm0, %v1178_v55, %v1155_v54  ;;  %v1198_v55 = vrot.slane %v15225_v20, 4 }
 0x22a   : > { %v1190_v56 = vrot.slane %v1173_v57, 4 }
 0x22b   : > { %v1192_v26 = vrot.slane %v15711_v30, 4 }
 0x22c   : > { %3930 = vxpose.xlu2.b32.start.end [1/1] (short) (narrow) %v727_v46, 8  ;;  %v15687_v53 = vpop.trf.xlu1  ;;  %v1191_v44 = vsel %vm314_vm0, 0.0, %v1190_v56 }
 0x22d   : > { %19602 = vst [vmem:[#allocation66_spill] sm:$0xff] %v15687_v53  ;;  %v15690_v10 = vpop.trf.xlu2  ;;  %v15699_v46 = vpop.trf.xlu0  ;;  %v15730_v53 = vperm.slane %v1179_v11, %v14989_v14 }
 0x22e   : > { %19603 = vst [vmem:[#allocation67_spill] sm:$0xff] %v15690_v10 }
 0x22f   : > { %5978 = vxpose.xlu0.b32.start.end [1/1] (short) (narrow) %v1143_v36, 8  ;;  %19604 = vst [vmem:[#allocation68_spill] sm:$0xff] %v15699_v46 }
 0x230   : > { %6010 = vxpose.xlu1.b32.start.end [1/1] (short) (narrow) %v15693_v45, 8 }
 0x234   : > { %4026 = vxpose.xlu2.b32.start.end [1/1] (short) (narrow) %v15255_v23, 8  ;;  %v15706_v36 = vpop.trf.xlu1  ;;  %v1213_v23 = vperm.slane %v15183_v40, %v14986_v8  ;;  %v1203_v40 = vperm.slane %v15225_v20, %v14986_v8  ;;  %v826_v20 = vrot.slane %v15316_v2, 4 }
 0x235   : > { %v15708_v50 = vpop.trf.xlu2  ;;  %v15715_v39 = vpop.trf.xlu0 }
 0x236   : > { %19605 = vst [vmem:[#allocation69_spill] sm:$0xff] %v15708_v50  ;;  %v827_v50 = vsel %vm314_vm0, 0.0, %v826_v20 }
 0x237   : > { %6074 = vxpose.xlu0.b32.start.end [1/1] (short) (narrow) %v1173_v57, 8  ;;  %19606 = vst [vmem:[#allocation70_spill] sm:$0xff] %v15715_v39  ;;  %v1181_v57 = vsel %vm314_vm0, %v1165_v60, %v1180_v17  ;;  %v1218_v39 = vrot.slane %v1213_v23, 4  ;;  %v1209_v60 = vsel %vm314_vm0, 0.0, %v1208_v12  ;;  %v1199_v12 = vsel %vm314_vm0, 0.0, %v1198_v55 }
 0x238   : > { %6106 = vxpose.xlu1.b32.start.end [1/1] (short) (narrow) %v1191_v44, 8  ;;  %v1193_v44 = vsel %vm314_vm0, 0.0, %v1192_v26  ;;  %v1189_v42 = vperm.slane %v1181_v57, %v14989_v14 }
 0x239   : > { %v1219_v26 = vsel %vm314_vm0, %v1218_v39, %v1203_v40 }
 0x23a   : > { %v1196_v17 = vrot.slane %v1189_v42, 4 }
 0x23c   : > { %4122 = vxpose.xlu2.b32.start.end [1/1] (short) (narrow) %v777_v24, 8  ;;  %v15723_v46 = vpop.trf.xlu1  ;;  %v1217_v24 = vperm.slane %v1209_v60, %v14986_v8  ;;  %v1197_v10 = vsel %vm314_vm0, 0.0, %v1196_v17 }
 0x23d   : > { %v15726_v56 = vpop.trf.xlu2  ;;  %v15734_v54 = vpop.trf.xlu0 }
 0x23e   : > { %19607 = vst [vmem:[#allocation71_spill] sm:$0xff] %v15726_v56  ;;  %v1230_v39 = vrot.slane %v1217_v24, 4 }
 0x23f   : > { %6170 = vxpose.xlu0.b32.start.end [1/1] (short) (narrow) %v1193_v44, 8  ;;  %19608 = vst [vmem:[#allocation72_spill] sm:$0xff] %v15734_v54  ;;  %v15748_v44 = vperm.slane %v1219_v26, %v14989_v14  ;;  %v1220_v54 = vrot.slane %v1203_v40, 4 }
 0x240   : > { %6202 = vxpose.xlu1.b32.start.end [1/1] (short) (narrow) %v15730_v53, 8 }
 0x241   : > { %v1221_v26 = vsel %vm314_vm0, %v1213_v23, %v1220_v54 }
 0x242   : > { %v15765_v2 = vperm.slane %v1221_v26, %v14989_v14  ;;  %v1255_v26 = vperm.slane %v15248_v18, %v14986_v8 }
 0x244   : > { %4218 = vxpose.xlu2.b32.start.end [1/1] (short) (narrow) %v15297_v61, 8  ;;  %v15743_v11 = vpop.trf.xlu1  ;;  %v1207_v61 = vperm.slane %v1199_v12, %v14986_v8 }
 0x245   : > { %19609 = vst [vmem:[#allocation73_spill] sm:$0xff] %v15743_v11  ;;  %v15745_v57 = vpop.trf.xlu2  ;;  %v15753_v60 = vpop.trf.xlu0  ;;  %v1242_v11 = vrot.slane %v15748_v44, 4 }
 0x246   : > { %19610 = vst [vmem:[#allocation74_spill] sm:$0xff] %v15745_v57  ;;  %v1231_v40 = vsel %vm314_vm0, %v1230_v39, %v1207_v61  ;;  %v1232_v17 = vrot.slane %v1207_v61, 4  ;;  %v1260_v39 = vrot.slane %v15203_v0, 4 }
 0x247   : > { %6266 = vxpose.xlu0.b32.start.end [1/1] (short) (narrow) %v1189_v42, 8  ;;  %v1237_v12 = vperm.slane %v1231_v40, %v14989_v14 }
 0x248   : > { %6298 = vxpose.xlu1.b32.start.end [1/1] (short) (narrow) %v1197_v10, 8  ;;  %v1243_v10 = vsel %vm314_vm0, 0.0, %v1242_v11  ;;  %v1233_v54 = vsel %vm314_vm0, %v1217_v24, %v1232_v17  ;;  %v832_v24 = vrot.slane %v15359_v59, 4  ;;  %v1272_v17 = vrot.slane %v1255_v26, 4 }
 0x249   : > { %v1246_v23 = vrot.slane %v1237_v12, 4  ;;  %v15784_v40 = vperm.slane %v1233_v54, %v14989_v14 }
 0x24a   : > { %v833_v54 = vsel %vm314_vm0, 0.0, %v832_v24 }
 0x24c   : > { %4314 = vxpose.xlu2.b32.start.end [1/1] (short) (narrow) %v827_v50, 8  ;;  %v15760_v55 = vpop.trf.xlu1  ;;  %v1265_v50 = vperm.slane %v15203_v0, %v14986_v8  ;;  %v1261_v0 = vsel %vm314_vm0, 0.0, %v1260_v39 }
 0x24d   : > { %19611 = vst [vmem:[#allocation75_spill] sm:$0xff] %v15760_v55  ;;  %v15762_v42 = vpop.trf.xlu2  ;;  %v15770_v20 = vpop.trf.xlu0  ;;  %v1247_v55 = vsel %vm314_vm0, 0.0, %v1246_v23 }
 0x24e   : > { %19612 = vst [vmem:[#allocation76_spill] sm:$0xff] %v15762_v42 }
 0x24f   : > { %6362 = vxpose.xlu0.b32.start.end [1/1] (short) (narrow) %v1243_v10, 8  ;;  %v1270_v10 = vrot.slane %v1265_v50, 4 }
 0x250   : > { %6394 = vxpose.xlu1.b32.start.end [1/1] (short) (narrow) %v15765_v2, 8 }
 0x251   : > { %v1271_v56 = vsel %vm314_vm0, %v1270_v10, %v1255_v26 }
 0x252   : > { %v15803_v39 = vperm.slane %v1271_v56, %v14989_v14  ;;  %v19619_v56 = vld [vmem:[#allocation33_spill] sm:$0xff] }
 0x254   : > { %4410 = vxpose.xlu2.b32.start.end [1/1] (short) (narrow) %v15336_v62, 8  ;;  %v15779_v11 = vpop.trf.xlu1  ;;  %v1250_v62 = vrot.slane %v15248_v18, 4 }
 0x255   : > { %19613 = vst [vmem:[#allocation77_spill] sm:$0xff] %v15779_v11  ;;  %v15781_v61 = vpop.trf.xlu2  ;;  %v15789_v42 = vpop.trf.xlu0  ;;  %v1248_v11 = vrot.slane %v15784_v40, 4 }
 0x256   : > { %19614 = vst [vmem:[#allocation78_spill] sm:$0xff] %v15781_v61  ;;  %v1269_v61 = vperm.slane %v1261_v0, %v14986_v8 }
 0x257   : > { %6458 = vxpose.xlu0.b32.start.end [1/1] (short) (narrow) %v1237_v12, 8  ;;  %v1273_v12 = vsel %vm314_vm0, %v1265_v50, %v1272_v17  ;;  %v1249_v18 = vsel %vm314_vm0, 0.0, %v1248_v11  ;;  %v19618_v17 = vld [vmem:[#allocation19_spill] sm:$0xff] }
 0x258   : > { %6490 = vxpose.xlu1.b32.start.end [1/1] (short) (narrow) %v1247_v55, 8  ;;  %v1251_v55 = vsel %vm314_vm0, 0.0, %v1250_v62  ;;  %v1282_v57 = vrot.slane %v1269_v61, 4  ;;  %v1281_v24 = vperm.slane %v1273_v12, %v14989_v14  ;;  %v1317_v62 = vperm.slane %v19618_v17, %v14986_v8 }
 0x259   : > { %v1259_v50 = vperm.slane %v1251_v55, %v14986_v8  ;;  %v882_v55 = vrot.slane %v15402_v28, 4 }
 0x25a   : > { %v1296_v10 = vrot.slane %v1281_v24, 4 }
 0x25b   : > { %v1283_v0 = vsel %vm314_vm0, %v1282_v57, %v1259_v50 }
 0x25c   : > { %4506 = vxpose.xlu2.b32.start.end [1/1] (short) (narrow) %v833_v54, 8  ;;  %v15797_v59 = vpop.trf.xlu1  ;;  %v15820_v12 = vperm.slane %v1283_v0, %v14989_v14 }
 0x25d   : > { %19615 = vst [vmem:[#allocation79_spill] sm:$0xff] %v15797_v59  ;;  %v15799_v23 = vpop.trf.xlu2  ;;  %v15808_v26 = vpop.trf.xlu0  ;;  %v1297_v59 = vsel %vm314_vm0, 0.0, %v1296_v10 }
 0x25e   : > { %19616 = vst [vmem:[#allocation80_spill] sm:$0xff] %v15799_v23  ;;  %v19623_v23 = vld [vmem:[#allocation22_spill] sm:$0xff] }
 0x25f   : > { %6554 = vxpose.xlu0.b32.start.end [1/1] (short) (narrow) %v1249_v18, 8  ;;  %19617 = vst [vmem:[#allocation81_spill] sm:$0xff] %v15808_v26  ;;  %v1284_v18 = vrot.slane %v1259_v50, 4  ;;  %v1322_v26 = vrot.slane %v1317_v62, 4  ;;  %v1312_v50 = vrot.slane %v19618_v17, 4  ;;  %v1302_v28 = vrot.slane %v19623_v23, 4 }
 0x260   : > { %6586 = vxpose.xlu1.b32.start.end [1/1] (short) (narrow) %v15803_v39, 8 }
 0x261   : > { %v1285_v0 = vsel %vm314_vm0, %v1269_v61, %v1284_v18  ;;  %v1313_v17 = vsel %vm314_vm0, 0.0, %v1312_v50 }
 0x264   : > { %4602 = vxpose.xlu2.b32.start.end [1/1] (short) (narrow) %v19619_v56, 8  ;;  %v15815_v54 = vpop.trf.xlu1  ;;  %v1307_v56 = vperm.slane %v19623_v23, %v14986_v8  ;;  %v1321_v23 = vperm.slane %v1313_v17, %v14986_v8 }
 0x265   : > { %19620 = vst [vmem:[#allocation19_spill] sm:$0xff] %v15815_v54  ;;  %v15817_v11 = vpop.trf.xlu2  ;;  %v15824_v57 = vpop.trf.xlu0  ;;  %v1298_v54 = vrot.slane %v15820_v12, 4 }
 0x266   : > { %19621 = vst [vmem:[#allocation33_spill] sm:$0xff] %v15817_v11  ;;  %v883_v11 = vsel %vm314_vm0, 0.0, %v882_v55  ;;  %v1324_v63 = vrot.slane %v1307_v56, 4  ;;  %v1334_v50 = vrot.slane %v1321_v23, 4 }
 0x267   : > { %6650 = vxpose.xlu0.b32.start.end [1/1] (short) (narrow) %v1281_v24, 8  ;;  %19622 = vst [vmem:[#allocation82_spill] sm:$0xff] %v15824_v57  ;;  %v1323_v24 = vsel %vm314_vm0, %v1322_v26, %v1307_v56  ;;  %v15839_v57 = vperm.slane %v1285_v0, %v14989_v14  ;;  %v1299_v1 = vsel %vm314_vm0, 0.0, %v1298_v54 }
 0x268   : > { %6682 = vxpose.xlu1.b32.start.end [1/1] (short) (narrow) %v1297_v59, 8  ;;  %v1329_v61 = vperm.slane %v1323_v24, %v14989_v14  ;;  %v1325_v55 = vsel %vm314_vm0, %v1317_v62, %v1324_v63 }
 0x269   : > { %v15857_v56 = vperm.slane %v1325_v55, %v14989_v14 }
 0x26a   : > { %v1346_v18 = vrot.slane %v1329_v61, 4 }
 0x26b   : > { %v1348_v62 = vrot.slane %v15857_v56, 4 }
 0x26c   : > { %4698 = vxpose.xlu2.b32.start.end [1/1] (short) (narrow) %v883_v11, 8  ;;  %v15833_v10 = vpop.trf.xlu1  ;;  %v1303_v11 = vsel %vm314_vm0, 0.0, %v1302_v28  ;;  %v1347_v24 = vsel %vm314_vm0, 0.0, %v1346_v18  ;;  %v932_v28 = vrot.slane %v15449_v35, 4 }
 0x26d   : > { %19624 = vst [vmem:[#allocation22_spill] sm:$0xff] %v15833_v10  ;;  %v15836_v59 = vpop.trf.xlu2  ;;  %v15845_v26 = vpop.trf.xlu0  ;;  %v1311_v0 = vperm.slane %v1303_v11, %v14986_v8  ;;  %v1349_v10 = vsel %vm314_vm0, 0.0, %v1348_v62 }
 0x26e   : > { %19625 = vst [vmem:[#allocation83_spill] sm:$0xff] %v15836_v59 }
 0x26f   : > { %6746 = vxpose.xlu0.b32.start.end [1/1] (short) (narrow) %v1299_v1, 8  ;;  %19626 = vst [vmem:[#allocation84_spill] sm:$0xff] %v15845_v26  ;;  %v1336_v17 = vrot.slane %v1311_v0, 4  ;;  %v1335_v55 = vsel %vm314_vm0, %v1334_v50, %v1311_v0 }
 0x270   : > { %6778 = vxpose.xlu1.b32.start.end [1/1] (short) (narrow) %v15839_v57, 8 }
 0x271   : > { %v1337_v26 = vsel %vm314_vm0, %v1321_v23, %v1336_v17 }
 0x274   : > { %4794 = vxpose.xlu2.b32.start.end [1/1] (short) (narrow) %v15431_v4, 8  ;;  %v15852_v1 = vpop.trf.xlu1  ;;  %v19630_v4 = vld [vmem:[#allocation20_spill] sm:$0xff] }
 0x275   : > { %19627 = vst [vmem:[#allocation85_spill] sm:$0xff] %v15852_v1  ;;  %v15854_v54 = vpop.trf.xlu2  ;;  %v15861_v63 = vpop.trf.xlu0  ;;  %v1369_v11 = vperm.slane %v19630_v4, %v14986_v8  ;;  %v933_v1 = vsel %vm314_vm0, 0.0, %v932_v28  ;;  %v1364_v35 = vrot.slane %v19630_v4, 4  ;;  %v1345_v28 = vperm.slane %v1337_v26, %v14989_v14 }
 0x276   : > { %19628 = vst [vmem:[#allocation86_spill] sm:$0xff] %v15854_v54 }
 0x277   : > { %6842 = vxpose.xlu0.b32.start.end [1/1] (short) (narrow) %v1329_v61, 8  ;;  %19629 = vst [vmem:[#allocation87_spill] sm:$0xff] %v15861_v63  ;;  %v1374_v63 = vrot.slane %v1369_v11, 4  ;;  %v1365_v23 = vsel %vm314_vm0, 0.0, %v1364_v35  ;;  %v1352_v4 = vrot.slane %v1345_v28, 4 }
 0x278   : > { %6874 = vxpose.xlu1.b32.start.end [1/1] (short) (narrow) %v1347_v24, 8  ;;  %v15875_v24 = vperm.slane %v1335_v55, %v14989_v14  ;;  %v1373_v62 = vperm.slane %v1365_v23, %v14986_v8 }
 0x279   : > { %v1353_v59 = vsel %vm314_vm0, 0.0, %v1352_v4 }
 0x27c   : > { %4890 = vxpose.xlu2.b32.start.end [1/1] (short) (narrow) %v933_v1, 8  ;;  %v15869_v18 = vpop.trf.xlu1  ;;  %v19634_v1 = vld [vmem:[#allocation24_spill] sm:$0xff] }
 0x27d   : > { %19631 = vst [vmem:[#allocation20_spill] sm:$0xff] %v15869_v18  ;;  %v15872_v61 = vpop.trf.xlu2  ;;  %v15880_v0 = vpop.trf.xlu0  ;;  %v1359_v50 = vperm.slane %v19634_v1, %v14986_v8  ;;  %v1354_v17 = vrot.slane %v19634_v1, 4  ;;  %v982_v1 = vrot.slane %v15508_v41, 4 }
 0x27e   : > { %19632 = vst [vmem:[#allocation88_spill] sm:$0xff] %v15872_v61 }
 0x27f   : > { %6938 = vxpose.xlu0.b32.start.end [1/1] (short) (narrow) %v1349_v10, 8  ;;  %19633 = vst [vmem:[#allocation89_spill] sm:$0xff] %v15880_v0  ;;  %v1375_v55 = vsel %vm314_vm0, %v1374_v63, %v1359_v50  ;;  %v1355_v35 = vsel %vm314_vm0, 0.0, %v1354_v17  ;;  %v1376_v0 = vrot.slane %v1359_v50, 4  ;;  %v1386_v63 = vrot.slane %v1373_v62, 4 }
 0x280   : > { %6970 = vxpose.xlu1.b32.start.end [1/1] (short) (narrow) %v15875_v24, 8  ;;  %v15894_v18 = vperm.slane %v1375_v55, %v14989_v14 }
 0x281   : > { %v1377_v55 = vsel %vm314_vm0, %v1369_v11, %v1376_v0  ;;  %v19641_v11 = vld [vmem:[#allocation21_spill] sm:$0xff] }
 0x282   : > { %v15911_v41 = vperm.slane %v1377_v55, %v14989_v14  ;;  %v1421_v0 = vperm.slane %v19641_v11, %v14986_v8  ;;  %v19642_v55 = vld [vmem:[#allocation26_spill] sm:$0xff] }
 0x284   : > { %4986 = vxpose.xlu2.b32.start.end [1/1] (short) (narrow) %v15484_v29, 8  ;;  %v15889_v10 = vpop.trf.xlu1  ;;  %v1363_v29 = vperm.slane %v1355_v35, %v14986_v8 }
 0x285   : > { %19635 = vst [vmem:[#allocation24_spill] sm:$0xff] %v15889_v10  ;;  %v15891_v26 = vpop.trf.xlu2  ;;  %v15899_v23 = vpop.trf.xlu0  ;;  %v1398_v10 = vrot.slane %v15894_v18, 4 }
 0x286   : > { %19636 = vst [vmem:[#allocation90_spill] sm:$0xff] %v15891_v26  ;;  %v983_v26 = vsel %vm314_vm0, 0.0, %v982_v1  ;;  %v1387_v50 = vsel %vm314_vm0, %v1386_v63, %v1363_v29  ;;  %v1388_v4 = vrot.slane %v1363_v29, 4 }
 0x287   : > { %7034 = vxpose.xlu0.b32.start.end [1/1] (short) (narrow) %v1345_v28, 8  ;;  %19637 = vst [vmem:[#allocation91_spill] sm:$0xff] %v15899_v23  ;;  %v1393_v35 = vperm.slane %v1387_v50, %v14989_v14  ;;  %v1411_v23 = vperm.slane %v19642_v55, %v14986_v8 }
 0x288   : > { %7066 = vxpose.xlu1.b32.start.end [1/1] (short) (narrow) %v1353_v59, 8  ;;  %v1399_v59 = vsel %vm314_vm0, 0.0, %v1398_v10  ;;  %v1389_v63 = vsel %vm314_vm0, %v1373_v62, %v1388_v4  ;;  %v988_v62 = vrot.slane %v15542_v19, 4 }
 0x289   : > { %v15930_v50 = vperm.slane %v1389_v63, %v14989_v14 }
 0x28a   : > { %v989_v63 = vsel %vm314_vm0, 0.0, %v988_v62 }
 0x28c   : > { %5082 = vxpose.xlu2.b32.start.end [1/1] (short) (narrow) %v983_v26, 8  ;;  %v15906_v17 = vpop.trf.xlu1  ;;  %v1402_v26 = vrot.slane %v1393_v35, 4 }
 0x28d   : > { %19638 = vst [vmem:[#allocation92_spill] sm:$0xff] %v15906_v17  ;;  %v15908_v28 = vpop.trf.xlu2  ;;  %v15916_v1 = vpop.trf.xlu0  ;;  %v1416_v17 = vrot.slane %v19641_v11, 4  ;;  %v1428_v11 = vrot.slane %v1411_v23, 4 }
 0x28e   : > { %19639 = vst [vmem:[#allocation93_spill] sm:$0xff] %v15908_v28 }
 0x28f   : > { %7130 = vxpose.xlu0.b32.start.end [1/1] (short) (narrow) %v1399_v59, 8  ;;  %19640 = vst [vmem:[#allocation94_spill] sm:$0xff] %v15916_v1  ;;  %v1426_v59 = vrot.slane %v1421_v0, 4  ;;  %v1403_v1 = vsel %vm314_vm0, 0.0, %v1402_v26  ;;  %v1417_v4 = vsel %vm314_vm0, 0.0, %v1416_v17 }
 0x290   : > { %7162 = vxpose.xlu1.b32.start.end [1/1] (short) (narrow) %v15911_v41, 8 }
 0x291   : > { %v1427_v61 = vsel %vm314_vm0, %v1426_v59, %v1411_v23 }
 0x292   : > { %v15949_v26 = vperm.slane %v1427_v61, %v14989_v14 }
 0x294   : > { %5178 = vxpose.xlu2.b32.start.end [1/1] (short) (narrow) %v15524_v5, 8  ;;  %v15925_v10 = vpop.trf.xlu1  ;;  %v1406_v5 = vrot.slane %v19642_v55, 4 }
 0x295   : > { %19643 = vst [vmem:[#allocation21_spill] sm:$0xff] %v15925_v10  ;;  %v15927_v29 = vpop.trf.xlu2  ;;  %v15935_v28 = vpop.trf.xlu0  ;;  %v1404_v10 = vrot.slane %v15930_v50, 4 }
 0x296   : > { %19644 = vst [vmem:[#allocation26_spill] sm:$0xff] %v15927_v29  ;;  %v1425_v29 = vperm.slane %v1417_v4, %v14986_v8 }
 0x297   : > { %7226 = vxpose.xlu0.b32.start.end [1/1] (short) (narrow) %v1393_v35, 8  ;;  %19645 = vst [vmem:[#allocation95_spill] sm:$0xff] %v15935_v28  ;;  %v1429_v35 = vsel %vm314_vm0, %v1421_v0, %v1428_v11  ;;  %v1405_v55 = vsel %vm314_vm0, 0.0, %v1404_v10  ;;  %v19649_v11 = vld [vmem:[#allocation23_spill] sm:$0xff] }
 0x298   : > { %7258 = vxpose.xlu1.b32.start.end [1/1] (short) (narrow) %v1403_v1, 8  ;;  %v1407_v1 = vsel %vm314_vm0, 0.0, %v1406_v5  ;;  %v1438_v28 = vrot.slane %v1425_v29, 4  ;;  %v1437_v62 = vperm.slane %v1429_v35, %v14989_v14  ;;  %v1473_v5 = vperm.slane %v19649_v11, %v14986_v8 }
 0x299   : > { %v1415_v0 = vperm.slane %v1407_v1, %v14986_v8  ;;  %v1038_v1 = vrot.slane %v15578_v43, 4 }
 0x29a   : > { %v1452_v59 = vrot.slane %v1437_v62, 4 }
 0x29b   : > { %v1439_v4 = vsel %vm314_vm0, %v1438_v28, %v1415_v0  ;;  %v1440_v35 = vrot.slane %v1415_v0, 4  ;;  %v1468_v0 = vrot.slane %v19649_v11, 4 }
 0x29c   : > { %5274 = vxpose.xlu2.b32.start.end [1/1] (short) (narrow) %v989_v63, 8  ;;  %v15943_v19 = vpop.trf.xlu1  ;;  %v15966_v63 = vperm.slane %v1439_v4, %v14989_v14 }
 0x29d   : > { %19646 = vst [vmem:[#allocation96_spill] sm:$0xff] %v15943_v19  ;;  %v15945_v17 = vpop.trf.xlu2  ;;  %v15954_v23 = vpop.trf.xlu0  ;;  %v1478_v19 = vrot.slane %v1473_v5, 4  ;;  %v1441_v4 = vsel %vm314_vm0, %v1425_v29, %v1440_v35  ;;  %v1469_v11 = vsel %vm314_vm0, 0.0, %v1468_v0 }
 0x29e   : > { %19647 = vst [vmem:[#allocation97_spill] sm:$0xff] %v15945_v17 }
 0x29f   : > { %7322 = vxpose.xlu0.b32.start.end [1/1] (short) (narrow) %v1405_v55, 8  ;;  %19648 = vst [vmem:[#allocation98_spill] sm:$0xff] %v15954_v23  ;;  %v1453_v55 = vsel %vm314_vm0, 0.0, %v1452_v59  ;;  %v19653_v23 = vld [vmem:[#allocation28_spill] sm:$0xff] }
 0x2a0   : > { %7354 = vxpose.xlu1.b32.start.end [1/1] (short) (narrow) %v15949_v26, 8  ;;  %v1458_v43 = vrot.slane %v19653_v23, 4 }
 0x2a4   : > { %5370 = vxpose.xlu2.b32.start.end [1/1] (short) (narrow) %v15561_v51, 8  ;;  %v15961_v61 = vpop.trf.xlu1  ;;  %v1463_v51 = vperm.slane %v19653_v23, %v14986_v8  ;;  %v1477_v23 = vperm.slane %v1469_v11, %v14986_v8 }
 0x2a5   : > { %19650 = vst [vmem:[#allocation23_spill] sm:$0xff] %v15961_v61  ;;  %v15963_v10 = vpop.trf.xlu2  ;;  %v15970_v28 = vpop.trf.xlu0  ;;  %v1454_v61 = vrot.slane %v15966_v63, 4 }
 0x2a6   : > { %19651 = vst [vmem:[#allocation99_spill] sm:$0xff] %v15963_v10  ;;  %v1039_v10 = vsel %vm314_vm0, 0.0, %v1038_v1  ;;  %v1480_v54 = vrot.slane %v1463_v51, 4  ;;  %v1490_v0 = vrot.slane %v1477_v23, 4 }
 0x2a7   : > { %7418 = vxpose.xlu0.b32.start.end [1/1] (short) (narrow) %v1437_v62, 8  ;;  %19652 = vst [vmem:[#allocation100_spill] sm:$0xff] %v15970_v28  ;;  %v1479_v62 = vsel %vm314_vm0, %v1478_v19, %v1463_v51  ;;  %v15985_v28 = vperm.slane %v1441_v4, %v14989_v14  ;;  %v1455_v17 = vsel %vm314_vm0, 0.0, %v1454_v61 }
 0x2a8   : > { %7450 = vxpose.xlu1.b32.start.end [1/1] (short) (narrow) %v1453_v55, 8  ;;  %v1485_v29 = vperm.slane %v1479_v62, %v14989_v14  ;;  %v1481_v1 = vsel %vm314_vm0, %v1473_v5, %v1480_v54 }
 0x2a9   : > { %v16003_v51 = vperm.slane %v1481_v1, %v14989_v14 }
 0x2aa   : > { %v1502_v35 = vrot.slane %v1485_v29, 4 }
 0x2ab   : > { %v1504_v5 = vrot.slane %v16003_v51, 4 }
 0x2ac   : > { %5466 = vxpose.xlu2.b32.start.end [1/1] (short) (narrow) %v1039_v10, 8  ;;  %v15979_v59 = vpop.trf.xlu1  ;;  %v1459_v10 = vsel %vm314_vm0, 0.0, %v1458_v43  ;;  %v1503_v62 = vsel %vm314_vm0, 0.0, %v1502_v35  ;;  %v1088_v43 = vrot.slane %v15619_v16, 4 }
 0x2ad   : > { %19654 = vst [vmem:[#allocation28_spill] sm:$0xff] %v15979_v59  ;;  %v15982_v55 = vpop.trf.xlu2  ;;  %v15991_v19 = vpop.trf.xlu0  ;;  %v1467_v4 = vperm.slane %v1459_v10, %v14986_v8  ;;  %v1505_v59 = vsel %vm314_vm0, 0.0, %v1504_v5 }
 0x2ae   : > { %19655 = vst [vmem:[#allocation101_spill] sm:$0xff] %v15982_v55 }
 0x2af   : > { %7514 = vxpose.xlu0.b32.start.end [1/1] (short) (narrow) %v1455_v17, 8  ;;  %19656 = vst [vmem:[#allocation102_spill] sm:$0xff] %v15991_v19  ;;  %v1492_v11 = vrot.slane %v1467_v4, 4  ;;  %v1491_v1 = vsel %vm314_vm0, %v1490_v0, %v1467_v4 }
 0x2b0   : > { %7546 = vxpose.xlu1.b32.start.end [1/1] (short) (narrow) %v15985_v28, 8 }
 0x2b1   : > { %v1493_v19 = vsel %vm314_vm0, %v1477_v23, %v1492_v11 }
 0x2b4   : > { %5562 = vxpose.xlu2.b32.start.end [1/1] (short) (narrow) %v15602_v33, 8  ;;  %v15998_v17 = vpop.trf.xlu1  ;;  %v19660_v33 = vld [vmem:[#allocation25_spill] sm:$0xff] }
 0x2b5   : > { %19657 = vst [vmem:[#allocation103_spill] sm:$0xff] %v15998_v17  ;;  %v16000_v61 = vpop.trf.xlu2  ;;  %v16007_v54 = vpop.trf.xlu0  ;;  %v1525_v10 = vperm.slane %v19660_v33, %v14986_v8  ;;  %v1089_v17 = vsel %vm314_vm0, 0.0, %v1088_v43  ;;  %v1520_v16 = vrot.slane %v19660_v33, 4  ;;  %v1501_v43 = vperm.slane %v1493_v19, %v14989_v14 }
 0x2b6   : > { %19658 = vst [vmem:[#allocation104_spill] sm:$0xff] %v16000_v61 }
 0x2b7   : > { %7610 = vxpose.xlu0.b32.start.end [1/1] (short) (narrow) %v1485_v29, 8  ;;  %19659 = vst [vmem:[#allocation105_spill] sm:$0xff] %v16007_v54  ;;  %v1530_v54 = vrot.slane %v1525_v10, 4  ;;  %v1521_v23 = vsel %vm314_vm0, 0.0, %v1520_v16  ;;  %v1508_v33 = vrot.slane %v1501_v43, 4 }
 0x2b8   : > { %7642 = vxpose.xlu1.b32.start.end [1/1] (short) (narrow) %v1503_v62, 8  ;;  %v16021_v62 = vperm.slane %v1491_v1, %v14989_v14  ;;  %v1529_v5 = vperm.slane %v1521_v23, %v14986_v8 }
 0x2bc   : > { %5658 = vxpose.xlu2.b32.start.end [1/1] (short) (narrow) %v1089_v17, 8  ;;  %v16015_v35 = vpop.trf.xlu1  ;;  %v19664_v17 = vld [vmem:[#allocation30_spill] sm:$0xff] }
 0x2bd   : > { %19661 = vst [vmem:[#allocation25_spill] sm:$0xff] %v16015_v35  ;;  %v16018_v29 = vpop.trf.xlu2  ;;  %v16026_v4 = vpop.trf.xlu0  ;;  %v1515_v0 = vperm.slane %v19664_v17, %v14986_v8  ;;  %v1510_v11 = vrot.slane %v19664_v17, 4  ;;  %v1138_v17 = vrot.slane %v15658_v52, 4 }
 0x2be   : > { %19662 = vst [vmem:[#allocation106_spill] sm:$0xff] %v16018_v29  ;;  %v1509_v29 = vsel %vm314_vm0, 0.0, %v1508_v33 }
 0x2bf   : > { %7706 = vxpose.xlu0.b32.start.end [1/1] (short) (narrow) %v1505_v59, 8  ;;  %19663 = vst [vmem:[#allocation107_spill] sm:$0xff] %v16026_v4  ;;  %v1531_v1 = vsel %vm314_vm0, %v1530_v54, %v1515_v0  ;;  %v1511_v16 = vsel %vm314_vm0, 0.0, %v1510_v11  ;;  %v1532_v4 = vrot.slane %v1515_v0, 4  ;;  %v1542_v54 = vrot.slane %v1529_v5, 4 }
 0x2c0   : > { %7738 = vxpose.xlu1.b32.start.end [1/1] (short) (narrow) %v16021_v62, 8  ;;  %v16040_v35 = vperm.slane %v1531_v1, %v14989_v14 }
 0x2c1   : > { %v1533_v1 = vsel %vm314_vm0, %v1525_v10, %v1532_v4  ;;  %v10490_v10 = vrot.slane %v15706_v36, 4  ;;  %v19670_v4 = vld [vmem:[#allocation27_spill] sm:$0xff] }
 0x2c2   : > { %v16055_v52 = vperm.slane %v1533_v1, %v14989_v14 }
 0x2c4   : > { %5754 = vxpose.xlu2.b32.start.end [1/1] (short) (narrow) %v15638_v15, 8  ;;  %v16035_v59 = vpop.trf.xlu1  ;;  %v1519_v15 = vperm.slane %v1511_v16, %v14986_v8 }
 0x2c5   : > { %19665 = vst [vmem:[#allocation30_spill] sm:$0xff] %v16035_v59  ;;  %v16037_v19 = vpop.trf.xlu2  ;;  %v16045_v23 = vpop.trf.xlu0  ;;  %v1554_v59 = vrot.slane %v16040_v35, 4 }
 0x2c6   : > { %19666 = vst [vmem:[#allocation108_spill] sm:$0xff] %v16037_v19  ;;  %v1139_v19 = vsel %vm314_vm0, 0.0, %v1138_v17  ;;  %v1543_v0 = vsel %vm314_vm0, %v1542_v54, %v1519_v15  ;;  %v1544_v33 = vrot.slane %v1519_v15, 4  ;;  %v1577_v54 = vperm.slane %v19670_v4, %v14986_v8 }
 0x2c7   : > { %7802 = vxpose.xlu0.b32.start.end [1/1] (short) (narrow) %v1501_v43, 8  ;;  %19667 = vst [vmem:[#allocation109_spill] sm:$0xff] %v16045_v23  ;;  %v1549_v16 = vperm.slane %v1543_v0, %v14989_v14 }
 0x2c8   : > { %7834 = vxpose.xlu1.b32.start.end [1/1] (short) (narrow) %v1509_v29, 8  ;;  %v1555_v29 = vsel %vm314_vm0, 0.0, %v1554_v59  ;;  %v1545_v1 = vsel %vm314_vm0, %v1529_v5, %v1544_v33  ;;  %v19671_v59 = vld [vmem:[#allocation32_spill] sm:$0xff]  ;;  %v1582_v61 = vrot.slane %v1577_v54, 4  ;;  %v1144_v33 = vrot.slane %v15693_v45, 4 }
 0x2c9   : > { %v1567_v15 = vperm.slane %v19671_v59, %v14986_v8  ;;  %v16075_v55 = vperm.slane %v1545_v1, %v14989_v14 }
 0x2cb   : > { %v1560_v45 = vrot.slane %v16075_v55, 4 }
 0x2cc   : > { %5850 = vxpose.xlu2.b32.start.end [1/1] (short) (narrow) %v1139_v19, 8  ;;  %v16052_v11 = vpop.trf.xlu1  ;;  %v1572_v19 = vrot.slane %v19670_v4, 4 }
 0x2cd   : > { %19668 = vst [vmem:[#allocation110_spill] sm:$0xff] %v16052_v11  ;;  %v4042_v43 = vpop.trf.xlu2  ;;  %v16060_v17 = vpop.trf.xlu0  ;;  %v1558_v11 = vrot.slane %v1549_v16, 4 }
 0x2ce   : > { %19669 = vst [vmem:[#allocation111_spill] sm:$0xff] %v16060_v17  ;;  %v10491_v36 = vsel %vm314_vm0, %v10490_v10, %v4042_v43  ;;  %v1573_v4 = vsel %vm314_vm0, 0.0, %v1572_v19 }
 0x2cf   : > { %7898 = vxpose.xlu0.b32.start.end [1/1] (short) (narrow) %v1555_v29, 8  ;;  %v10508_v29 = vrot.slane %v15789_v42, 4  ;;  %v1559_v5 = vsel %vm314_vm0, 0.0, %v1558_v11  ;;  %v1584_v42 = vrot.slane %v1567_v15, 4  ;;  %v10495_v10 = vperm.slane %v10491_v36, %v14986_v8 }
 0x2d0   : > { %7930 = vxpose.xlu1.b32.start.end [1/1] (short) (narrow) %v16055_v52, 8  ;;  %v1581_v11 = vperm.slane %v1573_v4, %v14986_v8 }
 0x2d4   : > { %5946 = vxpose.xlu2.b32.start.end [1/1] (short) (narrow) %v15674_v58, 8  ;;  %v16071_v0 = vpop.trf.xlu1  ;;  %v10509_v58 = vsel %vm314_vm0, %v10508_v29, %v15723_v46  ;;  %v1145_v46 = vsel %vm314_vm0, 0.0, %v1144_v33  ;;  %v1561_v33 = vsel %vm314_vm0, 0.0, %v1560_v45 }
 0x2d5   : > { %19672 = vst [vmem:[#allocation27_spill] sm:$0xff] %v16071_v0  ;;  %v4138_v17 = vpop.trf.xlu2  ;;  %v16084_v43 = vpop.trf.xlu0 }
 0x2d6   : > { %v10496_v23 = vrot.slane %v4138_v17, 4  ;;  %19673 = vst [vmem:[#allocation32_spill] sm:$0xff] %v16084_v43  ;;  %v1562_v17 = vrot.slane %v19671_v59, 4 }
 0x2d7   : > { %7994 = vxpose.xlu0.b32.start.end [1/1] (short) (narrow) %v1549_v16, 8  ;;  %v10513_v16 = vperm.slane %v10509_v58, %v14986_v8 }
 0x2d8   : > { %v10497_v0 = vsel %vm314_vm0, %v10496_v23, %v15753_v60  ;;  %8026 = vxpose.xlu1.b32.start.end [1/1] (short) (narrow) %v1559_v5, 8  ;;  %v1583_v60 = vsel %vm314_vm0, %v1582_v61, %v1567_v15  ;;  %v1585_v23 = vsel %vm314_vm0, %v1577_v54, %v1584_v42  ;;  %v1563_v59 = vsel %vm314_vm0, 0.0, %v1562_v17 }
 0x2d9   : > { %v10501_v19 = vperm.slane %v10497_v0, %v14986_v8  ;;  %v16101_v58 = vperm.slane %v1583_v60, %v14989_v14  ;;  %v10520_v61 = vrot.slane %v10513_v16, 4  ;;  %v1593_v54 = vperm.slane %v1585_v23, %v14989_v14  ;;  %v19675_v60 = vld [vmem:[#allocation29_spill] sm:$0xff] }
 0x2da   : > { %v1571_v17 = vperm.slane %v1563_v59, %v14986_v8  ;;  %v1629_v23 = vperm.slane %v19675_v60, %v14986_v8 }
 0x2db   : > { %v10514_v1 = vrot.slane %v10501_v19, 4  ;;  %v1594_v19 = vrot.slane %v1581_v11, 4  ;;  %v1608_v45 = vrot.slane %v1593_v54, 4 }
 0x2dc   : > { %6042 = vxpose.xlu2.b32.start.end [1/1] (short) (narrow) %v1145_v46, 8  ;;  %v16095_v29 = vpop.trf.xlu1 }
 0x2dd   : > { %v10515_v0 = vsel %vm314_vm0, %v10514_v1, %v10495_v10  ;;  %v4234_v36 = vpop.trf.xlu2  ;;  %v16108_v42 = vpop.trf.xlu0  ;;  %v1595_v16 = vsel %vm314_vm0, %v1594_v19, %v1571_v17  ;;  %v1609_v19 = vsel %vm314_vm0, 0.0, %v1608_v45 }
 0x2de   : > { %v10519_v4 = vperm.slane %v10515_v0, %v14989_v14  ;;  %v10502_v5 = vrot.slane %v4234_v36, 4  ;;  %19674 = vst [vmem:[#allocation112_spill] sm:$0xff] %v16108_v42 }
 0x2df   : > { %8090 = vxpose.xlu0.b32.start.end [1/1] (short) (narrow) %v1561_v33, 8 }
 0x2e0   : > { %v10503_v15 = vsel %vm314_vm0, %v10502_v5, %v15770_v20  ;;  %8122 = vxpose.xlu1.b32.start.end [1/1] (short) (narrow) %v16101_v58, 8  ;;  %v10528_v1 = vrot.slane %v10519_v4, 4  ;;  %v16123_v5 = vperm.slane %v1595_v16, %v14989_v14 }
 0x2e1   : > { %v10507_v10 = vperm.slane %v10503_v15, %v14986_v8  ;;  %v1194_v15 = vrot.slane %v15730_v53, 4 }
 0x2e2   : > { %v1610_v53 = vrot.slane %v16123_v5, 4 }
 0x2e3   : > { %v10521_v46 = vsel %vm314_vm0, %v10520_v61, %v10507_v10  ;;  %v1596_v61 = vrot.slane %v1571_v17, 4  ;;  %v1634_v10 = vrot.slane %v1629_v23, 4  ;;  %v19681_v17 = vld [vmem:[#allocation35_spill] sm:$0xff] }
 0x2e4   : > { %v10525_v0 = vperm.slane %v10521_v46, %v14989_v14  ;;  %6138 = vxpose.xlu2.b32.start.end [1/1] (short) (narrow) %v15711_v30, 8  ;;  %v16118_v20 = vpop.trf.xlu1  ;;  %v1614_v43 = vrot.slane %v19681_v17, 4 }
 0x2e5   : > { %v16120_v36 = vpop.trf.xlu2  ;;  %v16134_v46 = vpop.trf.xlu0 }
 0x2e6   : > { %v10526_v59 = vrot.slane %v10525_v0, 4  ;;  %v16126_v33 = vsel %vm314_vm0, %v10525_v0, %v10528_v1  ;;  %19678 = vst [vmem:[#allocation114_spill] sm:$0xff] %v16134_v46  ;;  %v1195_v0 = vsel %vm314_vm0, 0.0, %v1194_v15  ;;  %v1624_v46 = vrot.slane %v19675_v60, 4 }
 0x2e7   : > { %19676 = vst [vmem:[#allocation29_spill] sm:$0xff] %v16126_v33  ;;  %8186 = vxpose.xlu0.b32.start.end [1/1] (short) (narrow) %v1593_v54, 8  ;;  %v16132_v30 = vperm.slane %v16126_v33, %v14986_v8  ;;  %v1619_v54 = vperm.slane %v19681_v17, %v14986_v8 }
 0x2e8   : > { %8218 = vxpose.xlu1.b32.start.end [1/1] (short) (narrow) %v1609_v19, 8  ;;  %v16137_v16 = vsel %vm314_vm0, %v10526_v59, %v10519_v4  ;;  %v1597_v19 = vsel %vm314_vm0, %v1581_v11, %v1596_v61  ;;  %v1611_v11 = vsel %vm314_vm0, 0.0, %v1610_v53  ;;  %v1625_v15 = vsel %vm314_vm0, 0.0, %v1624_v46 }
 0x2e9   : > { %19677 = vst [vmem:[#allocation113_spill] sm:$0xff] %v16132_v30  ;;  %v16141_v1 = vperm.slane %v16137_v16, %v14986_v8  ;;  %v11886_v45 = vrot.slane %v16132_v30, 4  ;;  %v1635_v4 = vsel %vm314_vm0, %v1634_v10, %v1619_v54  ;;  %v16161_v30 = vperm.slane %v1597_v19, %v14989_v14 }
 0x2ea   : > { %19679 = vst [vmem:[#allocation115_spill] sm:$0xff] %v16137_v16  ;;  %v1636_v61 = vrot.slane %v1619_v54, 4  ;;  %v1641_v60 = vperm.slane %v1635_v4, %v14989_v14  ;;  %v1633_v17 = vperm.slane %v1625_v15, %v14986_v8 }
 0x2eb   : > { %19680 = vst [vmem:[#allocation116_spill] sm:$0xff] %v16141_v1  ;;  %v16155_v42 = vsel %vm314_vm0, %v11886_v45, %v16141_v1  ;;  %v1615_v45 = vsel %vm314_vm0, 0.0, %v1614_v43  ;;  %v1244_v43 = vrot.slane %v15765_v2, 4 }
 0x2ec   : > { %6234 = vxpose.xlu2.b32.start.end [1/1] (short) (narrow) %v1195_v0, 8  ;;  %v16151_v59 = vpop.trf.xlu1  ;;  %19682 = vst [vmem:[#allocation35_spill] sm:$0xff] %v16155_v42  ;;  %v1658_v0 = vrot.slane %v1641_v60, 4  ;;  %v1637_v19 = vsel %vm314_vm0, %v1629_v23, %v1636_v61  ;;  %v1623_v42 = vperm.slane %v1615_v45, %v14986_v8  ;;  %v1646_v4 = vrot.slane %v1633_v17, 4 }
 0x2ed   : > { %v16158_v16 = vpop.trf.xlu2  ;;  %v16167_v10 = vpop.trf.xlu0  ;;  %v16179_v46 = vperm.slane %v1637_v19, %v14989_v14 }
 0x2ee   : > { %19683 = vst [vmem:[#allocation117_spill] sm:$0xff] %v16158_v16  ;;  %v1648_v15 = vrot.slane %v1623_v42, 4  ;;  %v1647_v19 = vsel %vm314_vm0, %v1646_v4, %v1623_v42  ;;  %v1666_v4 = vrot.slane %v15422_v21, 4 }
 0x2ef   : > { %8282 = vxpose.xlu0.b32.start.end [1/1] (short) (narrow) %v1611_v11, 8  ;;  %v1659_v11 = vsel %vm314_vm0, 0.0, %v1658_v0  ;;  %v1660_v61 = vrot.slane %v16179_v46, 4 }
 0x2f0   : > { %8314 = vxpose.xlu1.b32.start.end [1/1] (short) (narrow) %v16161_v30, 8  ;;  %v1649_v1 = vsel %vm314_vm0, %v1633_v17, %v1648_v15 }
 0x2f1   : > { %v1661_v16 = vsel %vm314_vm0, 0.0, %v1660_v61 }
 0x2f4   : > { %6330 = vxpose.xlu2.b32.start.end [1/1] (short) (narrow) %v15748_v44, 8  ;;  %v16174_v54 = vpop.trf.xlu1  ;;  %v19685_v44 = vld [vmem:[#allocation31_spill] sm:$0xff] }
 0x2f5   : > { %19684 = vst [vmem:[#allocation118_spill] sm:$0xff] %v16174_v54  ;;  %v16176_v53 = vpop.trf.xlu2  ;;  %v16183_v23 = vpop.trf.xlu0  ;;  %v1681_v45 = vperm.slane %v19685_v44, %v14986_v8  ;;  %v1245_v54 = vsel %vm314_vm0, 0.0, %v1244_v43  ;;  %v1676_v2 = vrot.slane %v19685_v44, 4  ;;  %v1657_v43 = vperm.slane %v1649_v1, %v14989_v14 }
 0x2f7   : > { %8378 = vxpose.xlu0.b32.start.end [1/1] (short) (narrow) %v1641_v60, 8  ;;  %v1686_v33 = vrot.slane %v1681_v45, 4  ;;  %v1677_v17 = vsel %vm314_vm0, 0.0, %v1676_v2  ;;  %v1664_v15 = vrot.slane %v1657_v43, 4  ;;  %v1667_v2 = vsel %vm314_vm0, 0.0, %v1666_v4 }
 0x2f8   : > { %8410 = vxpose.xlu1.b32.start.end [1/1] (short) (narrow) %v1659_v11, 8  ;;  %v16197_v11 = vperm.slane %v1647_v19, %v14989_v14  ;;  %v1685_v61 = vperm.slane %v1677_v17, %v14986_v8 }
 0x2fc   : > { %6426 = vxpose.xlu2.b32.start.end [1/1] (short) (narrow) %v1245_v54, 8  ;;  %v16191_v0 = vpop.trf.xlu1  ;;  %v1671_v54 = vperm.slane %v15422_v21, %v14986_v8  ;;  %v1294_v21 = vrot.slane %v15803_v39, 4 }
 0x2fd   : > { %19686 = vst [vmem:[#allocation31_spill] sm:$0xff] %v16191_v0  ;;  %v16194_v60 = vpop.trf.xlu2  ;;  %v16202_v42 = vpop.trf.xlu0 }
 0x2fe   : > { %19687 = vst [vmem:[#allocation119_spill] sm:$0xff] %v16194_v60  ;;  %v1687_v44 = vsel %vm314_vm0, %v1686_v33, %v1671_v54  ;;  %v1688_v0 = vrot.slane %v1671_v54, 4  ;;  %v1665_v60 = vsel %vm314_vm0, 0.0, %v1664_v15  ;;  %v1698_v33 = vrot.slane %v1685_v61, 4 }
 0x2ff   : > { %8474 = vxpose.xlu0.b32.start.end [1/1] (short) (narrow) %v1661_v16, 8  ;;  %v16216_v19 = vperm.slane %v1687_v44, %v14989_v14 }
 0x300   : > { %8506 = vxpose.xlu1.b32.start.end [1/1] (short) (narrow) %v16197_v11, 8  ;;  %v1689_v44 = vsel %vm314_vm0, %v1681_v45, %v1688_v0  ;;  %v19694_v45 = vld [vmem:[#allocation34_spill] sm:$0xff] }
 0x301   : > { %v16233_v39 = vperm.slane %v1689_v44, %v14989_v14  ;;  %v1733_v0 = vperm.slane %v19694_v45, %v14986_v8  ;;  %v1723_v44 = vperm.slane %v15442_v9, %v14986_v8 }
 0x304   : > { %6522 = vxpose.xlu2.b32.start.end [1/1] (short) (narrow) %v15784_v40, 8  ;;  %v16211_v16 = vpop.trf.xlu1  ;;  %v1675_v40 = vperm.slane %v1667_v2, %v14986_v8 }
 0x305   : > { %19688 = vst [vmem:[#allocation120_spill] sm:$0xff] %v16211_v16  ;;  %v16213_v1 = vpop.trf.xlu2  ;;  %v16221_v17 = vpop.trf.xlu0  ;;  %v1710_v16 = vrot.slane %v16216_v19, 4 }
 0x306   : > { %19689 = vst [vmem:[#allocation121_spill] sm:$0xff] %v16213_v1  ;;  %v1295_v1 = vsel %vm314_vm0, 0.0, %v1294_v21  ;;  %v1699_v54 = vsel %vm314_vm0, %v1698_v33, %v1675_v40  ;;  %v1700_v15 = vrot.slane %v1675_v40, 4 }
 0x307   : > { %8570 = vxpose.xlu0.b32.start.end [1/1] (short) (narrow) %v1657_v43, 8  ;;  %19690 = vst [vmem:[#allocation122_spill] sm:$0xff] %v16221_v17  ;;  %v1705_v2 = vperm.slane %v1699_v54, %v14989_v14 }
 0x308   : > { %8602 = vxpose.xlu1.b32.start.end [1/1] (short) (narrow) %v1665_v60, 8  ;;  %v1711_v60 = vsel %vm314_vm0, 0.0, %v1710_v16  ;;  %v1701_v33 = vsel %vm314_vm0, %v1685_v61, %v1700_v15  ;;  %v1300_v61 = vrot.slane %v15839_v57, 4 }
 0x309   : > { %v16252_v54 = vperm.slane %v1701_v33, %v14989_v14 }
 0x30a   : > { %v1301_v33 = vsel %vm314_vm0, 0.0, %v1300_v61 }
 0x30c   : > { %6618 = vxpose.xlu2.b32.start.end [1/1] (short) (narrow) %v1295_v1, 8  ;;  %v16228_v4 = vpop.trf.xlu1  ;;  %v1714_v1 = vrot.slane %v1705_v2, 4 }
 0x30d   : > { %19691 = vst [vmem:[#allocation123_spill] sm:$0xff] %v16228_v4  ;;  %v16230_v43 = vpop.trf.xlu2  ;;  %v16238_v21 = vpop.trf.xlu0  ;;  %v1728_v4 = vrot.slane %v19694_v45, 4  ;;  %v1740_v45 = vrot.slane %v1723_v44, 4 }
 0x30e   : > { %19692 = vst [vmem:[#allocation124_spill] sm:$0xff] %v16230_v43 }
 0x30f   : > { %8666 = vxpose.xlu0.b32.start.end [1/1] (short) (narrow) %v1711_v60, 8  ;;  %19693 = vst [vmem:[#allocation125_spill] sm:$0xff] %v16238_v21  ;;  %v1738_v60 = vrot.slane %v1733_v0, 4  ;;  %v1715_v21 = vsel %vm314_vm0, 0.0, %v1714_v1  ;;  %v1729_v15 = vsel %vm314_vm0, 0.0, %v1728_v4 }
 0x310   : > { %8698 = vxpose.xlu1.b32.start.end [1/1] (short) (narrow) %v16233_v39, 8  ;;  %v1737_v43 = vperm.slane %v1729_v15, %v14986_v8 }
 0x314   : > { %6714 = vxpose.xlu2.b32.start.end [1/1] (short) (narrow) %v15820_v12, 8  ;;  %v16247_v16 = vpop.trf.xlu1  ;;  %v1718_v12 = vrot.slane %v15442_v9, 4 }
 0x315   : > { %19695 = vst [vmem:[#allocation34_spill] sm:$0xff] %v16247_v16  ;;  %v16249_v40 = vpop.trf.xlu2  ;;  %v16257_v17 = vpop.trf.xlu0  ;;  %v1716_v16 = vrot.slane %v16252_v54, 4 }
 0x316   : > { %19696 = vst [vmem:[#allocation126_spill] sm:$0xff] %v16249_v40  ;;  %v1739_v40 = vsel %vm314_vm0, %v1738_v60, %v1723_v44 }
 0x317   : > { %8762 = vxpose.xlu0.b32.start.end [1/1] (short) (narrow) %v1705_v2, 8  ;;  %19697 = vst [vmem:[#allocation127_spill] sm:$0xff] %v16257_v17  ;;  %v1741_v2 = vsel %vm314_vm0, %v1733_v0, %v1740_v45  ;;  %v16271_v1 = vperm.slane %v1739_v40, %v14989_v14  ;;  %v1717_v9 = vsel %vm314_vm0, 0.0, %v1716_v16  ;;  %v1750_v17 = vrot.slane %v1737_v43, 4 }
 0x318   : > { %8794 = vxpose.xlu1.b32.start.end [1/1] (short) (narrow) %v1715_v21, 8  ;;  %v1719_v21 = vsel %vm314_vm0, 0.0, %v1718_v12  ;;  %v1749_v61 = vperm.slane %v1741_v2, %v14989_v14  ;;  %v1785_v45 = vperm.slane %v15404_v37, %v14986_v8 }
 0x319   : > { %v1727_v0 = vperm.slane %v1719_v21, %v14986_v8  ;;  %v1350_v21 = vrot.slane %v15875_v24, 4  ;;  %v1770_v24 = vrot.slane %v15466_v6, 4 }
 0x31a   : > { %v1764_v60 = vrot.slane %v1749_v61, 4 }
 0x31b   : > { %v1751_v15 = vsel %vm314_vm0, %v1750_v17, %v1727_v0 }
 0x31c   : > { %6810 = vxpose.xlu2.b32.start.end [1/1] (short) (narrow) %v1301_v33, 8  ;;  %v16265_v57 = vpop.trf.xlu1  ;;  %v16288_v12 = vperm.slane %v1751_v15, %v14989_v14  ;;  %v1752_v33 = vrot.slane %v1727_v0, 4  ;;  %v1765_v2 = vsel %vm314_vm0, 0.0, %v1764_v60  ;;  %v1780_v0 = vrot.slane %v15404_v37, 4 }
 0x31d   : > { %19698 = vst [vmem:[#allocation128_spill] sm:$0xff] %v16265_v57  ;;  %v16267_v4 = vpop.trf.xlu2  ;;  %v16276_v44 = vpop.trf.xlu0  ;;  %v1351_v57 = vsel %vm314_vm0, 0.0, %v1350_v21 }
 0x31e   : > { %19699 = vst [vmem:[#allocation129_spill] sm:$0xff] %v16276_v44  ;;  %v1753_v15 = vsel %vm314_vm0, %v1737_v43, %v1752_v33  ;;  %v1781_v37 = vsel %vm314_vm0, 0.0, %v1780_v0  ;;  %v1771_v33 = vsel %vm314_vm0, 0.0, %v1770_v24  ;;  %v1400_v24 = vrot.slane %v15911_v41, 4 }
 0x31f   : > { %8858 = vxpose.xlu0.b32.start.end [1/1] (short) (narrow) %v1717_v9, 8  ;;  %v1790_v9 = vrot.slane %v1785_v45, 4  ;;  %v1832_v41 = vrot.slane %v15433_v31, 4 }
 0x320   : > { %8890 = vxpose.xlu1.b32.start.end [1/1] (short) (narrow) %v16271_v1, 8 }
 0x324   : > { %6906 = vxpose.xlu2.b32.start.end [1/1] (short) (narrow) %v15857_v56, 8  ;;  %v16283_v40 = vpop.trf.xlu1  ;;  %v1775_v56 = vperm.slane %v15466_v6, %v14986_v8  ;;  %v1789_v6 = vperm.slane %v1781_v37, %v14986_v8 }
 0x325   : > { %19700 = vst [vmem:[#allocation130_spill] sm:$0xff] %v16283_v40  ;;  %v16285_v16 = vpop.trf.xlu2  ;;  %v16292_v17 = vpop.trf.xlu0  ;;  %v1766_v40 = vrot.slane %v16288_v12, 4 }
 0x326   : > { %19701 = vst [vmem:[#allocation131_spill] sm:$0xff] %v16285_v16  ;;  %v1792_v16 = vrot.slane %v1775_v56, 4  ;;  %v1802_v0 = vrot.slane %v1789_v6, 4 }
 0x327   : > { %8954 = vxpose.xlu0.b32.start.end [1/1] (short) (narrow) %v1749_v61, 8  ;;  %19702 = vst [vmem:[#allocation132_spill] sm:$0xff] %v16292_v17  ;;  %v1791_v61 = vsel %vm314_vm0, %v1790_v9, %v1775_v56  ;;  %v16307_v17 = vperm.slane %v1753_v15, %v14989_v14  ;;  %v1767_v44 = vsel %vm314_vm0, 0.0, %v1766_v40  ;;  %v1779_v15 = vperm.slane %v1771_v33, %v14986_v8 }
 0x328   : > { %8986 = vxpose.xlu1.b32.start.end [1/1] (short) (narrow) %v1765_v2, 8  ;;  %v1797_v43 = vperm.slane %v1791_v61, %v14989_v14  ;;  %v1793_v9 = vsel %vm314_vm0, %v1785_v45, %v1792_v16  ;;  %v1401_v33 = vsel %vm314_vm0, 0.0, %v1400_v24 }
 0x329   : > { %v16325_v56 = vperm.slane %v1793_v9, %v14989_v14  ;;  %v1804_v37 = vrot.slane %v1779_v15, 4  ;;  %v1803_v9 = vsel %vm314_vm0, %v1802_v0, %v1779_v15  ;;  %v1822_v0 = vrot.slane %v15499_v48, 4 }
 0x32a   : > { %v1814_v21 = vrot.slane %v1797_v43, 4 }
 0x32b   : > { %v1816_v16 = vrot.slane %v16325_v56, 4 }
 0x32c   : > { %7002 = vxpose.xlu2.b32.start.end [1/1] (short) (narrow) %v1351_v57, 8  ;;  %v16301_v60 = vpop.trf.xlu1  ;;  %v1815_v61 = vsel %vm314_vm0, 0.0, %v1814_v21 }
 0x32d   : > { %19703 = vst [vmem:[#allocation133_spill] sm:$0xff] %v16301_v60  ;;  %v16304_v2 = vpop.trf.xlu2  ;;  %v16313_v57 = vpop.trf.xlu0 }
 0x32e   : > { %19704 = vst [vmem:[#allocation134_spill] sm:$0xff] %v16313_v57  ;;  %v1817_v57 = vsel %vm314_vm0, 0.0, %v1816_v16 }
 0x32f   : > { %9050 = vxpose.xlu0.b32.start.end [1/1] (short) (narrow) %v1767_v44, 8 }
 0x330   : > { %9082 = vxpose.xlu1.b32.start.end [1/1] (short) (narrow) %v16307_v17, 8 }
 0x334   : > { %7098 = vxpose.xlu2.b32.start.end [1/1] (short) (narrow) %v15894_v18, 8  ;;  %v16320_v44 = vpop.trf.xlu1  ;;  %v1837_v18 = vperm.slane %v15433_v31, %v14986_v8  ;;  %v1827_v31 = vperm.slane %v15499_v48, %v14986_v8  ;;  %v1450_v48 = vrot.slane %v15949_v26, 4 }
 0x335   : > { %19705 = vst [vmem:[#allocation135_spill] sm:$0xff] %v16320_v44  ;;  %v16322_v40 = vpop.trf.xlu2  ;;  %v16329_v45 = vpop.trf.xlu0  ;;  %v1805_v44 = vsel %vm314_vm0, %v1789_v6, %v1804_v37  ;;  %v1833_v6 = vsel %vm314_vm0, 0.0, %v1832_v41  ;;  %v1823_v41 = vsel %vm314_vm0, 0.0, %v1822_v0 }
 0x336   : > { %19706 = vst [vmem:[#allocation136_spill] sm:$0xff] %v16329_v45  ;;  %v1842_v60 = vrot.slane %v1837_v18, 4  ;;  %v1813_v24 = vperm.slane %v1805_v44, %v14989_v14  ;;  %v1841_v16 = vperm.slane %v1833_v6, %v14986_v8  ;;  %v1451_v45 = vsel %vm314_vm0, 0.0, %v1450_v48 }
 0x337   : > { %9146 = vxpose.xlu0.b32.start.end [1/1] (short) (narrow) %v1797_v43, 8 }
 0x338   : > { %9178 = vxpose.xlu1.b32.start.end [1/1] (short) (narrow) %v1815_v61, 8  ;;  %v16343_v61 = vperm.slane %v1803_v9, %v14989_v14  ;;  %v1820_v37 = vrot.slane %v1813_v24, 4 }
 0x33c   : > { %7194 = vxpose.xlu2.b32.start.end [1/1] (short) (narrow) %v1401_v33, 8  ;;  %v16337_v21 = vpop.trf.xlu1  ;;  %v1843_v33 = vsel %vm314_vm0, %v1842_v60, %v1827_v31  ;;  %v1854_v60 = vrot.slane %v1841_v16, 4 }
 0x33d   : > { %19707 = vst [vmem:[#allocation137_spill] sm:$0xff] %v16337_v21  ;;  %v16340_v43 = vpop.trf.xlu2  ;;  %v16348_v15 = vpop.trf.xlu0  ;;  %v16362_v9 = vperm.slane %v1843_v33, %v14989_v14  ;;  %v1844_v21 = vrot.slane %v1827_v31, 4 }
 0x33e   : > { %19708 = vst [vmem:[#allocation138_spill] sm:$0xff] %v16348_v15  ;;  %v1821_v15 = vsel %vm314_vm0, 0.0, %v1820_v37 }
 0x33f   : > { %9242 = vxpose.xlu0.b32.start.end [1/1] (short) (narrow) %v1817_v57, 8  ;;  %v1845_v33 = vsel %vm314_vm0, %v1837_v18, %v1844_v21 }
 0x340   : > { %9274 = vxpose.xlu1.b32.start.end [1/1] (short) (narrow) %v16343_v61, 8  ;;  %v16379_v26 = vperm.slane %v1845_v33, %v14989_v14  ;;  %v1879_v33 = vperm.slane %v15517_v22, %v14986_v8 }
 0x344   : > { %7290 = vxpose.xlu2.b32.start.end [1/1] (short) (narrow) %v15930_v50, 8  ;;  %v16357_v57 = vpop.trf.xlu1  ;;  %v1831_v50 = vperm.slane %v1823_v41, %v14986_v8 }
 0x345   : > { %19709 = vst [vmem:[#allocation139_spill] sm:$0xff] %v16357_v57  ;;  %v16359_v44 = vpop.trf.xlu2  ;;  %v16367_v6 = vpop.trf.xlu0  ;;  %v1866_v57 = vrot.slane %v16362_v9, 4 }
 0x346   : > { %19710 = vst [vmem:[#allocation140_spill] sm:$0xff] %v16367_v6  ;;  %v1855_v31 = vsel %vm314_vm0, %v1854_v60, %v1831_v50  ;;  %v1856_v37 = vrot.slane %v1831_v50, 4  ;;  %v1884_v60 = vrot.slane %v15452_v25, 4 }
 0x347   : > { %9338 = vxpose.xlu0.b32.start.end [1/1] (short) (narrow) %v1813_v24, 8  ;;  %v1861_v41 = vperm.slane %v1855_v31, %v14989_v14 }
 0x348   : > { %9370 = vxpose.xlu1.b32.start.end [1/1] (short) (narrow) %v1821_v15, 8  ;;  %v1867_v15 = vsel %vm314_vm0, 0.0, %v1866_v57  ;;  %v1857_v21 = vsel %vm314_vm0, %v1841_v16, %v1856_v37  ;;  %v1456_v16 = vrot.slane %v15985_v28, 4  ;;  %v1896_v37 = vrot.slane %v1879_v33, 4 }
 0x349   : > { %v1870_v18 = vrot.slane %v1861_v41, 4  ;;  %v16398_v31 = vperm.slane %v1857_v21, %v14989_v14 }
 0x34a   : > { %v1457_v21 = vsel %vm314_vm0, 0.0, %v1456_v16 }
 0x34c   : > { %7386 = vxpose.xlu2.b32.start.end [1/1] (short) (narrow) %v1451_v45, 8  ;;  %v16374_v0 = vpop.trf.xlu1  ;;  %v1889_v45 = vperm.slane %v15452_v25, %v14986_v8  ;;  %v1885_v25 = vsel %vm314_vm0, 0.0, %v1884_v60 }
 0x34d   : > { %19711 = vst [vmem:[#allocation141_spill] sm:$0xff] %v16374_v0  ;;  %v16376_v24 = vpop.trf.xlu2  ;;  %v16384_v48 = vpop.trf.xlu0  ;;  %v1871_v0 = vsel %vm314_vm0, 0.0, %v1870_v18  ;;  %v1893_v6 = vperm.slane %v1885_v25, %v14986_v8 }
 0x34e   : > { %19712 = vst [vmem:[#allocation142_spill] sm:$0xff] %v16376_v24 }
 0x34f   : > { %9434 = vxpose.xlu0.b32.start.end [1/1] (short) (narrow) %v1867_v15, 8  ;;  %19713 = vst [vmem:[#allocation143_spill] sm:$0xff] %v16384_v48  ;;  %v1894_v15 = vrot.slane %v1889_v45, 4 }
 0x350   : > { %9466 = vxpose.xlu1.b32.start.end [1/1] (short) (narrow) %v16379_v26, 8 }
 0x351   : > { %v1895_v24 = vsel %vm314_vm0, %v1894_v15, %v1879_v33 }
 0x352   : > { %v16417_v60 = vperm.slane %v1895_v24, %v14989_v14 }
 0x354   : > { %7482 = vxpose.xlu2.b32.start.end [1/1] (short) (narrow) %v15966_v63, 8  ;;  %v16393_v57 = vpop.trf.xlu1  ;;  %v1874_v63 = vrot.slane %v15517_v22, 4 }
 0x355   : > { %19714 = vst [vmem:[#allocation144_spill] sm:$0xff] %v16393_v57  ;;  %v16395_v50 = vpop.trf.xlu2  ;;  %v16403_v48 = vpop.trf.xlu0  ;;  %v1872_v57 = vrot.slane %v16398_v31, 4 }
 0x356   : > { %19715 = vst [vmem:[#allocation145_spill] sm:$0xff] %v16403_v48  ;;  %v1906_v48 = vrot.slane %v1893_v6, 4 }
 0x357   : > { %9530 = vxpose.xlu0.b32.start.end [1/1] (short) (narrow) %v1861_v41, 8  ;;  %v1897_v41 = vsel %vm314_vm0, %v1889_v45, %v1896_v37  ;;  %v1873_v22 = vsel %vm314_vm0, 0.0, %v1872_v57  ;;  %v1941_v37 = vperm.slane %v15486_v13, %v14986_v8 }
 0x358   : > { %9562 = vxpose.xlu1.b32.start.end [1/1] (short) (narrow) %v1871_v0, 8  ;;  %v1875_v0 = vsel %vm314_vm0, 0.0, %v1874_v63  ;;  %v1905_v16 = vperm.slane %v1897_v41, %v14989_v14 }
 0x359   : > { %v1883_v45 = vperm.slane %v1875_v0, %v14986_v8  ;;  %v1506_v0 = vrot.slane %v16021_v62, 4  ;;  %v1926_v62 = vrot.slane %v15535_v3, 4 }
 0x35a   : > { %v1920_v15 = vrot.slane %v1905_v16, 4 }
 0x35b   : > { %v1907_v25 = vsel %vm314_vm0, %v1906_v48, %v1883_v45 }
 0x35c   : > { %7578 = vxpose.xlu2.b32.start.end [1/1] (short) (narrow) %v1457_v21, 8  ;;  %v16411_v28 = vpop.trf.xlu1  ;;  %v16434_v63 = vperm.slane %v1907_v25, %v14989_v14  ;;  %v1908_v21 = vrot.slane %v1883_v45, 4  ;;  %v1921_v41 = vsel %vm314_vm0, 0.0, %v1920_v15  ;;  %v1936_v45 = vrot.slane %v15486_v13, 4 }
 0x35d   : > { %19716 = vst [vmem:[#allocation146_spill] sm:$0xff] %v16411_v28  ;;  %v16413_v18 = vpop.trf.xlu2  ;;  %v16422_v33 = vpop.trf.xlu0  ;;  %v1507_v28 = vsel %vm314_vm0, 0.0, %v1506_v0 }
 0x35e   : > { %19717 = vst [vmem:[#allocation147_spill] sm:$0xff] %v16422_v33  ;;  %v1909_v25 = vsel %vm314_vm0, %v1893_v6, %v1908_v21  ;;  %v1937_v13 = vsel %vm314_vm0, 0.0, %v1936_v45  ;;  %v1927_v21 = vsel %vm314_vm0, 0.0, %v1926_v62 }
 0x35f   : > { %9626 = vxpose.xlu0.b32.start.end [1/1] (short) (narrow) %v1873_v22, 8  ;;  %v1946_v22 = vrot.slane %v1941_v37, 4 }
 0x360   : > { %9658 = vxpose.xlu1.b32.start.end [1/1] (short) (narrow) %v16417_v60, 8 }
 0x364   : > { %7674 = vxpose.xlu2.b32.start.end [1/1] (short) (narrow) %v16003_v51, 8  ;;  %v16429_v24 = vpop.trf.xlu1  ;;  %v1931_v51 = vperm.slane %v15535_v3, %v14986_v8  ;;  %v1945_v3 = vperm.slane %v1937_v13, %v14986_v8  ;;  %v1556_v13 = vrot.slane %v16055_v52, 4 }
 0x365   : > { %19718 = vst [vmem:[#allocation148_spill] sm:$0xff] %v16429_v24  ;;  %v16431_v57 = vpop.trf.xlu2  ;;  %v16438_v48 = vpop.trf.xlu0  ;;  %v1922_v24 = vrot.slane %v16434_v63, 4 }
 0x366   : > { %19719 = vst [vmem:[#allocation149_spill] sm:$0xff] %v16431_v57  ;;  %v1948_v57 = vrot.slane %v1931_v51, 4 }
 0x367   : > { %9722 = vxpose.xlu0.b32.start.end [1/1] (short) (narrow) %v1905_v16, 8  ;;  %19720 = vst [vmem:[#allocation150_spill] sm:$0xff] %v16438_v48  ;;  %v1947_v16 = vsel %vm314_vm0, %v1946_v22, %v1931_v51  ;;  %v16453_v48 = vperm.slane %v1909_v25, %v14989_v14  ;;  %v1923_v33 = vsel %vm314_vm0, 0.0, %v1922_v24  ;;  %v1935_v25 = vperm.slane %v1927_v21, %v14986_v8 }
 0x368   : > { %9754 = vxpose.xlu1.b32.start.end [1/1] (short) (narrow) %v1921_v41, 8  ;;  %v1953_v6 = vperm.slane %v1947_v16, %v14989_v14  ;;  %v1949_v22 = vsel %vm314_vm0, %v1941_v37, %v1948_v57  ;;  %v10816_v24 = vrot.slane %v16183_v23, 4  ;;  %v1958_v16 = vrot.slane %v1945_v3, 4 }
 0x369   : > { %v16472_v45 = vperm.slane %v1949_v22, %v14989_v14  ;;  %v1960_v37 = vrot.slane %v1935_v25, 4  ;;  %v1557_v22 = vsel %vm314_vm0, 0.0, %v1556_v13  ;;  %v10822_v13 = vrot.slane %v16202_v42, 4 }
 0x36a   : > { %v1970_v0 = vrot.slane %v1953_v6, 4  ;;  %v10817_v57 = vsel %vm314_vm0, %v10816_v24, %v16095_v29 }
 0x36b   : > { %v10821_v21 = vperm.slane %v10817_v57, %v14986_v8 }
 0x36c   : > { %7770 = vxpose.xlu2.b32.start.end [1/1] (short) (narrow) %v1507_v28, 8  ;;  %v16447_v15 = vpop.trf.xlu1  ;;  %v1971_v62 = vsel %vm314_vm0, 0.0, %v1970_v0 }
 0x36d   : > { %19721 = vst [vmem:[#allocation151_spill] sm:$0xff] %v16447_v15  ;;  %v16450_v41 = vpop.trf.xlu2  ;;  %v16459_v28 = vpop.trf.xlu0 }
 0x36e   : > { %19722 = vst [vmem:[#allocation152_spill] sm:$0xff] %v16459_v28 }
 0x36f   : > { %9818 = vxpose.xlu0.b32.start.end [1/1] (short) (narrow) %v1923_v33, 8 }
 0x370   : > { %9850 = vxpose.xlu1.b32.start.end [1/1] (short) (narrow) %v16453_v48, 8 }
 0x374   : > { %7866 = vxpose.xlu2.b32.start.end [1/1] (short) (narrow) %v16040_v35, 8  ;;  %v16467_v33 = vpop.trf.xlu1  ;;  %v1972_v35 = vrot.slane %v16472_v45, 4 }
 0x375   : > { %19723 = vst [vmem:[#allocation153_spill] sm:$0xff] %v16467_v33  ;;  %v16469_v51 = vpop.trf.xlu2  ;;  %v16478_v23 = vpop.trf.xlu0  ;;  %v1959_v33 = vsel %vm314_vm0, %v1958_v16, %v1935_v25 }
 0x376   : > { %19724 = vst [vmem:[#allocation154_spill] sm:$0xff] %v16478_v23  ;;  %v16488_v29 = vperm.slane %v1959_v33, %v14989_v14  ;;  %v1973_v24 = vsel %vm314_vm0, 0.0, %v1972_v35  ;;  %v10828_v33 = vrot.slane %v16151_v59, 4 }
 0x377   : > { %9914 = vxpose.xlu0.b32.start.end [1/1] (short) (narrow) %v1953_v6, 8  ;;  %v1961_v6 = vsel %vm314_vm0, %v1945_v3, %v1960_v37 }
 0x378   : > { %9946 = vxpose.xlu1.b32.start.end [1/1] (short) (narrow) %v1971_v62, 8  ;;  %v10834_v62 = vrot.slane %v10821_v21, 4  ;;  %v1969_v57 = vperm.slane %v1961_v6, %v14989_v14  ;;  %v10823_v21 = vsel %vm314_vm0, %v10822_v13, %v16118_v20 }
 0x379   : > { %v10827_v6 = vperm.slane %v10823_v21, %v14986_v8 }
 0x37a   : > { %v1976_v35 = vrot.slane %v1969_v57, 4 }
 0x37c   : > { %7962 = vxpose.xlu2.b32.start.end [1/1] (short) (narrow) %v1557_v22, 8  ;;  %v16485_v0 = vpop.trf.xlu1  ;;  %v1977_v59 = vsel %vm314_vm0, 0.0, %v1976_v35 }
 0x37d   : > { %19725 = vst [vmem:[#allocation155_spill] sm:$0xff] %v16485_v0  ;;  %v6154_v52 = vpop.trf.xlu2  ;;  %v16496_v3 = vpop.trf.xlu0 }
 0x37e   : > { %v10810_v28 = vrot.slane %v6154_v52, 4  ;;  %19726 = vst [vmem:[#allocation156_spill] sm:$0xff] %v16496_v3  ;;  %v19751_v3 = vld [vmem:[#allocation37_spill] sm:$0xff] }
 0x37f   : > { %10010 = vxpose.xlu0.b32.start.end [1/1] (short) (narrow) %v1973_v24, 8  ;;  %v1606_v24 = vrot.slane %v16101_v58, 4 }
 0x380   : > { %v10811_v25 = vsel %vm314_vm0, %v10810_v28, %v16167_v10  ;;  %10042 = vxpose.xlu1.b32.start.end [1/1] (short) (narrow) %v16488_v29, 8 }
 0x381   : > { %v10815_v16 = vperm.slane %v10811_v25, %v14986_v8  ;;  %v1607_v25 = vsel %vm314_vm0, 0.0, %v1606_v24 }
 0x383   : > { %v10835_v37 = vsel %vm314_vm0, %v10834_v62, %v10815_v16 }
 0x384   : > { %8058 = vxpose.xlu2.b32.start.end [1/1] (short) (narrow) %v16075_v55, 8  ;;  %v16504_v42 = vpop.trf.xlu1  ;;  %v10839_v10 = vperm.slane %v10835_v37, %v14989_v14 }
 0x385   : > { %v6250_v22 = vpop.trf.xlu2  ;;  %v16512_v20 = vpop.trf.xlu0 }
 0x386   : > { %v10829_v28 = vsel %vm314_vm0, %v10828_v33, %v6250_v22  ;;  %19727 = vst [vmem:[#allocation157_spill] sm:$0xff] %v16512_v20  ;;  %v10848_v62 = vrot.slane %v10839_v10, 4  ;;  %v19746_v20 = vld [vmem:[#allocation40_spill] sm:$0xff] }
 0x387   : > { %v10833_v52 = vperm.slane %v10829_v28, %v14986_v8  ;;  %10106 = vxpose.xlu0.b32.start.end [1/1] (short) (narrow) %v1969_v57, 8 }
 0x388   : > { %10138 = vxpose.xlu1.b32.start.end [1/1] (short) (narrow) %v1977_v59, 8 }
 0x389   : > { %v10840_v55 = vrot.slane %v10833_v52, 4 }
 0x38b   : > { %v10841_v13 = vsel %vm314_vm0, %v10840_v55, %v10827_v6 }
 0x38c   : > { %v10845_v16 = vperm.slane %v10841_v13, %v14989_v14  ;;  %8154 = vxpose.xlu2.b32.start.end [1/1] (short) (narrow) %v1607_v25, 8  ;;  %v16517_v33 = vpop.trf.xlu1 }
 0x38d   : > { %v16519_v37 = vpop.trf.xlu2  ;;  %v16531_v22 = vpop.trf.xlu0 }
 0x38e   : > { %v10846_v35 = vrot.slane %v10845_v16, 4  ;;  %v16522_v57 = vsel %vm314_vm0, %v10845_v16, %v10848_v62  ;;  %19728 = vst [vmem:[#allocation158_spill] sm:$0xff] %v16531_v22  ;;  %v1712_v22 = vrot.slane %v16233_v39, 4 }
 0x38f   : > { %v16526_v58 = vperm.slane %v16522_v57, %v14986_v8 }
 0x390   : > { %v16529_v21 = vsel %vm314_vm0, %v10846_v35, %v10839_v10  ;;  %v1612_v10 = vrot.slane %v16161_v30, 4  ;;  %v1713_v0 = vsel %vm314_vm0, 0.0, %v1712_v22 }
 0x391   : > { %v16535_v28 = vperm.slane %v16529_v21, %v14986_v8  ;;  %v12302_v6 = vrot.slane %v16526_v58, 4 }
 0x392   : > { %v1613_v62 = vsel %vm314_vm0, 0.0, %v1612_v10 }
 0x393   : > { %v16543_v59 = vsel %vm314_vm0, %v12302_v6, %v16535_v28  ;;  %v1662_v6 = vrot.slane %v16197_v11, 4 }
 0x394   : > { %8250 = vxpose.xlu2.b32.start.end [1/1] (short) (narrow) %v16123_v5, 8  ;;  %v16539_v52 = vpop.trf.xlu1  ;;  %19729 = vst [vmem:[#allocation159_spill] sm:$0xff] %v16543_v59 }
 0x395   : > { %v16545_v24 = vpop.trf.xlu2  ;;  %v16548_v55 = vpop.trf.xlu0  ;;  %v1663_v59 = vsel %vm314_vm0, 0.0, %v1662_v6 }
 0x396   : > { %19730 = vst [vmem:[#allocation160_spill] sm:$0xff] %v16548_v55 }
 0x39c   : > { %8346 = vxpose.xlu2.b32.start.end [1/1] (short) (narrow) %v1613_v62, 8  ;;  %v16551_v13 = vpop.trf.xlu1 }
 0x39d   : > { %19731 = vst [vmem:[#allocation161_spill] sm:$0xff] %v16551_v13  ;;  %v16553_v25 = vpop.trf.xlu2  ;;  %v16555_v5 = vpop.trf.xlu0 }
 0x3a4   : > { %8442 = vxpose.xlu2.b32.start.end [1/1] (short) (narrow) %v16179_v46, 8  ;;  %v16558_v16 = vpop.trf.xlu1 }
 0x3a5   : > { %19732 = vst [vmem:[#allocation162_spill] sm:$0xff] %v16558_v16  ;;  %v16560_v35 = vpop.trf.xlu2  ;;  %v16563_v30 = vpop.trf.xlu0 }
 0x3ac   : > { %8538 = vxpose.xlu2.b32.start.end [1/1] (short) (narrow) %v1663_v59, 8  ;;  %v16566_v10 = vpop.trf.xlu1 }
 0x3ad   : > { %19733 = vst [vmem:[#allocation163_spill] sm:$0xff] %v16566_v10  ;;  %v16568_v62 = vpop.trf.xlu2  ;;  %v16570_v13 = vpop.trf.xlu0 }
 0x3ae   : > { %19734 = vst [vmem:[#allocation164_spill] sm:$0xff] %v16568_v62 }
 0x3af   : > { %19735 = vst [vmem:[#allocation165_spill] sm:$0xff] %v16570_v13 }
 0x3b4   : > { %8634 = vxpose.xlu2.b32.start.end [1/1] (short) (narrow) %v16216_v19, 8  ;;  %v16573_v46 = vpop.trf.xlu1 }
 0x3b5   : > { %19736 = vst [vmem:[#allocation166_spill] sm:$0xff] %v16573_v46  ;;  %v16575_v16 = vpop.trf.xlu2  ;;  %v16578_v11 = vpop.trf.xlu0  ;;  %v1762_v46 = vrot.slane %v16271_v1, 4  ;;  %v11472_v1 = vrot.slane %v19746_v20, 4 }
 0x3b6   : > { %19737 = vst [vmem:[#allocation167_spill] sm:$0xff] %v16575_v16 }
 0x3b7   : > { %19738 = vst [vmem:[#allocation168_spill] sm:$0xff] %v16578_v11  ;;  %v1763_v39 = vsel %vm314_vm0, 0.0, %v1762_v46  ;;  %v10222_v46 = vrot.slane %v15548_v34, 4 }
 0x3bc   : > { %8730 = vxpose.xlu2.b32.start.end [1/1] (short) (narrow) %v1713_v0, 8  ;;  %v16583_v6 = vpop.trf.xlu1  ;;  %v10216_v0 = vrot.slane %v15489_v49, 4 }
 0x3bd   : > { %v16581_v59 = vpop.trf.xlu2  ;;  %19740 = vst [vmem:[#allocation170_spill] sm:$0xff] %v16583_v6  ;;  %v16586_v13 = vpop.trf.xlu0  ;;  %v10228_v6 = vrot.slane %v15565_v27, 4  ;;  %v19750_v27 = vld [vmem:[#allocation36_spill] sm:$0xff] }
 0x3be   : > { %19739 = vst [vmem:[#allocation169_spill] sm:$0xff] %v16581_v59 }
 0x3bf   : > { %19741 = vst [vmem:[#allocation171_spill] sm:$0xff] %v16586_v13  ;;  %v10217_v13 = vsel %vm314_vm0, %v10216_v0, %v15435_v47  ;;  %v11460_v47 = vrot.slane %v19751_v3, 4  ;;  %v19752_v0 = vld [vmem:[#allocation39_spill] sm:$0xff] }
 0x3c0   : > { %v10221_v49 = vperm.slane %v10217_v13, %v14986_v8  ;;  %v11473_v20 = vsel %vm314_vm0, %v19752_v0, %v11472_v1 }
 0x3c1   : > { %v16626_v23 = vperm.slane %v11473_v20, %v14989_v14 }
 0x3c2   : > { %v10234_v15 = vrot.slane %v10221_v49, 4 }
 0x3c3   : > { %v11496_v49 = vrot.slane %v16626_v23, 4 }
 0x3c4   : > { %8826 = vxpose.xlu2.b32.start.end [1/1] (short) (narrow) %v16252_v54, 8  ;;  %v16591_v10 = vpop.trf.xlu1  ;;  %v10210_v54 = vrot.slane %v15454_v7, 4 }
 0x3c5   : > { %v16588_v19 = vpop.trf.xlu2  ;;  %19743 = vst [vmem:[#allocation173_spill] sm:$0xff] %v16591_v10  ;;  %v16597_v22 = vpop.trf.xlu0 }
 0x3c6   : > { %19742 = vst [vmem:[#allocation172_spill] sm:$0xff] %v16588_v19  ;;  %v10211_v7 = vsel %vm314_vm0, %v10210_v54, %v19750_v27  ;;  %v19755_v54 = vld [vmem:[#allocation38_spill] sm:$0xff]  ;;  %v11461_v27 = vsel %vm314_vm0, 0.0, %v11460_v47 }
 0x3c7   : > { %19745 = vst [vmem:[#allocation175_spill] sm:$0xff] %v16597_v22  ;;  %v10215_v13 = vperm.slane %v10211_v7, %v14986_v8  ;;  %v11450_v3 = vrot.slane %v19755_v54, 4  ;;  %v11469_v7 = vperm.slane %v11461_v27, %v14986_v8 }
 0x3c9   : > { %v11451_v20 = vsel %vm314_vm0, 0.0, %v11450_v3  ;;  %v10268_v3 = vrot.slane %v15671_v38, 4 }
 0x3ca   : > { %v11459_v54 = vperm.slane %v11451_v20, %v14986_v8 }
 0x3cc   : > { %8922 = vxpose.xlu2.b32.start.end [1/1] (short) (narrow) %v1763_v39, 8  ;;  %v16604_v55 = vpop.trf.xlu1  ;;  %v19748_v39 = vld [vmem:[#allocation45_spill] sm:$0xff] }
 0x3cd   : > { %v16594_v11 = vpop.trf.xlu2  ;;  %19747 = vst [vmem:[#allocation40_spill] sm:$0xff] %v16604_v55  ;;  %v10229_v10 = vsel %vm314_vm0, %v10228_v6, %v19748_v39  ;;  %v16618_v55 = vpop.trf.xlu0  ;;  %v1768_v6 = vrot.slane %v16307_v17, 4  ;;  %v19754_v39 = vld [vmem:[#allocation43_spill] sm:$0xff] }
 0x3ce   : > { %19744 = vst [vmem:[#allocation174_spill] sm:$0xff] %v16594_v11  ;;  %v10233_v34 = vperm.slane %v10229_v10, %v14986_v8 }
 0x3cf   : > { %19753 = vst [vmem:[#allocation36_spill] sm:$0xff] %v16618_v55  ;;  %v1769_v10 = vsel %vm314_vm0, 0.0, %v1768_v6  ;;  %v11497_v6 = vsel %vm314_vm0, 0.0, %v11496_v49  ;;  %v19762_v55 = vld [vmem:[#allocation47_spill] sm:$0xff] }
 0x3d0   : > { %v10240_v0 = vrot.slane %v10233_v34, 4 }
 0x3d4   : > { %9018 = vxpose.xlu2.b32.start.end [1/1] (short) (narrow) %v16288_v12, 8  ;;  %v10223_v12 = vsel %vm314_vm0, %v10222_v46, %v19754_v39  ;;  %v16632_v17 = vpop.trf.xlu1  ;;  %v10235_v46 = vsel %vm314_vm0, %v10234_v15, %v10215_v13  ;;  %v10256_v13 = vrot.slane %v15599_v32, 4  ;;  %v1818_v32 = vrot.slane %v16343_v61, 4 }
 0x3d5   : > { %v16611_v22 = vpop.trf.xlu2  ;;  %v10227_v1 = vperm.slane %v10223_v12, %v14986_v8  ;;  %19756 = vst [vmem:[#allocation37_spill] sm:$0xff] %v16632_v17  ;;  %v10239_v12 = vperm.slane %v10235_v46, %v14989_v14  ;;  %v16642_v34 = vpop.trf.xlu0 }
 0x3d6   : > { %19749 = vst [vmem:[#allocation45_spill] sm:$0xff] %v16611_v22 }
 0x3d7   : > { %v10241_v47 = vsel %vm314_vm0, %v10240_v0, %v10227_v1  ;;  %19758 = vst [vmem:[#allocation43_spill] sm:$0xff] %v16642_v34  ;;  %v10248_v27 = vrot.slane %v10239_v12, 4  ;;  %v19764_v34 = vld [vmem:[#allocation62_spill] sm:$0xff] }
 0x3d8   : > { %v10245_v15 = vperm.slane %v10241_v47, %v14989_v14  ;;  %v19761_v47 = vld [vmem:[#allocation42_spill] sm:$0xff] }
 0x3d9   : > { %v10250_v17 = vrot.slane %v19761_v47, 4 }
 0x3da   : > { %v10246_v46 = vrot.slane %v10245_v15, 4  ;;  %v10249_v49 = vsel %vm314_vm0, %v10245_v15, %v10248_v27  ;;  %v11484_v15 = vrot.slane %v11459_v54, 4 }
 0x3db   : > { %v11517_v27 = vperm.slane %v10249_v49, %v14986_v8 }
 0x3dc   : > { %9114 = vxpose.xlu2.b32.start.end [1/1] (short) (narrow) %v1769_v10, 8  ;;  %v11482_v10 = vrot.slane %v11469_v7, 4  ;;  %v16655_v20 = vpop.trf.xlu1  ;;  %v10247_v61 = vsel %vm314_vm0, %v10246_v46, %v10239_v12 }
 0x3dd   : > { %v16635_v39 = vpop.trf.xlu2  ;;  %19760 = vst [vmem:[#allocation176_spill] sm:$0xff] %v16655_v20  ;;  %v16664_v38 = vpop.trf.xlu0  ;;  %v11507_v20 = vperm.slane %v10247_v61, %v14986_v8 }
 0x3de   : > { %19757 = vst [vmem:[#allocation39_spill] sm:$0xff] %v16635_v39  ;;  %v11483_v0 = vsel %vm314_vm0, %v11482_v10, %v11459_v54  ;;  %v19765_v10 = vld [vmem:[#allocation59_spill] sm:$0xff] }
 0x3df   : > { %19763 = vst [vmem:[#allocation42_spill] sm:$0xff] %v16664_v38  ;;  %v10269_v39 = vsel %vm314_vm0, %v10268_v3, %v19765_v10  ;;  %v19767_v3 = vld [vmem:[#allocation56_spill] sm:$0xff]  ;;  %v11522_v38 = vrot.slane %v11517_v27, 4 }
 0x3e2   : > { %13123 = vrot.lane.b32.xlu1 %v11497_v6, %s19372_s16  ;;  %v10257_v6 = vsel %vm314_vm0, %v10256_v13, %v19762_v55  ;;  %v19766_v55 = vld [vmem:[#allocation51_spill] sm:$0xff] }
 0x3e3   : > { %v10261_v47 = vperm.slane %v10257_v6, %v14986_v8  ;;  %v10251_v13 = vsel %vm314_vm0, %v10250_v17, %v19766_v55  ;;  %v11485_v6 = vsel %vm314_vm0, %v11469_v7, %v11484_v15  ;;  %v11502_v15 = vrot.slane %v10247_v61, 4 }
 0x3e4   : > { %9210 = vxpose.xlu2.b32.start.end [1/1] (short) (narrow) %v16325_v56, 8  ;;  %v16662_v56 = vperm.slane %v11483_v0, %v14989_v14  ;;  %v1819_v0 = vsel %vm314_vm0, 0.0, %v1818_v32  ;;  %v10255_v12 = vperm.slane %v10251_v13, %v14986_v8  ;;  %v16687_v32 = vperm.slane %v11485_v6, %v14989_v14 }
 0x3e5   : > { %v16651_v1 = vpop.trf.xlu2  ;;  %v10274_v46 = vrot.slane %v10261_v47, 4  ;;  %v11524_v47 = vrot.slane %v11507_v20, 4 }
 0x3e6   : > { %19759 = vst [vmem:[#allocation38_spill] sm:$0xff] %v16651_v1  ;;  %v10262_v1 = vrot.slane %v19764_v34, 4  ;;  %v10273_v34 = vperm.slane %v10269_v39, %v14986_v8  ;;  %v16689_v39 = vpop.trf.xlu1 }
 0x3e7   : > { %19769 = vst [vmem:[#allocation62_spill] sm:$0xff] %v16689_v39  ;;  %v10275_v7 = vsel %vm314_vm0, %v10274_v46, %v10255_v12 }
 0x3e8   : > { %v10263_v54 = vsel %vm314_vm0, %v10262_v1, %v19767_v3  ;;  %v10280_v55 = vrot.slane %v10273_v34, 4  ;;  %v11512_v1 = vrot.slane %v10249_v49, 4  ;;  %v11523_v3 = vsel %vm314_vm0, %v11522_v38, %v11507_v20 }
 0x3e9   : > { %v10267_v17 = vperm.slane %v10263_v54, %v14986_v8  ;;  %v11529_v34 = vperm.slane %v11523_v3, %v14989_v14  ;;  %v10279_v54 = vperm.slane %v10275_v7, %v14989_v14  ;;  %v11525_v38 = vsel %vm314_vm0, %v11517_v27, %v11524_v47  ;;  %v19774_v7 = vld [vmem:[#allocation74_spill] sm:$0xff] }
 0x3ea   : > { %13127 = vrot.lane.b32.xlu1 %v16662_v56, %s19317_s17  ;;  %v11513_v49 = vsel %vm314_vm0, 0.0, %v11512_v1  ;;  %v11503_v20 = vsel %vm314_vm0, 0.0, %v11502_v15  ;;  %v10296_v15 = vrot.slane %v19774_v7, 4  ;;  %s19323_s17 = smov 58  }
 0x3eb   : > { %v10281_v13 = vsel %vm314_vm0, %v10280_v55, %v10267_v17  ;;  %v11546_v12 = vrot.slane %v11529_v34, 4  ;;  %v11521_v46 = vperm.slane %v11513_v49, %v14986_v8  ;;  %v10288_v17 = vrot.slane %v10279_v54, 4 }
 0x3ec   : > { %9306 = vxpose.xlu2.b32.start.end [1/1] (short) (narrow) %v1819_v0, 8  ;;  %v16691_v0 = vpop.trf.xlu0  ;;  %v10285_v61 = vperm.slane %v10281_v13, %v14989_v14  ;;  %v16712_v55 = vperm.slane %v11525_v38, %v14989_v14  ;;  %v11511_v3 = vperm.slane %v11503_v20, %v14986_v8  ;;  %v19775_v13 = vld [vmem:[#allocation33_spill] sm:$0xff] }
 0x3ed   : > { %v16680_v10 = vpop.trf.xlu2  ;;  %19770 = vst [vmem:[#allocation59_spill] sm:$0xff] %v16691_v0  ;;  %v10308_v49 = vrot.slane %v19775_v13, 4  ;;  %v11547_v38 = vsel %vm314_vm0, 0.0, %v11546_v12  ;;  %v11534_v20 = vrot.slane %v11521_v46, 4  ;;  %v19778_v0 = vld [vmem:[#allocation69_spill] sm:$0xff]  ;;  %v19780_v13 = vld [vmem:[#allocation78_spill] sm:$0xff] }
 0x3ee   : > { %19768 = vst [vmem:[#allocation47_spill] sm:$0xff] %v16680_v10  ;;  %v16718_v27 = vpop.trf.xlu1  ;;  %v10286_v1 = vrot.slane %v10285_v61, 4  ;;  %v10289_v47 = vsel %vm314_vm0, %v10285_v61, %v10288_v17  ;;  %v10297_v61 = vsel %vm314_vm0, %v10296_v15, %v19778_v0 }
 0x3ef   : > { %19773 = vst [vmem:[#allocation177_spill] sm:$0xff] %v16718_v27  ;;  %v11569_v7 = vperm.slane %v10289_v47, %v14986_v8  ;;  %v19777_v27 = vld [vmem:[#allocation71_spill] sm:$0xff]  ;;  %v11535_v10 = vsel %vm314_vm0, %v11534_v20, %v11511_v3  ;;  %v10301_v11 = vperm.slane %v10297_v61, %v14986_v8 }
 0x3f0   : > { %v10287_v17 = vsel %vm314_vm0, %v10286_v1, %v10279_v54  ;;  %v19781_v1 = vld [vmem:[#allocation67_spill] sm:$0xff] }
 0x3f1   : > { %v11559_v0 = vperm.slane %v10287_v17, %v14986_v8  ;;  %v11574_v54 = vrot.slane %v11569_v7, 4 }
 0x3f2   : > { %13135 = vrot.lane.b32.xlu1 %v16687_v32, %s19374_s18 }
 0x3f4   : > { %9402 = vxpose.xlu2.b32.start.end [1/1] (short) (narrow) %v16362_v9, 8  ;;  %v1868_v9 = vrot.slane %v16379_v26, 4 }
 0x3f5   : > { %v16701_v6 = vpop.trf.xlu2  ;;  %13119 = vrot.lane.b32.xlu0 %v16626_v23, %s19435_s22  ;;  %v16715_v23 = vpop.trf.xlu0 }
 0x3f6   : > { %19771 = vst [vmem:[#allocation51_spill] sm:$0xff] %v16701_v6  ;;  %v1869_v26 = vsel %vm314_vm0, 0.0, %v1868_v9  ;;  %v10290_v9 = vrot.slane %v19777_v27, 4  ;;  %v11564_v27 = vrot.slane %v10289_v47, 4  ;;  %v16755_v61 = vpop.trf.xlu1 }
 0x3f7   : > { %19772 = vst [vmem:[#allocation56_spill] sm:$0xff] %v16715_v23  ;;  %v11536_v23 = vrot.slane %v11511_v3, 4  ;;  %v16747_v3 = vperm.slane %v11535_v10, %v14989_v14 }
 0x3f8   : > { %v10291_v15 = vsel %vm314_vm0, %v10290_v9, %v19781_v1  ;;  %19784 = vst [vmem:[#allocation71_spill] sm:$0xff] %v16755_v61  ;;  %v10314_v9 = vrot.slane %v10301_v11, 4 }
 0x3f9   : > { %v11537_v6 = vsel %vm314_vm0, %v11521_v46, %v11536_v23  ;;  %v19783_v46 = vld [vmem:[#allocation76_spill] sm:$0xff]  ;;  %v10295_v10 = vperm.slane %v10291_v15, %v14986_v8  ;;  %v19786_v15 = vld [vmem:[#allocation49_spill] sm:$0xff] }
 0x3fa   : > { %13143 = vrot.lane.b32.xlu1 %v11529_v34, %s19425_s23  ;;  %v11548_v34 = vrot.slane %v16712_v55, 4 }
 0x3fc   : > { %9498 = vxpose.xlu2.b32.start.end [1/1] (short) (narrow) %v1869_v26, 8  ;;  %v19779_v26 = vld [vmem:[#allocation80_spill] sm:$0xff] }
 0x3fd   : > { %v16725_v39 = vpop.trf.xlu2  ;;  %13147 = vrot.lane.b32.xlu0 %v11547_v38, %s19377_s24  ;;  %v10302_v12 = vrot.slane %v19779_v26, 4  ;;  %v11549_v38 = vsel %vm314_vm0, 0.0, %v11548_v34  ;;  %v16749_v20 = vpop.trf.xlu0  ;;  %v11545_v34 = vperm.slane %v11537_v6, %v14989_v14  ;;  %v11575_v26 = vsel %vm314_vm0, %v11574_v54, %v11559_v0 }
 0x3fe   : > { %19776 = vst [vmem:[#allocation74_spill] sm:$0xff] %v16725_v39  ;;  %v10309_v39 = vsel %vm314_vm0, %v10308_v49, %v19780_v13  ;;  %v1918_v6 = vrot.slane %v16417_v60, 4  ;;  %v16767_v1 = vperm.slane %v11575_v26, %v14989_v14 }
 0x3ff   : > { %v10313_v49 = vperm.slane %v10309_v39, %v14986_v8  ;;  %19782 = vst [vmem:[#allocation33_spill] sm:$0xff] %v16749_v20  ;;  %v10303_v23 = vsel %vm314_vm0, %v10302_v12, %v19783_v46  ;;  %v11554_v39 = vrot.slane %v10287_v17, 4  ;;  %v11565_v12 = vsel %vm314_vm0, 0.0, %v11564_v27 }
 0x400   : > { %v11573_v46 = vperm.slane %v11565_v12, %v14986_v8  ;;  %v10315_v17 = vsel %vm314_vm0, %v10314_v9, %v10295_v10  ;;  %v1919_v54 = vsel %vm314_vm0, 0.0, %v1918_v6  ;;  %v19790_v6 = vld [vmem:[#allocation46_spill] sm:$0xff] }
 0x401   : > { %v10320_v13 = vrot.slane %v10313_v49, 4  ;;  %v11555_v11 = vsel %vm314_vm0, 0.0, %v11554_v39  ;;  %v10336_v49 = vrot.slane %v19786_v15, 4  ;;  %v10319_v26 = vperm.slane %v10315_v17, %v14989_v14 }
 0x402   : > { %13155 = vrot.lane.b32.xlu1 %v11549_v38, %s19419_s25  ;;  %v11552_v38 = vrot.slane %v11545_v34, 4  ;;  %v11563_v39 = vperm.slane %v11555_v11, %v14986_v8  ;;  %v11586_v10 = vrot.slane %v11573_v46, 4 }
 0x403   : > { %v10328_v61 = vrot.slane %v10319_v26, 4 }
 0x404   : > { %9594 = vxpose.xlu2.b32.start.end [1/1] (short) (narrow) %v16398_v31, 8  ;;  %v10307_v31 = vperm.slane %v10303_v23, %v14986_v8  ;;  %v11553_v60 = vsel %vm314_vm0, 0.0, %v11552_v38  ;;  %v11576_v23 = vrot.slane %v11559_v0, 4  ;;  %v10348_v0 = vrot.slane %v19790_v6, 4  ;;  %v19791_v38 = vld [vmem:[#allocation86_spill] sm:$0xff] }
 0x405   : > { %v16757_v47 = vpop.trf.xlu2  ;;  %13159 = vrot.lane.b32.xlu0 %v16747_v3, %s19379_s26  ;;  %v16783_v9 = vpop.trf.xlu0  ;;  %v10337_v17 = vsel %vm314_vm0, %v10336_v49, %v19791_v38  ;;  %v11587_v11 = vsel %vm314_vm0, %v11586_v10, %v11563_v39  ;;  %v19793_v38 = vld [vmem:[#allocation52_spill] sm:$0xff] }
 0x406   : > { %19785 = vst [vmem:[#allocation69_spill] sm:$0xff] %v16757_v47  ;;  %v10321_v27 = vsel %vm314_vm0, %v10320_v13, %v10307_v31  ;;  %v16786_v13 = vpop.trf.xlu1  ;;  %v19809_v47 = vld [vmem:[#allocation97_spill] sm:$0xff] }
 0x407   : > { %19788 = vst [vmem:[#allocation78_spill] sm:$0xff] %v16783_v9  ;;  %v10325_v31 = vperm.slane %v10321_v27, %v14989_v14  ;;  %v10341_v27 = vperm.slane %v10337_v17, %v14986_v8 }
 0x408   : > { %19789 = vst [vmem:[#allocation67_spill] sm:$0xff] %v16786_v13 }
 0x409   : > { %v10326_v9 = vrot.slane %v10325_v31, 4  ;;  %v10329_v49 = vsel %vm314_vm0, %v10325_v31, %v10328_v61 }
 0x40a   : > { %13167 = vrot.lane.b32.xlu1 %v11545_v34, %s19413_s27  ;;  %v11598_v34 = vrot.slane %v16767_v1, 4  ;;  %v11616_v17 = vrot.slane %v10329_v49, 4 }
 0x40b   : > { %v10327_v31 = vsel %vm314_vm0, %v10326_v9, %v10319_v26  ;;  %v11621_v26 = vperm.slane %v10329_v49, %v14986_v8 }
 0x40c   : > { %9690 = vxpose.xlu2.b32.start.end [1/1] (short) (narrow) %v1919_v54, 8  ;;  %v19792_v54 = vld [vmem:[#allocation88_spill] sm:$0xff]  ;;  %v11599_v20 = vsel %vm314_vm0, 0.0, %v11598_v34  ;;  %v19795_v34 = vld [vmem:[#allocation90_spill] sm:$0xff]  ;;  %v11606_v9 = vrot.slane %v10327_v31, 4 }
 0x40d   : > { %v16778_v12 = vpop.trf.xlu2  ;;  %13171 = vrot.lane.b32.xlu0 %v11553_v60, %s19381_s28  ;;  %v10330_v15 = vrot.slane %v19792_v54, 4  ;;  %v11577_v60 = vsel %vm314_vm0, %v11569_v7, %v11576_v23  ;;  %v10342_v54 = vrot.slane %v19793_v38, 4  ;;  %v19794_v7 = vld [vmem:[#allocation83_spill] sm:$0xff]  ;;  %v10349_v10 = vsel %vm314_vm0, %v10348_v0, %v19795_v34  ;;  %v16817_v38 = vpop.trf.xlu0 }
 0x40e   : > { %19787 = vst [vmem:[#allocation80_spill] sm:$0xff] %v16778_v12  ;;  %v11588_v12 = vrot.slane %v11563_v39, 4  ;;  %v16798_v6 = vperm.slane %v11577_v60, %v14989_v14  ;;  %v11593_v39 = vperm.slane %v11587_v11, %v14989_v14  ;;  %v10354_v60 = vrot.slane %v10341_v27, 4  ;;  %v19798_v11 = vld [vmem:[#allocation44_spill] sm:$0xff] }
 0x40f   : > { %v10331_v23 = vsel %vm314_vm0, %v10330_v15, %v19794_v7  ;;  %v10353_v0 = vperm.slane %v10349_v10, %v14986_v8  ;;  %19797 = vst [vmem:[#allocation49_spill] sm:$0xff] %v16817_v38  ;;  %v10343_v7 = vsel %vm314_vm0, %v10342_v54, %v19798_v11  ;;  %v11626_v11 = vrot.slane %v11621_v26, 4 }
 0x410   : > { %v11589_v61 = vsel %vm314_vm0, %v11573_v46, %v11588_v12  ;;  %v10335_v15 = vperm.slane %v10331_v23, %v14986_v8  ;;  %v11602_v34 = vrot.slane %v11593_v39, 4  ;;  %v16824_v46 = vpop.trf.xlu1  ;;  %v11611_v12 = vperm.slane %v10327_v31, %v14986_v8 }
 0x411   : > { %v16822_v13 = vperm.slane %v11589_v61, %v14989_v14  ;;  %19799 = vst [vmem:[#allocation46_spill] sm:$0xff] %v16824_v46  ;;  %v10347_v27 = vperm.slane %v10343_v7, %v14986_v8  ;;  %v10360_v23 = vrot.slane %v10353_v0, 4  ;;  %v19801_v7 = vld [vmem:[#allocation26_spill] sm:$0xff] }
 0x412   : > { %13179 = vrot.lane.b32.xlu1 %v11599_v20, %s19407_s29  ;;  %v10355_v54 = vsel %vm314_vm0, %v10354_v60, %v10335_v15  ;;  %v11603_v61 = vsel %vm314_vm0, 0.0, %v11602_v34  ;;  %v11607_v60 = vsel %vm314_vm0, 0.0, %v11606_v9  ;;  %v10376_v34 = vrot.slane %v19801_v7, 4 }
 0x413   : > { %v11604_v49 = vrot.slane %v16822_v13, 4  ;;  %v10361_v15 = vsel %vm314_vm0, %v10360_v23, %v10347_v27  ;;  %v19804_v27 = vld [vmem:[#allocation60_spill] sm:$0xff] }
 0x414   : > { %9786 = vxpose.xlu2.b32.start.end [1/1] (short) (narrow) %v16434_v63, 8  ;;  %v1924_v63 = vrot.slane %v16453_v48, 4  ;;  %v11617_v48 = vsel %vm314_vm0, 0.0, %v11616_v17  ;;  %v10359_v17 = vperm.slane %v10355_v54, %v14989_v14  ;;  %v10365_v54 = vperm.slane %v10361_v15, %v14989_v14 }
 0x415   : > { %v16808_v20 = vpop.trf.xlu2  ;;  %13183 = vrot.lane.b32.xlu0 %v16798_v6, %s19383_s30  ;;  %v16839_v31 = vperm.slane %v11617_v48, %v14986_v8  ;;  %v11605_v0 = vsel %vm314_vm0, 0.0, %v11604_v49  ;;  %v16848_v38 = vpop.trf.xlu0  ;;  %v10388_v23 = vrot.slane %v19804_v27, 4  ;;  %v19805_v49 = vld [vmem:[#allocation48_spill] sm:$0xff]  ;;  %v11136_v27 = vrot.slane %v16517_v33, 4 }
 0x416   : > { %19796 = vst [vmem:[#allocation76_spill] sm:$0xff] %v16808_v20  ;;  %v1925_v10 = vsel %vm314_vm0, 0.0, %v1924_v63  ;;  %v11627_v63 = vsel %vm314_vm0, %v11626_v11, %v11611_v12  ;;  %v10370_v11 = vrot.slane %v19805_v49, 4  ;;  %v19808_v20 = vld [vmem:[#allocation93_spill] sm:$0xff]  ;;  %v11130_v33 = vrot.slane %v16555_v5, 4 }
 0x417   : > { %19802 = vst [vmem:[#allocation88_spill] sm:$0xff] %v16848_v38  ;;  %v11638_v48 = vrot.slane %v16839_v31, 4 }
 0x418   : > { %v16854_v9 = vpop.trf.xlu1 }
 0x419   : > { %19803 = vst [vmem:[#allocation52_spill] sm:$0xff] %v16854_v9 }
 0x41a   : > { %13191 = vrot.lane.b32.xlu1 %v11593_v39, %s19401_s2  ;;  %v11628_v39 = vrot.slane %v11611_v12, 4  ;;  %v16857_v12 = vperm.slane %v11627_v63, %v14989_v14  ;;  %v10366_v63 = vrot.slane %v10365_v54, 4 }
 0x41c   : > { %9882 = vxpose.xlu2.b32.start.end [1/1] (short) (narrow) %v1925_v10, 8  ;;  %v11629_v10 = vsel %vm314_vm0, %v11621_v26, %v11628_v39  ;;  %v19806_v39 = vld [vmem:[#allocation54_spill] sm:$0xff] }
 0x41d   : > { %v16835_v46 = vpop.trf.xlu2  ;;  %13195 = vrot.lane.b32.xlu0 %v11603_v61, %s19395_s3  ;;  %v11615_v61 = vperm.slane %v11607_v60, %v14986_v8  ;;  %v11637_v26 = vperm.slane %v11629_v10, %v14989_v14  ;;  %v10377_v60 = vsel %vm314_vm0, %v10376_v34, %v19806_v39  ;;  %v19807_v10 = vld [vmem:[#allocation50_spill] sm:$0xff] }
 0x41e   : > { %19800 = vst [vmem:[#allocation86_spill] sm:$0xff] %v16835_v46  ;;  %v10368_v46 = vrot.slane %v10359_v17, 4  ;;  %v10389_v49 = vsel %vm314_vm0, %v10388_v23, %v19807_v10  ;;  %v10381_v9 = vperm.slane %v10377_v60, %v14986_v8  ;;  %v16887_v10 = vpop.trf.xlu0 }
 0x41f   : > { %v11652_v34 = vrot.slane %v11637_v26, 4  ;;  %v10393_v23 = vperm.slane %v10389_v49, %v14986_v8  ;;  %19810 = vst [vmem:[#allocation83_spill] sm:$0xff] %v16887_v10  ;;  %v11142_v10 = vrot.slane %v16539_v52, 4 }
 0x420   : > { %v10369_v7 = vsel %vm314_vm0, %v10365_v54, %v10368_v46  ;;  %v10382_v46 = vrot.slane %v19809_v47, 4  ;;  %v10367_v54 = vsel %vm314_vm0, %v10366_v63, %v10359_v17 }
 0x421   : > { %v11673_v38 = vperm.slane %v10369_v7, %v14986_v8  ;;  %v11653_v5 = vsel %vm314_vm0, 0.0, %v11652_v34  ;;  %v10400_v49 = vrot.slane %v10393_v23, 4 }
 0x422   : > { %13203 = vrot.lane.b32.xlu1 %v11605_v0, %s19385_s4  ;;  %v11639_v0 = vsel %vm314_vm0, %v11638_v48, %v11615_v61  ;;  %v10371_v48 = vsel %vm314_vm0, %v10370_v11, %v19808_v20  ;;  %v10394_v11 = vrot.slane %v10381_v9, 4  ;;  %v11131_v9 = vsel %vm314_vm0, %v11130_v33, %v16504_v42 }
 0x423   : > { %v16875_v39 = vperm.slane %v11639_v0, %v14989_v14  ;;  %v11640_v0 = vrot.slane %v11615_v61, 4  ;;  %v10375_v20 = vperm.slane %v10371_v48, %v14986_v8  ;;  %v11663_v61 = vperm.slane %v10367_v54, %v14986_v8 }
 0x424   : > { %9978 = vxpose.xlu2.b32.start.end [1/1] (short) (narrow) %v16472_v45, 8  ;;  %v1974_v45 = vrot.slane %v16488_v29, 4  ;;  %v11658_v42 = vrot.slane %v10367_v54, 4 }
 0x425   : > { %v8170_v15 = vpop.trf.xlu2  ;;  %13207 = vrot.lane.b32.xlu0 %v16857_v12, %s19387_s13  ;;  %v11654_v47 = vrot.slane %v16875_v39, 4  ;;  %v10395_v34 = vsel %vm314_vm0, %v10394_v11, %v10375_v20  ;;  %v11680_v33 = vrot.slane %v11663_v61, 4 }
 0x426   : > { %v11137_v29 = vsel %vm314_vm0, %v11136_v27, %v8170_v15  ;;  %v1975_v60 = vsel %vm314_vm0, 0.0, %v1974_v45  ;;  %v16892_v15 = vpop.trf.xlu1  ;;  %v11678_v45 = vrot.slane %v11673_v38, 4  ;;  %v10399_v23 = vperm.slane %v10395_v34, %v14989_v14  ;;  %v16919_v52 = vpop.trf.xlu0 }
 0x427   : > { %19811 = vst [vmem:[#allocation90_spill] sm:$0xff] %v16892_v15  ;;  %v11141_v63 = vperm.slane %v11137_v29, %v14986_v8  ;;  %v11668_v29 = vrot.slane %v10369_v7, 4 }
 0x428   : > { %v11679_v15 = vsel %vm314_vm0, %v11678_v45, %v11663_v61  ;;  %19813 = vst [vmem:[#allocation44_spill] sm:$0xff] %v16919_v52  ;;  %v11681_v61 = vsel %vm314_vm0, %v11673_v38, %v11680_v33  ;;  %v10408_v45 = vrot.slane %v10399_v23, 4 }
 0x429   : > { %v11685_v7 = vperm.slane %v11679_v15, %v14989_v14  ;;  %v11669_v54 = vsel %vm314_vm0, 0.0, %v11668_v29  ;;  %v11659_v15 = vsel %vm314_vm0, 0.0, %v11658_v42  ;;  %v19815_v29 = vld [vmem:[#allocation55_spill] sm:$0xff] }
 0x42a   : > { %13215 = vrot.lane.b32.xlu1 %v11637_v26, %s19389_s15  ;;  %v19812_v26 = vld [vmem:[#allocation57_spill] sm:$0xff]  ;;  %v11667_v38 = vperm.slane %v11659_v15, %v14986_v8 }
 0x42b   : > { %v10383_v17 = vsel %vm314_vm0, %v10382_v46, %v19812_v26  ;;  %v11641_v46 = vsel %vm314_vm0, %v16839_v31, %v11640_v0  ;;  %v11135_v26 = vperm.slane %v11131_v9, %v14986_v8 }
 0x42c   : > { %10074 = vxpose.xlu2.b32.start.end [1/1] (short) (narrow) %v1975_v60, 8  ;;  %v10387_v48 = vperm.slane %v10383_v17, %v14986_v8  ;;  %v11655_v60 = vsel %vm314_vm0, 0.0, %v11654_v47  ;;  %v16912_v20 = vperm.slane %v11641_v46, %v14989_v14  ;;  %v16935_v46 = vperm.slane %v11681_v61, %v14989_v14 }
 0x42d   : > { %v8266_v27 = vpop.trf.xlu2  ;;  %13219 = vrot.lane.b32.xlu0 %v11653_v5, %s19319_s12  ;;  %v11154_v5 = vrot.slane %v11141_v63, 4  ;;  %s19321_s12 = smov 60  }
 0x42e   : > { %v10401_v31 = vsel %vm314_vm0, %v10400_v49, %v10387_v48  ;;  %v11143_v47 = vsel %vm314_vm0, %v11142_v10, %v8266_v27  ;;  %v16923_v63 = vpop.trf.xlu1  ;;  %v11702_v48 = vrot.slane %v11685_v7, 4  ;;  %v11704_v15 = vrot.slane %v16935_v46, 4 }
 0x42f   : > { %v11155_v0 = vsel %vm314_vm0, %v11154_v5, %v11135_v26  ;;  %19814 = vst [vmem:[#allocation26_spill] sm:$0xff] %v16923_v63  ;;  %v10405_v9 = vperm.slane %v10401_v31, %v14989_v14  ;;  %v11147_v10 = vperm.slane %v11143_v47, %v14986_v8  ;;  %v10416_v26 = vrot.slane %v19815_v29, 4  ;;  %v19816_v5 = vld [vmem:[#allocation63_spill] sm:$0xff]  ;;  %v19823_v63 = vld [vmem:[#allocation65_spill] sm:$0xff] }
 0x430   : > { %v11159_v49 = vperm.slane %v11155_v0, %v14989_v14  ;;  %v10410_v42 = vrot.slane %v19816_v5, 4  ;;  %v19817_v0 = vld [vmem:[#allocation104_spill] sm:$0xff]  ;;  %v11703_v47 = vsel %vm314_vm0, 0.0, %v11702_v48  ;;  %v19820_v48 = vld [vmem:[#allocation53_spill] sm:$0xff] }
 0x431   : > { %v10409_v31 = vsel %vm314_vm0, %v10405_v9, %v10408_v45 }
 0x432   : > { %13227 = vrot.lane.b32.xlu1 %v11655_v60, %s19323_s17  ;;  %v11677_v60 = vperm.slane %v11669_v54, %v14986_v8  ;;  %v11168_v54 = vrot.slane %v11159_v49, 4  ;;  %s19325_s17 = smov 66   ;;  %v16951_v45 = vperm.slane %v10409_v31, %v14986_v8 }
 0x435   : > { %v8362_v11 = vpop.trf.xlu2  ;;  %13231 = vrot.lane.b32.xlu0 %v16912_v20, %s19321_s12  ;;  %s19331_s12 = smov 64  }
 0x436   : > { %v11148_v17 = vrot.slane %v8362_v11, 4  ;;  %v10428_v11 = vrot.slane %v19817_v0, 4  ;;  %v10411_v0 = vsel %vm314_vm0, %v10410_v42, %v19820_v48  ;;  %v11705_v42 = vsel %vm314_vm0, 0.0, %v11704_v15  ;;  %v19829_v15 = vld [vmem:[#allocation101_spill] sm:$0xff] }
 0x438   : > { %v11149_v34 = vsel %vm314_vm0, %v11148_v17, %v16563_v30  ;;  %v10406_v30 = vrot.slane %v10405_v9, 4  ;;  %v11690_v17 = vrot.slane %v11677_v60, 4  ;;  %v19819_v9 = vld [vmem:[#allocation58_spill] sm:$0xff]  ;;  %v10429_v52 = vsel %vm314_vm0, %v10428_v11, %v19823_v63 }
 0x439   : > { %v11153_v27 = vperm.slane %v11149_v34, %v14986_v8  ;;  %v19818_v34 = vld [vmem:[#allocation99_spill] sm:$0xff]  ;;  %v10422_v5 = vrot.slane %v19819_v9, 4 }
 0x43a   : > { %13239 = vrot.lane.b32.xlu1 %v11685_v7, %s19331_s12  ;;  %v11692_v7 = vrot.slane %v11667_v38, 4  ;;  %v10417_v29 = vsel %vm314_vm0, %v10416_v26, %v19818_v34  ;;  %v16963_v34 = vpop.trf.xlu1  ;;  %s19335_s12 = smov 78  }
 0x43b   : > { %v11160_v33 = vrot.slane %v11153_v27, 4  ;;  %19824 = vst [vmem:[#allocation54_spill] sm:$0xff] %v16963_v34  ;;  %v10421_v9 = vperm.slane %v10417_v29, %v14986_v8 }
 0x43c   : > { %v11693_v48 = vsel %vm314_vm0, %v11677_v60, %v11692_v7  ;;  %v10423_v7 = vsel %vm314_vm0, %v10422_v5, %v19829_v15 }
 0x43d   : > { %v11161_v61 = vsel %vm314_vm0, %v11160_v33, %v11147_v10  ;;  %13243 = vrot.lane.b32.xlu0 %v11703_v47, %s19325_s17  ;;  %v16956_v10 = vpop.trf.xlu2  ;;  %v16958_v33 = vpop.trf.xlu0  ;;  %v10407_v47 = vsel %vm314_vm0, %v10406_v30, %v10399_v23  ;;  %s19327_s17 = smov 70   ;;  %v11720_v30 = vrot.slane %v10409_v31, 4  ;;  %v11701_v29 = vperm.slane %v11693_v48, %v14989_v14 }
 0x43e   : > { %v11165_v27 = vperm.slane %v11161_v61, %v14989_v14  ;;  %19821 = vst [vmem:[#allocation60_spill] sm:$0xff] %v16956_v10  ;;  %v11691_v61 = vsel %vm314_vm0, %v11690_v17, %v11667_v38  ;;  %v11715_v63 = vperm.slane %v10407_v47, %v14986_v8  ;;  %v11730_v38 = vrot.slane %v16951_v45, 4  ;;  %v19878_v10 = vld [vmem:[#allocation119_spill] sm:$0xff] }
 0x43f   : > { %19822 = vst [vmem:[#allocation48_spill] sm:$0xff] %v16958_v33  ;;  %v16984_v17 = vperm.slane %v11691_v61, %v14989_v14  ;;  %v11721_v61 = vsel %vm314_vm0, 0.0, %v11720_v30  ;;  %v11708_v48 = vrot.slane %v11701_v29, 4 }
 0x440   : > { %v11166_v26 = vrot.slane %v11165_v27, 4  ;;  %v16967_v22 = vsel %vm314_vm0, %v11165_v27, %v11168_v54  ;;  %v10433_v54 = vperm.slane %v10429_v52, %v14986_v8  ;;  %v10415_v27 = vperm.slane %v10411_v0, %v14986_v8 }
 0x441   : > { %19825 = vst [vmem:[#allocation50_spill] sm:$0xff] %v16967_v22  ;;  %v16974_v23 = vperm.slane %v16967_v22, %v14986_v8  ;;  %v11731_v52 = vsel %vm314_vm0, %v11730_v38, %v11715_v63 }
 0x442   : > { %13251 = vrot.lane.b32.xlu1 %v11705_v42, %s19327_s17  ;;  %v16980_v11 = vsel %vm314_vm0, %v11166_v26, %v11159_v49  ;;  %v10434_v49 = vrot.slane %v10421_v9, 4  ;;  %s19329_s17 = smov 72   ;;  %v11710_v26 = vrot.slane %v10407_v47, 4  ;;  %v10427_v42 = vperm.slane %v10423_v7, %v14986_v8  ;;  %v17014_v30 = vpop.trf.xlu1 }
 0x443   : > { %19826 = vst [vmem:[#allocation93_spill] sm:$0xff] %v16974_v23  ;;  %v16988_v60 = vperm.slane %v16980_v11, %v14986_v8  ;;  %v12718_v31 = vrot.slane %v16974_v23, 4  ;;  %v10440_v34 = vrot.slane %v10433_v54, 4  ;;  %v17010_v33 = vperm.slane %v11731_v52, %v14989_v14  ;;  %v19834_v54 = vld [vmem:[#allocation70_spill] sm:$0xff] }
 0x444   : > { %19827 = vst [vmem:[#allocation97_spill] sm:$0xff] %v16980_v11  ;;  %v10435_v0 = vsel %vm314_vm0, %v10434_v49, %v10415_v27  ;;  %v11729_v47 = vperm.slane %v11721_v61, %v14986_v8  ;;  %v11711_v38 = vsel %vm314_vm0, 0.0, %v11710_v26  ;;  %v10456_v7 = vrot.slane %v19834_v54, 4  ;;  %v19835_v26 = vld [vmem:[#allocation61_spill] sm:$0xff] }
 0x445   : > { %19828 = vst [vmem:[#allocation57_spill] sm:$0xff] %v16988_v60  ;;  %13255 = vrot.lane.b32.xlu0 %v16984_v17, %s19329_s17  ;;  %v17002_v5 = vsel %vm314_vm0, %v12718_v31, %v16988_v60  ;;  %v17005_v9 = vpop.trf.xlu2  ;;  %v17007_v15 = vpop.trf.xlu0  ;;  %s19342_s17 = smov 76   ;;  %v10441_v31 = vsel %vm314_vm0, %v10440_v34, %v10427_v42  ;;  %v10439_v27 = vperm.slane %v10435_v0, %v14989_v14  ;;  %v11709_v49 = vsel %vm314_vm0, 0.0, %v11708_v48  ;;  %v19837_v0 = vld [vmem:[#allocation106_spill] sm:$0xff] }
 0x446   : > { %19830 = vst [vmem:[#allocation55_spill] sm:$0xff] %v17002_v5  ;;  %v11732_v5 = vrot.slane %v11715_v63, 4  ;;  %v11754_v52 = vrot.slane %v17010_v33, 4  ;;  %v11742_v61 = vrot.slane %v11729_v47, 4  ;;  %v10457_v54 = vsel %vm314_vm0, %v10456_v7, %v19835_v26  ;;  %v19838_v7 = vld [vmem:[#allocation72_spill] sm:$0xff] }
 0x447   : > { %19831 = vst [vmem:[#allocation63_spill] sm:$0xff] %v17005_v9  ;;  %v10448_v42 = vrot.slane %v10439_v27, 4  ;;  %v10450_v23 = vrot.slane %v19837_v0, 4  ;;  %v10462_v26 = vrot.slane %v19838_v7, 4 }
 0x448   : > { %19832 = vst [vmem:[#allocation104_spill] sm:$0xff] %v17007_v15  ;;  %v10445_v15 = vperm.slane %v10441_v31, %v14989_v14  ;;  %v11733_v63 = vsel %vm314_vm0, %v16951_v45, %v11732_v5  ;;  %v11755_v48 = vsel %vm314_vm0, 0.0, %v11754_v52  ;;  %v19841_v45 = vld [vmem:[#allocation68_spill] sm:$0xff] }
 0x449   : > { %19833 = vst [vmem:[#allocation99_spill] sm:$0xff] %v17014_v30  ;;  %v19836_v30 = vld [vmem:[#allocation66_spill] sm:$0xff]  ;;  %v17039_v0 = vperm.slane %v11733_v63, %v14989_v14  ;;  %v10451_v5 = vsel %vm314_vm0, %v10450_v23, %v19841_v45  ;;  %v19842_v52 = vld [vmem:[#allocation108_spill] sm:$0xff] }
 0x44a   : > { %13263 = vrot.lane.b32.xlu1 %v11701_v29, %s19342_s17  ;;  %v11719_v29 = vperm.slane %v11711_v38, %v14986_v8  ;;  %v10468_v34 = vrot.slane %v19836_v30, 4  ;;  %v10461_v38 = vperm.slane %v10457_v54, %v14986_v8  ;;  %v10446_v60 = vrot.slane %v10445_v15, 4  ;;  %s19344_s17 = smov 90  }
 0x44c   : > { %v11744_v31 = vrot.slane %v11719_v29, 4  ;;  %v10474_v63 = vrot.slane %v10461_v38, 4 }
 0x44d   : > { %13267 = vrot.lane.b32.xlu0 %v11709_v49, %s19335_s12  ;;  %v11743_v49 = vsel %vm314_vm0, %v11742_v61, %v11719_v29  ;;  %s19338_s12 = smov 82   ;;  %v17036_v30 = vpop.trf.xlu2  ;;  %v17041_v11 = vpop.trf.xlu0  ;;  %v10469_v61 = vsel %vm314_vm0, %v10468_v34, %v19842_v52  ;;  %v10449_v29 = vsel %vm314_vm0, %v10445_v15, %v10448_v42  ;;  %v10455_v34 = vperm.slane %v10451_v5, %v14986_v8 }
 0x44e   : > { %19839 = vst [vmem:[#allocation58_spill] sm:$0xff] %v17036_v30  ;;  %v11745_v7 = vsel %vm314_vm0, %v11729_v47, %v11744_v31  ;;  %v19844_v30 = vld [vmem:[#allocation64_spill] sm:$0xff]  ;;  %v10473_v45 = vperm.slane %v10469_v61, %v14986_v8  ;;  %v11772_v52 = vrot.slane %v10449_v29, 4  ;;  %v11777_v15 = vperm.slane %v10449_v29, %v14986_v8 }
 0x44f   : > { %19840 = vst [vmem:[#allocation53_spill] sm:$0xff] %v17041_v11  ;;  %v10447_v11 = vsel %vm314_vm0, %v10446_v60, %v10439_v27  ;;  %v10463_v23 = vsel %vm314_vm0, %v10462_v26, %v19844_v30  ;;  %v17061_v42 = vperm.slane %v11745_v7, %v14989_v14  ;;  %v10475_v60 = vsel %vm314_vm0, %v10474_v63, %v10455_v34 }
 0x450   : > { %v11767_v38 = vperm.slane %v10447_v11, %v14986_v8  ;;  %v10467_v47 = vperm.slane %v10463_v23, %v14986_v8  ;;  %v10480_v27 = vrot.slane %v10473_v45, 4  ;;  %v11762_v31 = vrot.slane %v10447_v11, 4 }
 0x451   : > { %v11773_v26 = vsel %vm314_vm0, 0.0, %v11772_v52  ;;  %v11782_v61 = vrot.slane %v11777_v15, 4  ;;  %v10479_v63 = vperm.slane %v10475_v60, %v14989_v14 }
 0x452   : > { %13275 = vrot.lane.b32.xlu1 %v11755_v48, %s19338_s12  ;;  %v11749_v48 = vperm.slane %v11743_v49, %v14989_v14  ;;  %s19340_s12 = smov 84   ;;  %v11784_v23 = vrot.slane %v11767_v38, 4  ;;  %v11781_v11 = vperm.slane %v11773_v26, %v14986_v8  ;;  %v10481_v34 = vsel %vm314_vm0, %v10480_v27, %v10467_v47 }
 0x453   : > { %v11763_v45 = vsel %vm314_vm0, 0.0, %v11762_v31  ;;  %v11783_v52 = vsel %vm314_vm0, %v11782_v61, %v11767_v38 }
 0x454   : > { %v17047_v54 = vpop.permute.xlu1 %13123  ;;  %v11758_v49 = vrot.slane %v11749_v48, 4  ;;  %v11771_v60 = vperm.slane %v11763_v45, %v14986_v8  ;;  %v17088_v26 = vperm.slane %v11783_v52, %v14989_v14 }
 0x455   : > { %19843 = vst [vmem:[#allocation65_spill] sm:$0xff] %v17047_v54  ;;  %13279 = vrot.lane.b32.xlu0 %v17039_v0, %s19340_s12  ;;  %s19346_s12 = smov 88   ;;  %v17071_v29 = vpop.trf.xlu2  ;;  %v17074_v7 = vpop.trf.xlu0  ;;  %v10485_v54 = vperm.slane %v10481_v34, %v14989_v14 }
 0x456   : > { %v11759_v5 = vsel %vm314_vm0, 0.0, %v11758_v49  ;;  %19846 = vst [vmem:[#allocation70_spill] sm:$0xff] %v17071_v29 }
 0x457   : > { %19847 = vst [vmem:[#allocation61_spill] sm:$0xff] %v17074_v7  ;;  %v11794_v7 = vrot.slane %v11781_v11, 4 }
 0x459   : > { %v11795_v31 = vsel %vm314_vm0, %v11794_v7, %v11771_v60  ;;  %v11796_v7 = vrot.slane %v11771_v60, 4 }
 0x45a   : > { %13287 = vrot.lane.b32.xlu1 %v11749_v48, %s19346_s12  ;;  %v11760_v48 = vrot.slane %v17061_v42, 4  ;;  %s19350_s12 = smov 96   ;;  %v17103_v45 = vperm.slane %v11795_v31, %v14989_v14 }
 0x45c   : > { %v17068_v30 = vpop.permute.xlu1 %13127  ;;  %v11761_v49 = vsel %vm314_vm0, 0.0, %v11760_v48 }
 0x45d   : > { %19845 = vst [vmem:[#allocation101_spill] sm:$0xff] %v17068_v30  ;;  %13291 = vrot.lane.b32.xlu0 %v11759_v5, %s19344_s17  ;;  %v11785_v30 = vsel %vm314_vm0, %v11777_v15, %v11784_v23  ;;  %v10488_v5 = vrot.slane %v10479_v63, 4  ;;  %s19348_s17 = smov 94   ;;  %v10486_v15 = vrot.slane %v10485_v54, 4  ;;  %v17097_v61 = vpop.trf.xlu2 }
 0x45e   : > { %v11793_v38 = vperm.slane %v11785_v30, %v14989_v14  ;;  %19849 = vst [vmem:[#allocation106_spill] sm:$0xff] %v17097_v61 }
 0x45f   : > { %v10489_v27 = vsel %vm314_vm0, %v10485_v54, %v10488_v5  ;;  %v10487_v30 = vsel %vm314_vm0, %v10486_v15, %v10479_v63 }
 0x460   : > { %v11808_v23 = vrot.slane %v11793_v38, 4  ;;  %v11829_v34 = vperm.slane %v10489_v27, %v14986_v8  ;;  %v11819_v5 = vperm.slane %v10487_v30, %v14986_v8  ;;  %v11814_v60 = vrot.slane %v10487_v30, 4 }
 0x462   : > { %13299 = vrot.lane.b32.xlu1 %v11761_v49, %s19348_s17  ;;  %s19352_s17 = smov 100   ;;  %v11809_v54 = vsel %vm314_vm0, 0.0, %v11808_v23  ;;  %v11810_v49 = vrot.slane %v17103_v45, 4  ;;  %v11836_v23 = vrot.slane %v11819_v5, 4  ;;  %v11815_v30 = vsel %vm314_vm0, 0.0, %v11814_v60 }
 0x464   : > { %v17090_v47 = vpop.permute.xlu1 %13135  ;;  %v11811_v63 = vsel %vm314_vm0, 0.0, %v11810_v49 }
 0x465   : > { %19848 = vst [vmem:[#allocation66_spill] sm:$0xff] %v17090_v47  ;;  %13303 = vrot.lane.b32.xlu0 %v17088_v26, %s19350_s12  ;;  %s19354_s12 = smov 102   ;;  %v11834_v47 = vrot.slane %v11829_v34, 4  ;;  %v17116_v61 = vpop.trf.xlu2 }
 0x466   : > { %19853 = vst [vmem:[#allocation64_spill] sm:$0xff] %v17116_v61 }
 0x467   : > { %v17099_v48 = vpop.permute.xlu0 %13119  ;;  %v11835_v15 = vsel %vm314_vm0, %v11834_v47, %v11819_v5  ;;  %v11837_v47 = vsel %vm314_vm0, %v11829_v34, %v11836_v23  ;;  %v19858_v34 = vld [vmem:[#allocation73_spill] sm:$0xff] }
 0x468   : > { %19850 = vst [vmem:[#allocation72_spill] sm:$0xff] %v17099_v48  ;;  %v11824_v48 = vrot.slane %v10489_v27, 4 }
 0x46a   : > { %13311 = vrot.lane.b32.xlu1 %v11793_v38, %s19352_s17  ;;  %v11797_v38 = vsel %vm314_vm0, %v11781_v11, %v11796_v7  ;;  %s19358_s17 = smov 106   ;;  %v11841_v11 = vperm.slane %v11835_v15, %v14989_v14  ;;  %v11825_v27 = vsel %vm314_vm0, 0.0, %v11824_v48  ;;  %v19856_v7 = vld [vmem:[#allocation81_spill] sm:$0xff]  ;;  %v17141_v15 = vperm.slane %v11837_v47, %v14989_v14 }
 0x46b   : > { %v10530_v49 = vrot.slane %v19856_v7, 4 }
 0x46c   : > { %v17107_v52 = vpop.permute.xlu1 %13143  ;;  %v11858_v48 = vrot.slane %v11841_v11, 4 }
 0x46d   : > { %19851 = vst [vmem:[#allocation68_spill] sm:$0xff] %v17107_v52  ;;  %13315 = vrot.lane.b32.xlu0 %v11809_v54, %s19354_s12  ;;  %v17122_v54 = vperm.slane %v11797_v38, %v14989_v14  ;;  %v19854_v52 = vld [vmem:[#allocation75_spill] sm:$0xff]  ;;  %s19356_s12 = smov 108   ;;  %v10531_v60 = vsel %vm314_vm0, %v10530_v49, %v19858_v34 }
 0x46e   : > { %v10536_v29 = vrot.slane %v19854_v52, 4  ;;  %v11833_v52 = vperm.slane %v11825_v27, %v14986_v8  ;;  %v17148_v27 = vpop.trf.xlu2 }
 0x46f   : > { %v17113_v31 = vpop.permute.xlu0 %13147  ;;  %19859 = vst [vmem:[#allocation73_spill] sm:$0xff] %v17148_v27 }
 0x470   : > { %19852 = vst [vmem:[#allocation108_spill] sm:$0xff] %v17113_v31  ;;  %v10537_v38 = vsel %vm314_vm0, %v10536_v29, %v16120_v36  ;;  %v11846_v7 = vrot.slane %v11833_v52, 4  ;;  %v19860_v36 = vld [vmem:[#allocation77_spill] sm:$0xff] }
 0x471   : > { %v10541_v23 = vperm.slane %v10537_v38, %v14986_v8  ;;  %v10542_v29 = vrot.slane %v19860_v36, 4  ;;  %v10535_v38 = vperm.slane %v10531_v60, %v14986_v8 }
 0x472   : > { %13323 = vrot.lane.b32.xlu1 %v11811_v63, %s19358_s17  ;;  %v10548_v63 = vrot.slane %v16176_v53, 4  ;;  %v19861_v53 = vld [vmem:[#allocation82_spill] sm:$0xff]  ;;  %s19361_s17 = smov 114  }
 0x473   : > { %v10554_v34 = vrot.slane %v10541_v23, 4 }
 0x474   : > { %v17125_v31 = vpop.permute.xlu1 %13155 }
 0x475   : > { %19855 = vst [vmem:[#allocation75_spill] sm:$0xff] %v17125_v31  ;;  %13327 = vrot.lane.b32.xlu0 %v17122_v54, %s19356_s12  ;;  %v11823_v31 = vperm.slane %v11815_v30, %v14986_v8  ;;  %s19363_s12 = smov 112   ;;  %v11859_v30 = vsel %vm314_vm0, 0.0, %v11858_v48 }
 0x477   : > { %v17134_v5 = vpop.permute.xlu0 %13159  ;;  %v11848_v49 = vrot.slane %v11823_v31, 4  ;;  %v11847_v36 = vsel %vm314_vm0, %v11846_v7, %v11823_v31 }
 0x478   : > { %19857 = vst [vmem:[#allocation81_spill] sm:$0xff] %v17134_v5  ;;  %v10549_v5 = vsel %vm314_vm0, %v10548_v63, %v19861_v53  ;;  %v19864_v63 = vld [vmem:[#allocation29_spill] sm:$0xff]  ;;  %v17170_v60 = vperm.slane %v11847_v36, %v14989_v14 }
 0x479   : > { %v10553_v27 = vperm.slane %v10549_v5, %v14986_v8  ;;  %v11876_v53 = vrot.slane %v19864_v63, 4  ;;  %v19866_v5 = vld [vmem:[#allocation115_spill] sm:$0xff] }
 0x47a   : > { %13335 = vrot.lane.b32.xlu1 %v11841_v11, %s19363_s12  ;;  %v11860_v11 = vrot.slane %v17141_v15, 4  ;;  %v11866_v23 = vrot.slane %v19866_v5, 4  ;;  %s19365_s12 = smov 120   ;;  %v19872_v5 = vld [vmem:[#allocation113_spill] sm:$0xff] }
 0x47b   : > { %v10560_v7 = vrot.slane %v10553_v27, 4  ;;  %v11877_v63 = vsel %vm314_vm0, 0.0, %v11876_v53  ;;  %v19871_v53 = vld [vmem:[#allocation87_spill] sm:$0xff] }
 0x47c   : > { %v17153_v47 = vpop.permute.xlu1 %13167  ;;  %v11861_v22 = vsel %vm314_vm0, 0.0, %v11860_v11  ;;  %v11867_v36 = vsel %vm314_vm0, 0.0, %v11866_v23  ;;  %v19875_v23 = vld [vmem:[#allocation79_spill] sm:$0xff] }
 0x47d   : > { %19862 = vst [vmem:[#allocation77_spill] sm:$0xff] %v17153_v47  ;;  %13339 = vrot.lane.b32.xlu0 %v11859_v30, %s19361_s17  ;;  %v19865_v47 = vld [vmem:[#allocation117_spill] sm:$0xff]  ;;  %v11849_v30 = vsel %vm314_vm0, %v11833_v52, %v11848_v49  ;;  %s19437_s17 = smov 118   ;;  %v17179_v52 = vpop.trf.xlu2 }
 0x47e   : > { %v10543_v48 = vsel %vm314_vm0, %v10542_v29, %v19865_v47  ;;  %v11857_v47 = vperm.slane %v11849_v30, %v14989_v14  ;;  %19868 = vst [vmem:[#allocation117_spill] sm:$0xff] %v17179_v52 }
 0x47f   : > { %v17160_v61 = vpop.permute.xlu0 %13171  ;;  %v10547_v31 = vperm.slane %v10543_v48, %v14986_v8  ;;  %v10576_v48 = vrot.slane %v19871_v53, 4 }
 0x480   : > { %19863 = vst [vmem:[#allocation82_spill] sm:$0xff] %v17160_v61  ;;  %v10555_v61 = vsel %vm314_vm0, %v10554_v34, %v10535_v38  ;;  %v11885_v38 = vperm.slane %v11877_v63, %v14986_v8  ;;  %v11864_v30 = vrot.slane %v11857_v47, 4 }
 0x481   : > { %v10559_v49 = vperm.slane %v10555_v61, %v14989_v14  ;;  %v10561_v27 = vsel %vm314_vm0, %v10560_v7, %v10547_v31  ;;  %v11875_v61 = vperm.slane %v11867_v36, %v14986_v8  ;;  %v19873_v31 = vld [vmem:[#allocation41_spill] sm:$0xff] }
 0x482   : > { %13347 = vrot.lane.b32.xlu1 %v11861_v22, %s19437_s17  ;;  %v19869_v22 = vld [vmem:[#allocation116_spill] sm:$0xff]  ;;  %v10565_v9 = vperm.slane %v10561_v27, %v14989_v14  ;;  %v11898_v63 = vrot.slane %v11885_v38, 4  ;;  %v17198_v7 = vperm.slane %v19873_v31, %v14989_v14  ;;  %v19877_v27 = vld [vmem:[#allocation22_spill] sm:$0xff]  ;;  %s19975_s17 = smov 102  }
 0x483   : > { %v11888_v11 = vrot.slane %v19869_v22, 4  ;;  %v10568_v52 = vrot.slane %v10559_v49, 4  ;;  %v10577_v22 = vsel %vm314_vm0, %v10576_v48, %v19875_v23 }
 0x484   : > { %v17176_v29 = vpop.permute.xlu1 %13179  ;;  %19874 = vst [vmem:[#allocation116_spill] sm:$0xff] %v17198_v7  ;;  %v10566_v36 = vrot.slane %v10565_v9, 4  ;;  %v11899_v31 = vsel %vm314_vm0, %v11898_v63, %v11875_v61  ;;  %v10581_v48 = vperm.slane %v10577_v22, %v14986_v8 }
 0x485   : > { %19867 = vst [vmem:[#allocation29_spill] sm:$0xff] %v17176_v29  ;;  %13351 = vrot.lane.b32.xlu0 %v17170_v60, %s19365_s12  ;;  %v11889_v29 = vsel %vm314_vm0, %v19872_v5, %v11888_v11  ;;  %s19367_s12 = smov 124   ;;  %v11865_v11 = vsel %vm314_vm0, 0.0, %v11864_v30  ;;  %v10569_v19 = vsel %vm314_vm0, %v10565_v9, %v10568_v52  ;;  %v17212_v23 = vpop.trf.xlu2  ;;  %v19881_v30 = vld [vmem:[#allocation89_spill] sm:$0xff]  ;;  %v17223_v63 = vperm.slane %v11899_v31, %v14989_v14  ;;  %v19885_v31 = vld [vmem:[#allocation19_spill] sm:$0xff] }
 0x486   : > { %v11897_v5 = vperm.slane %v11889_v29, %v14989_v14  ;;  %19879 = vst [vmem:[#allocation113_spill] sm:$0xff] %v17212_v23  ;;  %v11494_v29 = vrot.slane %v17198_v7, 4  ;;  %v11933_v9 = vperm.slane %v10569_v19, %v14986_v8  ;;  %v10567_v52 = vsel %vm314_vm0, %v10566_v36, %v10559_v49 }
 0x487   : > { %v17187_v34 = vpop.permute.xlu0 %13183  ;;  %v10594_v22 = vrot.slane %v10581_v48, 4  ;;  %v11914_v49 = vrot.slane %v17223_v63, 4 }
 0x488   : > { %19870 = vst [vmem:[#allocation115_spill] sm:$0xff] %v17187_v34  ;;  %v10588_v34 = vrot.slane %v19877_v27, 4  ;;  %v10582_v27 = vrot.slane %v19881_v30, 4  ;;  %v11912_v59 = vrot.slane %v11897_v5, 4 }
 0x48a   : > { %13359 = vrot.lane.b32.xlu1 %v11857_v47, %s19367_s12  ;;  %v10570_v47 = vrot.slane %v19878_v10, 4  ;;  %s19370_s12 = smov 126   ;;  %v19882_v10 = vld [vmem:[#allocation84_spill] sm:$0xff] }
 0x48c   : > { %v17202_v53 = vpop.permute.xlu1 %13191  ;;  %v10571_v62 = vsel %vm314_vm0, %v10570_v47, %v19882_v10  ;;  %v11900_v10 = vrot.slane %v11875_v61, 4 }
 0x48d   : > { %19876 = vst [vmem:[#allocation87_spill] sm:$0xff] %v17202_v53  ;;  %13363 = vrot.lane.b32.xlu0 %v11865_v11, %s19370_s12  ;;  %v19883_v11 = vld [vmem:[#allocation121_spill] sm:$0xff]  ;;  %v10575_v30 = vperm.slane %v10571_v62, %v14986_v8  ;;  %s19431_s12 = smov 2   ;;  %v11938_v62 = vrot.slane %v11933_v9, 4 }
 0x48e   : > { %v10589_v16 = vsel %vm314_vm0, %v10588_v34, %v19883_v11  ;;  %v11913_v34 = vsel %vm314_vm0, 0.0, %v11912_v59  ;;  %v10583_v11 = vsel %vm314_vm0, %v10582_v27, %v19885_v31  ;;  %v17246_v27 = vpop.trf.xlu2 }
 0x48f   : > { %v17214_v53 = vpop.permute.xlu0 %13195  ;;  %v10593_v7 = vperm.slane %v10589_v16, %v14986_v8  ;;  %v11498_v16 = vrot.slane %v16662_v56, 4  ;;  %v10587_v59 = vperm.slane %v10583_v11, %v14986_v8  ;;  %v10595_v61 = vsel %vm314_vm0, %v10594_v22, %v10575_v30  ;;  %19887 = vst [vmem:[#allocation119_spill] sm:$0xff] %v17246_v27 }
 0x490   : > { %19880 = vst [vmem:[#allocation41_spill] sm:$0xff] %v17214_v53  ;;  %v11495_v53 = vsel %vm314_vm0, 0.0, %v11494_v29  ;;  %v11901_v29 = vsel %vm314_vm0, %v11885_v38, %v11900_v10  ;;  %v10599_v56 = vperm.slane %v10595_v61, %v14989_v14 }
 0x491   : > { %v10600_v48 = vrot.slane %v10593_v7, 4  ;;  %v17253_v11 = vperm.slane %v11901_v29, %v14989_v14  ;;  %v11499_v22 = vsel %vm314_vm0, 0.0, %v11498_v16  ;;  %v11500_v16 = vrot.slane %v16687_v32, 4 }
 0x492   : > { %13371 = vrot.lane.b32.xlu1 %v11897_v5, %s19435_s22  ;;  %v11923_v5 = vperm.slane %v10567_v52, %v14986_v8  ;;  %s19439_s22 = smov 98  }
 0x493   : > { %v10601_v7 = vsel %vm314_vm0, %v10600_v48, %v10587_v59 }
 0x494   : > { %v17231_v47 = vpop.permute.xlu1 %13203  ;;  %v11939_v31 = vsel %vm314_vm0, %v11938_v62, %v11923_v5 }
 0x495   : > { %19884 = vst [vmem:[#allocation79_spill] sm:$0xff] %v17231_v47  ;;  %13115 = vrot.lane.b32.xlu2 %v11495_v53, %s19431_s12  ;;  %13375 = vrot.lane.b32.xlu0 %v11913_v34, %s19372_s16  ;;  %v11915_v53 = vsel %vm314_vm0, 0.0, %v11914_v49  ;;  %v11928_v34 = vrot.slane %v10569_v19, 4  ;;  %s19429_s16 = smov 10   ;;  %v11940_v47 = vrot.slane %v11923_v5, 4  ;;  %v11945_v19 = vperm.slane %v11939_v31, %v14989_v14  ;;  %v19893_v31 = vld [vmem:[#allocation95_spill] sm:$0xff] }
 0x496   : > { %v10608_v49 = vrot.slane %v10599_v56, 4  ;;  %v10605_v5 = vperm.slane %v10601_v7, %v14989_v14  ;;  %v10628_v7 = vrot.slane %v19893_v31, 4  ;;  %v19896_v31 = vld [vmem:[#allocation91_spill] sm:$0xff]  ;;  %s19970_s12 = smov 96  }
 0x497   : > { %v17240_v36 = vpop.permute.xlu0 %13207  ;;  %v11941_v30 = vsel %vm314_vm0, %v11933_v9, %v11940_v47  ;;  %v11962_v59 = vrot.slane %v11945_v19, 4 }
 0x498   : > { %19886 = vst [vmem:[#allocation22_spill] sm:$0xff] %v17240_v36  ;;  %v11918_v36 = vrot.slane %v10567_v52, 4  ;;  %v11929_v52 = vsel %vm314_vm0, 0.0, %v11928_v34  ;;  %v17272_v48 = vperm.slane %v11941_v30, %v14989_v14  ;;  %v10606_v9 = vrot.slane %v10605_v5, 4 }
 0x499   : > { %v11937_v61 = vperm.slane %v11929_v52, %v14986_v8  ;;  %v10609_v47 = vsel %vm314_vm0, %v10605_v5, %v10608_v49  ;;  %v11963_v52 = vsel %vm314_vm0, 0.0, %v11962_v59  ;;  %v19895_v49 = vld [vmem:[#allocation85_spill] sm:$0xff]  ;;  %v19898_v59 = vld [vmem:[#allocation20_spill] sm:$0xff] }
 0x49a   : > { %13383 = vrot.lane.b32.xlu1 %v11915_v53, %s19429_s16  ;;  %v11919_v10 = vsel %vm314_vm0, 0.0, %v11918_v36  ;;  %19890 = vst [vmem:[#allocation121_spill] sm:$0xff] %v17272_v48  ;;  %v19891_v53 = vld [vmem:[#allocation126_spill] sm:$0xff]  ;;  %v17278_v36 = vpop.trf.xlu2  ;;  %v10610_v5 = vrot.slane %v19895_v49, 4  ;;  %v11980_v23 = vrot.slane %v10609_v47, 4 }
 0x49b   : > { %v11927_v29 = vperm.slane %v11919_v10, %v14986_v8  ;;  %v10616_v34 = vrot.slane %v19891_v53, 4  ;;  %19892 = vst [vmem:[#allocation19_spill] sm:$0xff] %v17278_v36  ;;  %v11950_v30 = vrot.slane %v11937_v61, 4  ;;  %v11985_v53 = vperm.slane %v10609_v47, %v14986_v8 }
 0x49c   : > { %v17256_v38 = vpop.permute.xlu1 %13215 }
 0x49d   : > { %19888 = vst [vmem:[#allocation89_spill] sm:$0xff] %v17256_v38  ;;  %13131 = vrot.lane.b32.xlu2 %v11499_v22, %s19429_s16  ;;  %13387 = vrot.lane.b32.xlu0 %v17253_v11, %s19374_s18  ;;  %v11501_v22 = vsel %vm314_vm0, 0.0, %v11500_v16  ;;  %s19423_s18 = smov 14   ;;  %v11952_v10 = vrot.slane %v11927_v29, 4  ;;  %v10607_v16 = vsel %vm314_vm0, %v10606_v9, %v10599_v56  ;;  %v10629_v38 = vsel %vm314_vm0, %v10628_v7, %v19898_v59  ;;  %s19433_s16 = smov 92  }
 0x49e   : > { %v11975_v56 = vperm.slane %v10607_v16, %v14986_v8  ;;  %v11990_v9 = vrot.slane %v11985_v53, 4  ;;  %v10633_v7 = vperm.slane %v10629_v38, %v14986_v8  ;;  %v11550_v59 = vrot.slane %v16747_v3, 4 }
 0x49f   : > { %v17267_v62 = vpop.permute.xlu0 %13219  ;;  %v11953_v27 = vsel %vm314_vm0, %v11937_v61, %v11952_v10  ;;  %v11970_v10 = vrot.slane %v10607_v16, 4 }
 0x4a0   : > { %19889 = vst [vmem:[#allocation84_spill] sm:$0xff] %v17267_v62 }
 0x4a1   : > { %v11971_v16 = vsel %vm314_vm0, 0.0, %v11970_v10  ;;  %v19905_v10 = vld [vmem:[#allocation98_spill] sm:$0xff] }
 0x4a2   : > { %13395 = vrot.lane.b32.xlu1 %v11945_v19, %s19425_s23  ;;  %v11964_v19 = vrot.slane %v17272_v48, 4  ;;  %v19899_v48 = vld [vmem:[#allocation124_spill] sm:$0xff]  ;;  %s19965_s23 = smov 90  }
 0x4a4   : > { %v17281_v32 = vpop.permute.xlu1 %13227  ;;  %v11965_v49 = vsel %vm314_vm0, 0.0, %v11964_v19  ;;  %v17314_v19 = vpop.trf.xlu2 }
 0x4a5   : > { %19894 = vst [vmem:[#allocation126_spill] sm:$0xff] %v17281_v32  ;;  %13139 = vrot.lane.b32.xlu2 %v11501_v22, %s19423_s18  ;;  %13399 = vrot.lane.b32.xlu0 %v11963_v52, %s19377_s24  ;;  %v10617_v32 = vsel %vm314_vm0, %v10616_v34, %v19896_v31  ;;  %v10622_v22 = vrot.slane %v16267_v4, 4  ;;  %v11951_v52 = vsel %vm314_vm0, %v11950_v30, %v11927_v29  ;;  %v19900_v29 = vld [vmem:[#allocation94_spill] sm:$0xff]  ;;  %s19417_s24 = smov 20   ;;  %s19427_s18 = smov 86  }
 0x4a6   : > { %v10621_v36 = vperm.slane %v10617_v32, %v14986_v8  ;;  %v10611_v34 = vsel %vm314_vm0, %v10610_v5, %v19899_v48  ;;  %v17308_v4 = vperm.slane %v11951_v52, %v14989_v14  ;;  %v11961_v30 = vperm.slane %v11953_v27, %v14989_v14  ;;  %19901 = vst [vmem:[#allocation85_spill] sm:$0xff] %v17314_v19  ;;  %v20062_v19 = vld [vmem:[#allocation150_spill] sm:$0xff] }
 0x4a7   : > { %v17292_v62 = vpop.permute.xlu0 %13231  ;;  %v10623_v32 = vsel %vm314_vm0, %v10622_v22, %v19900_v29  ;;  %v10615_v61 = vperm.slane %v10611_v34, %v14986_v8  ;;  %v11991_v48 = vsel %vm314_vm0, %v11990_v9, %v11975_v56  ;;  %v11981_v5 = vsel %vm314_vm0, 0.0, %v11980_v23  ;;  %v19904_v9 = vld [vmem:[#allocation92_spill] sm:$0xff] }
 0x4a8   : > { %19897 = vst [vmem:[#allocation95_spill] sm:$0xff] %v17292_v62  ;;  %v10634_v47 = vrot.slane %v10621_v36, 4  ;;  %v10640_v27 = vrot.slane %v10633_v7, 4  ;;  %v10627_v31 = vperm.slane %v10623_v32, %v14986_v8  ;;  %v11968_v22 = vrot.slane %v11961_v30, 4  ;;  %v19941_v62 = vld [vmem:[#allocation142_spill] sm:$0xff] }
 0x4a9   : > { %v17330_v52 = vperm.slane %v11991_v48, %v14989_v14  ;;  %v11551_v34 = vsel %vm314_vm0, 0.0, %v11550_v59  ;;  %v10656_v7 = vrot.slane %v19904_v9, 4  ;;  %v11992_v32 = vrot.slane %v11975_v56, 4  ;;  %v19907_v59 = vld [vmem:[#allocation131_spill] sm:$0xff] }
 0x4aa   : > { %13407 = vrot.lane.b32.xlu1 %v11965_v49, %s19419_s25  ;;  %v11989_v49 = vperm.slane %v11981_v5, %v14986_v8  ;;  %v10641_v23 = vsel %vm314_vm0, %v10640_v27, %v10627_v31  ;;  %v11969_v29 = vsel %vm314_vm0, 0.0, %v11968_v22  ;;  %v10650_v5 = vrot.slane %v19905_v10, 4  ;;  %s19960_s25 = smov 84  }
 0x4ab   : > { %v10645_v48 = vperm.slane %v10641_v23, %v14989_v14  ;;  %v10657_v56 = vsel %vm314_vm0, %v10656_v7, %v19907_v59  ;;  %v10668_v22 = vrot.slane %v16322_v40, 4  ;;  %v19911_v59 = vld [vmem:[#allocation24_spill] sm:$0xff] }
 0x4ac   : > { %v17320_v38 = vpop.permute.xlu1 %13239  ;;  %v17346_v27 = vpop.trf.xlu2  ;;  %v10661_v7 = vperm.slane %v10657_v56, %v14986_v8 }
 0x4ad   : > { %13151 = vrot.lane.b32.xlu2 %v16712_v55, %s19417_s24  ;;  %13411 = vrot.lane.b32.xlu0 %v17308_v4, %s19379_s26  ;;  %19902 = vst [vmem:[#allocation91_spill] sm:$0xff] %v17320_v38  ;;  %v10635_v55 = vsel %vm314_vm0, %v10634_v47, %v10615_v61  ;;  %s19411_s26 = smov 26   ;;  %v11979_v61 = vperm.slane %v11971_v16, %v14986_v8  ;;  %v12002_v47 = vrot.slane %v11989_v49, 4  ;;  %s19421_s24 = smov 80  }
 0x4ae   : > { %v10639_v3 = vperm.slane %v10635_v55, %v14989_v14  ;;  %19906 = vst [vmem:[#allocation124_spill] sm:$0xff] %v17346_v27  ;;  %v10674_v56 = vrot.slane %v10661_v7, 4 }
 0x4af   : > { %v17325_v36 = vpop.permute.xlu0 %13243  ;;  %v12003_v23 = vsel %vm314_vm0, %v12002_v47, %v11979_v61  ;;  %v12004_v10 = vrot.slane %v11979_v61, 4 }
 0x4b0   : > { %19903 = vst [vmem:[#allocation20_spill] sm:$0xff] %v17325_v36  ;;  %v10648_v31 = vrot.slane %v10639_v3, 4  ;;  %v19910_v36 = vld [vmem:[#allocation21_spill] sm:$0xff] }
 0x4b1   : > { %v10662_v38 = vrot.slane %v19910_v36, 4  ;;  %v12005_v36 = vsel %vm314_vm0, %v11989_v49, %v12004_v10 }
 0x4b2   : > { %13419 = vrot.lane.b32.xlu1 %v11961_v30, %s19413_s27  ;;  %v12014_v30 = vrot.slane %v17330_v52, 4  ;;  %v10649_v47 = vsel %vm314_vm0, %v10645_v48, %v10648_v31  ;;  %v11600_v31 = vrot.slane %v16798_v6, 4  ;;  %v17385_v49 = vperm.slane %v12005_v36, %v14989_v14  ;;  %s19952_s27 = smov 78  }
 0x4b4   : > { %v17351_v55 = vpop.permute.xlu1 %13251  ;;  %v12015_v16 = vsel %vm314_vm0, 0.0, %v12014_v30  ;;  %v12009_v30 = vperm.slane %v12003_v23, %v14989_v14  ;;  %v17382_v23 = vpop.trf.xlu2 }
 0x4b5   : > { %13163 = vrot.lane.b32.xlu2 %v11551_v34, %s19411_s26  ;;  %13423 = vrot.lane.b32.xlu0 %v11969_v29, %s19381_s28  ;;  %19908 = vst [vmem:[#allocation94_spill] sm:$0xff] %v17351_v55  ;;  %v11993_v34 = vsel %vm314_vm0, %v11985_v53, %v11992_v32  ;;  %v10646_v29 = vrot.slane %v10645_v48, 4  ;;  %v10651_v53 = vsel %vm314_vm0, %v10650_v5, %v19911_v59  ;;  %v19912_v32 = vld [vmem:[#allocation100_spill] sm:$0xff]  ;;  %s19405_s28 = smov 32   ;;  %v11601_v59 = vsel %vm314_vm0, 0.0, %v11600_v31  ;;  %s19415_s26 = smov 74  }
 0x4b6   : > { %v17362_v40 = vperm.slane %v11993_v34, %v14989_v14  ;;  %v10655_v5 = vperm.slane %v10651_v53, %v14986_v8  ;;  %v12032_v34 = vrot.slane %v10649_v47, 4  ;;  %v10663_v48 = vsel %vm314_vm0, %v10662_v38, %v16304_v2  ;;  %19913 = vst [vmem:[#allocation98_spill] sm:$0xff] %v17382_v23 }
 0x4b7   : > { %v17354_v9 = vpop.permute.xlu0 %13255  ;;  %v10647_v61 = vsel %vm314_vm0, %v10646_v29, %v10639_v3  ;;  %v10667_v2 = vperm.slane %v10663_v48, %v14986_v8 }
 0x4b8   : > { %19909 = vst [vmem:[#allocation92_spill] sm:$0xff] %v17354_v9  ;;  %v10669_v9 = vsel %vm314_vm0, %v10668_v22, %v19912_v32  ;;  %v12027_v3 = vperm.slane %v10647_v61, %v14986_v8  ;;  %v10675_v10 = vsel %vm314_vm0, %v10674_v56, %v10655_v5  ;;  %v12033_v7 = vsel %vm314_vm0, 0.0, %v12032_v34 }
 0x4b9   : > { %v10673_v22 = vperm.slane %v10669_v9, %v14986_v8  ;;  %v12022_v9 = vrot.slane %v10647_v61, 4  ;;  %v10679_v36 = vperm.slane %v10675_v10, %v14989_v14  ;;  %v12041_v61 = vperm.slane %v12033_v7, %v14986_v8 }
 0x4ba   : > { %13431 = vrot.lane.b32.xlu1 %v12015_v16, %s19407_s29  ;;  %v12018_v16 = vrot.slane %v12009_v30, 4  ;;  %s19946_s29 = smov 72  }
 0x4bb   : > { %v10680_v6 = vrot.slane %v10673_v22, 4  ;;  %v12023_v56 = vsel %vm314_vm0, 0.0, %v12022_v9  ;;  %v19916_v22 = vld [vmem:[#allocation105_spill] sm:$0xff]  ;;  %v12054_v7 = vrot.slane %v12041_v61, 4 }
 0x4bc   : > { %v17388_v29 = vpop.permute.xlu1 %13263  ;;  %v12019_v53 = vsel %vm314_vm0, 0.0, %v12018_v16  ;;  %v10696_v34 = vrot.slane %v19916_v22, 4  ;;  %v12031_v10 = vperm.slane %v12023_v56, %v14986_v8 }
 0x4bd   : > { %13175 = vrot.lane.b32.xlu2 %v16767_v1, %s19405_s28  ;;  %13435 = vrot.lane.b32.xlu0 %v17362_v40, %s19383_s30  ;;  %v12037_v1 = vperm.slane %v10649_v47, %v14986_v8  ;;  %19914 = vst [vmem:[#allocation131_spill] sm:$0xff] %v17388_v29  ;;  %s19399_s30 = smov 38   ;;  %v12044_v47 = vrot.slane %v12027_v3, 4  ;;  %v10681_v5 = vsel %vm314_vm0, %v10680_v6, %v10667_v2  ;;  %v19918_v2 = vld [vmem:[#allocation96_spill] sm:$0xff]  ;;  %s19409_s28 = smov 68  }
 0x4be   : > { %v12055_v22 = vsel %vm314_vm0, %v12054_v7, %v12031_v10 }
 0x4bf   : > { %v17393_v38 = vpop.permute.xlu0 %13267  ;;  %v12042_v32 = vrot.slane %v12037_v1, 4  ;;  %v12045_v16 = vsel %vm314_vm0, %v12037_v1, %v12044_v47  ;;  %v10690_v47 = vrot.slane %v16340_v43, 4 }
 0x4c0   : > { %19915 = vst [vmem:[#allocation21_spill] sm:$0xff] %v17393_v38  ;;  %v17412_v38 = vpop.trf.xlu2  ;;  %v12053_v1 = vperm.slane %v12045_v16, %v14989_v14  ;;  %v19922_v16 = vld [vmem:[#allocation107_spill] sm:$0xff] }
 0x4c1   : > { %v12043_v48 = vsel %vm314_vm0, %v12042_v32, %v12027_v3  ;;  %19917 = vst [vmem:[#allocation24_spill] sm:$0xff] %v17412_v38  ;;  %v10697_v3 = vsel %vm314_vm0, %v10696_v34, %v19918_v2  ;;  %v19920_v32 = vld [vmem:[#allocation28_spill] sm:$0xff]  ;;  %v10702_v43 = vrot.slane %v19922_v16, 4 }
 0x4c2   : > { %13443 = vrot.lane.b32.xlu1 %v12009_v30, %s19401_s2  ;;  %v12020_v30 = vrot.slane %v17385_v49, 4  ;;  %v17415_v9 = vperm.slane %v12043_v48, %v14989_v14  ;;  %v10701_v48 = vperm.slane %v10697_v3, %v14986_v8  ;;  %v12068_v2 = vrot.slane %v12053_v1, 4  ;;  %s19936_s2 = smov 66  }
 0x4c4   : > { %v12021_v31 = vsel %vm314_vm0, 0.0, %v12020_v30  ;;  %v17419_v6 = vpop.permute.xlu1 %13275  ;;  %v10708_v30 = vrot.slane %v19920_v32, 4  ;;  %v19923_v32 = vld [vmem:[#allocation102_spill] sm:$0xff] }
 0x4c5   : > { %13187 = vrot.lane.b32.xlu2 %v11601_v59, %s19399_s30  ;;  %13447 = vrot.lane.b32.xlu0 %v12019_v53, %s19395_s3  ;;  %v10688_v59 = vrot.slane %v10679_v36, 4  ;;  %v10685_v53 = vperm.slane %v10681_v5, %v14989_v14  ;;  %19919 = vst [vmem:[#allocation100_spill] sm:$0xff] %v17419_v6  ;;  %v17440_v6 = vperm.slane %v12055_v22, %v14989_v14  ;;  %s19931_s3 = smov 60   ;;  %s19403_s30 = smov 62  }
 0x4c7   : > { %v17424_v5 = vpop.permute.xlu0 %13279  ;;  %v10686_v56 = vrot.slane %v10685_v53, 4  ;;  %v10689_v34 = vsel %vm314_vm0, %v10685_v53, %v10688_v59  ;;  %v10714_v53 = vrot.slane %v10701_v48, 4 }
 0x4c8   : > { %19921 = vst [vmem:[#allocation105_spill] sm:$0xff] %v17424_v5  ;;  %v10691_v5 = vsel %vm314_vm0, %v10690_v47, %v19923_v32  ;;  %v12089_v7 = vperm.slane %v10689_v34, %v14986_v8  ;;  %v12069_v47 = vsel %vm314_vm0, 0.0, %v12068_v2  ;;  %v12056_v32 = vrot.slane %v12031_v10, 4  ;;  %v17451_v22 = vpop.trf.xlu2 }
 0x4c9   : > { %v10687_v59 = vsel %vm314_vm0, %v10686_v56, %v10679_v36  ;;  %v10695_v3 = vperm.slane %v10691_v5, %v14986_v8  ;;  %19925 = vst [vmem:[#allocation96_spill] sm:$0xff] %v17451_v22  ;;  %v12070_v36 = vrot.slane %v17440_v6, 4 }
 0x4ca   : > { %13455 = vrot.lane.b32.xlu1 %v12021_v31, %s19385_s4  ;;  %s19393_s4 = smov 44   ;;  %v11650_v31 = vrot.slane %v16857_v12, 4  ;;  %v12094_v5 = vrot.slane %v12089_v7, 4  ;;  %v12057_v2 = vsel %vm314_vm0, %v12041_v61, %v12056_v32 }
 0x4cc   : > { %v11651_v12 = vsel %vm314_vm0, 0.0, %v11650_v31  ;;  %v17457_v56 = vpop.permute.xlu1 %13287  ;;  %v10715_v31 = vsel %vm314_vm0, %v10714_v53, %v10695_v3 }
 0x4cd   : > { %13199 = vrot.lane.b32.xlu2 %v16822_v13, %s19393_s4  ;;  %13459 = vrot.lane.b32.xlu0 %v17415_v9, %s19387_s13  ;;  %v10709_v13 = vsel %vm314_vm0, %v10708_v30, %v16359_v44  ;;  %v19924_v44 = vld [vmem:[#allocation23_spill] sm:$0xff]  ;;  %s19391_s13 = smov 50   ;;  %19927 = vst [vmem:[#allocation28_spill] sm:$0xff] %v17457_v56  ;;  %v10719_v56 = vperm.slane %v10715_v31, %v14989_v14  ;;  %s19397_s4 = smov 56  }
 0x4ce   : > { %v10713_v16 = vperm.slane %v10709_v13, %v14986_v8  ;;  %v10703_v30 = vsel %vm314_vm0, %v10702_v43, %v19924_v44  ;;  %v12071_v13 = vsel %vm314_vm0, 0.0, %v12070_v36  ;;  %v12074_v44 = vrot.slane %v10687_v59, 4 }
 0x4cf   : > { %v17459_v48 = vpop.permute.xlu0 %13291  ;;  %v10707_v10 = vperm.slane %v10703_v30, %v14986_v8 }
 0x4d0   : > { %19928 = vst [vmem:[#allocation107_spill] sm:$0xff] %v17459_v48  ;;  %v10720_v43 = vrot.slane %v10713_v16, 4  ;;  %v17469_v48 = vperm.slane %v12057_v2, %v14989_v14  ;;  %v17473_v3 = vpop.trf.xlu2  ;;  %v10728_v16 = vrot.slane %v10719_v56, 4 }
 0x4d1   : > { %19930 = vst [vmem:[#allocation102_spill] sm:$0xff] %v17473_v3 }
 0x4d2   : > { %13467 = vrot.lane.b32.xlu1 %v12053_v1, %s19389_s15  ;;  %s19926_s15 = smov 54   ;;  %v12079_v1 = vperm.slane %v10687_v59, %v14986_v8  ;;  %v10721_v30 = vsel %vm314_vm0, %v10720_v43, %v10707_v10  ;;  %v12075_v59 = vsel %vm314_vm0, 0.0, %v12074_v44 }
 0x4d3   : > { %v10725_v32 = vperm.slane %v10721_v30, %v14989_v14  ;;  %v12083_v43 = vperm.slane %v12075_v59, %v14986_v8  ;;  %v19938_v59 = vld [vmem:[#allocation109_spill] sm:$0xff] }
 0x4d4   : > { %v12096_v29 = vrot.slane %v12079_v1, 4  ;;  %v17483_v36 = vpop.permute.xlu1 %13299 }
 0x4d5   : > { %13211 = vrot.lane.b32.xlu2 %v11651_v12, %s19391_s13  ;;  %13471 = vrot.lane.b32.xlu0 %v12069_v47, %s19926_s15  ;;  %v12084_v12 = vrot.slane %v10689_v34, 4  ;;  %v12095_v47 = vsel %vm314_vm0, %v12094_v5, %v12079_v1  ;;  %s19929_s13 = smov 58   ;;  %19932 = vst [vmem:[#allocation23_spill] sm:$0xff] %v17483_v36  ;;  %v11656_v1 = vrot.slane %v16912_v20, 4  ;;  %v10729_v2 = vsel %vm314_vm0, %v10725_v32, %v10728_v16 }
 0x4d6   : > { %v12101_v53 = vperm.slane %v12095_v47, %v14989_v14  ;;  %v12097_v34 = vsel %vm314_vm0, %v12089_v7, %v12096_v29  ;;  %v10736_v29 = vrot.slane %v16395_v50, 4  ;;  %v10726_v7 = vrot.slane %v10725_v32, 4 }
 0x4d7   : > { %v12085_v61 = vsel %vm314_vm0, 0.0, %v12084_v12  ;;  %v17490_v31 = vperm.slane %v12097_v34, %v14989_v14  ;;  %v11657_v20 = vsel %vm314_vm0, 0.0, %v11656_v1  ;;  %v12108_v50 = vrot.slane %v12083_v43, 4 }
 0x4d8   : > { %v12118_v5 = vrot.slane %v12101_v53, 4  ;;  %v12093_v10 = vperm.slane %v12085_v61, %v14986_v8  ;;  %v19937_v61 = vld [vmem:[#allocation103_spill] sm:$0xff]  ;;  %v12141_v34 = vperm.slane %v10729_v2, %v14986_v8  ;;  %v10737_v16 = vsel %vm314_vm0, %v10736_v29, %v19938_v59  ;;  %v17506_v32 = vpop.trf.xlu2 }
 0x4d9   : > { %v12120_v30 = vrot.slane %v17490_v31, 4  ;;  %v10727_v1 = vsel %vm314_vm0, %v10726_v7, %v10719_v56  ;;  %v12136_v55 = vrot.slane %v10729_v2, 4 }
 0x4da   : > { %13479 = vrot.lane.b32.xlu1 %v12071_v13, %s19929_s13  ;;  %v19935_v13 = vld [vmem:[#allocation32_spill] sm:$0xff]  ;;  %v12119_v47 = vsel %vm314_vm0, 0.0, %v12118_v5  ;;  %v12106_v44 = vrot.slane %v12093_v10, 4  ;;  %v19940_v5 = vld [vmem:[#allocation25_spill] sm:$0xff]  ;;  %v12109_v36 = vsel %vm314_vm0, %v12093_v10, %v12108_v50  ;;  %v12131_v56 = vperm.slane %v10727_v1, %v14986_v8 }
 0x4db   : > { %v10748_v12 = vrot.slane %v19935_v13, 4  ;;  %19939 = vst [vmem:[#allocation32_spill] sm:$0xff] %v17506_v32  ;;  %v12146_v7 = vrot.slane %v12141_v34, 4  ;;  %v12117_v2 = vperm.slane %v12109_v36, %v14989_v14  ;;  %v11706_v36 = vrot.slane %v16984_v17, 4  ;;  %v20020_v32 = vld [vmem:[#allocation134_spill] sm:$0xff] }
 0x4dc   : > { %v17518_v59 = vpop.permute.xlu1 %13311 }
 0x4dd   : > { %13223 = vrot.lane.b32.xlu2 %v16875_v39, %s19397_s4  ;;  %13483 = vrot.lane.b32.xlu0 %v17469_v48, %s19931_s3  ;;  %v17487_v39 = vpop.permute.xlu0 %13303  ;;  %s19934_s4 = smov 64   ;;  %v10749_v13 = vsel %vm314_vm0, %v10748_v12, %v19940_v5  ;;  %19942 = vst [vmem:[#allocation103_spill] sm:$0xff] %v17518_v59  ;;  %v12147_v50 = vsel %vm314_vm0, %v12146_v7, %v12131_v56  ;;  %v19949_v7 = vld [vmem:[#allocation110_spill] sm:$0xff] }
 0x4de   : > { %19933 = vst [vmem:[#allocation178_spill] sm:$0xff] %v17487_v39  ;;  %v10741_v39 = vperm.slane %v10737_v16, %v14986_v8  ;;  %v12137_v16 = vsel %vm314_vm0, 0.0, %v12136_v55 }
 0x4e2   : > { %13491 = vrot.lane.b32.xlu1 %v12101_v53, %s19934_s4  ;;  %v10730_v53 = vrot.slane %v19937_v61, 4  ;;  %v12121_v61 = vsel %vm314_vm0, 0.0, %v12120_v30  ;;  %v10754_v30 = vrot.slane %v10741_v39, 4  ;;  %v12124_v39 = vrot.slane %v12117_v2, 4 }
 0x4e4   : > { %v10731_v29 = vsel %vm314_vm0, %v10730_v53, %v19941_v62  ;;  %v12126_v53 = vrot.slane %v10727_v1, 4 }
 0x4e5   : > { %13235 = vrot.lane.b32.xlu2 %v11657_v20, %s19403_s30  ;;  %13495 = vrot.lane.b32.xlu0 %v12119_v47, %s19936_s2  ;;  %v10742_v20 = vrot.slane %v16413_v18, 4  ;;  %v12107_v47 = vsel %vm314_vm0, %v12106_v44, %v12083_v43  ;;  %s19943_s30 = smov 70   ;;  %v10753_v18 = vperm.slane %v10749_v13, %v14986_v8  ;;  %v17523_v43 = vpop.permute.xlu0 %13315  ;;  %v19945_v44 = vld [vmem:[#allocation111_spill] sm:$0xff]  ;;  %v10735_v62 = vperm.slane %v10731_v29, %v14986_v8 }
 0x4e6   : > { %19944 = vst [vmem:[#allocation109_spill] sm:$0xff] %v17523_v43  ;;  %v17526_v12 = vperm.slane %v12107_v47, %v14989_v14  ;;  %v12127_v1 = vsel %vm314_vm0, 0.0, %v12126_v53  ;;  %v11707_v29 = vsel %vm314_vm0, 0.0, %v11706_v36 }
 0x4e7   : > { %v10743_v10 = vsel %vm314_vm0, %v10742_v20, %v19945_v44  ;;  %v10760_v5 = vrot.slane %v10753_v18, 4  ;;  %v10755_v47 = vsel %vm314_vm0, %v10754_v30, %v10735_v62  ;;  %v10776_v18 = vrot.slane %v19949_v7, 4  ;;  %v17553_v44 = vpop.permute.xlu1 %13323 }
 0x4e8   : > { %v10747_v13 = vperm.slane %v10743_v10, %v14986_v8  ;;  %v10759_v17 = vperm.slane %v10755_v47, %v14989_v14  ;;  %19950 = vst [vmem:[#allocation142_spill] sm:$0xff] %v17553_v44  ;;  %v12125_v10 = vsel %vm314_vm0, 0.0, %v12124_v39  ;;  %v12148_v62 = vrot.slane %v12131_v56, 4  ;;  %v19955_v56 = vld [vmem:[#allocation149_spill] sm:$0xff]  ;;  %v19957_v44 = vld [vmem:[#allocation27_spill] sm:$0xff] }
 0x4e9   : > { %v10777_v47 = vsel %vm314_vm0, %v10776_v18, %v19955_v56  ;;  %v10788_v7 = vrot.slane %v16469_v51, 4  ;;  %v19958_v18 = vld [vmem:[#allocation30_spill] sm:$0xff] }
 0x4ea   : > { %13503 = vrot.lane.b32.xlu1 %v12121_v61, %s19943_s30  ;;  %v12145_v61 = vperm.slane %v12137_v16, %v14986_v8  ;;  %v10761_v55 = vsel %vm314_vm0, %v10760_v5, %v10747_v13  ;;  %v19953_v5 = vld [vmem:[#allocation112_spill] sm:$0xff]  ;;  %v10768_v39 = vrot.slane %v10759_v17, 4  ;;  %v10781_v43 = vperm.slane %v10777_v47, %v14986_v8  ;;  %v19959_v56 = vld [vmem:[#allocation114_spill] sm:$0xff] }
 0x4eb   : > { %v10765_v16 = vperm.slane %v10761_v55, %v14989_v14  ;;  %v10770_v13 = vrot.slane %v19953_v5, 4  ;;  %v10782_v5 = vrot.slane %v19957_v44, 4 }
 0x4ec   : > { %v12158_v53 = vrot.slane %v12145_v61, 4  ;;  %v10794_v47 = vrot.slane %v10781_v43, 4 }
 0x4ed   : > { %13247 = vrot.lane.b32.xlu2 %v16935_v46, %s19409_s28  ;;  %13507 = vrot.lane.b32.xlu0 %v17526_v12, %s19946_s29  ;;  %v17544_v46 = vperm.slane %v12147_v50, %v14989_v14  ;;  %s19948_s28 = smov 76   ;;  %v17556_v30 = vpop.permute.xlu0 %13327  ;;  %v12135_v50 = vperm.slane %v12127_v1, %v14986_v8  ;;  %v10766_v1 = vrot.slane %v10765_v16, 4  ;;  %v10771_v51 = vsel %vm314_vm0, %v10770_v13, %v19958_v18 }
 0x4ee   : > { %19951 = vst [vmem:[#allocation111_spill] sm:$0xff] %v17556_v30  ;;  %v10775_v13 = vperm.slane %v10771_v51, %v14986_v8 }
 0x4ef   : > { %v17539_v20 = vpop.permute.xlu2 %13115  ;;  %v12159_v30 = vsel %vm314_vm0, %v12158_v53, %v12135_v50  ;;  %v12160_v55 = vrot.slane %v12135_v50, 4  ;;  %v17588_v44 = vpop.permute.xlu1 %13335  ;;  %v10767_v53 = vsel %vm314_vm0, %v10766_v1, %v10759_v17 }
 0x4f0   : > { %19947 = vst [vmem:[#allocation25_spill] sm:$0xff] %v17539_v20  ;;  %v12183_v43 = vperm.slane %v10767_v53, %v14986_v8  ;;  %v12178_v1 = vrot.slane %v10767_v53, 4 }
 0x4f1   : > { %19961 = vst [vmem:[#allocation112_spill] sm:$0xff] %v17588_v44  ;;  %v12161_v50 = vsel %vm314_vm0, %v12145_v61, %v12160_v55  ;;  %v10795_v55 = vsel %vm314_vm0, %v10794_v47, %v10775_v13 }
 0x4f2   : > { %13515 = vrot.lane.b32.xlu1 %v12117_v2, %s19948_s28  ;;  %v12170_v2 = vrot.slane %v17544_v46, 4  ;;  %v17603_v17 = vperm.slane %v12161_v50, %v14989_v14  ;;  %v12179_v47 = vsel %vm314_vm0, 0.0, %v12178_v1 }
 0x4f5   : > { %13259 = vrot.lane.b32.xlu2 %v11707_v29, %s19415_s26  ;;  %13519 = vrot.lane.b32.xlu0 %v12125_v10, %s19952_s27  ;;  %v12149_v29 = vsel %vm314_vm0, %v12141_v34, %v12148_v62  ;;  %v12171_v10 = vsel %vm314_vm0, 0.0, %v12170_v2  ;;  %s19956_s26 = smov 82   ;;  %v10789_v34 = vsel %vm314_vm0, %v10788_v7, %v19959_v56  ;;  %v12165_v62 = vperm.slane %v12159_v30, %v14989_v14  ;;  %v17594_v7 = vpop.permute.xlu0 %13339 }
 0x4f6   : > { %v17576_v59 = vperm.slane %v12149_v29, %v14989_v14  ;;  %v10769_v2 = vsel %vm314_vm0, %v10765_v16, %v10768_v39  ;;  %v10793_v30 = vperm.slane %v10789_v34, %v14986_v8  ;;  %19962 = vst [vmem:[#allocation149_spill] sm:$0xff] %v17594_v7  ;;  %v11756_v29 = vrot.slane %v17039_v0, 4 }
 0x4f7   : > { %v17564_v36 = vpop.permute.xlu2 %13131  ;;  %v12188_v39 = vrot.slane %v10769_v2, 4  ;;  %v12193_v61 = vperm.slane %v10769_v2, %v14986_v8  ;;  %v12176_v34 = vrot.slane %v17603_v17, 4  ;;  %v10799_v2 = vperm.slane %v10795_v55, %v14989_v14 }
 0x4f8   : > { %19954 = vst [vmem:[#allocation110_spill] sm:$0xff] %v17564_v36  ;;  %v10800_v51 = vrot.slane %v10793_v30, 4  ;;  %v11757_v0 = vsel %vm314_vm0, 0.0, %v11756_v29  ;;  %v17621_v30 = vpop.permute.xlu1 %13347 }
 0x4f9   : > { %v12198_v56 = vrot.slane %v12193_v61, 4  ;;  %19967 = vst [vmem:[#allocation114_spill] sm:$0xff] %v17621_v30  ;;  %v12177_v29 = vsel %vm314_vm0, 0.0, %v12176_v34  ;;  %v11806_v34 = vrot.slane %v17088_v26, 4 }
 0x4fa   : > { %13527 = vrot.lane.b32.xlu1 %v12171_v10, %s19956_s26  ;;  %v12174_v10 = vrot.slane %v12165_v62, 4 }
 0x4fd   : > { %13271 = vrot.lane.b32.xlu2 %v17010_v33, %s19421_s24  ;;  %13531 = vrot.lane.b32.xlu0 %v17576_v59, %s19960_s25  ;;  %v10783_v33 = vsel %vm314_vm0, %v10782_v5, %v16450_v41  ;;  %s19964_s24 = smov 88   ;;  %v12189_v41 = vsel %vm314_vm0, 0.0, %v12188_v39  ;;  %v12175_v5 = vsel %vm314_vm0, 0.0, %v12174_v10  ;;  %v12199_v39 = vsel %vm314_vm0, %v12198_v56, %v12183_v43 }
 0x4fe   : > { %v10787_v18 = vperm.slane %v10783_v33, %v14986_v8  ;;  %v12197_v50 = vperm.slane %v12189_v41, %v14986_v8  ;;  %v17624_v33 = vpop.permute.xlu0 %13351  ;;  %v17632_v1 = vperm.slane %v12199_v39, %v14989_v14 }
 0x4ff   : > { %v17596_v16 = vpop.permute.xlu2 %13139  ;;  %19968 = vst [vmem:[#allocation179_spill] sm:$0xff] %v17624_v33 }
 0x500   : > { %19963 = vst [vmem:[#allocation27_spill] sm:$0xff] %v17596_v16  ;;  %v10801_v53 = vsel %vm314_vm0, %v10800_v51, %v10787_v18  ;;  %v12187_v18 = vperm.slane %v12179_v47, %v14986_v8  ;;  %v12210_v51 = vrot.slane %v12197_v50, 4  ;;  %v17648_v39 = vpop.permute.xlu1 %13359  ;;  %v20019_v16 = vld [vmem:[#allocation172_spill] sm:$0xff] }
 0x501   : > { %v10805_v55 = vperm.slane %v10801_v53, %v14989_v14  ;;  %19972 = vst [vmem:[#allocation181_spill] sm:$0xff] %v17648_v39 }
 0x502   : > { %13539 = vrot.lane.b32.xlu1 %v12165_v62, %s19964_s24  ;;  %v12200_v62 = vrot.slane %v12183_v43, 4  ;;  %v12211_v43 = vsel %vm314_vm0, %v12210_v51, %v12187_v18 }
 0x503   : > { %v17645_v53 = vperm.slane %v12211_v43, %v14989_v14 }
 0x504   : > { %v12201_v10 = vsel %vm314_vm0, %v12193_v61, %v12200_v62  ;;  %v10806_v61 = vrot.slane %v10805_v55, 4 }
 0x505   : > { %13283 = vrot.lane.b32.xlu2 %v11757_v0, %s19427_s18  ;;  %13543 = vrot.lane.b32.xlu0 %v12175_v5, %s19965_s23  ;;  %v10808_v0 = vrot.slane %v10799_v2, 4  ;;  %s19969_s18 = smov 94   ;;  %v12209_v41 = vperm.slane %v12201_v10, %v14989_v14  ;;  %v11807_v10 = vsel %vm314_vm0, 0.0, %v11806_v34  ;;  %v12226_v26 = vrot.slane %v17645_v53, 4 }
 0x507   : > { %v17618_v13 = vpop.permute.xlu2 %13151  ;;  %v10809_v5 = vsel %vm314_vm0, %v10805_v55, %v10808_v0  ;;  %v12224_v62 = vrot.slane %v12209_v41, 4  ;;  %v12212_v55 = vrot.slane %v12187_v18, 4  ;;  %v12227_v34 = vsel %vm314_vm0, 0.0, %v12226_v26 }
 0x508   : > { %19966 = vst [vmem:[#allocation30_spill] sm:$0xff] %v17618_v13  ;;  %v12245_v47 = vperm.slane %v10809_v5, %v14986_v8  ;;  %v17670_v39 = vpop.permute.xlu1 %13371 }
 0x509   : > { %v12225_v0 = vsel %vm314_vm0, 0.0, %v12224_v62 }
 0x50a   : > { %13551 = vrot.lane.b32.xlu1 %v12177_v29, %s19969_s18  ;;  %v17652_v29 = vpop.permute.xlu0 %13363  ;;  %v12250_v43 = vrot.slane %v12245_v47, 4 }
 0x50b   : > { %19974 = vst [vmem:[#allocation182_spill] sm:$0xff] %v17652_v29  ;;  %v10856_v29 = vrot.slane %v16545_v24, 4  ;;  %v19979_v24 = vld [vmem:[#allocation127_spill] sm:$0xff] }
 0x50c   : > { %v10868_v26 = vrot.slane %v19979_v24, 4 }
 0x50d   : > { %13295 = vrot.lane.b32.xlu2 %v17061_v42, %s19433_s16  ;;  %13555 = vrot.lane.b32.xlu0 %v17632_v1, %s19970_s12  ;;  %s19973_s16 = smov 100   ;;  %v10807_v42 = vsel %vm314_vm0, %v10806_v61, %v10799_v2  ;;  %v12213_v2 = vsel %vm314_vm0, %v12197_v50, %v12212_v55  ;;  %v12240_v61 = vrot.slane %v10809_v5, 4 }
 0x50e   : > { %v12235_v51 = vperm.slane %v10807_v42, %v14986_v8  ;;  %v12230_v18 = vrot.slane %v10807_v42, 4 }
 0x50f   : > { %v17641_v56 = vpop.permute.xlu2 %13163  ;;  %v12241_v50 = vsel %vm314_vm0, 0.0, %v12240_v61 }
 0x510   : > { %19971 = vst [vmem:[#allocation180_spill] sm:$0xff] %v17641_v56  ;;  %v12251_v62 = vsel %vm314_vm0, %v12250_v43, %v12235_v51  ;;  %v12231_v55 = vsel %vm314_vm0, 0.0, %v12230_v18  ;;  %v12249_v43 = vperm.slane %v12241_v50, %v14986_v8  ;;  %v19984_v18 = vld [vmem:[#allocation31_spill] sm:$0xff] }
 0x511   : > { %v12257_v33 = vperm.slane %v12251_v62, %v14989_v14 }
 0x512   : > { %13563 = vrot.lane.b32.xlu1 %v12209_v41, %s19973_s16  ;;  %v17674_v5 = vpop.permute.xlu0 %13375  ;;  %v12262_v24 = vrot.slane %v12249_v43, 4 }
 0x513   : > { %v12274_v30 = vrot.slane %v12257_v33, 4 }
 0x515   : > { %13307 = vrot.lane.b32.xlu2 %v11807_v10, %s19439_s22  ;;  %13567 = vrot.lane.b32.xlu0 %v12225_v0, %s19975_s17  ;;  %v12252_v10 = vrot.slane %v12235_v51, 4  ;;  %v17667_v0 = vperm.slane %v12213_v2, %v14989_v14  ;;  %s19442_s22 = smov 104   ;;  %v19981_v2 = vld [vmem:[#allocation118_spill] sm:$0xff] }
 0x516   : > { %v10850_v61 = vrot.slane %v19981_v2, 4 }
 0x517   : > { %v17660_v41 = vpop.permute.xlu2 %13175  ;;  %v12253_v42 = vsel %vm314_vm0, %v12245_v47, %v12252_v10  ;;  %v12239_v47 = vperm.slane %v12231_v55, %v14986_v8  ;;  %v10869_v10 = vsel %vm314_vm0, %v10868_v26, %v19984_v18  ;;  %v19987_v18 = vld [vmem:[#allocation125_spill] sm:$0xff] }
 0x518   : > { %19976 = vst [vmem:[#allocation183_spill] sm:$0xff] %v17660_v41  ;;  %v17691_v7 = vperm.slane %v12253_v42, %v14989_v14  ;;  %v10851_v2 = vsel %vm314_vm0, %v10850_v61, %v16519_v37  ;;  %v12275_v42 = vsel %vm314_vm0, 0.0, %v12274_v30  ;;  %v10873_v26 = vperm.slane %v10869_v10, %v14986_v8 }
 0x519   : > { %v12264_v55 = vrot.slane %v12239_v47, 4  ;;  %v12292_v37 = vrot.slane %v16522_v57, 4 }
 0x51a   : > { %13575 = vrot.lane.b32.xlu1 %v12227_v34, %s19977_s0  ;;  %v19982_v34 = vld [vmem:[#allocation122_spill] sm:$0xff]  ;;  %v10880_v44 = vrot.slane %v10873_v26, 4 }
 0x51b   : > { %v10857_v62 = vsel %vm314_vm0, %v10856_v29, %v19982_v34  ;;  %v10862_v29 = vrot.slane %v16553_v25, 4  ;;  %v17707_v34 = vpop.permute.xlu1 %13383  ;;  %v10855_v25 = vperm.slane %v10851_v2, %v14986_v8  ;;  %v12265_v10 = vsel %vm314_vm0, %v12249_v43, %v12264_v55 }
 0x51c   : > { %v10861_v50 = vperm.slane %v10857_v62, %v14986_v8  ;;  %v17711_v62 = vpop.permute.xlu0 %13387  ;;  %v12304_v43 = vrot.slane %v16535_v28, 4 }
 0x51d   : > { %13319 = vrot.lane.b32.xlu2 %v17103_v45, %s19442_s22  ;;  %13579 = vrot.lane.b32.xlu0 %v17667_v0, %s19978_s14  ;;  %v11812_v45 = vrot.slane %v17122_v54, 4  ;;  %s19983_s22 = smov 112  }
 0x51e   : > { %v10874_v61 = vrot.slane %v10861_v50, 4  ;;  %v12305_v28 = vsel %vm314_vm0, %v16526_v58, %v12304_v43 }
 0x51f   : > { %v17683_v51 = vpop.permute.xlu2 %13187  ;;  %v11813_v54 = vsel %vm314_vm0, 0.0, %v11812_v45  ;;  %v12263_v45 = vsel %vm314_vm0, %v12262_v24, %v12239_v47  ;;  %v12293_v47 = vsel %vm314_vm0, 0.0, %v12292_v37  ;;  %v12273_v24 = vperm.slane %v12265_v10, %v14989_v14  ;;  %v19993_v10 = vld [vmem:[#allocation35_spill] sm:$0xff] }
 0x520   : > { %19980 = vst [vmem:[#allocation127_spill] sm:$0xff] %v17683_v51  ;;  %v17722_v57 = vperm.slane %v12263_v45, %v14989_v14  ;;  %v10875_v50 = vsel %vm314_vm0, %v10874_v61, %v10855_v25  ;;  %v11862_v25 = vrot.slane %v17170_v60, 4  ;;  %v19991_v61 = vld [vmem:[#allocation123_spill] sm:$0xff]  ;;  %v19994_v60 = vld [vmem:[#allocation129_spill] sm:$0xff]  ;;  %v12313_v58 = vperm.slane %v12305_v28, %v14989_v14  ;;  %v19998_v28 = vld [vmem:[#allocation120_spill] sm:$0xff] }
 0x521   : > { %v10896_v45 = vrot.slane %v19991_v61, 4 }
 0x522   : > { %13587 = vrot.lane.b32.xlu1 %v12257_v33, %s19983_s22  ;;  %v12276_v33 = vrot.slane %v17691_v7, 4 }
 0x523   : > { %v17740_v37 = vpop.permute.xlu1 %13395  ;;  %v10897_v43 = vsel %vm314_vm0, %v10896_v45, %v16560_v35  ;;  %v12328_v45 = vrot.slane %v12313_v58, 4 }
 0x524   : > { %v10901_v35 = vperm.slane %v10897_v43, %v14986_v8 }
 0x525   : > { %13331 = vrot.lane.b32.xlu2 %v11813_v54, %s19445_s10  ;;  %13591 = vrot.lane.b32.xlu0 %v12275_v42, %s19985_s20  ;;  %v10863_v54 = vsel %vm314_vm0, %v10862_v29, %v19987_v18  ;;  %v12277_v42 = vsel %vm314_vm0, 0.0, %v12276_v33  ;;  %s19988_s10 = smov 118   ;;  %v10879_v29 = vperm.slane %v10875_v50, %v14989_v14  ;;  %v12301_v33 = vperm.slane %v12293_v47, %v14986_v8  ;;  %v17744_v18 = vpop.permute.xlu0 %13399 }
 0x526   : > { %v10867_v2 = vperm.slane %v10863_v54, %v14986_v8  ;;  %v17753_v50 = vperm.slane %v19993_v10, %v14989_v14  ;;  %v11863_v47 = vsel %vm314_vm0, 0.0, %v11862_v25 }
 0x527   : > { %v17713_v30 = vpop.permute.xlu2 %13199  ;;  %v10888_v54 = vrot.slane %v10879_v29, 4 }
 0x528   : > { %19986 = vst [vmem:[#allocation118_spill] sm:$0xff] %v17713_v30  ;;  %v12282_v30 = vrot.slane %v16529_v21, 4  ;;  %v10881_v55 = vsel %vm314_vm0, %v10880_v44, %v10867_v2  ;;  %v10890_v2 = vrot.slane %v19994_v60, 4 }
 0x52a   : > { %13599 = vrot.lane.b32.xlu1 %v12277_v42, %s19988_s10  ;;  %v12283_v26 = vsel %vm314_vm0, 0.0, %v12282_v30  ;;  %v10885_v42 = vperm.slane %v10881_v55, %v14989_v14  ;;  %v12314_v30 = vrot.slane %v12301_v33, 4  ;;  %v19995_v55 = vld [vmem:[#allocation167_spill] sm:$0xff] }
 0x52b   : > { %v12291_v44 = vperm.slane %v12283_v26, %v14986_v8 }
 0x52c   : > { %v10886_v26 = vrot.slane %v10885_v42, 4  ;;  %v10889_v60 = vsel %vm314_vm0, %v10885_v42, %v10888_v54  ;;  %v17779_v42 = vpop.permute.xlu1 %13407 }
 0x52d   : > { %13343 = vrot.lane.b32.xlu2 %v17141_v15, %s19449_s8  ;;  %13603 = vrot.lane.b32.xlu0 %v17722_v57, %s19989_s7  ;;  %v12280_v15 = vrot.slane %v12273_v24, 4  ;;  %s19992_s8 = smov 124   ;;  %v12315_v10 = vsel %vm314_vm0, %v12314_v30, %v12291_v44  ;;  %v12349_v54 = vperm.slane %v10889_v60, %v14986_v8  ;;  %v17784_v43 = vpop.permute.xlu0 %13411 }
 0x52e   : > { %v17776_v41 = vperm.slane %v12315_v10, %v14989_v14  ;;  %v10887_v30 = vsel %vm314_vm0, %v10886_v26, %v10879_v29  ;;  %v12329_v10 = vsel %vm314_vm0, 0.0, %v12328_v45 }
 0x52f   : > { %v17737_v21 = vpop.permute.xlu2 %13211  ;;  %v12281_v61 = vsel %vm314_vm0, 0.0, %v12280_v15  ;;  %v11910_v15 = vrot.slane %v17753_v50, 4 }
 0x530   : > { %19990 = vst [vmem:[#allocation122_spill] sm:$0xff] %v17737_v21  ;;  %v10891_v21 = vsel %vm314_vm0, %v10890_v2, %v19998_v28  ;;  %v12330_v29 = vrot.slane %v17776_v41, 4 }
 0x531   : > { %v10895_v2 = vperm.slane %v10891_v21, %v14986_v8  ;;  %v11911_v28 = vsel %vm314_vm0, 0.0, %v11910_v15  ;;  %v12339_v21 = vperm.slane %v10887_v30, %v14986_v8 }
 0x532   : > { %13611 = vrot.lane.b32.xlu1 %v12273_v24, %s19992_s8  ;;  %v10908_v24 = vrot.slane %v19995_v55, 4  ;;  %v19999_v55 = vld [vmem:[#allocation34_spill] sm:$0xff] }
 0x533   : > { %v10902_v51 = vrot.slane %v19999_v55, 4  ;;  %v10914_v55 = vrot.slane %v10901_v35, 4 }
 0x535   : > { %13355 = vrot.lane.b32.xlu2 %v11863_v47, %s19454_s11  ;;  %13615 = vrot.lane.b32.xlu0 %v12281_v61, %s19996_s21  ;;  %v20000_v47 = vld [vmem:[#allocation132_spill] sm:$0xff]  ;;  %s20001_s11 = smov 4   ;;  %v10915_v15 = vsel %vm314_vm0, %v10914_v55, %v10895_v2  ;;  %v17811_v55 = vpop.permute.xlu0 %13423 }
 0x536   : > { %v10909_v61 = vsel %vm314_vm0, %v10908_v24, %v20000_v47  ;;  %v12316_v47 = vrot.slane %v12291_v44, 4  ;;  %v10919_v13 = vperm.slane %v10915_v15, %v14989_v14 }
 0x537   : > { %v17766_v25 = vpop.permute.xlu2 %13223  ;;  %v10913_v24 = vperm.slane %v10909_v61, %v14986_v8 }
 0x538   : > { %19997 = vst [vmem:[#allocation31_spill] sm:$0xff] %v17766_v25  ;;  %v20002_v25 = vld [vmem:[#allocation164_spill] sm:$0xff]  ;;  %v12317_v44 = vsel %vm314_vm0, %v12301_v33, %v12316_v47  ;;  %v10928_v47 = vrot.slane %v10919_v13, 4 }
 0x539   : > { %v10903_v56 = vsel %vm314_vm0, %v10902_v51, %v20002_v25  ;;  %v10920_v45 = vrot.slane %v10913_v24, 4  ;;  %v12331_v51 = vsel %vm314_vm0, 0.0, %v12330_v29  ;;  %v12344_v25 = vrot.slane %v10889_v60, 4 }
 0x53a   : > { %13623 = vrot.lane.b32.xlu1 %v12313_v58, %s20001_s11  ;;  %v12354_v58 = vrot.slane %v12349_v54, 4  ;;  %v10907_v35 = vperm.slane %v10903_v56, %v14986_v8  ;;  %v17808_v56 = vpop.permute.xlu1 %13419 }
 0x53b   : > { %v12345_v60 = vsel %vm314_vm0, 0.0, %v12344_v25 }
 0x53c   : > { %v12355_v61 = vsel %vm314_vm0, %v12354_v58, %v12339_v21  ;;  %v10921_v2 = vsel %vm314_vm0, %v10920_v45, %v10907_v35  ;;  %v11916_v58 = vrot.slane %v17253_v11, 4  ;;  %v12353_v35 = vperm.slane %v12345_v60, %v14986_v8 }
 0x53d   : > { %13367 = vrot.lane.b32.xlu2 %v11911_v28, %s20003_s6  ;;  %13627 = vrot.lane.b32.xlu0 %v12329_v10, %s20004_s19  ;;  %v12334_v28 = vrot.slane %v10887_v30, 4  ;;  %v12356_v10 = vrot.slane %v12339_v21, 4  ;;  %v12361_v33 = vperm.slane %v12355_v61, %v14989_v14  ;;  %v10925_v29 = vperm.slane %v10921_v2, %v14989_v14  ;;  %v20012_v61 = vld [vmem:[#allocation133_spill] sm:$0xff] }
 0x53e   : > { %v12366_v2 = vrot.slane %v12353_v35, 4 }
 0x53f   : > { %v17795_v26 = vpop.permute.xlu2 %13235  ;;  %v12357_v30 = vsel %vm314_vm0, %v12349_v54, %v12356_v10  ;;  %v12335_v24 = vsel %vm314_vm0, 0.0, %v12334_v28  ;;  %v12378_v15 = vrot.slane %v12361_v33, 4  ;;  %v10926_v54 = vrot.slane %v10925_v29, 4 }
 0x540   : > { %20005 = vst [vmem:[#allocation125_spill] sm:$0xff] %v17795_v26  ;;  %v17805_v26 = vperm.slane %v12317_v44, %v14989_v14  ;;  %v12343_v45 = vperm.slane %v12335_v24, %v14986_v8  ;;  %v20010_v44 = vld [vmem:[#allocation136_spill] sm:$0xff]  ;;  %v10929_v25 = vsel %vm314_vm0, %v10925_v29, %v10928_v47  ;;  %v10948_v28 = vrot.slane %v20012_v61, 4 }
 0x541   : > { %v11917_v10 = vsel %vm314_vm0, 0.0, %v11916_v58  ;;  %v12379_v11 = vsel %vm314_vm0, 0.0, %v12378_v15  ;;  %v20015_v24 = vld [vmem:[#allocation128_spill] sm:$0xff]  ;;  %v12401_v29 = vperm.slane %v10929_v25, %v14986_v8  ;;  %v17844_v58 = vpop.permute.xlu0 %13435  ;;  %v10927_v61 = vsel %vm314_vm0, %v10926_v54, %v10919_v13 }
 0x542   : > { %13635 = vrot.lane.b32.xlu1 %v12331_v51, %s20006_s1  ;;  %v10936_v51 = vrot.slane %v20010_v44, 4  ;;  %s20014_s1 = smov 18   ;;  %v20016_v44 = vld [vmem:[#allocation169_spill] sm:$0xff]  ;;  %v17841_v47 = vpop.permute.xlu1 %13431  ;;  %v10949_v36 = vsel %vm314_vm0, %v10948_v28, %v20019_v16  ;;  %v12367_v20 = vsel %vm314_vm0, %v12366_v2, %v12343_v45  ;;  %v12391_v13 = vperm.slane %v10927_v61, %v14986_v8 }
 0x543   : > { %v12396_v54 = vrot.slane %v10929_v25, 4  ;;  %v17862_v16 = vperm.slane %v12367_v20, %v14989_v14 }
 0x545   : > { %13379 = vrot.lane.b32.xlu2 %v17223_v63, %s20007_s5  ;;  %13639 = vrot.lane.b32.xlu0 %v17805_v26, %s20008_s9  ;;  %v17826_v63 = vperm.slane %v12357_v30, %v14989_v14  ;;  %s20011_s9 = smov 16   ;;  %s20013_s5 = smov 14   ;;  %v12368_v30 = vrot.slane %v12343_v45, 4  ;;  %20022 = vst [vmem:[#allocation129_spill] sm:$0xff] %v17862_v16  ;;  %v20023_v45 = vld [vmem:[#allocation130_spill] sm:$0xff]  ;;  %v12397_v20 = vsel %vm314_vm0, 0.0, %v12396_v54 }
 0x547   : > { %v17821_v21 = vpop.permute.xlu2 %13247  ;;  %v12380_v60 = vrot.slane %v17826_v63, 4 }
 0x548   : > { %20009 = vst [vmem:[#allocation123_spill] sm:$0xff] %v17821_v21  ;;  %v10930_v21 = vrot.slane %v20016_v44, 4  ;;  %v12369_v44 = vsel %vm314_vm0, %v12353_v35, %v12368_v30 }
 0x549   : > { %v12377_v2 = vperm.slane %v12369_v44, %v14989_v14  ;;  %v17881_v44 = vpop.permute.xlu0 %13447 }
 0x54a   : > { %13647 = vrot.lane.b32.xlu1 %v12361_v33, %s20011_s9  ;;  %v10937_v33 = vsel %vm314_vm0, %v10936_v51, %v20015_v24  ;;  %v12381_v24 = vsel %vm314_vm0, 0.0, %v12380_v60  ;;  %v10931_v3 = vsel %vm314_vm0, %v10930_v21, %v20020_v32  ;;  %v20025_v32 = vld [vmem:[#allocation121_spill] sm:$0xff]  ;;  %s20032_s9 = smov 30  }
 0x54b   : > { %v10941_v51 = vperm.slane %v10937_v33, %v14986_v8  ;;  %v10935_v60 = vperm.slane %v10931_v3, %v14986_v8  ;;  %v12384_v3 = vrot.slane %v12377_v2, 4 }
 0x54d   : > { %13391 = vrot.lane.b32.xlu2 %v11917_v10, %s20013_s5  ;;  %13651 = vrot.lane.b32.xlu0 %v12379_v11, %s20014_s1  ;;  %v20018_v10 = vld [vmem:[#allocation138_spill] sm:$0xff]  ;;  %s20021_s1 = smov 22   ;;  %v10954_v35 = vrot.slane %v10941_v51, 4  ;;  %s20024_s5 = smov 20   ;;  %v17878_v51 = vpop.permute.xlu1 %13443 }
 0x54e   : > { %v10942_v11 = vrot.slane %v20018_v10, 4  ;;  %v12406_v10 = vrot.slane %v12401_v29, 4 }
 0x54f   : > { %v17846_v15 = vpop.permute.xlu2 %13259 }
 0x550   : > { %20017 = vst [vmem:[#allocation35_spill] sm:$0xff] %v17846_v15  ;;  %v10953_v15 = vperm.slane %v10949_v36, %v14986_v8  ;;  %v10943_v28 = vsel %vm314_vm0, %v10942_v11, %v20023_v45  ;;  %v12407_v21 = vsel %vm314_vm0, %v12406_v10, %v12391_v13  ;;  %v12386_v36 = vrot.slane %v10927_v61, 4 }
 0x551   : > { %v10947_v25 = vperm.slane %v10943_v28, %v14986_v8  ;;  %v11966_v11 = vrot.slane %v17308_v4, 4  ;;  %v17884_v45 = vperm.slane %v12407_v21, %v14989_v14  ;;  %v12405_v61 = vperm.slane %v12397_v20, %v14986_v8  ;;  %v20030_v28 = vld [vmem:[#allocation45_spill] sm:$0xff]  ;;  %v17914_v22 = vpop.permute.xlu0 %13459 }
 0x552   : > { %13659 = vrot.lane.b32.xlu1 %v12381_v24, %s20021_s1  ;;  %s20026_s1 = smov 24   ;;  %v10960_v30 = vrot.slane %v10953_v15, 4  ;;  %v10955_v24 = vsel %vm314_vm0, %v10954_v35, %v10935_v60  ;;  %v12387_v15 = vsel %vm314_vm0, 0.0, %v12386_v36  ;;  %v12385_v35 = vsel %vm314_vm0, 0.0, %v12384_v3  ;;  %v20036_v3 = vld [vmem:[#allocation140_spill] sm:$0xff] }
 0x553   : > { %20028 = vst [vmem:[#allocation120_spill] sm:$0xff] %v17884_v45  ;;  %v11967_v4 = vsel %vm314_vm0, 0.0, %v11966_v11  ;;  %v10959_v10 = vperm.slane %v10955_v24, %v14989_v14  ;;  %v12408_v60 = vrot.slane %v12391_v13, 4  ;;  %v12430_v21 = vrot.slane %v17884_v45, 4  ;;  %v20035_v24 = vld [vmem:[#allocation135_spill] sm:$0xff]  ;;  %v20079_v45 = vld [vmem:[#allocation69_spill] sm:$0xff] }
 0x554   : > { %v10961_v54 = vsel %vm314_vm0, %v10960_v30, %v10947_v25  ;;  %v12418_v36 = vrot.slane %v12405_v61, 4  ;;  %v20033_v25 = vld [vmem:[#allocation145_spill] sm:$0xff] }
 0x555   : > { %13403 = vrot.lane.b32.xlu2 %v20025_v32, %s20024_s5  ;;  %13663 = vrot.lane.b32.xlu0 %v17862_v16, %s20026_s1  ;;  %s20029_s1 = smov 28   ;;  %v10976_v32 = vrot.slane %v20030_v28, 4  ;;  %s20031_s5 = smov 26   ;;  %v10965_v20 = vperm.slane %v10961_v54, %v14989_v14  ;;  %v10988_v30 = vrot.slane %v20033_v25, 4  ;;  %v10970_v28 = vrot.slane %v20035_v24, 4  ;;  %v17908_v23 = vpop.permute.xlu1 %13455  ;;  %v20038_v25 = vld [vmem:[#allocation137_spill] sm:$0xff] }
 0x557   : > { %v17875_v33 = vpop.permute.xlu2 %13271  ;;  %v10977_v13 = vsel %vm314_vm0, %v10976_v32, %v20036_v3 }
 0x558   : > { %20027 = vst [vmem:[#allocation167_spill] sm:$0xff] %v17875_v33  ;;  %v10968_v33 = vrot.slane %v10959_v10, 4  ;;  %v10981_v24 = vperm.slane %v10977_v13, %v14986_v8 }
 0x55a   : > { %13671 = vrot.lane.b32.xlu1 %v12377_v2, %s20029_s1  ;;  %v12395_v2 = vperm.slane %v12387_v15, %v14986_v8  ;;  %v10966_v15 = vrot.slane %v10965_v20, 4  ;;  %s20049_s1 = smov 42  }
 0x55c   : > { %v12419_v38 = vsel %vm314_vm0, %v12418_v36, %v12395_v2  ;;  %v12420_v54 = vrot.slane %v12395_v2, 4  ;;  %v20041_v36 = vld [vmem:[#allocation39_spill] sm:$0xff]  ;;  %v10967_v13 = vsel %vm314_vm0, %v10966_v15, %v10959_v10 }
 0x55d   : > { %13415 = vrot.lane.b32.xlu2 %v11967_v4, %s20031_s5  ;;  %13675 = vrot.lane.b32.xlu0 %v12385_v35, %s20032_s9  ;;  %v12409_v4 = vsel %vm314_vm0, %v12401_v29, %v12408_v60  ;;  %v12431_v35 = vsel %vm314_vm0, 0.0, %v12430_v21  ;;  %s20037_s9 = smov 34   ;;  %v10969_v29 = vsel %vm314_vm0, %v10965_v20, %v10968_v33  ;;  %v20040_v60 = vld [vmem:[#allocation174_spill] sm:$0xff]  ;;  %v10982_v3 = vrot.slane %v20041_v36, 4  ;;  %s20043_s5 = smov 36  }
 0x55e   : > { %v17917_v32 = vperm.slane %v12409_v4, %v14989_v14  ;;  %v10971_v21 = vsel %vm314_vm0, %v10970_v28, %v20040_v60  ;;  %v12448_v33 = vrot.slane %v10969_v29, 4  ;;  %v10994_v28 = vrot.slane %v10981_v24, 4 }
 0x55f   : > { %v17900_v11 = vpop.permute.xlu2 %13283  ;;  %v10975_v20 = vperm.slane %v10971_v21, %v14986_v8  ;;  %v12016_v60 = vrot.slane %v17362_v40, 4  ;;  %v12438_v24 = vrot.slane %v10967_v13, 4  ;;  %v17946_v21 = vpop.permute.xlu1 %13467 }
 0x560   : > { %20034 = vst [vmem:[#allocation34_spill] sm:$0xff] %v17900_v11  ;;  %v10989_v11 = vsel %vm314_vm0, %v10988_v30, %v20038_v25  ;;  %v12421_v30 = vsel %vm314_vm0, %v12405_v61, %v12420_v54  ;;  %v20045_v25 = vld [vmem:[#allocation143_spill] sm:$0xff]  ;;  %v12443_v61 = vperm.slane %v10967_v13, %v14986_v8 }
 0x561   : > { %20039 = vst [vmem:[#allocation132_spill] sm:$0xff] %v17917_v32  ;;  %v10993_v2 = vperm.slane %v10989_v11, %v14986_v8  ;;  %v17939_v11 = vperm.slane %v12421_v30, %v14989_v14  ;;  %v10995_v15 = vsel %vm314_vm0, %v10994_v28, %v10975_v20  ;;  %v12017_v40 = vsel %vm314_vm0, 0.0, %v12016_v60 }
 0x562   : > { %13683 = vrot.lane.b32.xlu1 %v12431_v35, %s20037_s9  ;;  %v12425_v35 = vperm.slane %v12419_v38, %v14989_v14  ;;  %s20042_s9 = smov 32   ;;  %v12453_v38 = vperm.slane %v10969_v29, %v14986_v8  ;;  %v12449_v29 = vsel %vm314_vm0, 0.0, %v12448_v33  ;;  %v10999_v13 = vperm.slane %v10995_v15, %v14989_v14 }
 0x563   : > { %20046 = vst [vmem:[#allocation136_spill] sm:$0xff] %v17939_v11  ;;  %v11000_v10 = vrot.slane %v10993_v2, 4  ;;  %v12460_v2 = vrot.slane %v12443_v61, 4  ;;  %v12457_v33 = vperm.slane %v12449_v29, %v14986_v8 }
 0x564   : > { %v12434_v36 = vrot.slane %v12425_v35, 4  ;;  %v12458_v30 = vrot.slane %v12453_v38, 4  ;;  %v11008_v27 = vrot.slane %v10999_v13, 4 }
 0x565   : > { %13427 = vrot.lane.b32.xlu2 %v17330_v52, %s20042_s9  ;;  %13687 = vrot.lane.b32.xlu0 %v17917_v32, %s20043_s5  ;;  %v10983_v52 = vsel %vm314_vm0, %v10982_v3, %v20045_v25  ;;  %s20047_s5 = smov 40   ;;  %v17950_v25 = vpop.permute.xlu0 %13471  ;;  %s20048_s9 = smov 38  }
 0x566   : > { %v10987_v54 = vperm.slane %v10983_v52, %v14986_v8  ;;  %v12435_v3 = vsel %vm314_vm0, 0.0, %v12434_v36  ;;  %v12439_v52 = vsel %vm314_vm0, 0.0, %v12438_v24  ;;  %v12459_v60 = vsel %vm314_vm0, %v12458_v30, %v12443_v61  ;;  %v20051_v36 = vld [vmem:[#allocation141_spill] sm:$0xff]  ;;  %v20054_v24 = vld [vmem:[#allocation147_spill] sm:$0xff]  ;;  %v20055_v30 = vld [vmem:[#allocation38_spill] sm:$0xff] }
 0x567   : > { %v17932_v4 = vpop.permute.xlu2 %13295  ;;  %v12447_v15 = vperm.slane %v12439_v52, %v14986_v8  ;;  %v11010_v29 = vrot.slane %v20054_v24, 4  ;;  %v20060_v24 = vld [vmem:[#allocation139_spill] sm:$0xff] }
 0x568   : > { %20044 = vst [vmem:[#allocation164_spill] sm:$0xff] %v17932_v4  ;;  %v11001_v20 = vsel %vm314_vm0, %v11000_v10, %v10987_v54  ;;  %v11016_v4 = vrot.slane %v20051_v36, 4  ;;  %v12470_v10 = vrot.slane %v12457_v33, 4  ;;  %v17969_v54 = vperm.slane %v12459_v60, %v14989_v14  ;;  %v20056_v36 = vld [vmem:[#allocation51_spill] sm:$0xff] }
 0x56a   : > { %13695 = vrot.lane.b32.xlu1 %v12425_v35, %s20047_s5  ;;  %v12436_v35 = vrot.slane %v17939_v11, 4  ;;  %v11005_v11 = vperm.slane %v11001_v20, %v14989_v14  ;;  %20053 = vst [vmem:[#allocation128_spill] sm:$0xff] %v17969_v54  ;;  %s20058_s5 = smov 48   ;;  %v17980_v20 = vpop.permute.xlu1 %13479  ;;  %v12471_v52 = vsel %vm314_vm0, %v12470_v10, %v12447_v15 }
 0x56b   : > { %v17996_v10 = vperm.slane %v12471_v52, %v14989_v14 }
 0x56c   : > { %v11009_v60 = vsel %vm314_vm0, %v11005_v11, %v11008_v27 }
 0x56d   : > { %13439 = vrot.lane.b32.xlu2 %v12017_v40, %s20048_s9  ;;  %13699 = vrot.lane.b32.xlu0 %v12435_v3, %s20049_s1  ;;  %v12437_v40 = vsel %vm314_vm0, 0.0, %v12436_v35  ;;  %v12461_v3 = vsel %vm314_vm0, %v12453_v38, %v12460_v2  ;;  %s20052_s1 = smov 46   ;;  %v11017_v35 = vsel %vm314_vm0, %v11016_v4, %v20055_v30  ;;  %v11028_v38 = vrot.slane %v20056_v36, 4  ;;  %s20057_s9 = smov 44   ;;  %20063 = vst [vmem:[#allocation138_spill] sm:$0xff] %v17996_v10 }
 0x56e   : > { %v12469_v61 = vperm.slane %v12461_v3, %v14989_v14  ;;  %v11006_v2 = vrot.slane %v11005_v11, 4  ;;  %v12066_v4 = vrot.slane %v17415_v9, 4  ;;  %v11011_v30 = vsel %vm314_vm0, %v11010_v29, %v20060_v24 }
 0x56f   : > { %v17958_v28 = vpop.permute.xlu2 %13307  ;;  %v11029_v32 = vsel %vm314_vm0, %v11028_v38, %v20062_v19  ;;  %v12505_v27 = vperm.slane %v11009_v60, %v14986_v8  ;;  %v11015_v11 = vperm.slane %v11011_v30, %v14986_v8  ;;  %v20065_v19 = vld [vmem:[#allocation47_spill] sm:$0xff] }
 0x570   : > { %20050 = vst [vmem:[#allocation133_spill] sm:$0xff] %v17958_v28  ;;  %v12484_v36 = vrot.slane %v12469_v61, 4  ;;  %v20061_v28 = vld [vmem:[#allocation144_spill] sm:$0xff]  ;;  %v11007_v9 = vsel %vm314_vm0, %v11006_v2, %v10999_v13  ;;  %v12067_v29 = vsel %vm314_vm0, 0.0, %v12066_v4  ;;  %v11033_v24 = vperm.slane %v11029_v32, %v14986_v8 }
 0x571   : > { %v12495_v13 = vperm.slane %v11007_v9, %v14986_v8  ;;  %v12510_v2 = vrot.slane %v12505_v27, 4 }
 0x572   : > { %13707 = vrot.lane.b32.xlu1 %v12437_v40, %s20052_s1  ;;  %v17984_v40 = vpop.permute.xlu0 %13483  ;;  %v11040_v30 = vrot.slane %v11033_v24, 4 }
 0x575   : > { %13451 = vrot.lane.b32.xlu2 %v17385_v49, %s20057_s9  ;;  %13711 = vrot.lane.b32.xlu0 %v17969_v54, %s20058_s5  ;;  %v11021_v49 = vperm.slane %v11017_v35, %v14986_v8  ;;  %v11022_v54 = vrot.slane %v20061_v28, 4  ;;  %s20064_s5 = smov 52   ;;  %v12485_v28 = vsel %vm314_vm0, 0.0, %v12484_v36  ;;  %s20066_s9 = smov 50  }
 0x577   : > { %v17986_v3 = vpop.permute.xlu2 %13319  ;;  %v11034_v35 = vrot.slane %v11021_v49, 4  ;;  %v11023_v38 = vsel %vm314_vm0, %v11022_v54, %v20065_v19  ;;  %v12490_v19 = vrot.slane %v11007_v9, 4 }
 0x578   : > { %20059 = vst [vmem:[#allocation169_spill] sm:$0xff] %v17986_v3  ;;  %v12472_v3 = vrot.slane %v12447_v15, 4  ;;  %v11027_v32 = vperm.slane %v11023_v38, %v14986_v8  ;;  %v18015_v15 = vpop.permute.xlu1 %13491 }
 0x579   : > { %v11035_v4 = vsel %vm314_vm0, %v11034_v35, %v11015_v11  ;;  %v12491_v9 = vsel %vm314_vm0, 0.0, %v12490_v19 }
 0x57a   : > { %13719 = vrot.lane.b32.xlu1 %v12469_v61, %s20064_s5  ;;  %v12486_v61 = vrot.slane %v17996_v10, 4  ;;  %v12473_v54 = vsel %vm314_vm0, %v12457_v33, %v12472_v3  ;;  %v18018_v49 = vpop.permute.xlu0 %13495  ;;  %v11039_v11 = vperm.slane %v11035_v4, %v14989_v14  ;;  %v11041_v24 = vsel %vm314_vm0, %v11040_v30, %v11027_v32 }
 0x57b   : > { %v18025_v35 = vperm.slane %v12473_v54, %v14989_v14  ;;  %v12499_v30 = vperm.slane %v12491_v9, %v14986_v8  ;;  %v20072_v54 = vld [vmem:[#allocation154_spill] sm:$0xff] }
 0x57c   : > { %v12487_v36 = vsel %vm314_vm0, 0.0, %v12486_v61  ;;  %v11048_v38 = vrot.slane %v11039_v11, 4  ;;  %v11045_v61 = vperm.slane %v11041_v24, %v14989_v14 }
 0x57d   : > { %13463 = vrot.lane.b32.xlu2 %v12067_v29, %s20066_s9  ;;  %13723 = vrot.lane.b32.xlu0 %v12485_v28, %s19926_s15  ;;  %v12500_v29 = vrot.slane %v11009_v60, 4  ;;  %v12511_v28 = vsel %vm314_vm0, %v12510_v2, %v12495_v13  ;;  %20068 = vst [vmem:[#allocation134_spill] sm:$0xff] %v18025_v35  ;;  %s20069_s15 = smov 56   ;;  %v12072_v2 = vrot.slane %v17469_v48, 4  ;;  %v20073_v48 = vld [vmem:[#allocation151_spill] sm:$0xff] }
 0x57e   : > { %v12517_v33 = vperm.slane %v12511_v28, %v14989_v14  ;;  %v11049_v28 = vsel %vm314_vm0, %v11045_v61, %v11048_v38  ;;  %v11068_v19 = vrot.slane %v20073_v48, 4 }
 0x57f   : > { %v18011_v52 = vpop.permute.xlu2 %13331  ;;  %v12501_v60 = vsel %vm314_vm0, 0.0, %v12500_v29  ;;  %v12073_v24 = vsel %vm314_vm0, 0.0, %v12072_v2  ;;  %v12557_v38 = vperm.slane %v11049_v28, %v14986_v8 }
 0x580   : > { %20067 = vst [vmem:[#allocation172_spill] sm:$0xff] %v18011_v52  ;;  %v12512_v52 = vrot.slane %v12495_v13, 4  ;;  %v12534_v4 = vrot.slane %v12517_v33, 4  ;;  %v12509_v32 = vperm.slane %v12501_v60, %v14986_v8 }
 0x582   : > { %13731 = vrot.lane.b32.xlu1 %v12487_v36, %s19929_s13  ;;  %v12513_v3 = vsel %vm314_vm0, %v12505_v27, %v12512_v52  ;;  %v11056_v36 = vrot.slane %v20072_v54, 4  ;;  %v18046_v27 = vpop.permute.xlu1 %13503  ;;  %v11046_v52 = vrot.slane %v11045_v61, 4  ;;  %v18049_v29 = vpop.permute.xlu0 %13507  ;;  %v12535_v60 = vsel %vm314_vm0, 0.0, %v12534_v4  ;;  %v20078_v4 = vld [vmem:[#allocation156_spill] sm:$0xff] }
 0x583   : > { %v12524_v54 = vrot.slane %v12499_v30, 4  ;;  %v11062_v48 = vrot.slane %v20078_v4, 4  ;;  %v12562_v4 = vrot.slane %v12557_v38, 4 }
 0x584   : > { %v11047_v2 = vsel %vm314_vm0, %v11046_v52, %v11039_v11  ;;  %v12552_v52 = vrot.slane %v11049_v28, 4 }
 0x585   : > { %13475 = vrot.lane.b32.xlu2 %v17440_v6, %s20069_s15  ;;  %13735 = vrot.lane.b32.xlu0 %v18025_v35, %s19931_s3  ;;  %v18042_v6 = vperm.slane %v12513_v3, %v14989_v14  ;;  %v12522_v3 = vrot.slane %v12509_v32, 4  ;;  %s20074_s3 = smov 62   ;;  %v20076_v35 = vld [vmem:[#allocation74_spill] sm:$0xff]  ;;  %v12547_v11 = vperm.slane %v11047_v2, %v14986_v8 }
 0x586   : > { %v11050_v10 = vrot.slane %v20076_v35, 4  ;;  %v20080_v35 = vld [vmem:[#allocation152_spill] sm:$0xff] }
 0x587   : > { %v18037_v13 = vpop.permute.xlu2 %13343  ;;  %20071 = vst [vmem:[#allocation121_spill] sm:$0xff] %v18042_v6  ;;  %v12536_v9 = vrot.slane %v18042_v6, 4  ;;  %v12563_v28 = vsel %vm314_vm0, %v12562_v4, %v12547_v11 }
 0x588   : > { %20070 = vst [vmem:[#allocation130_spill] sm:$0xff] %v18037_v13 }
 0x589   : > { %v12537_v16 = vsel %vm314_vm0, 0.0, %v12536_v9  ;;  %v12542_v9 = vrot.slane %v11047_v2, 4 }
 0x58a   : > { %13743 = vrot.lane.b32.xlu1 %v12517_v33, %s19934_s4  ;;  %v20075_v33 = vld [vmem:[#allocation146_spill] sm:$0xff] }
 0x58b   : > { %v11057_v13 = vsel %vm314_vm0, %v11056_v36, %v20075_v33  ;;  %v12525_v36 = vsel %vm314_vm0, %v12509_v32, %v12524_v54  ;;  %v11051_v33 = vsel %vm314_vm0, %v11050_v10, %v20080_v35  ;;  %v12553_v54 = vsel %vm314_vm0, 0.0, %v12552_v52 }
 0x58c   : > { %v11061_v6 = vperm.slane %v11057_v13, %v14986_v8  ;;  %v12533_v32 = vperm.slane %v12525_v36, %v14989_v14  ;;  %v11055_v10 = vperm.slane %v11051_v33, %v14986_v8  ;;  %v18098_v33 = vperm.slane %v12563_v28, %v14989_v14 }
 0x58d   : > { %13487 = vrot.lane.b32.xlu2 %v12073_v24, %s20074_s3  ;;  %13747 = vrot.lane.b32.xlu0 %v12535_v60, %s19936_s2  ;;  %v11069_v24 = vsel %vm314_vm0, %v11068_v19, %v20079_v45  ;;  %v12523_v60 = vsel %vm314_vm0, %v12522_v3, %v12499_v30  ;;  %v20082_v30 = vld [vmem:[#allocation148_spill] sm:$0xff]  ;;  %v18082_v19 = vpop.permute.xlu1 %13515  ;;  %v12543_v2 = vsel %vm314_vm0, 0.0, %v12542_v9 }
 0x58e   : > { %v18078_v45 = vperm.slane %v12523_v60, %v14989_v14  ;;  %v11063_v13 = vsel %vm314_vm0, %v11062_v48, %v20082_v30  ;;  %v11074_v3 = vrot.slane %v11061_v6, 4  ;;  %v12122_v6 = vrot.slane %v17526_v12, 4  ;;  %20085 = vst [vmem:[#allocation140_spill] sm:$0xff] %v18098_v33  ;;  %v20086_v30 = vld [vmem:[#allocation76_spill] sm:$0xff] }
 0x58f   : > { %v18062_v61 = vpop.permute.xlu2 %13355  ;;  %v11067_v48 = vperm.slane %v11063_v13, %v14986_v8  ;;  %v12540_v36 = vrot.slane %v12533_v32, 4  ;;  %v11096_v12 = vrot.slane %v20086_v30, 4 }
 0x590   : > { %20077 = vst [vmem:[#allocation45_spill] sm:$0xff] %v18062_v61  ;;  %v11073_v61 = vperm.slane %v11069_v24, %v14986_v8  ;;  %v11075_v35 = vsel %vm314_vm0, %v11074_v3, %v11055_v10  ;;  %v12123_v4 = vsel %vm314_vm0, 0.0, %v12122_v6  ;;  %v12564_v3 = vrot.slane %v12547_v11, 4 }
 0x591   : > { %20081 = vst [vmem:[#allocation145_spill] sm:$0xff] %v18078_v45  ;;  %v12541_v13 = vsel %vm314_vm0, 0.0, %v12540_v36  ;;  %v12586_v10 = vrot.slane %v18098_v33, 4  ;;  %v20091_v36 = vld [vmem:[#allocation153_spill] sm:$0xff] }
 0x592   : > { %13755 = vrot.lane.b32.xlu1 %v12537_v16, %s19943_s30  ;;  %v18086_v16 = vpop.permute.xlu0 %13519  ;;  %s20084_s30 = smov 68   ;;  %v11080_v24 = vrot.slane %v11073_v61, 4  ;;  %v11079_v61 = vperm.slane %v11075_v35, %v14989_v14  ;;  %v11090_v11 = vrot.slane %v20091_v36, 4  ;;  %v12565_v33 = vsel %vm314_vm0, %v12557_v38, %v12564_v3  ;;  %v20095_v3 = vld [vmem:[#allocation86_spill] sm:$0xff] }
 0x593   : > { %20083 = vst [vmem:[#allocation135_spill] sm:$0xff] %v18086_v16  ;;  %v18129_v36 = vperm.slane %v12565_v33, %v14989_v14 }
 0x594   : > { %v11081_v52 = vsel %vm314_vm0, %v11080_v24, %v11067_v48  ;;  %v20089_v48 = vld [vmem:[#allocation160_spill] sm:$0xff]  ;;  %v11088_v30 = vrot.slane %v11079_v61, 4 }
 0x595   : > { %13499 = vrot.lane.b32.xlu2 %v17490_v31, %s20084_s30  ;;  %13759 = vrot.lane.b32.xlu0 %v18078_v45, %s19946_s29  ;;  %v12561_v31 = vperm.slane %v12553_v54, %v14986_v8  ;;  %s20087_s29 = smov 74   ;;  %v11085_v9 = vperm.slane %v11081_v52, %v14989_v14  ;;  %v18113_v54 = vpop.permute.xlu1 %13527  ;;  %v11108_v24 = vrot.slane %v20089_v48, 4  ;;  %v20093_v48 = vld [vmem:[#allocation155_spill] sm:$0xff] }
 0x596   : > { %20088 = vst [vmem:[#allocation137_spill] sm:$0xff] %v18113_v54 }
 0x597   : > { %v13368_v60 = vpop.permute.xlu2 %13367  ;;  %v12574_v28 = vrot.slane %v12561_v31, 4  ;;  %v11086_v52 = vrot.slane %v11085_v9, 4 }
 0x59a   : > { %13767 = vrot.lane.b32.xlu1 %v12533_v32, %s19948_s28  ;;  %v12551_v32 = vperm.slane %v12543_v2, %v14986_v8  ;;  %v18116_v6 = vpop.permute.xlu0 %13531  ;;  %v12587_v2 = vsel %vm314_vm0, 0.0, %v12586_v10  ;;  %v11102_v10 = vrot.slane %v20095_v3, 4 }
 0x59b   : > { %20090 = vst [vmem:[#allocation174_spill] sm:$0xff] %v18116_v6  ;;  %v11109_v6 = vsel %vm314_vm0, %v11108_v24, %v20093_v48 }
 0x59c   : > { %v12575_v45 = vsel %vm314_vm0, %v12574_v28, %v12551_v32  ;;  %v12576_v54 = vrot.slane %v12551_v32, 4  ;;  %v11113_v32 = vperm.slane %v11109_v6, %v14986_v8  ;;  %v12172_v6 = vrot.slane %v17576_v59, 4 }
 0x59d   : > { %13511 = vrot.lane.b32.xlu2 %v12123_v4, %s20087_s29  ;;  %13771 = vrot.lane.b32.xlu0 %v12541_v13, %s19952_s27  ;;  %v20092_v4 = vld [vmem:[#allocation157_spill] sm:$0xff]  ;;  %v12581_v28 = vperm.slane %v12575_v45, %v14989_v14  ;;  %s20096_s27 = smov 80   ;;  %v14248_v45 = vsel %vm14122_vm1, %v17753_v50, %v13368_v60 }
 0x59e   : > { %v11097_v13 = vsel %vm314_vm0, %v11096_v12, %v20092_v4  ;;  %v11089_v12 = vsel %vm314_vm0, %v11085_v9, %v11088_v30  ;;  %v20094_v4 = vld [vmem:[#allocation80_spill] sm:$0xff]  ;;  %v12577_v33 = vsel %vm314_vm0, %v12561_v31, %v12576_v54  ;;  %v11087_v9 = vsel %vm314_vm0, %v11086_v52, %v11079_v61 }
 0x59f   : > { %v13380_v35 = vpop.permute.xlu2 %13379  ;;  %v11101_v16 = vperm.slane %v11097_v13, %v14986_v8  ;;  %v11091_v38 = vsel %vm314_vm0, %v11090_v11, %v20094_v4  ;;  %v12604_v24 = vrot.slane %v11089_v12, 4  ;;  %v18149_v4 = vpop.permute.xlu1 %13539  ;;  %v12590_v31 = vrot.slane %v12581_v28, 4 }
 0x5a0   : > { %v11095_v11 = vperm.slane %v11091_v38, %v14986_v8  ;;  %v18155_v54 = vperm.slane %v12577_v33, %v14989_v14  ;;  %v11120_v50 = vrot.slane %v11113_v32, 4  ;;  %v14249_v60 = vsel %vm14124_vm2, %v14248_v45, %v17670_v39 }
 0x5a1   : > { %v11114_v30 = vrot.slane %v11101_v16, 4  ;;  %v12599_v16 = vperm.slane %v11087_v9, %v14986_v8  ;;  %v12594_v59 = vrot.slane %v11087_v9, 4  ;;  %v12605_v38 = vsel %vm314_vm0, 0.0, %v12604_v24 }
 0x5a2   : > { %13779 = vrot.lane.b32.xlu1 %v12587_v2, %s19956_s26  ;;  %v20097_v2 = vld [vmem:[#allocation158_spill] sm:$0xff]  ;;  %v18152_v61 = vpop.permute.xlu0 %13543  ;;  %v12173_v3 = vsel %vm314_vm0, 0.0, %v12172_v6  ;;  %v14250_v32 = vsel %vm14126_vm3, %v14249_v60, %v17674_v5  ;;  %v12592_v39 = vrot.slane %v18155_v54, 4 }
 0x5a3   : > { %v11103_v48 = vsel %vm314_vm0, %v11102_v10, %v20097_v2  ;;  %v11115_v52 = vsel %vm314_vm0, %v11114_v30, %v11095_v11  ;;  %v12591_v10 = vsel %vm314_vm0, 0.0, %v12590_v31  ;;  %v14251_v24 = vsel %vm14128_vm4, %v14250_v32, %v13380_v35 }
 0x5a4   : > { %v11119_v9 = vperm.slane %v11115_v52, %v14989_v14  ;;  %v12613_v11 = vperm.slane %v12605_v38, %v14986_v8  ;;  %v12595_v2 = vsel %vm314_vm0, 0.0, %v12594_v59  ;;  %v12593_v6 = vsel %vm314_vm0, 0.0, %v12592_v39 }
 0x5a5   : > { %13523 = vrot.lane.b32.xlu2 %v17544_v46, %s20096_s27  ;;  %13783 = vrot.lane.b32.xlu0 %v18129_v36, %s19960_s25  ;;  %v12609_v46 = vperm.slane %v11089_v12, %v14986_v8  ;;  %v11107_v12 = vperm.slane %v11103_v48, %v14986_v8  ;;  %s20098_s25 = smov 86   ;;  %v14252_v48 = vsel %vm14130_vm5, %v14251_v24, %v17707_v34  ;;  %v12222_v39 = vrot.slane %v17632_v1, 4 }
 0x5a6   : > { %v11128_v60 = vrot.slane %v11119_v9, 4  ;;  %v14253_v34 = vsel %vm14132_vm6, %v14252_v48, %v17711_v62 }
 0x5a7   : > { %v13392_v13 = vpop.permute.xlu2 %13391  ;;  %v12614_v33 = vrot.slane %v12609_v46, 4  ;;  %v11121_v30 = vsel %vm314_vm0, %v11120_v50, %v11107_v12  ;;  %v18182_v52 = vpop.permute.xlu1 %13551  ;;  %v12603_v50 = vperm.slane %v12595_v2, %v14986_v8  ;;  %v12626_v12 = vrot.slane %v12613_v11, 4 }
 0x5a8   : > { %v11125_v35 = vperm.slane %v11121_v30, %v14989_v14  ;;  %v14254_v38 = vsel %vm19536_vm7, %v14253_v34, %v13392_v13  ;;  %v12223_v1 = vsel %vm314_vm0, 0.0, %v12222_v39 }
 0x5a9   : > { %v12615_v5 = vsel %vm314_vm0, %v12614_v33, %v12599_v16  ;;  %v14255_v62 = vsel %vm19535_vm8, %v14254_v38, %v17740_v37  ;;  %v12628_v48 = vrot.slane %v12603_v50, 4 }
 0x5aa   : > { %13791 = vrot.lane.b32.xlu1 %v12581_v28, %s19964_s24  ;;  %v12616_v28 = vrot.slane %v12599_v16, 4  ;;  %v18186_v59 = vpop.permute.xlu0 %13555  ;;  %v18189_v16 = vperm.slane %v12615_v5, %v14989_v14  ;;  %v11129_v33 = vsel %vm314_vm0, %v11125_v35, %v11128_v60  ;;  %v14256_v30 = vsel %vm19534_vm9, %v14255_v62, %v17744_v18 }
 0x5ac   : > { %v12617_v31 = vsel %vm314_vm0, %v12609_v46, %v12616_v28 }
 0x5ad   : > { %13535 = vrot.lane.b32.xlu2 %v12173_v3, %s20098_s25  ;;  %13795 = vrot.lane.b32.xlu0 %v12591_v10, %s19965_s23  ;;  %v12625_v46 = vperm.slane %v12617_v31, %v14989_v14  ;;  %s20099_s23 = smov 92   ;;  %v11126_v3 = vrot.slane %v11125_v35, 4  ;;  %v12627_v10 = vsel %vm314_vm0, %v12626_v12, %v12603_v50  ;;  %v12629_v35 = vsel %vm314_vm0, %v12613_v11, %v12628_v48 }
 0x5ae   : > { %v18205_v13 = vperm.slane %v12627_v10, %v14989_v14  ;;  %v12656_v12 = vrot.slane %v11129_v33, 4  ;;  %v20101_v10 = vld [vmem:[#allocation168_spill] sm:$0xff]  ;;  %v18234_v11 = vperm.slane %v12629_v35, %v14989_v14 }
 0x5af   : > { %v13404_v45 = vpop.permute.xlu2 %13403  ;;  %v12640_v28 = vrot.slane %v12625_v46, 4  ;;  %v11127_v24 = vsel %vm314_vm0, %v11126_v3, %v11119_v9  ;;  %v18212_v2 = vpop.permute.xlu1 %13563  ;;  %v11176_v62 = vrot.slane %v20101_v10, 4 }
 0x5b0   : > { %v14257_v37 = vsel %vm19532_vm10, %v14256_v30, %v13404_v45  ;;  %v12642_v9 = vrot.slane %v18205_v13, 4  ;;  %v12651_v31 = vperm.slane %v11127_v24, %v14986_v8  ;;  %v12657_v39 = vsel %vm314_vm0, 0.0, %v12656_v12 }
 0x5b1   : > { %v12641_v5 = vsel %vm314_vm0, 0.0, %v12640_v28  ;;  %v14258_v45 = vsel %vm19531_vm11, %v14257_v37, %v17779_v42  ;;  %v20103_v37 = vld [vmem:[#allocation163_spill] sm:$0xff] }
 0x5b2   : > { %13803 = vrot.lane.b32.xlu1 %v12593_v6, %s19969_s18  ;;  %v18217_v6 = vpop.permute.xlu0 %13567  ;;  %v12643_v50 = vsel %vm314_vm0, 0.0, %v12642_v9  ;;  %v14259_v38 = vsel %vm19533_vm12, %v14258_v45, %v17784_v43  ;;  %v12668_v3 = vrot.slane %v12651_v31, 4 }
 0x5b5   : > { %13547 = vrot.lane.b32.xlu2 %v17603_v17, %s20099_s23  ;;  %13807 = vrot.lane.b32.xlu0 %v18189_v16, %s19970_s12  ;;  %v12661_v17 = vperm.slane %v11129_v33, %v14986_v8  ;;  %s20100_s12 = smov 98  }
 0x5b7   : > { %v13416_v32 = vpop.permute.xlu2 %13415  ;;  %v12666_v18 = vrot.slane %v12661_v17, 4  ;;  %v18243_v28 = vpop.permute.xlu1 %13575  ;;  %v12669_v30 = vsel %vm314_vm0, %v12661_v17, %v12668_v3  ;;  %v20107_v3 = vld [vmem:[#allocation63_spill] sm:$0xff] }
 0x5b8   : > { %v14260_v42 = vsel %vm19485_vm13, %v14259_v38, %v13416_v32  ;;  %v18260_v17 = vperm.slane %v12669_v30, %v14989_v14  ;;  %vm19488_vm13 = vcmask 310272  }
 0x5b9   : > { %v12667_v34 = vsel %vm314_vm0, %v12666_v18, %v12651_v31  ;;  %v14261_v32 = vsel %vm19481_vm14, %v14260_v42, %v17808_v56  ;;  %v12665_v31 = vperm.slane %v12657_v39, %v14986_v8  ;;  %v20105_v18 = vld [vmem:[#allocation60_spill] sm:$0xff]  ;;  %vm19484_vm14 = vcmask 261120   ;;  %v20108_v42 = vld [vmem:[#allocation165_spill] sm:$0xff] }
 0x5ba   : > { %13815 = vrot.lane.b32.xlu1 %v12625_v46, %s19973_s16  ;;  %v12646_v46 = vrot.slane %v11127_v24, 4  ;;  %v12673_v33 = vperm.slane %v12667_v34, %v14989_v14  ;;  %v12228_v24 = vrot.slane %v17667_v0, 4  ;;  %v11170_v45 = vrot.slane %v20105_v18, 4 }
 0x5bb   : > { %v14262_v0 = vsel %vm19482_vm15, %v14261_v32, %v17811_v55  ;;  %vm19489_vm15 = vcmask 277504   ;;  %v20110_v32 = vld [vmem:[#allocation50_spill] sm:$0xff] }
 0x5bc   : > { %v12647_v43 = vsel %vm314_vm0, 0.0, %v12646_v46  ;;  %v12690_v35 = vrot.slane %v12673_v33, 4  ;;  %v20106_v46 = vld [vmem:[#allocation171_spill] sm:$0xff]  ;;  %v11171_v55 = vsel %vm314_vm0, %v11170_v45, %v20108_v42 }
 0x5bd   : > { %13559 = vrot.lane.b32.xlu2 %v12223_v1, %s20100_s12  ;;  %13819 = vrot.lane.b32.xlu0 %v12641_v5, %s19975_s17  ;;  %s20102_s17 = smov 104   ;;  %v11188_v1 = vrot.slane %v20103_v37, 4  ;;  %v20104_v5 = vld [vmem:[#allocation161_spill] sm:$0xff]  ;;  %v12655_v56 = vperm.slane %v12647_v43, %v14986_v8  ;;  %v11182_v38 = vrot.slane %v20106_v46, 4 }
 0x5be   : > { %v11177_v48 = vsel %vm314_vm0, %v11176_v62, %v20104_v5  ;;  %v12678_v62 = vrot.slane %v12665_v31, 4  ;;  %v12691_v39 = vsel %vm314_vm0, 0.0, %v12690_v35  ;;  %v20112_v46 = vld [vmem:[#allocation97_spill] sm:$0xff] }
 0x5bf   : > { %v13428_v60 = vpop.permute.xlu2 %13427  ;;  %v11181_v34 = vperm.slane %v11177_v48, %v14986_v8  ;;  %v11189_v10 = vsel %vm314_vm0, %v11188_v1, %v20107_v3  ;;  %v12680_v43 = vrot.slane %v12655_v56, 4  ;;  %v20111_v1 = vld [vmem:[#allocation162_spill] sm:$0xff]  ;;  %v11175_v48 = vperm.slane %v11171_v55, %v14986_v8 }
 0x5c0   : > { %v14263_v12 = vsel %vm19484_vm14, %v14262_v0, %v13428_v60  ;;  %v11193_v30 = vperm.slane %v11189_v10, %v14986_v8  ;;  %v11183_v5 = vsel %vm314_vm0, %v11182_v38, %v20111_v1  ;;  %vm19486_vm14 = vcmask 293888  }
 0x5c1   : > { %v14264_v60 = vsel %vm19489_vm15, %v14263_v12, %v17841_v47  ;;  %v11194_v37 = vrot.slane %v11181_v34, 4  ;;  %v18282_v47 = vpop.permute.xlu1 %13587  ;;  %v12679_v35 = vsel %vm314_vm0, %v12678_v62, %v12655_v56  ;;  %v12681_v0 = vsel %vm314_vm0, %v12665_v31, %v12680_v43  ;;  %v20113_v62 = vld [vmem:[#allocation57_spill] sm:$0xff] }
 0x5c2   : > { %13827 = vrot.lane.b32.xlu1 %v12643_v50, %s19977_s0  ;;  %v12229_v50 = vsel %vm314_vm0, 0.0, %v12228_v24  ;;  %v12708_v24 = vrot.slane %v20110_v32, 4  ;;  %v14265_v45 = vsel %vm19486_vm14, %v14264_v60, %v17844_v58  ;;  %v12698_v38 = vrot.slane %v20112_v46, 4 }
 0x5c3   : > { %v11187_v10 = vperm.slane %v11183_v5, %v14986_v8  ;;  %v11200_v42 = vrot.slane %v11193_v30, 4  ;;  %v11195_v58 = vsel %vm314_vm0, %v11194_v37, %v11175_v48  ;;  %vm19497_vm14 = vcmask 326656   ;;  %v20115_v37 = vld [vmem:[#allocation93_spill] sm:$0xff] }
 0x5c4   : > { %v12709_v3 = vsel %vm314_vm0, 0.0, %v12708_v24  ;;  %v18298_v31 = vperm.slane %v12679_v35, %v14989_v14  ;;  %v12689_v56 = vperm.slane %v12681_v0, %v14989_v14  ;;  %v12720_v55 = vrot.slane %v20113_v62, 4  ;;  %v20116_v35 = vld [vmem:[#allocation70_spill] sm:$0xff] }
 0x5c5   : > { %13571 = vrot.lane.b32.xlu2 %v17645_v53, %s20102_s17  ;;  %13831 = vrot.lane.b32.xlu0 %v18234_v11, %s19978_s14  ;;  %v18252_v53 = vpop.permute.xlu0 %13579  ;;  %v12699_v43 = vsel %vm314_vm0, 0.0, %v12698_v38  ;;  %v11199_v60 = vperm.slane %v11195_v58, %v14989_v14  ;;  %vm19491_vm15 = vcmask 359424   ;;  %v12278_v24 = vrot.slane %v17722_v57, 4  ;;  %v20117_v57 = vld [vmem:[#allocation159_spill] sm:$0xff] }
 0x5c6   : > { %v12696_v30 = vrot.slane %v12689_v56, 4  ;;  %v12721_v1 = vsel %vm314_vm0, %v20115_v37, %v12720_v55  ;;  %v18321_v5 = vperm.slane %v12699_v43, %v14986_v8  ;;  %v11216_v0 = vrot.slane %v20116_v35, 4  ;;  %v20119_v58 = vld [vmem:[#allocation43_spill] sm:$0xff] }
 0x5c7   : > { %v13440_v9 = vpop.permute.xlu2 %13439  ;;  %v12279_v38 = vsel %vm314_vm0, 0.0, %v12278_v24  ;;  %v20120_v43 = vld [vmem:[#allocation175_spill] sm:$0xff] }
 0x5c8   : > { %v12697_v62 = vsel %vm314_vm0, 0.0, %v12696_v30 }
 0x5ca   : > { %13839 = vrot.lane.b32.xlu1 %v12673_v33, %s19983_s22  ;;  %s20109_s22 = smov 110   ;;  %v12692_v33 = vrot.slane %v18260_v17, 4 }
 0x5cc   : > { %v12693_v34 = vsel %vm314_vm0, 0.0, %v12692_v33  ;;  %v11201_v33 = vsel %vm314_vm0, %v11200_v42, %v11187_v10  ;;  %v20118_v10 = vld [vmem:[#allocation166_spill] sm:$0xff] }
 0x5cd   : > { %13583 = vrot.lane.b32.xlu2 %v12229_v50, %s20109_s22  ;;  %13843 = vrot.lane.b32.xlu0 %v12691_v39, %s19985_s20  ;;  %v18288_v12 = vpop.permute.xlu0 %13591  ;;  %v14266_v50 = vsel %vm19488_vm13, %v14265_v45, %v13440_v9  ;;  %v18305_v39 = vperm.slane %v12709_v3, %v14986_v8  ;;  %s20114_s20 = smov 116   ;;  %vm19490_vm13 = vcmask 343040   ;;  %v11205_v45 = vperm.slane %v11201_v33, %v14989_v14 }
 0x5ce   : > { %v14267_v9 = vsel %vm19497_vm14, %v14266_v50, %v17878_v51  ;;  %v11208_v50 = vrot.slane %v11199_v60, 4  ;;  %v12729_v3 = vperm.slane %v12721_v1, %v14989_v14  ;;  %v11210_v42 = vrot.slane %v20118_v10, 4 }
 0x5cf   : > { %v13452_v18 = vpop.permute.xlu2 %13451  ;;  %v14268_v51 = vsel %vm19490_vm13, %v14267_v9, %v17881_v44  ;;  %v12730_v48 = vrot.slane %v18305_v39, 4  ;;  %vm19493_vm13 = vcmask 375808   ;;  %v18326_v44 = vpop.permute.xlu1 %13599  ;;  %v11228_v9 = vrot.slane %v20119_v58, 4 }
 0x5d0   : > { %v11206_v55 = vrot.slane %v11205_v45, 4  ;;  %v11217_v33 = vsel %vm314_vm0, %v11216_v0, %v20120_v43  ;;  %v12744_v37 = vrot.slane %v12729_v3, 4  ;;  %v20123_v0 = vld [vmem:[#allocation58_spill] sm:$0xff]  ;;  %vm19502_vm14 = vcmask 474112  }
 0x5d2   : > { %13851 = vrot.lane.b32.xlu1 %v12693_v34, %s19988_s10 }
 0x5d5   : > { %13595 = vrot.lane.b32.xlu2 %v17691_v7, %s20114_s20  ;;  %13855 = vrot.lane.b32.xlu0 %v18298_v31, %s19989_s7  ;;  %v14269_v7 = vsel %vm19491_vm15, %v14268_v51, %v13452_v18  ;;  %v18331_v18 = vperm.slane %v20117_v57, %v14989_v14  ;;  %v18333_v34 = vpop.permute.xlu0 %13603  ;;  %vm19494_vm15 = vcmask 392192   ;;  %v11211_v57 = vsel %vm314_vm0, %v11210_v42, %v20123_v0 }
 0x5d6   : > { %v14270_v46 = vsel %vm19493_vm13, %v14269_v7, %v17908_v23  ;;  %v11209_v23 = vsel %vm314_vm0, %v11205_v45, %v11208_v50  ;;  %vm19495_vm13 = vcmask 408576   ;;  %v11221_v45 = vperm.slane %v11217_v33, %v14986_v8 }
 0x5d7   : > { %v13464_v32 = vpop.permute.xlu2 %13463  ;;  %v14271_v51 = vsel %vm19494_vm15, %v14270_v46, %v17914_v22  ;;  %v12326_v24 = vrot.slane %v18331_v18, 4  ;;  %v12765_v50 = vperm.slane %v11209_v23, %v14986_v8  ;;  %v20124_v22 = vld [vmem:[#allocation106_spill] sm:$0xff]  ;;  %vm19496_vm15 = vcmask 424960  }
 0x5d8   : > { %v14272_v30 = vsel %vm19495_vm13, %v14271_v51, %v13464_v32  ;;  %v11222_v46 = vrot.slane %v20124_v22, 4  ;;  %v11207_v32 = vsel %vm314_vm0, %v11206_v55, %v11199_v60  ;;  %v12745_v42 = vsel %vm314_vm0, 0.0, %v12744_v37  ;;  %v18373_v60 = vpop.permute.xlu1 %13611  ;;  %v20126_v55 = vld [vmem:[#allocation36_spill] sm:$0xff] }
 0x5d9   : > { %v12327_v10 = vsel %vm314_vm0, 0.0, %v12326_v24  ;;  %v11234_v43 = vrot.slane %v11221_v45, 4  ;;  %vm19499_vm13 = vcmask 441344   ;;  %20125 = vst [vmem:[#allocation39_spill] sm:$0xff] %v18373_v60  ;;  %v20191_v60 = vld [vmem:[#allocation46_spill] sm:$0xff] }
 0x5da   : > { %13863 = vrot.lane.b32.xlu1 %v12689_v56, %s19992_s8  ;;  %v12731_v56 = vsel %vm314_vm0, %v12730_v48, %v18321_v5  ;;  %s20121_s8 = smov 122   ;;  %v20122_v48 = vld [vmem:[#allocation170_spill] sm:$0xff] }
 0x5db   : > { %v18354_v1 = vperm.slane %v12731_v56, %v14989_v14  ;;  %v11229_v35 = vsel %vm314_vm0, %v11228_v9, %v20122_v48  ;;  %v11215_v56 = vperm.slane %v11211_v57, %v14986_v8  ;;  %v12760_v57 = vrot.slane %v11209_v23, 4 }
 0x5dc   : > { %v11233_v58 = vperm.slane %v11229_v35, %v14986_v8 }
 0x5dd   : > { %13607 = vrot.lane.b32.xlu2 %v12279_v38, %s20121_s8  ;;  %13867 = vrot.lane.b32.xlu0 %v12697_v62, %s19996_s21  ;;  %v14273_v38 = vsel %vm19496_vm15, %v14272_v30, %v17946_v21  ;;  %v12746_v9 = vrot.slane %v18354_v1, 4  ;;  %v12732_v62 = vrot.slane %v18321_v5, 4  ;;  %v12755_v21 = vperm.slane %v11207_v32, %v14986_v8  ;;  %v18378_v33 = vpop.permute.xlu0 %13615 }
 0x5de   : > { %vm19498_vm15 = vcmask 457728   ;;  %20127 = vst [vmem:[#allocation143_spill] sm:$0xff] %v18378_v33  ;;  %v14274_v51 = vsel %vm19499_vm13, %v14273_v38, %v17950_v25  ;;  %v12770_v5 = vrot.slane %v12765_v50, 4  ;;  %v11240_v30 = vrot.slane %v11233_v58, 4 }
 0x5df   : > { %v13476_v7 = vpop.permute.xlu2 %13475  ;;  %v11235_v48 = vsel %vm314_vm0, %v11234_v43, %v11215_v56  ;;  %v12733_v0 = vsel %vm314_vm0, %v18305_v39, %v12732_v62  ;;  %v12747_v45 = vsel %vm314_vm0, 0.0, %v12746_v9  ;;  %vm19500_vm13 = vcmask 506880  }
 0x5e0   : > { %v14275_v24 = vsel %vm19498_vm15, %v14274_v51, %v13476_v7  ;;  %v12771_v22 = vsel %vm314_vm0, %v12770_v5, %v12755_v21  ;;  %v12750_v7 = vrot.slane %v11207_v32, 4  ;;  %v11239_v38 = vperm.slane %v11235_v48, %v14989_v14  ;;  %v20131_v5 = vld [vmem:[#allocation40_spill] sm:$0xff] }
 0x5e1   : > { %v14276_v25 = vsel %vm19502_vm14, %v14275_v24, %v17980_v20  ;;  %vm19501_vm15 = vcmask 490496   ;;  %v12777_v23 = vperm.slane %v12771_v22, %v14989_v14  ;;  %v12761_v32 = vsel %vm314_vm0, 0.0, %v12760_v57  ;;  %v20134_v57 = vld [vmem:[#allocation117_spill] sm:$0xff] }
 0x5e2   : > { %13875 = vrot.lane.b32.xlu1 %v12729_v3, %s20001_s11  ;;  %v11223_v3 = vsel %vm314_vm0, %v11222_v46, %v20126_v55  ;;  %s20128_s11 = smov 10   ;;  %v12772_v46 = vrot.slane %v12755_v21, 4  ;;  %v14277_v20 = vsel %vm19501_vm15, %v14276_v25, %v17984_v40  ;;  %v12332_v9 = vrot.slane %v17805_v26, 4 }
 0x5e3   : > { %v11227_v35 = vperm.slane %v11223_v3, %v14986_v8  ;;  %v12751_v40 = vsel %vm314_vm0, 0.0, %v12750_v7  ;;  %v11248_v56 = vrot.slane %v11239_v38, 4  ;;  %v12794_v3 = vrot.slane %v12777_v23, 4 }
 0x5e4   : > { %v12773_v62 = vsel %vm314_vm0, %v12765_v50, %v12772_v46  ;;  %v12769_v51 = vperm.slane %v12761_v32, %v14986_v8  ;;  %v11256_v24 = vrot.slane %v20131_v5, 4  ;;  %v12759_v50 = vperm.slane %v12751_v40, %v14986_v8  ;;  %v20135_v46 = vld [vmem:[#allocation64_spill] sm:$0xff] }
 0x5e5   : > { %13619 = vrot.lane.b32.xlu2 %v12327_v10, %s20003_s6  ;;  %13879 = vrot.lane.b32.xlu0 %v12745_v42, %s20004_s19  ;;  %v18396_v10 = vperm.slane %v12733_v0, %v14989_v14  ;;  %v11241_v39 = vsel %vm314_vm0, %v11240_v30, %v11227_v35  ;;  %s20129_s19 = smov 8   ;;  %v18408_v42 = vpop.permute.xlu1 %13623  ;;  %v18414_v21 = vpop.permute.xlu0 %13627  ;;  %v18421_v26 = vperm.slane %v12773_v62, %v14989_v14  ;;  %v20132_v30 = vld [vmem:[#allocation42_spill] sm:$0xff]  ;;  %vm19503_vm15 = vcmask 539648   ;;  %s20167_s6 = smov 42  }
 0x5e6   : > { %v11245_v43 = vperm.slane %v11241_v39, %v14989_v14  ;;  %v12333_v48 = vsel %vm314_vm0, 0.0, %v12332_v9  ;;  %vm19504_vm14 = vcmask 556032   ;;  %v11268_v25 = vrot.slane %v20134_v57, 4 }
 0x5e7   : > { %v13488_v37 = vpop.permute.xlu2 %13487  ;;  %v12795_v22 = vsel %vm314_vm0, 0.0, %v12794_v3  ;;  %v12782_v7 = vrot.slane %v12769_v51, 4  ;;  %v11257_v39 = vsel %vm314_vm0, %v11256_v24, %v20135_v46 }
 0x5e8   : > { %v14278_v58 = vsel %vm19500_vm13, %v14277_v20, %v13488_v37  ;;  %vm19508_vm13 = vcmask 523264   ;;  %v11250_v37 = vrot.slane %v20132_v30, 4  ;;  %v11246_v35 = vrot.slane %v11245_v43, 4 }
 0x5e9   : > { %v14279_v55 = vsel %vm19508_vm13, %v14278_v58, %v18015_v15  ;;  %v11249_v0 = vsel %vm314_vm0, %v11245_v43, %v11248_v56  ;;  %v12796_v20 = vrot.slane %v18421_v26, 4  ;;  %v20138_v58 = vld [vmem:[#allocation37_spill] sm:$0xff]  ;;  %v12783_v24 = vsel %vm314_vm0, %v12782_v7, %v12759_v50 }
 0x5ea   : > { %13887 = vrot.lane.b32.xlu1 %v12747_v45, %s20128_s11  ;;  %s20130_s11 = smov 12   ;;  %v14280_v15 = vsel %vm19503_vm15, %v14279_v55, %v18018_v49  ;;  %vm19505_vm15 = vcmask 572416   ;;  %v18439_v49 = vperm.slane %v11249_v0, %v14986_v8  ;;  %v11262_v32 = vrot.slane %v20138_v58, 4  ;;  %v20139_v56 = vld [vmem:[#allocation173_spill] sm:$0xff]  ;;  %v20140_v55 = vld [vmem:[#allocation59_spill] sm:$0xff] }
 0x5eb   : > { %v11247_v40 = vsel %vm314_vm0, %v11246_v35, %v11239_v38  ;;  %v11251_v43 = vsel %vm314_vm0, %v11250_v37, %v20139_v56  ;;  %v11269_v3 = vsel %vm314_vm0, %v11268_v25, %v20140_v55  ;;  %v12812_v38 = vrot.slane %v11249_v0, 4  ;;  %v20146_v56 = vld [vmem:[#allocation129_spill] sm:$0xff]  ;;  %v20147_v55 = vld [vmem:[#allocation135_spill] sm:$0xff] }
 0x5ec   : > { %v12807_v35 = vperm.slane %v11247_v40, %v14986_v8  ;;  %v18465_v25 = vperm.slane %v12783_v24, %v14989_v14  ;;  %vm19510_vm13 = vcmask 654336  }
 0x5ed   : > { %13631 = vrot.lane.b32.xlu2 %v17776_v41, %s20129_s19  ;;  %13891 = vrot.lane.b32.xlu0 %v18396_v10, %s20130_s11  ;;  %s20133_s11 = smov 16   ;;  %s20137_s19 = smov 18   ;;  %v18450_v5 = vpop.permute.xlu1 %13635  ;;  %v18453_v30 = vpop.permute.xlu0 %13639 }
 0x5ef   : > { %v13500_v41 = vpop.permute.xlu2 %13499 }
 0x5f0   : > { %v14281_v45 = vsel %vm19504_vm14, %v14280_v15, %v13500_v41  ;;  %v11261_v41 = vperm.slane %v11257_v39, %v14986_v8  ;;  %vm19506_vm14 = vcmask 588800   ;;  %v12822_v15 = vrot.slane %v18439_v49, 4 }
 0x5f1   : > { %v14282_v9 = vsel %vm19505_vm15, %v14281_v45, %v18046_v27  ;;  %v12797_v27 = vsel %vm314_vm0, 0.0, %v12796_v20  ;;  %vm19507_vm15 = vcmask 605184   ;;  %v20142_v45 = vld [vmem:[#allocation73_spill] sm:$0xff]  ;;  %v12802_v39 = vrot.slane %v11247_v40, 4 }
 0x5f2   : > { %13899 = vrot.lane.b32.xlu1 %v12777_v23, %s20133_s11  ;;  %s20136_s11 = smov 14   ;;  %v12784_v23 = vrot.slane %v12759_v50, 4  ;;  %v14283_v37 = vsel %vm19506_vm14, %v14282_v9, %v18049_v29  ;;  %v11273_v50 = vperm.slane %v11269_v3, %v14986_v8  ;;  %v11274_v0 = vrot.slane %v11261_v41, 4 }
 0x5f3   : > { %vm19512_vm14 = vcmask 621568   ;;  %v12823_v46 = vsel %vm314_vm0, %v12822_v15, %v12807_v35  ;;  %v12813_v20 = vsel %vm314_vm0, 0.0, %v12812_v38  ;;  %v20149_v38 = vld [vmem:[#allocation176_spill] sm:$0xff] }
 0x5f4   : > { %v11280_v9 = vrot.slane %v11273_v50, 4  ;;  %v18486_v40 = vperm.slane %v12823_v46, %v14989_v14  ;;  %v12821_v3 = vperm.slane %v12813_v20, %v14986_v8 }
 0x5f5   : > { %13643 = vrot.lane.b32.xlu2 %v12333_v48, %s20136_s11  ;;  %13903 = vrot.lane.b32.xlu0 %v12795_v22, %s20137_s19  ;;  %v12785_v48 = vsel %vm314_vm0, %v12769_v51, %v12784_v23  ;;  %s20141_s19 = smov 22   ;;  %v11255_v51 = vperm.slane %v11251_v43, %v14986_v8  ;;  %v11263_v22 = vsel %vm314_vm0, %v11262_v32, %v20142_v45  ;;  %s20144_s11 = smov 24   ;;  %v20145_v23 = vld [vmem:[#allocation33_spill] sm:$0xff]  ;;  %v12382_v43 = vrot.slane %v20146_v56, 4  ;;  %v18489_v24 = vpop.permute.xlu1 %13647  ;;  %v18497_v50 = vpop.permute.xlu0 %13651 }
 0x5f6   : > { %v12793_v29 = vperm.slane %v12785_v48, %v14989_v14  ;;  %v11296_v58 = vrot.slane %v20145_v23, 4  ;;  %v11267_v32 = vperm.slane %v11263_v22, %v14986_v8  ;;  %v12803_v48 = vsel %vm314_vm0, 0.0, %v12802_v39  ;;  %v20150_v22 = vld [vmem:[#allocation137_spill] sm:$0xff] }
 0x5f7   : > { %v13512_v62 = vpop.permute.xlu2 %13511  ;;  %v12824_v45 = vrot.slane %v12807_v35, 4  ;;  %v12811_v46 = vperm.slane %v12803_v48, %v14986_v8  ;;  %v12834_v39 = vrot.slane %v12821_v3, 4  ;;  %v20153_v23 = vld [vmem:[#allocation177_spill] sm:$0xff] }
 0x5f8   : > { %v14284_v57 = vsel %vm19507_vm15, %v14283_v37, %v13512_v62  ;;  %vm19509_vm15 = vcmask 637952   ;;  %v12800_v41 = vrot.slane %v12793_v29, 4  ;;  %v11297_v37 = vsel %vm314_vm0, %v11296_v58, %v20149_v38 }
 0x5f9   : > { %v14285_v7 = vsel %vm19512_vm14, %v14284_v57, %v18082_v19  ;;  %v11281_v15 = vsel %vm314_vm0, %v11280_v9, %v11267_v32  ;;  %v12383_v57 = vsel %vm314_vm0, 0.0, %v12382_v43  ;;  %v11308_v58 = vrot.slane %v20153_v23, 4  ;;  %v20154_v9 = vld [vmem:[#allocation113_spill] sm:$0xff]  ;;  %v20155_v43 = vld [vmem:[#allocation174_spill] sm:$0xff] }
 0x5fa   : > { %13911 = vrot.lane.b32.xlu1 %v12797_v27, %s20141_s19  ;;  %s20143_s19 = smov 20   ;;  %v14286_v19 = vsel %vm19509_vm15, %v14285_v7, %v20147_v55  ;;  %vm19511_vm15 = vcmask 670720   ;;  %v12846_v7 = vrot.slane %v18486_v40, 4  ;;  %v11285_v20 = vperm.slane %v11281_v15, %v14989_v14  ;;  %v20156_v55 = vld [vmem:[#allocation78_spill] sm:$0xff] }
 0x5fb   : > { %v11301_v32 = vperm.slane %v11297_v37, %v14986_v8  ;;  %v11290_v35 = vrot.slane %v20154_v9, 4  ;;  %v12835_v38 = vsel %vm314_vm0, %v12834_v39, %v12811_v46  ;;  %v12836_v15 = vrot.slane %v12811_v46, 4  ;;  %v20160_v9 = vld [vmem:[#allocation62_spill] sm:$0xff] }
 0x5fc   : > { %v12847_v48 = vsel %vm314_vm0, 0.0, %v12846_v7  ;;  %v11286_v37 = vrot.slane %v11285_v20, 4  ;;  %vm19514_vm14 = vcmask 719872   ;;  %v12841_v39 = vperm.slane %v12835_v38, %v14989_v14 }
 0x5fd   : > { %13655 = vrot.lane.b32.xlu2 %v17826_v63, %s20143_s19  ;;  %13915 = vrot.lane.b32.xlu0 %v18465_v25, %s20144_s11  ;;  %v11275_v63 = vsel %vm314_vm0, %v11274_v0, %v11255_v51  ;;  %s20148_s11 = smov 28   ;;  %v12801_v0 = vsel %vm314_vm0, 0.0, %v12800_v41  ;;  %s20152_s19 = smov 30   ;;  %v12825_v41 = vsel %vm314_vm0, %v18439_v49, %v12824_v45  ;;  %v20159_v49 = vld [vmem:[#allocation119_spill] sm:$0xff]  ;;  %v11314_v46 = vrot.slane %v11301_v32, 4 }
 0x5fe   : > { %v11279_v51 = vperm.slane %v11275_v63, %v14989_v14  ;;  %v11309_v45 = vsel %vm314_vm0, %v11308_v58, %v20159_v49 }
 0x5ff   : > { %v13524_v62 = vpop.permute.xlu2 %13523 }
 0x600   : > { %v14287_v27 = vsel %vm19510_vm13, %v14286_v19, %v13524_v62  ;;  %vm19524_vm13 = vcmask 687104   ;;  %v11288_v56 = vrot.slane %v11279_v51, 4  ;;  %v11302_v19 = vrot.slane %v20156_v55, 4 }
 0x602   : > { %13923 = vrot.lane.b32.xlu1 %v12793_v29, %s20148_s11  ;;  %v14288_v29 = vsel %vm19511_vm15, %v14287_v27, %v20150_v22  ;;  %s20151_s11 = smov 26   ;;  %vm19513_vm15 = vcmask 703488   ;;  %v18524_v22 = vperm.slane %v12825_v41, %v14989_v14  ;;  %v11289_v23 = vsel %vm314_vm0, %v11285_v20, %v11288_v56 }
 0x603   : > { %v14289_v63 = vsel %vm19524_vm13, %v14288_v29, %v20155_v43  ;;  %v18528_v29 = vpop.permute.xlu1 %13659  ;;  %v20162_v43 = vld [vmem:[#allocation120_spill] sm:$0xff]  ;;  %v11313_v20 = vperm.slane %v11309_v45, %v14986_v8  ;;  %v12864_v41 = vrot.slane %v11289_v23, 4  ;;  %v12869_v38 = vperm.slane %v11289_v23, %v14986_v8 }
 0x604   : > { %vm19526_vm13 = vcmask 900096  }
 0x605   : > { %13667 = vrot.lane.b32.xlu2 %v12383_v57, %s20151_s11  ;;  %13927 = vrot.lane.b32.xlu0 %v12801_v0, %s20152_s19  ;;  %s20157_s19 = smov 34   ;;  %v20158_v57 = vld [vmem:[#allocation56_spill] sm:$0xff]  ;;  %s20163_s11 = smov 36   ;;  %v12874_v23 = vrot.slane %v12869_v38, 4 }
 0x606   : > { %v11291_v0 = vsel %vm314_vm0, %v11290_v35, %v20158_v57  ;;  %v11303_v35 = vsel %vm314_vm0, %v11302_v19, %v20160_v9  ;;  %v20164_v19 = vld [vmem:[#allocation132_spill] sm:$0xff] }
 0x607   : > { %v13536_v62 = vpop.permute.xlu2 %13535  ;;  %v11295_v58 = vperm.slane %v11291_v0, %v14986_v8  ;;  %v12865_v0 = vsel %vm314_vm0, 0.0, %v12864_v41  ;;  %v20168_v41 = vld [vmem:[#allocation85_spill] sm:$0xff] }
 0x608   : > { %v14290_v27 = vsel %vm19513_vm15, %v14289_v63, %v13536_v62  ;;  %v18536_v62 = vpop.permute.xlu0 %13663  ;;  %vm19515_vm15 = vcmask 736256   ;;  %v11287_v63 = vsel %vm314_vm0, %v11286_v37, %v11279_v51  ;;  %v11307_v51 = vperm.slane %v11303_v35, %v14986_v8 }
 0x609   : > { %v14291_v7 = vsel %vm19514_vm14, %v14290_v27, %v18149_v4  ;;  %v12837_v4 = vsel %vm314_vm0, %v12821_v3, %v12836_v15  ;;  %vm19517_vm14 = vcmask 752640   ;;  %v12432_v27 = vrot.slane %v20164_v19, 4 }
 0x60a   : > { %13935 = vrot.lane.b32.xlu1 %v12847_v48, %s20157_s19  ;;  %s20161_s19 = smov 32   ;;  %v14292_v56 = vsel %vm19515_vm15, %v14291_v7, %v18152_v61  ;;  %v12850_v48 = vrot.slane %v12841_v39, 4  ;;  %v18552_v57 = vperm.slane %v12837_v4, %v14989_v14  ;;  %v12859_v3 = vperm.slane %v11287_v63, %v14986_v8 }
 0x60b   : > { %v11315_v37 = vsel %vm314_vm0, %v11314_v46, %v11295_v58  ;;  %v11320_v61 = vrot.slane %v11313_v20, 4  ;;  %vm19518_vm15 = vcmask 769024   ;;  %v12854_v15 = vrot.slane %v11287_v63, 4  ;;  %v18567_v35 = vpop.permute.xlu1 %13671 }
 0x60c   : > { %v12433_v45 = vsel %vm314_vm0, 0.0, %v12432_v27  ;;  %v12851_v7 = vsel %vm314_vm0, 0.0, %v12850_v48  ;;  %v12852_v46 = vrot.slane %v18552_v57, 4  ;;  %v11319_v9 = vperm.slane %v11315_v37, %v14989_v14 }
 0x60d   : > { %13679 = vrot.lane.b32.xlu2 %v20162_v43, %s20161_s19  ;;  %13939 = vrot.lane.b32.xlu0 %v18524_v22, %s20163_s11  ;;  %s20165_s11 = smov 40   ;;  %s20166_s19 = smov 38   ;;  %v18570_v43 = vperm.slane %v12865_v0, %v14986_v8  ;;  %v12855_v20 = vsel %vm314_vm0, 0.0, %v12854_v15 }
 0x60e   : > { %v12853_v19 = vsel %vm314_vm0, 0.0, %v12852_v46  ;;  %v11328_v48 = vrot.slane %v11319_v9, 4  ;;  %v12863_v37 = vperm.slane %v12855_v20, %v14986_v8  ;;  %v20173_v46 = vld [vmem:[#allocation136_spill] sm:$0xff] }
 0x60f   : > { %v13548_v32 = vpop.permute.xlu2 %13547  ;;  %v20175_v20 = vld [vmem:[#allocation128_spill] sm:$0xff] }
 0x610   : > { %v14293_v55 = vsel %vm19517_vm14, %v14292_v56, %v13548_v32  ;;  %vm19519_vm14 = vcmask 785408   ;;  %v18573_v58 = vpop.permute.xlu0 %13675  ;;  %v12875_v56 = vsel %vm314_vm0, %v12874_v23, %v12859_v3 }
 0x611   : > { %v14294_v49 = vsel %vm19518_vm15, %v14293_v55, %v18182_v52  ;;  %v11321_v52 = vsel %vm314_vm0, %v11320_v61, %v11307_v51  ;;  %vm19520_vm15 = vcmask 801792   ;;  %v11336_v55 = vrot.slane %v20168_v41, 4 }
 0x612   : > { %13947 = vrot.lane.b32.xlu1 %v12841_v39, %s20165_s11  ;;  %v12876_v39 = vrot.slane %v12859_v3, 4  ;;  %v14295_v63 = vsel %vm19519_vm14, %v14294_v49, %v18186_v59  ;;  %v11325_v51 = vperm.slane %v11321_v52, %v14989_v14  ;;  %v12886_v59 = vrot.slane %v18570_v43, 4  ;;  %v20169_v3 = vld [vmem:[#allocation83_spill] sm:$0xff]  ;;  %s20208_s11 = smov 90  }
 0x613   : > { %vm19521_vm14 = vcmask 818176   ;;  %v18588_v61 = vperm.slane %v12875_v56, %v14989_v14  ;;  %v11348_v15 = vrot.slane %v20169_v3, 4  ;;  %v20170_v49 = vld [vmem:[#allocation71_spill] sm:$0xff] }
 0x614   : > { %v12877_v27 = vsel %vm314_vm0, %v12869_v38, %v12876_v39  ;;  %v11326_v39 = vrot.slane %v11325_v51, 4  ;;  %v11329_v52 = vsel %vm314_vm0, %v11325_v51, %v11328_v48  ;;  %v20176_v56 = vld [vmem:[#allocation67_spill] sm:$0xff] }
 0x615   : > { %13691 = vrot.lane.b32.xlu2 %v12433_v45, %s20166_s19  ;;  %13951 = vrot.lane.b32.xlu0 %v12851_v7, %s20167_s6  ;;  %v12885_v38 = vperm.slane %v12877_v27, %v14989_v14  ;;  %v11330_v45 = vrot.slane %v20170_v49, 4  ;;  %v20171_v7 = vld [vmem:[#allocation49_spill] sm:$0xff]  ;;  %s20174_s6 = smov 48   ;;  %v11349_v41 = vsel %vm314_vm0, %v11348_v15, %v20176_v56  ;;  %v12921_v51 = vperm.slane %v11329_v52, %v14986_v8  ;;  %v20178_v49 = vld [vmem:[#allocation124_spill] sm:$0xff] }
 0x616   : > { %v11337_v23 = vsel %vm314_vm0, %v11336_v55, %v20171_v7  ;;  %v11342_v7 = vrot.slane %v20178_v49, 4  ;;  %v11327_v15 = vsel %vm314_vm0, %v11326_v39, %v11319_v9 }
 0x617   : > { %v13560_v4 = vpop.permute.xlu2 %13559  ;;  %v11341_v55 = vperm.slane %v11337_v23, %v14986_v8  ;;  %v12900_v48 = vrot.slane %v12885_v38, 4  ;;  %v11353_v23 = vperm.slane %v11349_v41, %v14986_v8 }
 0x618   : > { %v14296_v32 = vsel %vm19520_vm15, %v14295_v63, %v13560_v4  ;;  %vm19523_vm15 = vcmask 834560   ;;  %v12887_v4 = vsel %vm314_vm0, %v12886_v59, %v12863_v37  ;;  %v20177_v59 = vld [vmem:[#allocation19_spill] sm:$0xff] }
 0x619   : > { %v14297_v0 = vsel %vm19521_vm14, %v14296_v32, %v18212_v2  ;;  %vm19522_vm14 = vcmask 850944   ;;  %v12482_v32 = vrot.slane %v20175_v20, 4  ;;  %v11331_v3 = vsel %vm314_vm0, %v11330_v45, %v20177_v59 }
 0x61a   : > { %13959 = vrot.lane.b32.xlu1 %v12853_v19, %s20052_s1  ;;  %s20172_s1 = smov 44   ;;  %v14298_v63 = vsel %vm19523_vm15, %v14297_v0, %v18217_v6  ;;  %v18609_v19 = vpop.permute.xlu1 %13683  ;;  %v18616_v6 = vpop.permute.xlu0 %13687  ;;  %v18619_v0 = vperm.slane %v12887_v4, %v14989_v14  ;;  %v11354_v45 = vrot.slane %v11341_v55, 4  ;;  %v12901_v56 = vsel %vm314_vm0, 0.0, %v12900_v48  ;;  %v20179_v4 = vld [vmem:[#allocation88_spill] sm:$0xff] }
 0x61b   : > { %v11343_v59 = vsel %vm314_vm0, %v11342_v7, %v20179_v4  ;;  %vm19525_vm15 = vcmask 883712   ;;  %v11360_v39 = vrot.slane %v11353_v23, 4  ;;  %v12906_v23 = vrot.slane %v11327_v15, 4 }
 0x61c   : > { %v12902_v9 = vrot.slane %v18619_v0, 4 }
 0x61d   : > { %13703 = vrot.lane.b32.xlu2 %v20173_v46, %s20172_s1  ;;  %13963 = vrot.lane.b32.xlu0 %v18588_v61, %s20174_s6  ;;  %v12483_v46 = vsel %vm314_vm0, 0.0, %v12482_v32  ;;  %v12916_v32 = vrot.slane %v11329_v52, 4  ;;  %v12907_v4 = vsel %vm314_vm0, 0.0, %v12906_v23  ;;  %s20244_s6 = smov 20  }
 0x61e   : > { %v12903_v49 = vsel %vm314_vm0, 0.0, %v12902_v9 }
 0x61f   : > { %v13572_v2 = vpop.permute.xlu2 %13571 }
 0x620   : > { %v14299_v27 = vsel %vm19522_vm14, %v14298_v63, %v13572_v2  ;;  %vm19528_vm14 = vcmask 867328   ;;  %v12888_v2 = vrot.slane %v12863_v37, 4  ;;  %v11335_v63 = vperm.slane %v11331_v3, %v14986_v8 }
 0x621   : > { %v14300_v20 = vsel %vm19528_vm14, %v14299_v27, %v18243_v28  ;;  %v12926_v37 = vrot.slane %v12921_v51, 4  ;;  %v11347_v27 = vperm.slane %v11343_v59, %v14986_v8  ;;  %v20183_v59 = vld [vmem:[#allocation134_spill] sm:$0xff]  ;;  %vm19530_vm14 = vcmask 965632  }
 0x622   : > { %13971 = vrot.lane.b32.xlu1 %v12885_v38, %s20064_s5  ;;  %s20180_s5 = smov 54   ;;  %v12911_v38 = vperm.slane %v11327_v15, %v14986_v8  ;;  %v14301_v28 = vsel %vm19525_vm15, %v14300_v20, %v18252_v53  ;;  %v11355_v55 = vsel %vm314_vm0, %v11354_v45, %v11335_v63  ;;  %v12889_v3 = vsel %vm314_vm0, %v18570_v43, %v12888_v2  ;;  %v18644_v52 = vpop.permute.xlu1 %13695  ;;  %v18648_v63 = vpop.permute.xlu0 %13699 }
 0x623   : > { %v11359_v53 = vperm.slane %v11355_v55, %v14989_v14  ;;  %vm19527_vm15 = vcmask 916480   ;;  %v18651_v45 = vperm.slane %v12889_v3, %v14989_v14  ;;  %v12917_v43 = vsel %vm314_vm0, 0.0, %v12916_v32  ;;  %v20184_v3 = vld [vmem:[#allocation52_spill] sm:$0xff] }
 0x624   : > { %v12927_v7 = vsel %vm314_vm0, %v12926_v37, %v12911_v38  ;;  %v11361_v2 = vsel %vm314_vm0, %v11360_v39, %v11347_v27  ;;  %v12488_v9 = vrot.slane %v20183_v59, 4  ;;  %v12925_v37 = vperm.slane %v12917_v43, %v14986_v8 }
 0x625   : > { %13715 = vrot.lane.b32.xlu2 %v12483_v46, %s20066_s9  ;;  %13975 = vrot.lane.b32.xlu0 %v12901_v56, %s20180_s5  ;;  %v12928_v46 = vrot.slane %v12911_v38, 4  ;;  %v12933_v20 = vperm.slane %v12927_v7, %v14989_v14  ;;  %v20181_v56 = vld [vmem:[#allocation138_spill] sm:$0xff]  ;;  %v11368_v39 = vrot.slane %v11359_v53, 4  ;;  %v12915_v27 = vperm.slane %v12907_v4, %v14986_v8  ;;  %s20248_s5 = smov 26  }
 0x626   : > { %v12938_v23 = vrot.slane %v12925_v37, 4 }
 0x627   : > { %v13584_v41 = vpop.permute.xlu2 %13583  ;;  %v12929_v38 = vsel %vm314_vm0, %v12921_v51, %v12928_v46  ;;  %v12950_v55 = vrot.slane %v12933_v20, 4  ;;  %v11376_v51 = vrot.slane %v20184_v3, 4  ;;  %v12940_v4 = vrot.slane %v12915_v27, 4 }
 0x628   : > { %v14302_v48 = vsel %vm19526_vm13, %v14301_v28, %v13584_v41  ;;  %vm14234_vm13 = vcmask 932864  }
 0x629   : > { %v14303_v15 = vsel %vm19527_vm15, %v14302_v48, %v18282_v47  ;;  %v11365_v47 = vperm.slane %v11361_v2, %v14989_v14  ;;  %vm19529_vm15 = vcmask 949248   ;;  %v18672_v48 = vperm.slane %v12929_v38, %v14989_v14 }
 0x62a   : > { %13983 = vrot.lane.b32.xlu1 %v12903_v49, %s19929_s13  ;;  %s20182_s13 = smov 60   ;;  %v14304_v41 = vsel %vm14234_vm13, %v14303_v15, %v18288_v12  ;;  %v12489_v49 = vsel %vm314_vm0, 0.0, %v12488_v9  ;;  %v20185_v12 = vld [vmem:[#allocation96_spill] sm:$0xff]  ;;  %v18679_v2 = vpop.permute.xlu1 %13707  ;;  %v18684_v59 = vpop.permute.xlu0 %13711 }
 0x62b   : > { %v11366_v7 = vrot.slane %v11365_v47, 4  ;;  %v11369_v46 = vsel %vm314_vm0, %v11365_v47, %v11368_v39  ;;  %v11388_v43 = vrot.slane %v20185_v12, 4  ;;  %v20186_v9 = vld [vmem:[#allocation44_spill] sm:$0xff]  ;;  %v20187_v39 = vld [vmem:[#allocation98_spill] sm:$0xff] }
 0x62c   : > { %v11370_v38 = vrot.slane %v20186_v9, 4  ;;  %v11377_v47 = vsel %vm314_vm0, %v11376_v51, %v20187_v39  ;;  %v12939_v51 = vsel %vm314_vm0, %v12938_v23, %v12915_v27  ;;  %v12941_v9 = vsel %vm314_vm0, %v12925_v37, %v12940_v4  ;;  %v20193_v27 = vld [vmem:[#allocation24_spill] sm:$0xff] }
 0x62d   : > { %13727 = vrot.lane.b32.xlu2 %v20181_v56, %s20069_s15  ;;  %13987 = vrot.lane.b32.xlu0 %v18651_v45, %s20182_s13  ;;  %v12951_v56 = vsel %vm314_vm0, 0.0, %v12950_v55  ;;  %v11367_v3 = vsel %vm314_vm0, %v11366_v7, %v11359_v53  ;;  %v11381_v39 = vperm.slane %v11377_v47, %v14986_v8  ;;  %v12968_v33 = vrot.slane %v11369_v46, 4  ;;  %s20252_s13 = smov 32  }
 0x62e   : > { %v12963_v53 = vperm.slane %v11367_v3, %v14986_v8  ;;  %v12949_v37 = vperm.slane %v12941_v9, %v14989_v14 }
 0x62f   : > { %v13596_v32 = vpop.permute.xlu2 %13595  ;;  %v11394_v4 = vrot.slane %v11381_v39, 4 }
 0x630   : > { %v14305_v28 = vsel %vm19529_vm15, %v14304_v41, %v13596_v32  ;;  %vm14240_vm15 = vcmask 982016   ;;  %v12973_v32 = vperm.slane %v11369_v46, %v14986_v8  ;;  %v12956_v39 = vrot.slane %v12949_v37, 4 }
 0x631   : > { %v14306_v15 = vsel %vm19530_vm14, %v14305_v28, %v18326_v44  ;;  %v20188_v44 = vld [vmem:[#allocation90_spill] sm:$0xff]  ;;  %vm14242_vm14 = vcmask 998400  }
 0x632   : > { %13995 = vrot.lane.b32.xlu1 %v12933_v20, %s19934_s4  ;;  %v12952_v20 = vrot.slane %v18672_v48, 4  ;;  %v11382_v41 = vrot.slane %v20188_v44, 4  ;;  %v14307_v55 = vsel %vm14240_vm15, %v14306_v15, %v18333_v34  ;;  %v11371_v34 = vsel %vm314_vm0, %v11370_v38, %v20191_v60  ;;  %v20194_v60 = vld [vmem:[#allocation121_spill] sm:$0xff]  ;;  %s20195_s4 = smov 72   ;;  %v18723_v47 = vpop.permute.xlu1 %13719 }
 0x633   : > { %v12978_v7 = vrot.slane %v12973_v32, 4  ;;  %v18712_v15 = vperm.slane %v12939_v51, %v14989_v14  ;;  %v11375_v46 = vperm.slane %v11371_v34, %v14986_v8  ;;  %v12969_v38 = vsel %vm314_vm0, 0.0, %v12968_v33  ;;  %v18728_v51 = vpop.permute.xlu0 %13723 }
 0x634   : > { %v12953_v44 = vsel %vm314_vm0, 0.0, %v12952_v20  ;;  %v11383_v23 = vsel %vm314_vm0, %v11382_v41, %v20193_v27  ;;  %v12958_v20 = vrot.slane %v11367_v3, 4 }
 0x635   : > { %13739 = vrot.lane.b32.xlu2 %v12489_v49, %s20074_s3  ;;  %13999 = vrot.lane.b32.xlu0 %v12951_v56, %s19936_s2  ;;  %v20189_v49 = vld [vmem:[#allocation48_spill] sm:$0xff]  ;;  %s20192_s2 = smov 70   ;;  %v11387_v41 = vperm.slane %v11383_v23, %v14986_v8  ;;  %v11395_v34 = vsel %vm314_vm0, %v11394_v4, %v11375_v46 }
 0x636   : > { %v11389_v12 = vsel %vm314_vm0, %v11388_v43, %v20189_v49  ;;  %v12979_v49 = vsel %vm314_vm0, %v12978_v7, %v12963_v53  ;;  %v12959_v27 = vsel %vm314_vm0, 0.0, %v12958_v20  ;;  %v11399_v46 = vperm.slane %v11395_v34, %v14989_v14 }
 0x637   : > { %v13608_v28 = vpop.permute.xlu2 %13607  ;;  %v11393_v43 = vperm.slane %v11389_v12, %v14986_v8  ;;  %v18735_v3 = vperm.slane %v12979_v49, %v14989_v14  ;;  %v12967_v4 = vperm.slane %v12959_v27, %v14986_v8 }
 0x638   : > { %v18700_v56 = vsel %vm14242_vm14, %v14307_v55, %v13608_v28  ;;  %v20196_v28 = vld [vmem:[#allocation145_spill] sm:$0xff]  ;;  %v11408_v34 = vrot.slane %v11399_v46, 4 }
 0x639   : > { %20190 = vst [vmem:[#allocation141_spill] sm:$0xff] %v18700_v56  ;;  %v12538_v55 = vrot.slane %v20196_v28, 4  ;;  %v11400_v12 = vrot.slane %v11393_v43, 4  ;;  %v20197_v43 = vld [vmem:[#allocation53_spill] sm:$0xff]  ;;  %v12980_v28 = vrot.slane %v12963_v53, 4 }
 0x63a   : > { %14007 = vrot.lane.b32.xlu1 %v12953_v44, %s20192_s2  ;;  %v12977_v44 = vperm.slane %v12969_v38, %v14986_v8  ;;  %v11416_v23 = vrot.slane %v20197_v43, 4  ;;  %v12957_v38 = vsel %vm314_vm0, 0.0, %v12956_v39 }
 0x63b   : > { %v12539_v7 = vsel %vm314_vm0, 0.0, %v12538_v55  ;;  %v20199_v55 = vld [vmem:[#allocation99_spill] sm:$0xff]  ;;  %v12981_v39 = vsel %vm314_vm0, %v12973_v32, %v12980_v28  ;;  %v12992_v32 = vrot.slane %v12967_v4, 4 }
 0x63c   : > { %v12990_v49 = vrot.slane %v12977_v44, 4  ;;  %v18769_v28 = vperm.slane %v12981_v39, %v14989_v14  ;;  %v20207_v39 = vld [vmem:[#allocation54_spill] sm:$0xff] }
 0x63d   : > { %13751 = vrot.lane.b32.xlu2 %v20194_v60, %s20084_s30  ;;  %14011 = vrot.lane.b32.xlu0 %v18712_v15, %s20195_s4  ;;  %v11401_v60 = vsel %vm314_vm0, %v11400_v12, %v11387_v41  ;;  %v11428_v41 = vrot.slane %v20199_v55, 4  ;;  %v20200_v12 = vld [vmem:[#allocation26_spill] sm:$0xff] }
 0x63e   : > { %v11405_v20 = vperm.slane %v11401_v60, %v14989_v14  ;;  %v11417_v53 = vsel %vm314_vm0, %v11416_v23, %v20200_v12  ;;  %v12991_v60 = vsel %vm314_vm0, %v12990_v49, %v12967_v4  ;;  %v20202_v12 = vld [vmem:[#allocation61_spill] sm:$0xff] }
 0x63f   : > { %v13620_v9 = vpop.permute.xlu2 %13619  ;;  %v11421_v23 = vperm.slane %v11417_v53, %v14986_v8  ;;  %v11422_v56 = vrot.slane %v20202_v12, 4  ;;  %v20205_v12 = vld [vmem:[#allocation140_spill] sm:$0xff] }
 0x640   : > { %v14311_v33 = vsel %vm14122_vm1, %v18331_v18, %v13620_v9  ;;  %v11409_v53 = vsel %vm314_vm0, %v11405_v20, %v11408_v34 }
 0x641   : > { %v14312_v18 = vsel %vm14124_vm2, %v14311_v33, %v18408_v42  ;;  %v20201_v33 = vld [vmem:[#allocation102_spill] sm:$0xff]  ;;  %v11434_v4 = vrot.slane %v11421_v23, 4  ;;  %v13020_v34 = vrot.slane %v11409_v53, 4  ;;  %v12588_v23 = vrot.slane %v18129_v36, 4 }
 0x642   : > { %14019 = vrot.lane.b32.xlu1 %v12949_v37, %s19948_s28  ;;  %s20198_s28 = smov 78   ;;  %v13002_v37 = vrot.slane %v18735_v3, 4  ;;  %v14313_v42 = vsel %vm14126_vm3, %v14312_v18, %v18414_v21  ;;  %v11410_v27 = vrot.slane %v20201_v33, 4  ;;  %v11406_v21 = vrot.slane %v11405_v20, 4 }
 0x643   : > { %v12997_v18 = vperm.slane %v12991_v60, %v14989_v14  ;;  %v11423_v60 = vsel %vm314_vm0, %v11422_v56, %v20207_v39  ;;  %v13025_v56 = vperm.slane %v11409_v53, %v14986_v8 }
 0x644   : > { %v13003_v55 = vsel %vm314_vm0, 0.0, %v13002_v37 }
 0x645   : > { %13763 = vrot.lane.b32.xlu2 %v12539_v7, %s20087_s29  ;;  %14023 = vrot.lane.b32.xlu0 %v12957_v38, %s20198_s28  ;;  %v18758_v7 = vpop.permute.xlu1 %13731  ;;  %v18762_v38 = vpop.permute.xlu0 %13735 }
 0x647   : > { %v13632_v9 = vpop.permute.xlu2 %13631 }
 0x648   : > { %v14314_v43 = vsel %vm14128_vm4, %v14313_v42, %v13632_v9  ;;  %v20203_v9 = vld [vmem:[#allocation104_spill] sm:$0xff] }
 0x649   : > { %v11411_v49 = vsel %vm314_vm0, %v11410_v27, %v20203_v9  ;;  %v20204_v42 = vld [vmem:[#allocation32_spill] sm:$0xff]  ;;  %v14315_v37 = vsel %vm14130_vm5, %v14314_v43, %v18450_v5  ;;  %v12993_v27 = vsel %vm314_vm0, %v12977_v44, %v12992_v32 }
 0x64a   : > { %14031 = vrot.lane.b32.xlu1 %v13003_v55, %s19956_s26  ;;  %v11429_v33 = vsel %vm314_vm0, %v11428_v41, %v20204_v42  ;;  %s20206_s26 = smov 84   ;;  %v11407_v55 = vsel %vm314_vm0, %v11406_v21, %v11399_v46  ;;  %v11415_v41 = vperm.slane %v11411_v49, %v14986_v8  ;;  %v14316_v20 = vsel %vm14132_vm6, %v14315_v37, %v18453_v30 }
 0x64b   : > { %v11433_v5 = vperm.slane %v11429_v33, %v14986_v8  ;;  %v13006_v42 = vrot.slane %v12997_v18, 4  ;;  %v18795_v44 = vperm.slane %v12993_v27, %v14989_v14  ;;  %v13015_v46 = vperm.slane %v11407_v55, %v14986_v8 }
 0x64c   : > { %v11427_v21 = vperm.slane %v11423_v60, %v14986_v8  ;;  %v11435_v30 = vsel %vm314_vm0, %v11434_v4, %v11415_v41  ;;  %v13010_v36 = vrot.slane %v11407_v55, 4  ;;  %v13021_v37 = vsel %vm314_vm0, 0.0, %v13020_v34 }
 0x64d   : > { %13775 = vrot.lane.b32.xlu2 %v20205_v12, %s20096_s27  ;;  %14035 = vrot.lane.b32.xlu0 %v18769_v28, %s20206_s26  ;;  %v18799_v32 = vpop.permute.xlu1 %13743  ;;  %v11440_v49 = vrot.slane %v11433_v5, 4  ;;  %v18803_v33 = vpop.permute.xlu0 %13747  ;;  %v12589_v12 = vsel %vm314_vm0, 0.0, %v12588_v23  ;;  %v13007_v39 = vsel %vm314_vm0, 0.0, %v13006_v42  ;;  %v13030_v60 = vrot.slane %v13025_v56, 4 }
 0x64e   : > { %v13032_v4 = vrot.slane %v13015_v46, 4  ;;  %v11439_v27 = vperm.slane %v11435_v30, %v14989_v14  ;;  %v13029_v55 = vperm.slane %v13021_v37, %v14986_v8 }
 0x64f   : > { %v13644_v43 = vpop.permute.xlu2 %13643  ;;  %v11441_v41 = vsel %vm314_vm0, %v11440_v49, %v11427_v21  ;;  %v13031_v34 = vsel %vm314_vm0, %v13030_v60, %v13015_v46 }
 0x650   : > { %v14317_v9 = vsel %vm19536_vm7, %v14316_v20, %v13644_v43  ;;  %v13011_v43 = vsel %vm314_vm0, 0.0, %v13010_v36  ;;  %v13033_v23 = vsel %vm314_vm0, %v13025_v56, %v13032_v4  ;;  %v11448_v42 = vrot.slane %v11439_v27, 4 }
 0x651   : > { %v14318_v53 = vsel %vm19535_vm8, %v14317_v9, %v18489_v24  ;;  %v11445_v30 = vperm.slane %v11441_v41, %v14989_v14  ;;  %v13019_v21 = vperm.slane %v13011_v43, %v14986_v8  ;;  %v13042_v49 = vrot.slane %v13029_v55, 4 }
 0x652   : > { %14043 = vrot.lane.b32.xlu1 %v12997_v18, %s19964_s24  ;;  %v13008_v18 = vrot.slane %v18795_v44, 4  ;;  %v14319_v24 = vsel %vm19534_vm9, %v14318_v53, %v18497_v50  ;;  %v18827_v50 = vperm.slane %v13031_v34, %v14989_v14  ;;  %v13041_v37 = vperm.slane %v13033_v23, %v14989_v14  ;;  %s20209_s24 = smov 96  }
 0x653   : > { %v11446_v56 = vrot.slane %v11445_v30, 4  ;;  %v12638_v4 = vrot.slane %v18189_v16, 4  ;;  %v13044_v34 = vrot.slane %v13019_v21, 4  ;;  %vm20233_vm9 = vcmask 490496  }
 0x654   : > { %v13009_v9 = vsel %vm314_vm0, 0.0, %v13008_v18  ;;  %v13056_v41 = vrot.slane %v13041_v37, 4  ;;  %vm20234_vm8 = vcmask 506880   ;;  %vm20258_vm7 = vcmask 818176  }
 0x655   : > { %13787 = vrot.lane.b32.xlu2 %v12589_v12, %s20098_s25  ;;  %14047 = vrot.lane.b32.xlu0 %v13007_v39, %s20208_s11  ;;  %v18829_v36 = vpop.permute.xlu1 %13755  ;;  %v18834_v53 = vpop.permute.xlu0 %13759  ;;  %v11449_v12 = vsel %vm314_vm0, %v11445_v30, %v11448_v42  ;;  %v13043_v39 = vsel %vm314_vm0, %v13042_v49, %v13019_v21  ;;  %v13045_v21 = vsel %vm314_vm0, %v13029_v55, %v13044_v34 }
 0x657   : > { %v13656_v5 = vpop.permute.xlu2 %13655 }
 0x658   : > { %v14320_v20 = vsel %vm19532_vm10, %v14319_v24, %v13656_v5  ;;  %v13077_v5 = vperm.slane %v11449_v12, %v14986_v8  ;;  %v11447_v24 = vsel %vm314_vm0, %v11446_v56, %v11439_v27  ;;  %vm20211_vm10 = vcmask 228352  }
 0x659   : > { %v14321_v46 = vsel %vm19531_vm11, %v14320_v20, %v18528_v29  ;;  %vm20210_vm11 = vcmask 211968   ;;  %v12639_v20 = vsel %vm314_vm0, 0.0, %v12638_v4 }
 0x65a   : > { %14055 = vrot.lane.b32.xlu1 %v13009_v9, %s19969_s18  ;;  %v14322_v18 = vsel %vm19533_vm12, %v14321_v46, %v18536_v62  ;;  %v13057_v62 = vsel %vm314_vm0, 0.0, %v13056_v41  ;;  %s20212_s18 = smov 102   ;;  %v13067_v9 = vperm.slane %v11447_v24, %v14986_v8  ;;  %v13082_v23 = vrot.slane %v13077_v5, 4 }
 0x65b   : > { %v13072_v46 = vrot.slane %v11449_v12, 4  ;;  %vm20215_vm12 = vcmask 277504  }
 0x65c   : > { %v13083_v56 = vsel %vm314_vm0, %v13082_v23, %v13067_v9 }
 0x65d   : > { %13799 = vrot.lane.b32.xlu2 %v18155_v54, %s20099_s23  ;;  %14059 = vrot.lane.b32.xlu0 %v18827_v50, %s20209_s24  ;;  %v18848_v54 = vperm.slane %v13043_v39, %v14989_v14  ;;  %v18860_v42 = vpop.permute.xlu1 %13767  ;;  %v18862_v27 = vpop.permute.xlu0 %13771  ;;  %v13062_v39 = vrot.slane %v11447_v24, 4  ;;  %v13073_v55 = vsel %vm314_vm0, 0.0, %v13072_v46 }
 0x65f   : > { %v13668_v60 = vpop.permute.xlu2 %13667  ;;  %v13058_v16 = vrot.slane %v18848_v54, 4  ;;  %v13063_v4 = vsel %vm314_vm0, 0.0, %v13062_v39 }
 0x660   : > { %v14323_v29 = vsel %vm20210_vm11, %v14322_v18, %v13668_v60  ;;  %vm20214_vm11 = vcmask 261120   ;;  %v13084_v60 = vrot.slane %v13067_v9, 4  ;;  %v18872_v18 = vperm.slane %v13045_v21, %v14989_v14 }
 0x661   : > { %v14324_v43 = vsel %vm20211_vm10, %v14323_v29, %v18567_v35  ;;  %vm20213_vm10 = vcmask 244736  }
 0x662   : > { %14067 = vrot.lane.b32.xlu1 %v13041_v37, %s19973_s16  ;;  %v14325_v35 = vsel %vm20213_vm10, %v14324_v43, %v18573_v58  ;;  %v13059_v37 = vsel %vm314_vm0, 0.0, %v13058_v16  ;;  %v13089_v58 = vperm.slane %v13083_v56, %v14989_v14  ;;  %v13085_v12 = vsel %vm314_vm0, %v13077_v5, %v13084_v60  ;;  %s20240_s16 = smov 14  }
 0x663   : > { %vm20216_vm10 = vcmask 293888   ;;  %v18894_v16 = vperm.slane %v13085_v12, %v14989_v14  ;;  %v13071_v5 = vperm.slane %v13063_v4, %v14986_v8  ;;  %v12694_v4 = vrot.slane %v18298_v31, 4 }
 0x665   : > { %13811 = vrot.lane.b32.xlu2 %v12639_v20, %s20100_s12  ;;  %14071 = vrot.lane.b32.xlu0 %v13057_v62, %s20212_s18  ;;  %v18886_v43 = vpop.permute.xlu1 %13779  ;;  %v12644_v20 = vrot.slane %v18234_v11, 4  ;;  %v13081_v62 = vperm.slane %v13073_v55, %v14986_v8  ;;  %v18891_v34 = vpop.permute.xlu0 %13783 }
 0x667   : > { %v13680_v30 = vpop.permute.xlu2 %13679  ;;  %v12645_v9 = vsel %vm314_vm0, 0.0, %v12644_v20  ;;  %v13094_v11 = vrot.slane %v13081_v62, 4  ;;  %v20228_v20 = vld [vmem:[#allocation55_spill] sm:$0xff] }
 0x668   : > { %v14326_v49 = vsel %vm20214_vm11, %v14325_v35, %v13680_v30  ;;  %vm20219_vm11 = vcmask 326656   ;;  %v13108_v30 = vrot.slane %v18894_v16, 4  ;;  %v13096_v35 = vrot.slane %v13071_v5, 4 }
 0x669   : > { %v14327_v29 = vsel %vm20215_vm12, %v14326_v49, %v18609_v19  ;;  %vm20217_vm12 = vcmask 310272  }
 0x66a   : > { %14079 = vrot.lane.b32.xlu1 %v13059_v37, %s19977_s0  ;;  %v14328_v24 = vsel %vm20216_vm10, %v14327_v29, %v18616_v6  ;;  %s20218_s0 = smov 112   ;;  %vm20221_vm10 = vcmask 343040   ;;  %v13109_v46 = vsel %vm314_vm0, 0.0, %v13108_v30  ;;  %v13097_v37 = vsel %vm314_vm0, %v13081_v62, %v13096_v35 }
 0x66b   : > { %v13105_v29 = vperm.slane %v13097_v37, %v14989_v14 }
 0x66d   : > { %13823 = vrot.lane.b32.xlu2 %v18205_v13, %s20102_s17  ;;  %14083 = vrot.lane.b32.xlu0 %v18872_v18, %s19978_s14  ;;  %v13106_v13 = vrot.slane %v13089_v58, 4  ;;  %s20220_s14 = smov 114   ;;  %v18911_v56 = vpop.permute.xlu1 %13791  ;;  %v18914_v39 = vpop.permute.xlu0 %13795 }
 0x66f   : > { %v13692_v41 = vpop.permute.xlu2 %13691  ;;  %v13107_v23 = vsel %vm314_vm0, 0.0, %v13106_v13  ;;  %v18937_v13 = vperm.slane %v20228_v20, %v14989_v14 }
 0x670   : > { %v14329_v19 = vsel %vm20217_vm12, %v14328_v24, %v13692_v41  ;;  %vm20222_vm12 = vcmask 359424   ;;  %v13112_v41 = vrot.slane %v13105_v29, 4 }
 0x671   : > { %v14330_v6 = vsel %vm20219_vm11, %v14329_v19, %v18644_v52  ;;  %v13095_v52 = vsel %vm314_vm0, %v13094_v11, %v13071_v5  ;;  %vm20223_vm11 = vcmask 375808  }
 0x672   : > { %14091 = vrot.lane.b32.xlu1 %v13089_v58, %s20218_s0  ;;  %v14331_v8 = vsel %vm20221_vm10, %v14330_v6, %v18648_v63  ;;  %v18917_v60 = vperm.slane %v13095_v52, %v14989_v14  ;;  %vm20224_vm10 = vcmask 392192   ;;  %v13113_v19 = vsel %vm314_vm0, 0.0, %v13112_v41 }
 0x673   : > { %v12748_v52 = vrot.slane %v18396_v10, 4 }
 0x675   : > { %13835 = vrot.lane.b32.xlu2 %v12645_v9, %s20109_s22  ;;  %14095 = vrot.lane.b32.xlu0 %v13107_v23, %s20220_s14  ;;  %v12749_v37 = vsel %vm314_vm0, 0.0, %v12748_v52 }
 0x677   : > { %v13704_v49 = vpop.permute.xlu2 %13703 }
 0x678   : > { %v14332_v21 = vsel %vm20222_vm12, %v14331_v8, %v13704_v49  ;;  %vm20225_vm12 = vcmask 408576  }
 0x679   : > { %v14333_v63 = vsel %vm20223_vm11, %v14332_v21, %v18679_v2  ;;  %v13804_v2 = vpop.permute.xlu1 %13803  ;;  %vm20227_vm11 = vcmask 424960  }
 0x67a   : > { %14103 = vrot.lane.b32.xlu1 %v13109_v46, %s19988_s10  ;;  %v14334_v55 = vsel %vm20224_vm10, %v14333_v63, %v18684_v59  ;;  %s20226_s10 = smov 124   ;;  %v13808_v59 = vpop.permute.xlu0 %13807  ;;  %vm20229_vm10 = vcmask 441344  }
 0x67d   : > { %13847 = vrot.lane.b32.xlu2 %v18260_v17, %s20114_s20  ;;  %14107 = vrot.lane.b32.xlu0 %v18917_v60, %s19989_s7  ;;  %v12695_v17 = vsel %vm314_vm0, 0.0, %v12694_v4  ;;  %s20232_s7 = smov 2  }
 0x67f   : > { %v13716_v58 = vpop.permute.xlu2 %13715 }
 0x680   : > { %v14335_v12 = vsel %vm20225_vm12, %v14334_v55, %v13716_v58  ;;  %vm20230_vm12 = vcmask 457728  }
 0x681   : > { %v14336_v24 = vsel %vm20227_vm11, %v14335_v12, %v18723_v47  ;;  %v12742_v47 = vrot.slane %v18937_v13, 4  ;;  %vm20231_vm11 = vcmask 474112   ;;  %v13816_v14 = vpop.permute.xlu1 %13815  ;;  %v12798_v12 = vrot.slane %v18465_v25, 4 }
 0x682   : > { %14115 = vrot.lane.b32.xlu1 %v13105_v29, %s20226_s10  ;;  %v14337_v62 = vsel %vm20229_vm10, %v14336_v24, %v18728_v51  ;;  %v13820_v23 = vpop.permute.xlu0 %13819  ;;  %vm20235_vm10 = vcmask 523264  }
 0x683   : > { %v12743_v9 = vsel %vm314_vm0, 0.0, %v12742_v47  ;;  %v12799_v41 = vsel %vm314_vm0, 0.0, %v12798_v12 }
 0x685   : > { %13859 = vrot.lane.b32.xlu2 %v12695_v17, %s20121_s8  ;;  %14119 = vrot.lane.b32.xlu0 %v13113_v19, %s19996_s21  ;;  %s20236_s21 = smov 8  }
 0x687   : > { %v13728_v31 = vpop.permute.xlu2 %13727 }
 0x688   : > { %v14338_v5 = vsel %vm20230_vm12, %v14337_v62, %v13728_v31  ;;  %vm20237_vm12 = vcmask 539648  }
 0x689   : > { %v14339_v6 = vsel %vm20231_vm11, %v14338_v5, %v18758_v7  ;;  %v13828_v8 = vpop.permute.xlu1 %13827  ;;  %vm20238_vm11 = vcmask 556032  }
 0x68a   : > { %v14340_v30 = vsel %vm20233_vm9, %v14339_v6, %v18762_v38  ;;  %v13832_v46 = vpop.permute.xlu0 %13831  ;;  %vm20239_vm9 = vcmask 572416  }
 0x68d   : > { %13871 = vrot.lane.b32.xlu2 %v12743_v9, %s20232_s7 }
 0x68f   : > { %v13740_v11 = vpop.permute.xlu2 %13739 }
 0x690   : > { %v14341_v35 = vsel %vm20234_vm8, %v14340_v30, %v13740_v11  ;;  %vm20241_vm8 = vcmask 588800   ;;  %v12898_v30 = vrot.slane %v18588_v61, 4 }
 0x691   : > { %v14342_v51 = vsel %vm20235_vm10, %v14341_v35, %v18799_v32  ;;  %vm20242_vm10 = vcmask 605184  }
 0x692   : > { %v14343_v7 = vsel %vm20237_vm12, %v14342_v51, %v18803_v33  ;;  %v13840_v33 = vpop.permute.xlu1 %13839  ;;  %v13844_v29 = vpop.permute.xlu0 %13843  ;;  %vm20243_vm12 = vcmask 621568  }
 0x695   : > { %13883 = vrot.lane.b32.xlu2 %v18354_v1, %s20236_s21 }
 0x697   : > { %v13752_v49 = vpop.permute.xlu2 %13751 }
 0x698   : > { %v14344_v21 = vsel %vm20238_vm11, %v14343_v7, %v13752_v49  ;;  %vm20245_vm11 = vcmask 637952   ;;  %v12899_v49 = vsel %vm314_vm0, 0.0, %v12898_v30 }
 0x699   : > { %v14345_v38 = vsel %vm20239_vm9, %v14344_v21, %v18829_v36  ;;  %vm20246_vm9 = vcmask 654336  }
 0x69a   : > { %v14346_v1 = vsel %vm20241_vm8, %v14345_v38, %v18834_v53  ;;  %v13852_v4 = vpop.permute.xlu1 %13851  ;;  %vm20247_vm8 = vcmask 670720   ;;  %v13856_v24 = vpop.permute.xlu0 %13855 }
 0x69d   : > { %13895 = vrot.lane.b32.xlu2 %v12749_v37, %s20240_s16  ;;  %v12904_v37 = vrot.slane %v18651_v45, 4  ;;  %v12954_v45 = vrot.slane %v18712_v15, 4 }
 0x69f   : > { %v13764_v32 = vpop.permute.xlu2 %13763 }
 0x6a0   : > { %v14347_v63 = vsel %vm20242_vm10, %v14346_v1, %v13764_v32  ;;  %vm20249_vm10 = vcmask 687104  }
 0x6a1   : > { %v14348_v58 = vsel %vm20243_vm12, %v14347_v63, %v18860_v42  ;;  %vm20250_vm12 = vcmask 703488  }
 0x6a2   : > { %v14349_v36 = vsel %vm20245_vm11, %v14348_v58, %v18862_v27  ;;  %vm20251_vm11 = vcmask 719872   ;;  %v18986_v25 = vpop.permute.xlu1 %13863 }
 0x6a5   : > { %13907 = vrot.lane.b32.xlu2 %v18421_v26, %s20244_s6 }
 0x6a7   : > { %v13776_v10 = vpop.permute.xlu2 %13775 }
 0x6a8   : > { %v14350_v55 = vsel %vm20246_vm9, %v14349_v36, %v13776_v10  ;;  %vm20253_vm9 = vcmask 736256  }
 0x6a9   : > { %v14351_v53 = vsel %vm20247_vm8, %v14350_v55, %v18886_v43  ;;  %v18988_v43 = vpop.permute.xlu0 %13867  ;;  %vm20254_vm8 = vcmask 752640  }
 0x6aa   : > { %v14352_v26 = vsel %vm20249_vm10, %v14351_v53, %v18891_v34  ;;  %v12848_v34 = vrot.slane %v18524_v22, 4  ;;  %vm20255_vm10 = vcmask 769024   ;;  %v13876_v47 = vpop.permute.xlu1 %13875 }
 0x6ac   : > { %v12849_v5 = vsel %vm314_vm0, 0.0, %v12848_v34 }
 0x6ad   : > { %13919 = vrot.lane.b32.xlu2 %v12799_v41, %s20248_s5 }
 0x6af   : > { %v13788_v42 = vpop.permute.xlu2 %13787 }
 0x6b0   : > { %v14353_v17 = vsel %vm20250_vm12, %v14352_v26, %v13788_v42  ;;  %vm20256_vm12 = vcmask 785408  }
 0x6b1   : > { %v14354_v27 = vsel %vm20251_vm11, %v14353_v17, %v18911_v56  ;;  %vm20257_vm11 = vcmask 801792   ;;  %v13880_v9 = vpop.permute.xlu0 %13879 }
 0x6b2   : > { %v14355_v20 = vsel %vm20253_vm9, %v14354_v27, %v18914_v39  ;;  %vm20259_vm9 = vcmask 834560   ;;  %v13888_v35 = vpop.permute.xlu1 %13887  ;;  %v13004_v27 = vrot.slane %v18769_v28, 4 }
 0x6b5   : > { %13931 = vrot.lane.b32.xlu2 %v18486_v40, %s20252_s13 }
 0x6b7   : > { %v13800_v19 = vpop.permute.xlu2 %13799 }
 0x6b8   : > { %v14356_v31 = vsel %vm20254_vm8, %v14355_v20, %v13800_v19  ;;  %vm20260_vm8 = vcmask 850944   ;;  %v20268_v19 = vld [vmem:[#allocation25_spill] sm:$0xff]  ;;  %v20269_v20 = vld [vmem:[#allocation116_spill] sm:$0xff] }
 0x6b9   : > { %v14357_v62 = vsel %vm20255_vm10, %v14356_v31, %v13804_v2  ;;  %v13892_v51 = vpop.permute.xlu0 %13891  ;;  %vm20261_vm10 = vcmask 867328   ;;  %v14123_v31 = vsel %vm14122_vm1, %v20269_v20, %v20268_v19 }
 0x6ba   : > { %v14358_v40 = vsel %vm20256_vm12, %v14357_v62, %v13808_v59  ;;  %vm20263_vm12 = vcmask 900096   ;;  %v13900_v21 = vpop.permute.xlu1 %13899 }
 0x6bd   : > { %13943 = vrot.lane.b32.xlu2 %v12849_v5, %s20166_s19  ;;  %v13005_v5 = vsel %vm314_vm0, 0.0, %v13004_v27 }
 0x6bf   : > { %v13812_v56 = vpop.permute.xlu2 %13811 }
 0x6c0   : > { %v14359_v6 = vsel %vm20257_vm11, %v14358_v40, %v13812_v56  ;;  %vm20264_vm11 = vcmask 916480   ;;  %v20271_v56 = vld [vmem:[#allocation72_spill] sm:$0xff] }
 0x6c1   : > { %v14360_v11 = vsel %vm20258_vm7, %v14359_v6, %v13816_v14  ;;  %vm20262_vm7 = vcmask 883712   ;;  %v13904_v52 = vpop.permute.xlu0 %13903  ;;  %v14125_v40 = vsel %vm14124_vm2, %v14123_v31, %v20271_v56  ;;  %v20307_v56 = vld [vmem:[#allocation183_spill] sm:$0xff] }
 0x6c2   : > { %v14361_v22 = vsel %vm20259_vm9, %v14360_v11, %v13820_v23  ;;  %vm20265_vm9 = vcmask 949248   ;;  %v13912_v1 = vpop.permute.xlu1 %13911 }
 0x6c5   : > { %13955 = vrot.lane.b32.xlu2 %v18552_v57, %s20172_s1 }
 0x6c7   : > { %v13824_v39 = vpop.permute.xlu2 %13823 }
 0x6c8   : > { %v14362_v2 = vsel %vm20260_vm8, %v14361_v22, %v13824_v39  ;;  %vm20266_vm8 = vcmask 965632   ;;  %v20275_v39 = vld [vmem:[#allocation101_spill] sm:$0xff] }
 0x6c9   : > { %v14363_v59 = vsel %vm20261_vm10, %v14362_v2, %v13828_v8  ;;  %v13916_v63 = vpop.permute.xlu0 %13915  ;;  %vm20267_vm10 = vcmask 113664   ;;  %v20276_v2 = vld [vmem:[#allocation110_spill] sm:$0xff] }
 0x6ca   : > { %v14364_v14 = vsel %vm20262_vm7, %v14363_v59, %v13832_v46  ;;  %v12905_v46 = vsel %vm314_vm0, 0.0, %v12904_v37  ;;  %v13924_v10 = vpop.permute.xlu1 %13923  ;;  %vm20270_vm7 = vcmask 130048   ;;  %v20278_v59 = vld [vmem:[#allocation66_spill] sm:$0xff] }
 0x6cd   : > { %13967 = vrot.lane.b32.xlu2 %v12899_v49, %s20066_s9 }
 0x6cf   : > { %v13836_v7 = vpop.permute.xlu2 %13835 }
 0x6d0   : > { %v14365_v57 = vsel %vm20263_vm12, %v14364_v14, %v13836_v7  ;;  %vm20272_vm12 = vcmask 146432  }
 0x6d1   : > { %v14366_v23 = vsel %vm20264_vm11, %v14365_v57, %v13840_v33  ;;  %v13928_v36 = vpop.permute.xlu0 %13927  ;;  %vm20274_vm11 = vcmask 162816  }
 0x6d2   : > { %v14367_v38 = vsel %vm14234_vm13, %v14366_v23, %v13844_v29 }
 0x6d5   : > { %13979 = vrot.lane.b32.xlu2 %v18619_v0, %s20069_s15 }
 0x6d7   : > { %v13848_v61 = vpop.permute.xlu2 %13847 }
 0x6d8   : > { %v14368_v8 = vsel %vm20265_vm9, %v14367_v38, %v13848_v61  ;;  %v13054_v61 = vrot.slane %v18827_v50, 4  ;;  %v20283_v38 = vld [vmem:[#allocation68_spill] sm:$0xff]  ;;  %vm20285_vm9 = vcmask 228352  }
 0x6d9   : > { %v14369_v32 = vsel %vm20266_vm8, %v14368_v8, %v13852_v4  ;;  %v12955_v4 = vsel %vm314_vm0, 0.0, %v12954_v45  ;;  %v13940_v42 = vpop.permute.xlu0 %13939  ;;  %vm20289_vm8 = vmmov %vm20274_vm11 }
 0x6da   : > { %v14370_v58 = vsel %vm14240_vm15, %v14369_v32, %v13856_v24  ;;  %v13055_v37 = vsel %vm314_vm0, 0.0, %v13054_v61  ;;  %v20286_v32 = vld [vmem:[#allocation108_spill] sm:$0xff] }
 0x6dd   : > { %13991 = vrot.lane.b32.xlu2 %v12905_v46, %s20074_s3 }
 0x6df   : > { %v13860_v33 = vpop.permute.xlu2 %13859 }
 0x6e0   : > { %v19021_v0 = vsel %vm14242_vm14, %v14370_v58, %v13860_v33 }
 0x6e5   : > { %14003 = vrot.lane.b32.xlu2 %v18672_v48, %s20084_s30  ;;  %v13936_v48 = vpop.permute.xlu1 %13935 }
 0x6e7   : > { %v13872_v29 = vpop.permute.xlu2 %13871 }
 0x6e8   : > { %v14374_v55 = vsel %vm14122_vm1, %v18937_v13, %v13872_v29  ;;  %vm20277_vm1 = vcmask 179200  }
 0x6e9   : > { %v14375_v12 = vsel %vm14124_vm2, %v14374_v55, %v13876_v47  ;;  %vm20279_vm2 = vcmask 195584   ;;  %v20292_v55 = vld [vmem:[#allocation75_spill] sm:$0xff] }
 0x6ea   : > { %v14376_v41 = vsel %vm14126_vm3, %v14375_v12, %v13880_v9  ;;  %v20273_v9 = vld [vmem:[#allocation65_spill] sm:$0xff] }
 0x6eb   : > { %v14127_v28 = vsel %vm14126_vm3, %v14125_v40, %v20273_v9  ;;  %vm20281_vm3 = vmmov %vm20267_vm10  ;;  %v20309_v40 = vld [vmem:[#allocation29_spill] sm:$0xff]  ;;  %v20314_v9 = vld [vmem:[#allocation115_spill] sm:$0xff] }
 0x6ec   : > { %v14129_v22 = vsel %vm14128_vm4, %v14127_v28, %v20275_v39 }
 0x6ed   : > { %14015 = vrot.lane.b32.xlu2 %v12955_v4, %s20087_s29  ;;  %v13948_v34 = vpop.permute.xlu1 %13947  ;;  %v14131_v30 = vsel %vm14130_vm5, %v14129_v22, %v20276_v2  ;;  %v20295_v4 = vld [vmem:[#allocation81_spill] sm:$0xff] }
 0x6ee   : > { %v14133_v49 = vsel %vm14132_vm6, %v14131_v30, %v20278_v59  ;;  %v20318_v30 = vld [vmem:[#allocation87_spill] sm:$0xff] }
 0x6ef   : > { %v13884_v53 = vpop.permute.xlu2 %13883 }
 0x6f0   : > { %v14377_v24 = vsel %vm14128_vm4, %v14376_v41, %v13884_v53  ;;  %vm20282_vm4 = vcmask 211968   ;;  %v20297_v41 = vld [vmem:[#allocation180_spill] sm:$0xff] }
 0x6f1   : > { %v14378_v26 = vsel %vm14130_vm5, %v14377_v24, %v13888_v35  ;;  %vm20284_vm5 = vmmov %vm20270_vm7 }
 0x6f2   : > { %v14379_v13 = vsel %vm14132_vm6, %v14378_v26, %v13892_v51  ;;  %vm20287_vm6 = vmmov %vm20272_vm12 }
 0x6f5   : > { %14027 = vrot.lane.b32.xlu2 %v18735_v3, %s20096_s27  ;;  %v13952_v3 = vpop.permute.xlu0 %13951  ;;  %v13960_v51 = vpop.permute.xlu1 %13959 }
 0x6f7   : > { %v13896_v15 = vpop.permute.xlu2 %13895 }
 0x6f8   : > { %v14380_v17 = vsel %vm20267_vm10, %v14379_v13, %v13896_v15  ;;  %vm20290_vm10 = vcmask 244736   ;;  %v13060_v13 = vrot.slane %v18872_v18, 4 }
 0x6f9   : > { %v14381_v62 = vsel %vm20270_vm7, %v14380_v17, %v13900_v21  ;;  %v20280_v21 = vld [vmem:[#allocation27_spill] sm:$0xff]  ;;  %vm20291_vm7 = vcmask 261120   ;;  %v20301_v17 = vld [vmem:[#allocation77_spill] sm:$0xff] }
 0x6fa   : > { %v14382_v6 = vsel %vm20272_vm12, %v14381_v62, %v13904_v52  ;;  %v14135_v23 = vsel %vm20281_vm3, %v14133_v49, %v20280_v21  ;;  %vm20293_vm12 = vmmov %vm20277_vm1  ;;  %vm20299_vm3 = vcmask 293888   ;;  %v13110_v49 = vrot.slane %v18917_v60, 4  ;;  %v20328_v60 = vld [vmem:[#allocation122_spill] sm:$0xff] }
 0x6fb   : > { %v14137_v8 = vsel %vm20284_vm5, %v14135_v23, %v20283_v38  ;;  %vm20302_vm5 = vmmov %vm20285_vm9  ;;  %v20324_v23 = vld [vmem:[#allocation79_spill] sm:$0xff] }
 0x6fc   : > { %v14139_v46 = vsel %vm20287_vm6, %v14137_v8, %v20286_v32  ;;  %vm20304_vm6 = vcmask 343040   ;;  %v13111_v21 = vsel %vm314_vm0, 0.0, %v13110_v49  ;;  %v20326_v8 = vld [vmem:[#allocation22_spill] sm:$0xff] }
 0x6fd   : > { %14039 = vrot.lane.b32.xlu2 %v13005_v5, %s20098_s25  ;;  %v13964_v7 = vpop.permute.xlu0 %13963  ;;  %v13972_v29 = vpop.permute.xlu1 %13971  ;;  %v13061_v5 = vsel %vm314_vm0, 0.0, %v13060_v13 }
 0x6ff   : > { %v13908_v47 = vpop.permute.xlu2 %13907 }
 0x700   : > { %v14383_v11 = vsel %vm20274_vm11, %v14382_v6, %v13908_v47  ;;  %vm20294_vm11 = vcmask 277504  }
 0x701   : > { %v14384_v35 = vsel %vm20277_vm1, %v14383_v11, %v13912_v1  ;;  %v20288_v1 = vld [vmem:[#allocation30_spill] sm:$0xff]  ;;  %vm20296_vm1 = vmmov %vm20279_vm2  ;;  %v20316_v11 = vld [vmem:[#allocation127_spill] sm:$0xff] }
 0x702   : > { %v14385_v57 = vsel %vm20279_vm2, %v14384_v35, %v13916_v63  ;;  %v14141_v63 = vsel %vm20289_vm8, %v14139_v46, %v20288_v1  ;;  %vm20298_vm2 = vmmov %vm20282_vm4  ;;  %v20331_v46 = vld [vmem:[#allocation89_spill] sm:$0xff] }
 0x703   : > { %vm20306_vm8 = vmmov %vm20290_vm10 }
 0x705   : > { %14051 = vrot.lane.b32.xlu2 %v18795_v44, %s20099_s23  ;;  %v13976_v45 = vpop.permute.xlu0 %13975  ;;  %v13984_v19 = vpop.permute.xlu1 %13983 }
 0x707   : > { %v13920_v14 = vpop.permute.xlu2 %13919 }
 0x708   : > { %v14386_v52 = vsel %vm20282_vm4, %v14385_v57, %v13920_v14  ;;  %vm20300_vm4 = vcmask 310272   ;;  %v20322_v14 = vld [vmem:[#allocation118_spill] sm:$0xff] }
 0x709   : > { %v14387_v44 = vsel %vm20285_vm9, %v14386_v52, %v13924_v10  ;;  %v14143_v10 = vsel %vm20293_vm12, %v14141_v63, %v20292_v55  ;;  %vm20303_vm9 = vcmask 326656   ;;  %vm20311_vm12 = vcmask 359424  }
 0x70a   : > { %v14388_v58 = vsel %vm20290_vm10, %v14387_v44, %v13928_v36  ;;  %v14145_v53 = vsel %vm20296_vm1, %v14143_v10, %v20295_v4  ;;  %vm20308_vm10 = vmmov %vm20291_vm7  ;;  %vm20313_vm1 = vcmask 392192   ;;  %v20336_v10 = vld [vmem:[#allocation31_spill] sm:$0xff] }
 0x70b   : > { %v14147_v24 = vsel %vm20298_vm2, %v14145_v53, %v20297_v41  ;;  %vm20315_vm2 = vmmov %vm20299_vm3 }
 0x70c   : > { %v14149_v27 = vsel %vm20302_vm5, %v14147_v24, %v20301_v17  ;;  %vm20321_vm5 = vmmov %vm20304_vm6  ;;  %v20340_v24 = vld [vmem:[#allocation126_spill] sm:$0xff]  ;;  %v20345_v17 = vld [vmem:[#allocation125_spill] sm:$0xff] }
 0x70d   : > { %14063 = vrot.lane.b32.xlu2 %v13055_v37, %s20100_s12  ;;  %v13988_v31 = vpop.permute.xlu0 %13987  ;;  %v13996_v22 = vpop.permute.xlu1 %13995 }
 0x70f   : > { %v13932_v33 = vpop.permute.xlu2 %13931 }
 0x710   : > { %v14389_v50 = vsel %vm20291_vm7, %v14388_v58, %v13932_v33  ;;  %vm20310_vm7 = vmmov %vm20294_vm11  ;;  %v20334_v58 = vld [vmem:[#allocation84_spill] sm:$0xff] }
 0x711   : > { %v14390_v12 = vsel %vm20294_vm11, %v14389_v50, %v13936_v48  ;;  %vm20312_vm11 = vcmask 375808  }
 0x712   : > { %v14391_v36 = vsel %vm20299_vm3, %v14390_v12, %v13940_v42  ;;  %vm20317_vm3 = vmmov %vm20300_vm4 }
 0x715   : > { %14075 = vrot.lane.b32.xlu2 %v18848_v54, %s20102_s17  ;;  %v20305_v54 = vld [vmem:[#allocation82_spill] sm:$0xff]  ;;  %v14000_v2 = vpop.permute.xlu0 %13999 }
 0x716   : > { %v14151_v62 = vsel %vm20306_vm8, %v14149_v27, %v20305_v54  ;;  %vm20327_vm8 = vmmov %vm20313_vm1 }
 0x717   : > { %v13944_v26 = vpop.permute.xlu2 %13943  ;;  %v14153_v42 = vsel %vm20308_vm10, %v14151_v62, %v20307_v56  ;;  %vm20329_vm10 = vcmask 408576  }
 0x718   : > { %v14392_v15 = vsel %vm20300_vm4, %v14391_v36, %v13944_v26  ;;  %v14155_v47 = vsel %vm20310_vm7, %v14153_v42, %v20309_v40  ;;  %vm20319_vm4 = vmmov %vm20303_vm9  ;;  %v20352_v42 = vld [vmem:[#allocation20_spill] sm:$0xff] }
 0x719   : > { %v14393_v48 = vsel %vm20303_vm9, %v14392_v15, %v13948_v34  ;;  %v14157_v28 = vsel %vm20315_vm2, %v14155_v47, %v20314_v9  ;;  %vm20323_vm9 = vmmov %vm20311_vm12  ;;  %v20343_v15 = vld [vmem:[#allocation95_spill] sm:$0xff] }
 0x71a   : > { %v14394_v20 = vsel %vm20304_vm6, %v14393_v48, %v13952_v3  ;;  %v14159_v39 = vsel %vm20317_vm3, %v14157_v28, %v20316_v11  ;;  %vm20325_vm6 = vmmov %vm20312_vm11  ;;  %v20361_v11 = vld [vmem:[#allocation92_spill] sm:$0xff] }
 0x71b   : > { %v14161_v35 = vsel %vm20319_vm4, %v14159_v39, %v20318_v30  ;;  %vm20330_vm7 = vmmov %vm20329_vm10  ;;  %vm20341_vm4 = vcmask 474112   ;;  %v20363_v30 = vld [vmem:[#allocation35_spill] sm:$0xff] }
 0x71d   : > { %14087 = vrot.lane.b32.xlu2 %v13061_v5, %s20109_s22  ;;  %v14012_v61 = vpop.permute.xlu0 %14011  ;;  %s20438_s22 = sld [smem:[#allocation185_spill]] }
 0x71f   : > { %v13956_v18 = vpop.permute.xlu2 %13955 }
 0x720   : > { %v14395_v34 = vsel %vm20311_vm12, %v14394_v20, %v13956_v18  ;;  %vm20332_vm12 = vcmask 424960   ;;  %v20354_v18 = vld [vmem:[#allocation123_spill] sm:$0xff] }
 0x721   : > { %v14396_v6 = vsel %vm20312_vm11, %v14395_v34, %v13960_v51  ;;  %v20320_v51 = vld [vmem:[#allocation41_spill] sm:$0xff]  ;;  %vm20333_vm0 = vmmov %vm20332_vm12  ;;  %vm20335_vm11 = vcmask 441344  }
 0x722   : > { %v14397_v3 = vsel %vm20313_vm1, %v14396_v6, %v13964_v7  ;;  %v14163_v7 = vsel %vm20321_vm5, %v14161_v35, %v20320_v51  ;;  %vm20337_vm1 = vcmask 457728   ;;  %vm20338_vm2 = vmmov %vm20335_vm11  ;;  %v20358_v6 = vld [vmem:[#allocation94_spill] sm:$0xff]  ;;  %v20367_v51 = vld [vmem:[#allocation131_spill] sm:$0xff] }
 0x723   : > { %v14165_v57 = vsel %vm20323_vm9, %v14163_v7, %v20322_v14  ;;  %vm20339_vm3 = vmmov %vm20337_vm1  ;;  %vm20344_vm9 = vcmask 490496   ;;  %s14761_s28 = scalar_lea.hbm %s20438_s22, 16 }
 0x724   : > { %v14167_v52 = vsel %vm20325_vm6, %v14165_v57, %v20324_v23  ;;  %vm20342_vm5 = vmmov %vm20341_vm4  ;;  %vm20346_vm6 = vcmask 506880   ;;  %v20370_v57 = vld [vmem:[#allocation21_spill] sm:$0xff]  ;;  %v20372_v23 = vld [vmem:[#allocation167_spill] sm:$0xff] }
 0x725   : > { %14099 = vrot.lane.b32.xlu2 %v18894_v16, %s20114_s20  ;;  %v14008_v16 = vpop.permute.xlu1 %14007  ;;  %v14169_v44 = vsel %vm20327_vm8, %v14167_v52, %v20326_v8  ;;  %v14024_v4 = vpop.permute.xlu0 %14023  ;;  %vm20347_vm8 = vmmov %vm20344_vm9  ;;  %s20436_s20 = sld [smem:[#allocation18_spill]] }
 0x726   : > { %v14171_v37 = vsel %vm20329_vm10, %v14169_v44, %v20328_v60  ;;  %vm20348_vm10 = vmmov %vm20346_vm6  ;;  %v20376_v60 = vld [vmem:[#allocation100_spill] sm:$0xff] }
 0x727   : > { %v13968_v59 = vpop.permute.xlu2 %13967  ;;  %v14173_v1 = vsel %vm20332_vm12, %v14171_v37, %v20331_v46  ;;  %v20379_v46 = vld [vmem:[#allocation105_spill] sm:$0xff] }
 0x728   : > { %v14398_v32 = vsel %vm20330_vm7, %v14397_v3, %v13968_v59  ;;  %v14175_v50 = vsel %vm20335_vm11, %v14173_v1, %v20334_v58  ;;  %vm20350_vm7 = vcmask 523264   ;;  %vm20355_vm11 = vcmask 556032  }
 0x729   : > { %v14399_v63 = vsel %vm20333_vm0, %v14398_v32, %v13972_v29  ;;  %v14177_v12 = vsel %vm20337_vm1, %v14175_v50, %v20336_v10  ;;  %vm20351_vm12 = vmmov %vm20350_vm7  ;;  %vm20353_vm0 = vcmask 539648  }
 0x72a   : > { %v14400_v53 = vsel %vm20338_vm2, %v14399_v63, %v13976_v45  ;;  %v14179_v26 = vsel %vm20341_vm4, %v14177_v12, %v20340_v24  ;;  %v20349_v45 = vld [vmem:[#allocation91_spill] sm:$0xff]  ;;  %vm20356_vm1 = vmmov %vm20353_vm0  ;;  %v20381_v63 = vld [vmem:[#allocation34_spill] sm:$0xff] }
 0x72b   : > { %v14181_v29 = vsel %vm20344_vm9, %v14179_v26, %v20343_v15  ;;  %vm20357_vm2 = vmmov %vm20355_vm11  ;;  %vm20364_vm9 = vcmask 605184   ;;  %v20388_v24 = vld [vmem:[#allocation107_spill] sm:$0xff]  ;;  %s20440_s25 = sshll.u32 %s20436_s20, 3  ;;  %s14453_s15 = scalar_lea.sflag [#allocation4], %s20436_s20 }
 0x72c   : > { %v14183_v27 = vsel %vm20346_vm6, %v14181_v29, %v20345_v17  ;;  %v20394_v17 = vld [vmem:[#allocation23_spill] sm:$0xff]  ;;  %s167_s27 = scalar_lea.vmem [#allocation5], %s20440_s25 }
 0x72d   : > { %14111 = vrot.lane.b32.xlu2 %v13111_v21, %s20121_s8  ;;  %v14020_v55 = vpop.permute.xlu1 %14019  ;;  %v14185_v62 = vsel %vm20350_vm7, %v14183_v27, %v20349_v45  ;;  %v14036_v5 = vpop.permute.xlu0 %14035  ;;  %s20420_s8 = sld [smem:[#allocation11_spill]]  ;;  %s14470_s29 = sshll.u32 %s167_s27, 4  ;;  %s14471_s29 = int_to_ptr.vmem [resolvable:$true] %s14470_s29 }
 0x72f   : > { %v13980_v38 = vpop.permute.xlu2 %13979 }
 0x730   : > { %v14401_v41 = vsel %vm20339_vm3, %v14400_v53, %v13980_v38  ;;  %vm20359_vm3 = vcmask 572416  }
 0x731   : > { %v14402_v36 = vsel %vm20342_vm5, %v14401_v41, %v13984_v19  ;;  %v14187_v19 = vsel %vm20353_vm0, %v14185_v62, %v20352_v42  ;;  %vm20360_vm4 = vmmov %vm20359_vm3  ;;  %vm20362_vm5 = vcmask 588800   ;;  %vm20373_vm0 = vcmask 654336   ;;  %v20399_v62 = vld [vmem:[#allocation133_spill] sm:$0xff] }
 0x732   : > { %v14403_v48 = vsel %vm20347_vm8, %v14402_v36, %v13988_v31  ;;  %v14189_v40 = vsel %vm20355_vm11, %v14187_v19, %v20354_v18  ;;  %vm20365_vm6 = vmmov %vm20362_vm5  ;;  %v20390_v36 = vld [vmem:[#allocation164_spill] sm:$0xff] }
 0x733   : > { %v14191_v3 = vsel %vm20359_vm3, %v14189_v40, %v20358_v6  ;;  %vm20366_vm8 = vmmov %vm20364_vm9  ;;  %v20403_v40 = vld [vmem:[#allocation103_spill] sm:$0xff]  ;;  %v20406_v6 = vld [vmem:[#allocation109_spill] sm:$0xff]  ;;  %s14580_s9 = sshll.u32 %s20420_s8, 3 }
 0x734   : > { %v14193_v39 = vsel %vm20362_vm5, %v14191_v3, %v20361_v11  ;;  %vm20382_vm5 = vcmask 703488   ;;  %s14468_s23 = scalar_lea.hbm %s20438_s22, %s14580_s9 }
 0x735   : > { %v14032_v20 = vpop.permute.xlu1 %14031  ;;  %v14195_v35 = vsel %vm20364_vm9, %v14193_v39, %v20363_v30  ;;  %s14472_s30 = sshll.u32 %s14468_s23, 4  ;;  %s14473_s30 = int_to_ptr.hbm [resolvable:$true] %s14472_s30 }
 0x736   : > { %s14755_s19 = sshra.s32 %s14473_s30, 4  ;;  %s14756_s19 = int_to_ptr.hbm [resolvable:$true] %s14755_s19 }
 0x737   : > { %v13992_v33 = vpop.permute.xlu2 %13991  ;;  %s14757_s1 = scalar_lea.hbm %s14756_s19, 8  ;;  %p14762_p7 = scmp.lt.s32.totalorder %s14756_s19, %s20438_s22 }
 0x738   : > { %v14404_v54 = vsel %vm20348_vm10, %v14403_v48, %v13992_v33  ;;  %vm20368_vm10 = vcmask 621568   ;;  %p14758_p4 = scmp.ne.s32.totalorder %s14756_s19, %s14757_s1  ;;  %p14763_p8 = scmp.lt.s32.totalorder %s14761_s28, %s14757_s1 }
 0x739   : > { %v14405_v56 = vsel %vm20351_vm12, %v14404_v54, %v13996_v22  ;;  %v14048_v22 = vpop.permute.xlu0 %14047  ;;  %v14197_v7 = vsel %vm20368_vm10, %v14195_v35, %v20367_v51  ;;  %vm20369_vm7 = vmmov %vm20368_vm10  ;;  %vm20371_vm12 = vcmask 637952   ;;  %v20397_v54 = vld [vmem:[#allocation178_spill] sm:$0xff] }
 0x73a   : > { %v14406_v34 = vsel %vm20356_vm1, %v14405_v56, %v14000_v2  ;;  %v14199_v21 = vsel %vm20371_vm12, %v14197_v7, %v20370_v57  ;;  %vm20374_vm11 = vmmov %vm20371_vm12  ;;  %vm20391_vm12 = vcmask 752640   ;;  %p14759_p5 = pnand %p14758_p4, %p14953_p9  ;;  %p14764_p10 = por %p14763_p8, %p14762_p7 }
 0x73b   : > { %v14201_v52 = vsel %vm20373_vm0, %v14199_v21, %v20372_v23  ;;  %vm20375_vm1 = vmmov %vm20373_vm0 }
 0x73c   : > { %p14760_p6 = pneg %p14759_p5 }
 0x73d   : > { %v14044_v9 = vpop.permute.xlu1 %14043 }
 0x73e   : > { %p14765_p13 = pnand %p14764_p10, %p14760_p6 }
 0x73f   : > { %v14004_v13 = vpop.permute.xlu2 %14003 }
 0x740   : > { %v14407_v31 = vsel %vm20357_vm2, %v14406_v34, %v14004_v13  ;;  %vm20377_vm2 = vcmask 670720  }
 0x741   : > { %v14408_v28 = vsel %vm20360_vm4, %v14407_v31, %v14008_v16  ;;  %v14060_v8 = vpop.permute.xlu0 %14059  ;;  %v14203_v37 = vsel %vm20377_vm2, %v14201_v52, %v20376_v60  ;;  %vm20378_vm3 = vmmov %vm20377_vm2  ;;  %vm20380_vm4 = vcmask 687104   ;;  %v20422_v52 = vld [vmem:[#allocation112_spill] sm:$0xff]  ;;  %v20426_v60 = vld [vmem:[#allocation130_spill] sm:$0xff] }
 0x742   : > { %v14409_v59 = vsel %vm20365_vm6, %v14408_v28, %v14012_v61  ;;  %v14205_v1 = vsel %vm20380_vm4, %v14203_v37, %v20379_v46  ;;  %vm20383_vm9 = vmmov %vm20380_vm4  ;;  %vm20400_vm4 = vcmask 801792  }
 0x743   : > { %v14207_v33 = vsel %vm20382_vm5, %v14205_v1, %v20381_v63  ;;  %vm20384_vm6 = vmmov %vm20382_vm5 }
 0x745   : > { %v14056_v16 = vpop.permute.xlu1 %14055 }
 0x747   : > { %v14016_v47 = vpop.permute.xlu2 %14015 }
 0x748   : > { %v14410_v2 = vsel %vm20366_vm8, %v14409_v59, %v14016_v47  ;;  %vm20386_vm8 = vcmask 719872  }
 0x749   : > { %v14411_v14 = vsel %vm20369_vm7, %v14410_v2, %v14020_v55  ;;  %v20385_v55 = vld [vmem:[#allocation28_spill] sm:$0xff]  ;;  %v14072_v53 = vpop.permute.xlu0 %14071  ;;  %vm20387_vm10 = vmmov %vm20386_vm8  ;;  %vm20389_vm7 = vcmask 736256   ;;  %v20415_v2 = vld [vmem:[#allocation111_spill] sm:$0xff] }
 0x74a   : > { %v14412_v38 = vsel %vm20374_vm11, %v14411_v14, %v14024_v4  ;;  %v14209_v10 = vsel %vm20386_vm8, %v14207_v33, %v20385_v55  ;;  %vm20392_vm0 = vmmov %vm20389_vm7  ;;  %v20417_v14 = vld [vmem:[#allocation172_spill] sm:$0xff]  ;;  %v20429_v33 = vld [vmem:[#allocation114_spill] sm:$0xff] }
 0x74b   : > { %v14211_v26 = vsel %vm20389_vm7, %v14209_v10, %v20388_v24  ;;  %vm20393_vm11 = vmmov %vm20391_vm12  ;;  %vm20409_vm7 = vcmask 850944   ;;  %v20432_v55 = vld [vmem:[#allocation141_spill] sm:$0xff] }
 0x74c   : > { %v14213_v15 = vsel %vm20391_vm12, %v14211_v26, %v20390_v36  ;;  %v20435_v24 = vld [vmem:[#allocation45_spill] sm:$0xff]  ;;  %v20437_v36 = vld [vmem:[#allocation143_spill] sm:$0xff] }
 0x74d   : > { %v14068_v4 = vpop.permute.xlu1 %14067 }
 0x74f   : > { %v14028_v49 = vpop.permute.xlu2 %14027 }
 0x750   : > { %v14413_v61 = vsel %vm20375_vm1, %v14412_v38, %v14028_v49  ;;  %vm20395_vm1 = vcmask 769024  }
 0x751   : > { %v14414_v32 = vsel %vm20378_vm3, %v14413_v61, %v14032_v20  ;;  %v14215_v27 = vsel %vm20395_vm1, %v14213_v15, %v20394_v17  ;;  %vm20396_vm2 = vmmov %vm20395_vm1  ;;  %vm20398_vm3 = vcmask 785408   ;;  %v14084_v42 = vpop.permute.xlu0 %14083 }
 0x752   : > { %v14415_v58 = vsel %vm20383_vm9, %v14414_v32, %v14036_v5  ;;  %v14217_v45 = vsel %vm20398_vm3, %v14215_v27, %v20397_v54  ;;  %vm20401_vm5 = vmmov %vm20398_vm3  ;;  %vm20418_vm3 = vcmask 900096  }
 0x753   : > { %v14219_v5 = vsel %vm20400_vm4, %v14217_v45, %v20399_v62  ;;  %vm20402_vm9 = vmmov %vm20400_vm4 }
 0x755   : > { %v14080_v56 = vpop.permute.xlu1 %14079 }
 0x757   : > { %v14040_v44 = vpop.permute.xlu2 %14039 }
 0x758   : > { %v14416_v50 = vsel %vm20384_vm6, %v14415_v58, %v14040_v44  ;;  %vm20404_vm6 = vcmask 818176  }
 0x759   : > { %v14417_v41 = vsel %vm20387_vm10, %v14416_v50, %v14044_v9  ;;  %v14221_v47 = vsel %vm20404_vm6, %v14219_v5, %v20403_v40  ;;  %vm20405_vm8 = vmmov %vm20404_vm6  ;;  %vm20407_vm10 = vcmask 834560   ;;  %v20408_v9 = vld [vmem:[#allocation169_spill] sm:$0xff]  ;;  %v14096_v59 = vpop.permute.xlu0 %14095  ;;  %v20431_v50 = vld [vmem:[#allocation39_spill] sm:$0xff] }
 0x75a   : > { %v14418_v29 = vsel %vm20392_vm0, %v14417_v41, %v14048_v22  ;;  %v14223_v3 = vsel %vm20407_vm10, %v14221_v47, %v20406_v6  ;;  %vm20410_vm12 = vmmov %vm20407_vm10  ;;  %v20412_v22 = vld [vmem:[#allocation142_spill] sm:$0xff] }
 0x75b   : > { %v14225_v28 = vsel %vm20409_vm7, %v14223_v3, %v20408_v9  ;;  %vm20411_vm0 = vmmov %vm20409_vm7  ;;  %vm20430_vm7 = vcmask 965632  }
 0x75d   : > { %v14092_v35 = vpop.permute.xlu1 %14091 }
 0x75f   : > { %v14052_v12 = vpop.permute.xlu2 %14051 }
 0x760   : > { %v14419_v13 = vsel %vm20393_vm11, %v14418_v29, %v14052_v12  ;;  %vm20413_vm11 = vcmask 867328  }
 0x761   : > { %v14420_v20 = vsel %vm20396_vm2, %v14419_v13, %v14056_v16  ;;  %v14227_v30 = vsel %vm20413_vm11, %v14225_v28, %v20412_v22  ;;  %vm20414_vm1 = vmmov %vm20413_vm11  ;;  %vm20416_vm2 = vcmask 883712   ;;  %v14108_v32 = vpop.permute.xlu0 %14107  ;;  %vm14246_vm11 = vcmask 1031168  }
 0x762   : > { %v14421_v19 = vsel %vm20401_vm5, %v14420_v20, %v14060_v8  ;;  %v14229_v51 = vsel %vm20416_vm2, %v14227_v30, %v20415_v2  ;;  %vm20419_vm4 = vmmov %vm20416_vm2  ;;  %v20425_v8 = vld [vmem:[#allocation149_spill] sm:$0xff] }
 0x763   : > { %v14231_v57 = vsel %vm20418_vm3, %v14229_v51, %v20417_v14  ;;  %vm20421_vm5 = vmmov %vm20418_vm3 }
 0x765   : > { %v14104_v44 = vpop.permute.xlu1 %14103 }
 0x767   : > { %v14064_v48 = vpop.permute.xlu2 %14063 }
 0x768   : > { %v14422_v18 = vsel %vm20402_vm9, %v14421_v19, %v14064_v48  ;;  %vm20423_vm9 = vcmask 916480  }
 0x769   : > { %v14423_v34 = vsel %vm20405_vm8, %v14422_v18, %v14068_v4  ;;  %v14233_v16 = vsel %vm20423_vm9, %v14231_v57, %v20422_v52  ;;  %vm20424_vm6 = vmmov %vm20423_vm9  ;;  %vm20427_vm8 = vcmask 949248   ;;  %v20434_v4 = vld [vmem:[#allocation179_spill] sm:$0xff]  ;;  %v14120_v54 = vpop.permute.xlu0 %14119 }
 0x76a   : > { %v14424_v11 = vsel %vm20410_vm12, %v14423_v34, %v14072_v53  ;;  %v14235_v61 = vsel %vm14234_vm13, %v14233_v16, %v20425_v8  ;;  %vm20428_vm10 = vmmov %vm20427_vm8  ;;  %vm14244_vm12 = vcmask 1014784  }
 0x76b   : > { %v14237_v37 = vsel %vm20427_vm8, %v14235_v61, %v20426_v60  ;;  %v14309_v10 = vsel %vm14244_vm12, %v20432_v55, %v20431_v50  ;;  %v14372_v41 = vsel %vm14244_vm12, %v19021_v0, %v18986_v25  ;;  %v20439_v0 = vld [vmem:[#allocation181_spill] sm:$0xff] }
 0x76c   : > { %v14239_v58 = vsel %vm20430_vm7, %v14237_v37, %v20429_v33  ;;  %v14310_v15 = vsel %vm14246_vm11, %v14309_v10, %v20437_v36  ;;  %v14373_v17 = vsel %vm14246_vm11, %v14372_v41, %v18988_v43 }
 0x76d   : > { %v14241_v53 = vsel %vm14240_vm15, %v14239_v58, %v20434_v4  ;;  %v14116_v27 = vpop.permute.xlu1 %14115  ;;  %v14441_v20 = vrot.slane %v14310_v15, 6  ;;  %v14442_v43 = vrot.slane %v14373_v17, 4 }
 0x76e   : > { %v14243_v26 = vsel %vm14242_vm14, %v14241_v53, %v20435_v24 }
 0x76f   : > { %v14076_v31 = vpop.permute.xlu2 %14075  ;;  %v14245_v48 = vsel %vm14244_vm12, %v14243_v26, %v20439_v0 }
 0x770   : > { %v14425_v39 = vsel %vm20411_vm0, %v14424_v11, %v14076_v31  ;;  %vm20433_vm0 = vmmov %vm20430_vm7 }
 0x771   : > { %v14426_v49 = vsel %vm20414_vm1, %v14425_v39, %v14080_v56  ;;  %v20442_v56 = vld [vmem:[#allocation182_spill] sm:$0xff] }
 0x772   : > { %v14427_v21 = vsel %vm20419_vm4, %v14426_v49, %v14084_v42  ;;  %v14247_v42 = vsel %vm14246_vm11, %v14245_v48, %v20442_v56 }
 0x777   : > { %v14088_v7 = vpop.permute.xlu2 %14087 }
 0x778   : > { %v14428_v23 = vsel %vm20421_vm5, %v14427_v21, %v14088_v7 }
 0x779   : > { %v14429_v38 = vsel %vm20424_vm6, %v14428_v23, %v14092_v35 }
 0x77a   : > { %v14430_v1 = vsel %vm14234_vm13, %v14429_v38, %v14096_v59  ;;  %vm14444_vm13 = vcmask 1041408  }
 0x77b   : > { %v14445_v19 = vsel %vm14444_vm13, %v14247_v42, %v14441_v20 }
 0x77f   : > { %v14100_v46 = vpop.permute.xlu2 %14099 }
 0x780   : > { %v14431_v63 = vsel %vm20428_vm10, %v14430_v1, %v14100_v46 }
 0x781   : > { %v14432_v12 = vsel %vm20433_vm0, %v14431_v63, %v14104_v44 }
 0x782   : > { %v14433_v13 = vsel %vm14240_vm15, %v14432_v12, %v14108_v32  ;;  %vm14446_vm15 = vcmask 1045508  }
 0x787   : > { %v14112_v29 = vpop.permute.xlu2 %14111 }
 0x788   : > { %v14434_v25 = vsel %vm14242_vm14, %v14433_v13, %v14112_v29  ;;  %vm14448_vm14 = vcmask 1043456  }
 0x789   : > { %v14435_v45 = vsel %vm14244_vm12, %v14434_v25, %v14116_v27 }
 0x78a   : > { %v14436_v62 = vsel %vm14246_vm11, %v14435_v45, %v14120_v54 }
 0x78b   : > { %v14443_v5 = vrot.slane %v14436_v62, 2 }
 0x78d   : > { %v14447_v18 = vsel %vm14446_vm15, %v14442_v43, %v14443_v5 }
 0x78e   : > { %v14449_v40 = vsel %vm14448_vm14, %v14445_v19, %v14447_v18 }
 0x78f   : > { %14451 = vst [vmem:[%s167_s27] sm:$0xff] %v14449_v40 }
 0x790   : > { %14768 = shalt.err (!%p14765_p13)
}
 0x791   : > { %14583 = dma.vmem_to_hbm [thread:$0]  (%p14953_p9), %s14471_s29, 128, %s14473_s30, %s14453_s15  }
 0x792 PF: > { %s20443_s24 = sld [smem:[#allocation8_spill]]  ;;  %p14590_p0 = pnand %p14567_p12, %p14960_p11 }
 0x793   : > { %s20445_s0 = sld [smem:[#allocation13_spill]] }
 0x794   : > { %p14591_p1 = pneg %p14590_p0 }
 0x798   : > { %s14484_s14 = sand.u32 1, %s20443_s24  }
 0x799   : > { %s14485_s10 = scalar_lea.sflag [#allocation4], %s14484_s14 }
 0x79a   : > { %14798 = dma.done.wait (%p14591_p1), %s14485_s10, 128  }
 0x79b   : > { %14800 = vsyncadd (%p14591_p1), %s14485_s10, 4294967168  ;;  %s17_s11 = sadd.s32 1, %s20445_s0   ;;  %s20446_s6 = sld [smem:[#allocation9_spill]] }
 0x79c   : > { %p14_p2 = scmp.ge.s32.totalorder %s17_s11, 4   ;;  %s20447_s7 = sld [smem:[#allocation10_spill]] }
 0x79d   : > { %s20448_s8 = sld [smem:[#allocation16_spill]] }
 0x79e   : > { %s20449_s9 = sld [smem:[#allocation12_spill]]  ;;  %16 = sbr.rel (!%p14_p2) target bundleno = 9 (0x9), region = 70 }
 0x79f   : > { %s20450_s10 = sld [smem:[#allocation14_spill]] }
 0x7a3   :  { %14491 = vsyncpa [#allocation3], 1 }
 0x7a4   :  { %14493 = vsyncpa [#allocation3 + $0x1], 1 }
 0x7a5   :  { %14494 = vsyncpa [#allocation4], 1 }
 0x7a6   :  { %14496 = vsyncpa [#allocation4 + $0x1], 1 }

</bundles_post_ra>
